<compile_context>
chip_gen: v5e
topology: v5e:2x2
jax: 0.10.0
libtpu: 0.0.40
codegen_flags: <defaults>
</compile_context>

<pallas_src>
import functools
import math

import jax
import jax.numpy as jnp
from jax import lax
from jax.experimental import pallas as pl
from jax.experimental.pallas import tpu as pltpu

EPS = 1e-5
LANE = 128                 # pad every channel dim to a multiple of the lane width
DEFAULT_BLOCK_M = 512      # rows (flattened N*H*W) per grid step.
                           # sweep 512-1024 on v5e/v6e (128 MiB VMEM); 512 on v7x.


def _round_up(x, m):
    return (x + m - 1) // m * m


def _pad_to(a, shape):
    """Zero-pad `a` up to `shape` (same rank)."""
    pads = [(0, t - s) for s, t in zip(a.shape, shape)]
    if all(p == (0, 0) for p in pads):
        return a
    return jnp.pad(a, pads)


# ---------------------------------------------------------------------------
# Compiler-parameter helpers
# ---------------------------------------------------------------------------
_VMEM_BUDGET = None


def _vmem_budget():
    """Per-core VMEM budget, clamped against the real capacity (64 MiB on v7x,
    128 MiB on v5e/v6e) with headroom for Mosaic internal scratch."""
    try:
        cap = int(pltpu.get_tpu_info().vmem_capacity_bytes)
    except Exception:   # query unavailable -> assume the smallest (v7x) VMEM
        cap = 64 << 20
    return max(cap - (16 << 20), 32 << 20)


def _mosaic_params(block_bytes):
    global _VMEM_BUDGET
    if _VMEM_BUDGET is None:
        _VMEM_BUDGET = _vmem_budget()
    limit = int(min(max(2 * block_bytes + (4 << 20), 16 << 20), _VMEM_BUDGET))
    return pltpu.CompilerParams(dimension_semantics=("parallel",),
                                vmem_limit_bytes=limit)


def _wspec(shape):
    """Grid-invariant (weight) block: single-buffered to save VMEM headroom
    (biggest win on v7x's 64 MiB).  Falls back to a default BlockSpec if the
    installed jax does not take pipeline_mode."""
    idx = lambda i: (0,) * len(shape)
    try:
        return pl.BlockSpec(shape, idx, pipeline_mode=pl.Buffered(1))
    except (TypeError, AttributeError):
        return pl.BlockSpec(shape, idx)


# ---------------------------------------------------------------------------
# In-kernel helpers
# ---------------------------------------------------------------------------
def _stats_block(y):
    """Pack per-channel sum (sublanes 0-3) and sum-of-squares (sublanes 4-7) of
    an (M, C) f32 tile into one lane/sublane-dense (8, C) partial-stats block."""
    s = jnp.sum(y, axis=0, keepdims=True)
    ss = jnp.sum(y * y, axis=0, keepdims=True)
    r = lax.broadcasted_iota(jnp.int32, (8, y.shape[-1]), 0)
    return jnp.where(r < 4, s, ss)


def _finalize_bn(stats, count, gamma, beta):
    """Tiny JAX epilogue: reduce per-tile partial stats into per-channel
    scale/bias so that training-mode BN(x) == x * scale + bias."""
    total = jnp.sum(stats, axis=0)                    # (8, C)
    mean = total[0] / count
    var = jnp.maximum(total[4] / count - mean * mean, 0.0)   # biased variance
    scale = gamma * lax.rsqrt(var + EPS)
    bias = beta - mean * scale
    return scale.reshape(1, -1), bias.reshape(1, -1)


def _tail_mask(a, tm, m_rem, needs_mask):
    """Zero padded rows (so they don't pollute BN stats).  Compiled in only when
    row padding exists; (tm,1) iota + scalar limit instead of a full-tile iota."""
    if not needs_mask:
        return a
    is_last = pl.program_id(0) == pl.num_programs(0) - 1
    limit = jnp.where(is_last, m_rem, tm)
    row = lax.broadcasted_iota(jnp.int32, (tm, 1), 0)
    return jnp.where(row < limit, a, 0.0)


# ---------------------------------------------------------------------------
# Pallas kernels
# ---------------------------------------------------------------------------
def _conv1x1_stats_kernel(x_ref, w_ref, y_ref, stats_ref):
    # 1x1 conv == matmul over channels (bf16 operands, f32 MXU accumulation).
    y = jnp.dot(x_ref[...], w_ref[...], preferred_element_type=jnp.float32)
    y_ref[...] = y.astype(y_ref.dtype)
    stats_ref[...] = _stats_block(y).reshape(stats_ref.shape)


def _make_conv3x3_kernel(stride, hout, wout, h, w):
    """3x3 conv with BN1 affine + ReLU hoisted out of the 9-tap loop (applied
    once into a zero-padded bf16 VMEM scratch) and the 9 tap matmuls chained
    into a single accumulated value (one output write, no f32 scratch RMWs)."""
    def kernel(y1_ref, s1_ref, b1_ref, w_ref, y_ref, stats_ref, pre_ref):
        cin, cout = w_ref.shape[2], w_ref.shape[3]
        s1 = s1_ref[...].reshape(1, 1, cin)
        b1 = b1_ref[...].reshape(1, 1, cin)

        # Pre-activation (BN1 affine + ReLU) ONCE per element, into the padded
        # bf16 scratch.  The 1-px zero ring is rewritten every step so the
        # kernel stays correct when the batch grid axis is sharded across TCs.
        # (v6e note: the affine itself could run in bf16 on the bf16 VALU.)
        zr = jnp.zeros((1, w + 2, cin), pre_ref.dtype)
        zc = jnp.zeros((h + 2, 1, cin), pre_ref.dtype)
        pre_ref[0:1, :, :] = zr
        pre_ref[h + 1:h + 2, :, :] = zr
        pre_ref[:, 0:1, :] = zc
        pre_ref[:, w + 1:w + 2, :] = zc
        act = jnp.maximum(y1_ref[0].astype(jnp.float32) * s1 + b1, 0.0)
        pre_ref[1:h + 1, 1:w + 1, :] = act.astype(pre_ref.dtype)

        acc = None
        for dy in range(3):
            for dx in range(3):
                if stride == 1:
                    win = pre_ref[dy:dy + hout, dx:dx + wout, :]
                else:
                    win = pre_ref[pl.ds(dy, hout, stride=stride),
                                  pl.ds(dx, wout, stride=stride), :]
                t = jnp.dot(win.reshape(hout * wout, cin), w_ref[dy, dx],
                            preferred_element_type=jnp.float32)
                acc = t if acc is None else acc + t

        y_ref[...] = acc.reshape(1, hout, wout, cout).astype(y_ref.dtype)
        stats_ref[...] = _stats_block(acc).reshape(stats_ref.shape)
    return kernel


def _conv1x1_bn_proj_kernel(y2_ref, xs_ref, s2_ref, b2_ref, w3_ref, ws_ref,
                            main_ref, sc_ref, st3_ref, sts_ref,
                            *, m_rem, needs_mask):
    tm = y2_ref.shape[0]
    a2 = jnp.maximum(y2_ref[...].astype(jnp.float32) * s2_ref[...] + b2_ref[...],
                     0.0)
    a2 = _tail_mask(a2, tm, m_rem, needs_mask)
    main = jnp.dot(a2.astype(jnp.bfloat16), w3_ref[...],
                   preferred_element_type=jnp.float32)
    short = jnp.dot(xs_ref[...], ws_ref[...], preferred_element_type=jnp.float32)
    main_ref[...] = main.astype(main_ref.dtype)
    sc_ref[...] = short.astype(sc_ref.dtype)
    st3_ref[...] = _stats_block(main).reshape(st3_ref.shape)
    sts_ref[...] = _stats_block(short).reshape(sts_ref.shape)


def _conv1x1_bn_main_kernel(y2_ref, s2_ref, b2_ref, w3_ref, main_ref, st3_ref,
                            *, m_rem, needs_mask):
    tm = y2_ref.shape[0]
    a2 = jnp.maximum(y2_ref[...].astype(jnp.float32) * s2_ref[...] + b2_ref[...],
                     0.0)
    a2 = _tail_mask(a2, tm, m_rem, needs_mask)
    main = jnp.dot(a2.astype(jnp.bfloat16), w3_ref[...],
                   preferred_element_type=jnp.float32)
    main_ref[...] = main.astype(main_ref.dtype)
    st3_ref[...] = _stats_block(main).reshape(st3_ref.shape)


def _add_relu_proj_kernel(main_ref, sc_ref, s3_ref, b3_ref, ss_ref, bs_ref,
                          o_ref):
    main = main_ref[...].astype(jnp.float32) * s3_ref[...] + b3_ref[...]
    short = sc_ref[...].astype(jnp.float32) * ss_ref[...] + bs_ref[...]
    o_ref[...] = jnp.maximum(main + short, 0.0).astype(o_ref.dtype)


def _add_relu_id_kernel(main_ref, x_ref, s3_ref, b3_ref, o_ref):
    main = main_ref[...].astype(jnp.float32) * s3_ref[...] + b3_ref[...]
    o_ref[...] = jnp.maximum(main + x_ref[...].astype(jnp.float32),
                             0.0).astype(o_ref.dtype)


# ---------------------------------------------------------------------------
# pallas_call wrappers
# ---------------------------------------------------------------------------
def _conv1x1_stats(x_flat, w, tm):
    m_pad, k = x_flat.shape
    cout = w.shape[1]
    nt = m_pad // tm
    blk = (tm * k + k * cout + tm * cout) * 2 + 8 * cout * 4
    return pl.pallas_call(
        _conv1x1_stats_kernel,
        out_shape=(jax.ShapeDtypeStruct((m_pad, cout), jnp.bfloat16),
                   jax.ShapeDtypeStruct((nt, 8, cout), jnp.float32)),
        grid=(nt,),
        in_specs=[pl.BlockSpec((tm, k), lambda i: (i, 0)),
                  _wspec((k, cout))],
        out_specs=(pl.BlockSpec((tm, cout), lambda i: (i, 0)),
                   pl.BlockSpec((1, 8, cout), lambda i: (i, 0, 0))),
        compiler_params=_mosaic_params(blk),
        cost_estimate=pl.CostEstimate(
            flops=2 * m_pad * k * cout, transcendentals=0,
            bytes_accessed=(m_pad * k + k * cout + m_pad * cout) * 2
                           + nt * 8 * cout * 4),
    )(x_flat, w)


def _conv3x3_stats(y1, scale1, bias1, w2, *, stride, hout, wout):
    # TODO(synk): for very large feature maps add a second grid axis over
    # output-row tiles (needs a manual halo DMA since BlockSpec blocks cannot
    # overlap); batch-only grid is fine at bottleneck-sized spatial dims.
    n, h, w, cin = y1.shape
    cout = w2.shape[3]
    kernel = _make_conv3x3_kernel(stride, hout, wout, h, w)
    blk = (h * w * cin + (h + 2) * (w + 2) * cin
           + hout * wout * cout) * 2 + 9 * cin * cout * 2 + 8 * cout * 4
    return pl.pallas_call(
        kernel,
        out_shape=(jax.ShapeDtypeStruct((n, hout, wout, cout), jnp.bfloat16),
                   jax.ShapeDtypeStruct((n, 8, cout), jnp.float32)),
        grid=(n,),
        in_specs=[pl.BlockSpec((1, h, w, cin), lambda i: (i, 0, 0, 0)),
                  pl.BlockSpec((1, cin), lambda i: (0, 0)),
                  pl.BlockSpec((1, cin), lambda i: (0, 0)),
                  _wspec((3, 3, cin, cout))],
        out_specs=(pl.BlockSpec((1, hout, wout, cout), lambda i: (i, 0, 0, 0)),
                   pl.BlockSpec((1, 8, cout), lambda i: (i, 0, 0))),
        scratch_shapes=[pltpu.VMEM((h + 2, w + 2, cin), jnp.bfloat16)],
        compiler_params=_mosaic_params(blk),
        cost_estimate=pl.CostEstimate(
            flops=2 * n * hout * wout * 9 * cin * cout, transcendentals=0,
            bytes_accessed=n * (h * w * cin + hout * wout * cout) * 2
                           + 9 * cin * cout * 2 + n * 8 * cout * 4),
    )(y1, scale1, bias1, w2)


def _conv1x1_bn_proj(y2_flat, xs_flat, scale2, bias2, w3, ws, *, tm, m_true):
    m_pad, cp = y2_flat.shape
    cin = xs_flat.shape[1]
    cexp = w3.shape[1]
    nt = m_pad // tm
    kernel = functools.partial(_conv1x1_bn_proj_kernel,
                               m_rem=m_true - (nt - 1) * tm,
                               needs_mask=(m_pad != m_true))
    blk = (tm * (cp + cin) + (cp + cin) * cexp + 2 * tm * cexp) * 2 \
        + 2 * 8 * cexp * 4
    return pl.pallas_call(
        kernel,
        out_shape=(jax.ShapeDtypeStruct((m_pad, cexp), jnp.bfloat16),
                   jax.ShapeDtypeStruct((m_pad, cexp), jnp.bfloat16),
                   jax.ShapeDtypeStruct((nt, 8, cexp), jnp.float32),
                   jax.ShapeDtypeStruct((nt, 8, cexp), jnp.float32)),
        grid=(nt,),
        in_specs=[pl.BlockSpec((tm, cp), lambda i: (i, 0)),
                  pl.BlockSpec((tm, cin), lambda i: (i, 0)),
                  pl.BlockSpec((1, cp), lambda i: (0, 0)),
                  pl.BlockSpec((1, cp), lambda i: (0, 0)),
                  _wspec((cp, cexp)),
                  _wspec((cin, cexp))],
        out_specs=(pl.BlockSpec((tm, cexp), lambda i: (i, 0)),
                   pl.BlockSpec((tm, cexp), lambda i: (i, 0)),
                   pl.BlockSpec((1, 8, cexp), lambda i: (i, 0, 0)),
                   pl.BlockSpec((1, 8, cexp), lambda i: (i, 0, 0))),
        compiler_params=_mosaic_params(blk),
        cost_estimate=pl.CostEstimate(
            flops=2 * m_pad * (cp + cin) * cexp, transcendentals=0,
            bytes_accessed=(m_pad * (cp + cin) + (cp + cin) * cexp
                            + 2 * m_pad * cexp) * 2 + 2 * nt * 8 * cexp * 4),
    )(y2_flat, xs_flat, scale2, bias2, w3, ws)


def _conv1x1_bn_main(y2_flat, scale2, bias2, w3, *, tm, m_true):
    m_pad, cp = y2_flat.shape
    cexp = w3.shape[1]
    nt = m_pad // tm
    kernel = functools.partial(_conv1x1_bn_main_kernel,
                               m_rem=m_true - (nt - 1) * tm,
                               needs_mask=(m_pad != m_true))
    blk = (tm * cp + cp * cexp + tm * cexp) * 2 + 8 * cexp * 4
    return pl.pallas_call(
        kernel,
        out_shape=(jax.ShapeDtypeStruct((m_pad, cexp), jnp.bfloat16),
                   jax.ShapeDtypeStruct((nt, 8, cexp), jnp.float32)),
        grid=(nt,),
        in_specs=[pl.BlockSpec((tm, cp), lambda i: (i, 0)),
                  pl.BlockSpec((1, cp), lambda i: (0, 0)),
                  pl.BlockSpec((1, cp), lambda i: (0, 0)),
                  _wspec((cp, cexp))],
        out_specs=(pl.BlockSpec((tm, cexp), lambda i: (i, 0)),
                   pl.BlockSpec((1, 8, cexp), lambda i: (i, 0, 0))),
        compiler_params=_mosaic_params(blk),
        cost_estimate=pl.CostEstimate(
            flops=2 * m_pad * cp * cexp, transcendentals=0,
            bytes_accessed=(m_pad * cp + cp * cexp + m_pad * cexp) * 2
                           + nt * 8 * cexp * 4),
    )(y2_flat, scale2, bias2, w3)


def _add_relu_proj(main, short, scale3, bias3, scale_s, bias_s, *, tm, out_dtype):
    m_pad, cexp = main.shape
    nt = m_pad // tm
    ob = jnp.dtype(out_dtype).itemsize
    blk = 2 * tm * cexp * 2 + tm * cexp * ob + 4 * cexp * 4
    return pl.pallas_call(
        _add_relu_proj_kernel,
        out_shape=jax.ShapeDtypeStruct((m_pad, cexp), out_dtype),
        grid=(nt,),
        in_specs=[pl.BlockSpec((tm, cexp), lambda i: (i, 0)),
                  pl.BlockSpec((tm, cexp), lambda i: (i, 0)),
                  pl.BlockSpec((1, cexp), lambda i: (0, 0)),
                  pl.BlockSpec((1, cexp), lambda i: (0, 0)),
                  pl.BlockSpec((1, cexp), lambda i: (0, 0)),
                  pl.BlockSpec((1, cexp), lambda i: (0, 0))],
        out_specs=pl.BlockSpec((tm, cexp), lambda i: (i, 0)),
        compiler_params=_mosaic_params(blk),
        cost_estimate=pl.CostEstimate(
            flops=5 * m_pad * cexp, transcendentals=0,
            bytes_accessed=2 * m_pad * cexp * 2 + m_pad * cexp * ob),
    )(main, short, scale3, bias3, scale_s, bias_s)


def _add_relu_id(main, x_id, scale3, bias3, *, tm, out_dtype):
    m_pad, cexp = main.shape
    nt = m_pad // tm
    ob = jnp.dtype(out_dtype).itemsize
    blk = 2 * tm * cexp * 2 + tm * cexp * ob + 2 * cexp * 4
    return pl.pallas_call(
        _add_relu_id_kernel,
        out_shape=jax.ShapeDtypeStruct((m_pad, cexp), out_dtype),
        grid=(nt,),
        in_specs=[pl.BlockSpec((tm, cexp), lambda i: (i, 0)),
                  pl.BlockSpec((tm, cexp), lambda i: (i, 0)),
                  pl.BlockSpec((1, cexp), lambda i: (0, 0)),
                  pl.BlockSpec((1, cexp), lambda i: (0, 0))],
        out_specs=pl.BlockSpec((tm, cexp), lambda i: (i, 0)),
        compiler_params=_mosaic_params(blk),
        cost_estimate=pl.CostEstimate(
            flops=3 * m_pad * cexp, transcendentals=0,
            bytes_accessed=2 * m_pad * cexp * 2 + m_pad * cexp * ob),
    )(main, x_id, scale3, bias3)


# ---------------------------------------------------------------------------
# One-time parameter prep (hoisted out of the per-call forward)
# ---------------------------------------------------------------------------
def prepare_params(params):
    """Zero-pad every channel dim to a multiple of 128 and cast matmul operands
    to bf16.  Returns (prepped_arrays, static_meta)."""
    cin, planes = params["w1"].shape
    cexp = params["w3"].shape[1]
    cin_p = _round_up(cin, LANE)
    cp = _round_up(planes, LANE)
    cexp_p = _round_up(cexp, LANE)
    f32, bf16 = jnp.float32, jnp.bfloat16
    p = {
        "w1": _pad_to(params["w1"].astype(bf16), (cin_p, cp)),
        "w2": _pad_to(params["w2"].astype(bf16), (3, 3, cp, cp)),
        "w3": _pad_to(params["w3"].astype(bf16), (cp, cexp_p)),
        "g1": _pad_to(params["g1"].astype(f32), (cp,)),
        "b1": _pad_to(params["b1"].astype(f32), (cp,)),
        "g2": _pad_to(params["g2"].astype(f32), (cp,)),
        "b2": _pad_to(params["b2"].astype(f32), (cp,)),
        "g3": _pad_to(params["g3"].astype(f32), (cexp_p,)),
        "b3": _pad_to(params["b3"].astype(f32), (cexp_p,)),
    }
    has_proj = "ws" in params
    if has_proj:
        p["ws"] = _pad_to(params["ws"].astype(bf16), (cin_p, cexp_p))
        p["gs"] = _pad_to(params["gs"].astype(f32), (cexp_p,))
        p["bs"] = _pad_to(params["bs"].astype(f32), (cexp_p,))
    meta = dict(cin=cin, planes=planes, cexp=cexp, has_proj=has_proj)
    return p, meta


# ---------------------------------------------------------------------------
# Full Bottleneck forward (accepts NCHW like the PyTorch module)
# ---------------------------------------------------------------------------
def bottleneck_forward(x_nchw, params, stride=1, block_m=DEFAULT_BLOCK_M,
                       out_dtype=jnp.bfloat16, meta=None):
    # out_dtype=jnp.bfloat16 halves the epilogue/output HBM traffic; pass
    # jnp.float32 to match the PyTorch output dtype exactly.
    if meta is None:
        params, meta = prepare_params(params)
    cin, cexp, has_proj = meta["cin"], meta["cexp"], meta["has_proj"]
    if not has_proj:
        assert stride == 1 and cin == cexp, \
            "identity shortcut requires stride == 1 and in_planes == expansion*planes"

    x = jnp.transpose(x_nchw, (0, 2, 3, 1))                       # NHWC
    n, h, w, _ = x.shape
    cin_p, cp = params["w1"].shape
    cexp_p = params["w3"].shape[1]

    hout = (h + 2 - 3) // stride + 1
    wout = (w + 2 - 3) // stride + 1
    m1, m2 = n * h * w, n * hout * wout
    tm1 = min(block_m, _round_up(m1, 8))
    tm2 = min(block_m, _round_up(m2, 8))
    m1_pad, m2_pad = _round_up(m1, tm1), _round_up(m2, tm2)

    # ---- stage 1: conv1 (1x1) as a row-tiled matmul + BN1 partial stats ----
    x_pad = _pad_to(x, (n, h, w, cin_p)).astype(jnp.bfloat16)
    x_flat = _pad_to(x_pad.reshape(m1, cin_p), (m1_pad, cin_p))
    y1_flat, stats1 = _conv1x1_stats(x_flat, params["w1"], tm1)
    scale1, bias1 = _finalize_bn(stats1, m1, params["g1"], params["b1"])

    # ---- stage 2: BN1+ReLU fused into the 3x3 conv (pad ring only in VMEM) --
    y1 = y1_flat[:m1].reshape(n, h, w, cp)       # no-op when m1_pad == m1
    y2, stats2 = _conv3x3_stats(y1, scale1, bias1, params["w2"],
                                stride=stride, hout=hout, wout=wout)
    scale2, bias2 = _finalize_bn(stats2, m2, params["g2"], params["b2"])
    y2_flat = _pad_to(y2.reshape(m2, cp), (m2_pad, cp))

    # ---- stage 3: BN2+ReLU fused into conv3 (+ shortcut), then BN3+add+ReLU -
    if has_proj:
        if stride == 1:
            xs_flat = x_flat                     # reuse stage-1 bf16 input
        else:
            # TODO(synk): fold this stride-2 spatial subsample of x into the
            # projection kernel (strided index_map) to avoid the XLA slice.
            xs = x_pad[:, ::stride, ::stride, :].reshape(m2, cin_p)
            xs_flat = _pad_to(xs, (m2_pad, cin_p))
        main, short, stats3, stats_s = _conv1x1_bn_proj(
            y2_flat, xs_flat, scale2, bias2, params["w3"], params["ws"],
            tm=tm2, m_true=m2)
        scale3, bias3 = _finalize_bn(stats3, m2, params["g3"], params["b3"])
        scale_s, bias_s = _finalize_bn(stats_s, m2, params["gs"], params["bs"])
        out_flat = _add_relu_proj(main, short, scale3, bias3, scale_s, bias_s,
                                  tm=tm2, out_dtype=out_dtype)
    else:
        main, stats3 = _conv1x1_bn_main(y2_flat, scale2, bias2, params["w3"],
                                        tm=tm2, m_true=m2)
        scale3, bias3 = _finalize_bn(stats3, m2, params["g3"], params["b3"])
        # identity shortcut: m2 == m1 and cin_p == cexp_p, so stage-1's padded
        # bf16 x_flat is byte-identical -- reuse it (saves an HBM read+write).
        out_flat = _add_relu_id(main, x_flat, scale3, bias3,
                                tm=tm2, out_dtype=out_dtype)

    out = out_flat[:m2, :cexp].reshape(n, hout, wout, cexp)
    return jnp.transpose(out, (0, 3, 1, 2))                       # NCHW


# ---------------------------------------------------------------------------
# Pure-JAX f32 reference (for correctness check only)
# ---------------------------------------------------------------------------
def ref_bottleneck(x_nchw, params, stride=1):
    x = jnp.transpose(x_nchw, (0, 2, 3, 1)).astype(jnp.float32)

    def bn(y, g, b):
        m = y.mean(axis=(0, 1, 2))
        v = y.var(axis=(0, 1, 2))
        return g * (y - m) / jnp.sqrt(v + EPS) + b

    def conv1x1(y, w, s=1):
        return lax.conv_general_dilated(
            y, w.reshape(1, 1, *w.shape), (s, s), "VALID",
            dimension_numbers=("NHWC", "HWIO", "NHWC"))

    out = jax.nn.relu(bn(conv1x1(x, params["w1"]), params["g1"], params["b1"]))
    out = lax.conv_general_dilated(
        out, params["w2"], (stride, stride), ((1, 1), (1, 1)),
        dimension_numbers=("NHWC", "HWIO", "NHWC"))
    out = jax.nn.relu(bn(out, params["g2"], params["b2"]))
    out = bn(conv1x1(out, params["w3"]), params["g3"], params["b3"])
    if "ws" in params:
        sc = bn(conv1x1(x, params["ws"], stride), params["gs"], params["bs"])
    else:
        sc = x
    return jnp.transpose(jax.nn.relu(out + sc), (0, 3, 1, 2))


if __name__ == "__main__":
    expansion = 4
    N, H, W = 2, 16, 16
    configs = [
        dict(in_planes=4, planes=4, stride=1),    # projection (1x1 conv) shortcut
        dict(in_planes=16, planes=4, stride=1),   # identity shortcut
        dict(in_planes=4, planes=4, stride=2),    # strided projection shortcut
    ]

    key = jax.random.PRNGKey(0)
    for cfg in configs:
        in_planes, planes, stride = cfg["in_planes"], cfg["planes"], cfg["stride"]
        cexp = expansion * planes
        key, *ks = jax.random.split(key, 14)
        x = jax.random.normal(ks[0], (N, in_planes, H, W), jnp.float32)   # NCHW
        params = {
            "w1": jax.random.normal(ks[1], (in_planes, planes), jnp.float32)
                  / math.sqrt(in_planes),
            "g1": 1.0 + 0.1 * jax.random.normal(ks[2], (planes,), jnp.float32),
            "b1": 0.1 * jax.random.normal(ks[3], (planes,), jnp.float32),
            "w2": jax.random.normal(ks[4], (3, 3, planes, planes), jnp.float32)
                  / math.sqrt(9 * planes),
            "g2": 1.0 + 0.1 * jax.random.normal(ks[5], (planes,), jnp.float32),
            "b2": 0.1 * jax.random.normal(ks[6], (planes,), jnp.float32),
            "w3": jax.random.normal(ks[7], (planes, cexp), jnp.float32)
                  / math.sqrt(planes),
            "g3": 1.0 + 0.1 * jax.random.normal(ks[8], (cexp,), jnp.float32),
            "b3": 0.1 * jax.random.normal(ks[9], (cexp,), jnp.float32),
        }
        if stride != 1 or in_planes != cexp:   # same condition as the PyTorch module
            params["ws"] = jax.random.normal(
                ks[10], (in_planes, cexp), jnp.float32) / math.sqrt(in_planes)
            params["gs"] = 1.0 + 0.1 * jax.random.normal(ks[11], (cexp,), jnp.float32)
            params["bs"] = 0.1 * jax.random.normal(ks[12], (cexp,), jnp.float32)

        # One-time parameter prep (padding/bf16 cast hoisted out of the forward).
        prepped, meta = prepare_params(params)
        fwd = jax.jit(functools.partial(bottleneck_forward, stride=stride,
                                        meta=meta))
        out = jax.block_until_ready(fwd(x, prepped))
        ref = ref_bottleneck(x, params, stride)

        hw_out = (H + 2 - 3) // stride + 1
        assert out.shape == (N, cexp, hw_out, hw_out), out.shape
        # bf16 MXU operands + bf16 inter-stage/output activations vs. an f32
        # reference: check the relative L2 error (typically ~1%).
        out_f = out.astype(jnp.float32)
        rel = float(jnp.sqrt(jnp.sum((out_f - ref) ** 2)
                             / (jnp.sum(ref ** 2) + 1e-12)))
        assert rel < 4e-2, (cfg, rel)

    print("KERNEL_OK")
</pallas_src>

<mosaic_0001>
module attributes {stable_mosaic.version = 11 : i64} {
  func.func @_conv1x1_stats_kernel(%arg0: i32, %arg1: memref<512x128xbf16, #tpu.memory_space<vmem>>, %arg2: memref<128x128xbf16, #tpu.memory_space<vmem>>, %arg3: memref<512x128xbf16, #tpu.memory_space<vmem>>, %arg4: memref<1x8x128xf32, #tpu.memory_space<vmem>>) attributes {dimension_semantics = [#tpu.dimension_semantics<parallel>], iteration_bounds = array<i64: 1>, scalar_prefetch = 0 : i64, scratch_operands = 0 : i64, tpu.core_type = #tpu.core_type<tc>, window_params = [{transform_indices = @transform_0, window_bounds = array<i64: 512, 128>}, {pipeline_mode = #tpu.pipeline_mode<synchronous>, transform_indices = @transform_1, window_bounds = array<i64: 128, 128>}, {transform_indices = @transform_2, window_bounds = array<i64: 512, 128>}, {transform_indices = @transform_3, window_bounds = array<i64: 1, 8, 128>}]} {
    %c0 = arith.constant 0 : index
    %c0_0 = arith.constant 0 : index
    %0 = vector.load %arg1[%c0, %c0_0] : memref<512x128xbf16, #tpu.memory_space<vmem>>, vector<512x128xbf16>
    %c0_1 = arith.constant 0 : index
    %c0_2 = arith.constant 0 : index
    %1 = vector.load %arg2[%c0_1, %c0_2] : memref<128x128xbf16, #tpu.memory_space<vmem>>, vector<128x128xbf16>
    %cst = arith.constant dense<0.000000e+00> : vector<512x128xf32>
    %2 = tpu.matmul %0, %1, %cst {dimension_numbers = #tpu.dot_dimension_numbers<[1], [0], [0], [1], [0, 0, 1, 1], [], []>} : vector<512x128xbf16>, vector<128x128xbf16>, vector<512x128xf32> -> vector<512x128xf32>
    %3 = arith.truncf %2 : vector<512x128xf32> to vector<512x128xbf16>
    %c0_3 = arith.constant 0 : index
    %c0_4 = arith.constant 0 : index
    %4 = vector.load %arg3[%c0_3, %c0_4] : memref<512x128xbf16, #tpu.memory_space<vmem>>, vector<512x128xbf16>
    tpu.vector_store %arg3[%c0_3, %c0_4], %3 {strides = array<i32>} : memref<512x128xbf16, #tpu.memory_space<vmem>>, vector<512x128xbf16>,
    %cst_5 = arith.constant dense<0.000000e+00> : vector<128xf32>
    %5 = vector.multi_reduction <add>, %2, %cst_5 [0] : vector<512x128xf32> to vector<128xf32>
    %6 = vector.shape_cast %5 : vector<128xf32> to vector<1x128xf32>
    %7 = arith.mulf %2, %2 : vector<512x128xf32>
    %cst_6 = arith.constant dense<0.000000e+00> : vector<128xf32>
    %8 = vector.multi_reduction <add>, %7, %cst_6 [0] : vector<512x128xf32> to vector<128xf32>
    %9 = vector.shape_cast %8 : vector<128xf32> to vector<1x128xf32>
    %10 = tpu.iota {dimensions = array<i32: 0>} : vector<8x128xi32>
    %c4_i32 = arith.constant 4 : i32
    %11 = vector.broadcast %c4_i32 : i32 to vector<8x128xi32>
    %12 = arith.cmpi slt, %10, %11 : vector<8x128xi32>
    %13 = vector.shape_cast %6 : vector<1x128xf32> to vector<1x128xf32>
    %14 = vector.broadcast %13 : vector<1x128xf32> to vector<8x128xf32>
    %15 = vector.shape_cast %9 : vector<1x128xf32> to vector<1x128xf32>
    %16 = vector.broadcast %15 : vector<1x128xf32> to vector<8x128xf32>
    %17 = arith.select %12, %14, %16 : vector<8x128xi1>, vector<8x128xf32>
    %18 = vector.shape_cast %17 : vector<8x128xf32> to vector<1x8x128xf32>
    %c0_7 = arith.constant 0 : index
    %c0_8 = arith.constant 0 : index
    %c0_9 = arith.constant 0 : index
    %19 = vector.load %arg4[%c0_7, %c0_8, %c0_9] : memref<1x8x128xf32, #tpu.memory_space<vmem>>, vector<1x8x128xf32>
    tpu.vector_store %arg4[%c0_7, %c0_8, %c0_9], %18 {strides = array<i32>} : memref<1x8x128xf32, #tpu.memory_space<vmem>>, vector<1x8x128xf32>,
    return
  }
  func.func @transform_0(%arg0: i32) -> (i32, i32) {
    %c0_i32 = arith.constant 0 : i32
    %c0_i32_0 = arith.constant 0 : i32
    return %arg0, %c0_i32 : i32, i32
  }
  func.func @transform_1(%arg0: i32) -> (i32, i32) {
    %c0_i32 = arith.constant 0 : i32
    %c0_i32_0 = arith.constant 0 : i32
    %c0_i32_1 = arith.constant 0 : i32
    return %c0_i32, %c0_i32_0 : i32, i32
  }
  func.func @transform_2(%arg0: i32) -> (i32, i32) {
    %c0_i32 = arith.constant 0 : i32
    %c0_i32_0 = arith.constant 0 : i32
    return %arg0, %c0_i32 : i32, i32
  }
  func.func @transform_3(%arg0: i32) -> (i32, i32, i32) {
    %c0_i32 = arith.constant 0 : i32
    %c0_i32_0 = arith.constant 0 : i32
    %c0_i32_1 = arith.constant 0 : i32
    return %arg0, %c0_i32, %c0_i32_0 : i32, i32, i32
  }
}

module attributes {stable_mosaic.version = 11 : i64} {
  func.func @kernel(%arg0: i32, %arg1: memref<1x16x16x128xbf16, #tpu.memory_space<vmem>>, %arg2: memref<1x128xf32, #tpu.memory_space<vmem>>, %arg3: memref<1x128xf32, #tpu.memory_space<vmem>>, %arg4: memref<3x3x128x128xbf16, #tpu.memory_space<vmem>>, %arg5: memref<1x16x16x128xbf16, #tpu.memory_space<vmem>>, %arg6: memref<1x8x128xf32, #tpu.memory_space<vmem>>, %arg7: memref<18x18x128xbf16, #tpu.memory_space<vmem>>) attributes {dimension_semantics = [#tpu.dimension_semantics<parallel>], iteration_bounds = array<i64: 2>, scalar_prefetch = 0 : i64, scratch_operands = 1 : i64, tpu.core_type = #tpu.core_type<tc>, window_params = [{transform_indices = @transform_0, window_bounds = array<i64: 1, 16, 16, 128>}, {pipeline_mode = #tpu.pipeline_mode<synchronous>, transform_indices = @transform_1, window_bounds = array<i64: 1, 128>}, {pipeline_mode = #tpu.pipeline_mode<synchronous>, transform_indices = @transform_2, window_bounds = array<i64: 1, 128>}, {pipeline_mode = #tpu.pipeline_mode<synchronous>, transform_indices = @transform_3, window_bounds = array<i64: 3, 3, 128, 128>}, {transform_indices = @transform_4, window_bounds = array<i64: 1, 16, 16, 128>}, {transform_indices = @transform_5, window_bounds = array<i64: 1, 8, 128>}]} {
    %c0 = arith.constant 0 : index
    %c0_0 = arith.constant 0 : index
    %0 = vector.load %arg2[%c0, %c0_0] : memref<1x128xf32, #tpu.memory_space<vmem>>, vector<1x128xf32>
    %1 = vector.shape_cast %0 : vector<1x128xf32> to vector<1x1x128xf32>
    %c0_1 = arith.constant 0 : index
    %c0_2 = arith.constant 0 : index
    %2 = vector.load %arg3[%c0_1, %c0_2] : memref<1x128xf32, #tpu.memory_space<vmem>>, vector<1x128xf32>
    %3 = vector.shape_cast %2 : vector<1x128xf32> to vector<1x1x128xf32>
    %cst = arith.constant 0.000000e+00 : bf16
    %4 = vector.broadcast %cst : bf16 to vector<1x18x128xbf16>
    %cst_3 = arith.constant 0.000000e+00 : bf16
    %5 = vector.broadcast %cst_3 : bf16 to vector<18x1x128xbf16>
    %c0_4 = arith.constant 0 : index
    %c0_5 = arith.constant 0 : index
    %c0_6 = arith.constant 0 : index
    %6 = vector.load %arg7[%c0_4, %c0_5, %c0_6] : memref<18x18x128xbf16, #tpu.memory_space<vmem>>, vector<1x18x128xbf16>
    tpu.vector_store %arg7[%c0_4, %c0_5, %c0_6], %4 {strides = array<i32>} : memref<18x18x128xbf16, #tpu.memory_space<vmem>>, vector<1x18x128xbf16>,
    %c17 = arith.constant 17 : index
    %c0_7 = arith.constant 0 : index
    %c0_8 = arith.constant 0 : index
    %7 = vector.load %arg7[%c17, %c0_7, %c0_8] : memref<18x18x128xbf16, #tpu.memory_space<vmem>>, vector<1x18x128xbf16>
    tpu.vector_store %arg7[%c17, %c0_7, %c0_8], %4 {strides = array<i32>} : memref<18x18x128xbf16, #tpu.memory_space<vmem>>, vector<1x18x128xbf16>,
    %c0_9 = arith.constant 0 : index
    %c0_10 = arith.constant 0 : index
    %c0_11 = arith.constant 0 : index
    %8 = vector.load %arg7[%c0_9, %c0_10, %c0_11] : memref<18x18x128xbf16, #tpu.memory_space<vmem>>, vector<18x1x128xbf16>
    tpu.vector_store %arg7[%c0_9, %c0_10, %c0_11], %5 {strides = array<i32>} : memref<18x18x128xbf16, #tpu.memory_space<vmem>>, vector<18x1x128xbf16>,
    %c0_12 = arith.constant 0 : index
    %c17_13 = arith.constant 17 : index
    %c0_14 = arith.constant 0 : index
    %9 = vector.load %arg7[%c0_12, %c17_13, %c0_14] : memref<18x18x128xbf16, #tpu.memory_space<vmem>>, vector<18x1x128xbf16>
    tpu.vector_store %arg7[%c0_12, %c17_13, %c0_14], %5 {strides = array<i32>} : memref<18x18x128xbf16, #tpu.memory_space<vmem>>, vector<18x1x128xbf16>,
    %c0_15 = arith.constant 0 : index
    %c0_16 = arith.constant 0 : index
    %c0_17 = arith.constant 0 : index
    %c0_18 = arith.constant 0 : index
    %10 = vector.load %arg1[%c0_15, %c0_16, %c0_17, %c0_18] : memref<1x16x16x128xbf16, #tpu.memory_space<vmem>>, vector<1x16x16x128xbf16>
    %11 = vector.shape_cast %10 : vector<1x16x16x128xbf16> to vector<16x16x128xbf16>
    %12 = arith.extf %11 : vector<16x16x128xbf16> to vector<16x16x128xf32>
    %13 = vector.broadcast %1 : vector<1x1x128xf32> to vector<16x16x128xf32>
    %14 = arith.mulf %12, %13 : vector<16x16x128xf32>
    %15 = vector.broadcast %3 : vector<1x1x128xf32> to vector<16x16x128xf32>
    %16 = arith.addf %14, %15 : vector<16x16x128xf32>
    %cst_19 = arith.constant 0.000000e+00 : f32
    %17 = vector.broadcast %cst_19 : f32 to vector<16x16x128xf32>
    %18 = arith.maximumf %16, %17 : vector<16x16x128xf32>
    %19 = arith.truncf %18 : vector<16x16x128xf32> to vector<16x16x128xbf16>
    %c1 = arith.constant 1 : index
    %c1_20 = arith.constant 1 : index
    %c0_21 = arith.constant 0 : index
    %20 = vector.load %arg7[%c1, %c1_20, %c0_21] : memref<18x18x128xbf16, #tpu.memory_space<vmem>>, vector<16x16x128xbf16>
    tpu.vector_store %arg7[%c1, %c1_20, %c0_21], %19 {strides = array<i32>} : memref<18x18x128xbf16, #tpu.memory_space<vmem>>, vector<16x16x128xbf16>,
    %c0_22 = arith.constant 0 : index
    %c0_23 = arith.constant 0 : index
    %c0_24 = arith.constant 0 : index
    %21 = vector.load %arg7[%c0_22, %c0_23, %c0_24] : memref<18x18x128xbf16, #tpu.memory_space<vmem>>, vector<16x16x128xbf16>
    %22 = vector.shape_cast %21 : vector<16x16x128xbf16> to vector<256x128xbf16>
    %c0_25 = arith.constant 0 : index
    %c0_26 = arith.constant 0 : index
    %c0_27 = arith.constant 0 : index
    %c0_28 = arith.constant 0 : index
    %23 = vector.load %arg4[%c0_25, %c0_26, %c0_27, %c0_28] : memref<3x3x128x128xbf16, #tpu.memory_space<vmem>>, vector<1x1x128x128xbf16>
    %24 = vector.shape_cast %23 : vector<1x1x128x128xbf16> to vector<128x128xbf16>
    %cst_29 = arith.constant dense<0.000000e+00> : vector<256x128xf32>
    %25 = tpu.matmul %22, %24, %cst_29 {dimension_numbers = #tpu.dot_dimension_numbers<[1], [0], [0], [1], [0, 0, 1, 1], [], []>} : vector<256x128xbf16>, vector<128x128xbf16>, vector<256x128xf32> -> vector<256x128xf32>
    %c0_30 = arith.constant 0 : index
    %c1_31 = arith.constant 1 : index
    %c0_32 = arith.constant 0 : index
    %26 = vector.load %arg7[%c0_30, %c1_31, %c0_32] : memref<18x18x128xbf16, #tpu.memory_space<vmem>>, vector<16x16x128xbf16>
    %27 = vector.shape_cast %26 : vector<16x16x128xbf16> to vector<256x128xbf16>
    %c0_33 = arith.constant 0 : index
    %c1_34 = arith.constant 1 : index
    %c0_35 = arith.constant 0 : index
    %c0_36 = arith.constant 0 : index
    %28 = vector.load %arg4[%c0_33, %c1_34, %c0_35, %c0_36] : memref<3x3x128x128xbf16, #tpu.memory_space<vmem>>, vector<1x1x128x128xbf16>
    %29 = vector.shape_cast %28 : vector<1x1x128x128xbf16> to vector<128x128xbf16>
    %cst_37 = arith.constant dense<0.000000e+00> : vector<256x128xf32>
    %30 = tpu.matmul %27, %29, %cst_37 {dimension_numbers = #tpu.dot_dimension_numbers<[1], [0], [0], [1], [0, 0, 1, 1], [], []>} : vector<256x128xbf16>, vector<128x128xbf16>, vector<256x128xf32> -> vector<256x128xf32>
    %31 = arith.addf %25, %30 : vector<256x128xf32>
    %c0_38 = arith.constant 0 : index
    %c2 = arith.constant 2 : index
    %c0_39 = arith.constant 0 : index
    %32 = vector.load %arg7[%c0_38, %c2, %c0_39] : memref<18x18x128xbf16, #tpu.memory_space<vmem>>, vector<16x16x128xbf16>
    %33 = vector.shape_cast %32 : vector<16x16x128xbf16> to vector<256x128xbf16>
    %c0_40 = arith.constant 0 : index
    %c2_41 = arith.constant 2 : index
    %c0_42 = arith.constant 0 : index
    %c0_43 = arith.constant 0 : index
    %34 = vector.load %arg4[%c0_40, %c2_41, %c0_42, %c0_43] : memref<3x3x128x128xbf16, #tpu.memory_space<vmem>>, vector<1x1x128x128xbf16>
    %35 = vector.shape_cast %34 : vector<1x1x128x128xbf16> to vector<128x128xbf16>
    %cst_44 = arith.constant dense<0.000000e+00> : vector<256x128xf32>
    %36 = tpu.matmul %33, %35, %cst_44 {dimension_numbers = #tpu.dot_dimension_numbers<[1], [0], [0], [1], [0, 0, 1, 1], [], []>} : vector<256x128xbf16>, vector<128x128xbf16>, vector<256x128xf32> -> vector<256x128xf32>
    %37 = arith.addf %31, %36 : vector<256x128xf32>
    %c1_45 = arith.constant 1 : index
    %c0_46 = arith.constant 0 : index
    %c0_47 = arith.constant 0 : index
    %38 = vector.load %arg7[%c1_45, %c0_46, %c0_47] : memref<18x18x128xbf16, #tpu.memory_space<vmem>>, vector<16x16x128xbf16>
    %39 = vector.shape_cast %38 : vector<16x16x128xbf16> to vector<256x128xbf16>
    %c1_48 = arith.constant 1 : index
    %c0_49 = arith.constant 0 : index
    %c0_50 = arith.constant 0 : index
    %c0_51 = arith.constant 0 : index
    %40 = vector.load %arg4[%c1_48, %c0_49, %c0_50, %c0_51] : memref<3x3x128x128xbf16, #tpu.memory_space<vmem>>, vector<1x1x128x128xbf16>
    %41 = vector.shape_cast %40 : vector<1x1x128x128xbf16> to vector<128x128xbf16>
    %cst_52 = arith.constant dense<0.000000e+00> : vector<256x128xf32>
    %42 = tpu.matmul %39, %41, %cst_52 {dimension_numbers = #tpu.dot_dimension_numbers<[1], [0], [0], [1], [0, 0, 1, 1], [], []>} : vector<256x128xbf16>, vector<128x128xbf16>, vector<256x128xf32> -> vector<256x128xf32>
    %43 = arith.addf %37, %42 : vector<256x128xf32>
    %c1_53 = arith.constant 1 : index
    %c1_54 = arith.constant 1 : index
    %c0_55 = arith.constant 0 : index
    %44 = vector.load %arg7[%c1_53, %c1_54, %c0_55] : memref<18x18x128xbf16, #tpu.memory_space<vmem>>, vector<16x16x128xbf16>
    %45 = vector.shape_cast %44 : vector<16x16x128xbf16> to vector<256x128xbf16>
    %c1_56 = arith.constant 1 : index
    %c1_57 = arith.constant 1 : index
    %c0_58 = arith.constant 0 : index
    %c0_59 = arith.constant 0 : index
    %46 = vector.load %arg4[%c1_56, %c1_57, %c0_58, %c0_59] : memref<3x3x128x128xbf16, #tpu.memory_space<vmem>>, vector<1x1x128x128xbf16>
    %47 = vector.shape_cast %46 : vector<1x1x128x128xbf16> to vector<128x128xbf16>
    %cst_60 = arith.constant dense<0.000000e+00> : vector<256x128xf32>
    %48 = tpu.matmul %45, %47, %cst_60 {dimension_numbers = #tpu.dot_dimension_numbers<[1], [0], [0], [1], [0, 0, 1, 1], [], []>} : vector<256x128xbf16>, vector<128x128xbf16>, vector<256x128xf32> -> vector<256x128xf32>
    %49 = arith.addf %43, %48 : vector<256x128xf32>
    %c1_61 = arith.constant 1 : index
    %c2_62 = arith.constant 2 : index
    %c0_63 = arith.constant 0 : index
    %50 = vector.load %arg7[%c1_61, %c2_62, %c0_63] : memref<18x18x128xbf16, #tpu.memory_space<vmem>>, vector<16x16x128xbf16>
    %51 = vector.shape_cast %50 : vector<16x16x128xbf16> to vector<256x128xbf16>
    %c1_64 = arith.constant 1 : index
    %c2_65 = arith.constant 2 : index
    %c0_66 = arith.constant 0 : index
    %c0_67 = arith.constant 0 : index
    %52 = vector.load %arg4[%c1_64, %c2_65, %c0_66, %c0_67] : memref<3x3x128x128xbf16, #tpu.memory_space<vmem>>, vector<1x1x128x128xbf16>
    %53 = vector.shape_cast %52 : vector<1x1x128x128xbf16> to vector<128x128xbf16>
    %cst_68 = arith.constant dense<0.000000e+00> : vector<256x128xf32>
    %54 = tpu.matmul %51, %53, %cst_68 {dimension_numbers = #tpu.dot_dimension_numbers<[1], [0], [0], [1], [0, 0, 1, 1], [], []>} : vector<256x128xbf16>, vector<128x128xbf16>, vector<256x128xf32> -> vector<256x128xf32>
    %55 = arith.addf %49, %54 : vector<256x128xf32>
    %c2_69 = arith.constant 2 : index
    %c0_70 = arith.constant 0 : index
    %c0_71 = arith.constant 0 : index
    %56 = vector.load %arg7[%c2_69, %c0_70, %c0_71] : memref<18x18x128xbf16, #tpu.memory_space<vmem>>, vector<16x16x128xbf16>
    %57 = vector.shape_cast %56 : vector<16x16x128xbf16> to vector<256x128xbf16>
    %c2_72 = arith.constant 2 : index
    %c0_73 = arith.constant 0 : index
    %c0_74 = arith.constant 0 : index
    %c0_75 = arith.constant 0 : index
    %58 = vector.load %arg4[%c2_72, %c0_73, %c0_74, %c0_75] : memref<3x3x128x128xbf16, #tpu.memory_space<vmem>>, vector<1x1x128x128xbf16>
    %59 = vector.shape_cast %58 : vector<1x1x128x128xbf16> to vector<128x128xbf16>
    %cst_76 = arith.constant dense<0.000000e+00> : vector<256x128xf32>
    %60 = tpu.matmul %57, %59, %cst_76 {dimension_numbers = #tpu.dot_dimension_numbers<[1], [0], [0], [1], [0, 0, 1, 1], [], []>} : vector<256x128xbf16>, vector<128x128xbf16>, vector<256x128xf32> -> vector<256x128xf32>
    %61 = arith.addf %55, %60 : vector<256x128xf32>
    %c2_77 = arith.constant 2 : index
    %c1_78 = arith.constant 1 : index
    %c0_79 = arith.constant 0 : index
    %62 = vector.load %arg7[%c2_77, %c1_78, %c0_79] : memref<18x18x128xbf16, #tpu.memory_space<vmem>>, vector<16x16x128xbf16>
    %63 = vector.shape_cast %62 : vector<16x16x128xbf16> to vector<256x128xbf16>
    %c2_80 = arith.constant 2 : index
    %c1_81 = arith.constant 1 : index
    %c0_82 = arith.constant 0 : index
    %c0_83 = arith.constant 0 : index
    %64 = vector.load %arg4[%c2_80, %c1_81, %c0_82, %c0_83] : memref<3x3x128x128xbf16, #tpu.memory_space<vmem>>, vector<1x1x128x128xbf16>
    %65 = vector.shape_cast %64 : vector<1x1x128x128xbf16> to vector<128x128xbf16>
    %cst_84 = arith.constant dense<0.000000e+00> : vector<256x128xf32>
    %66 = tpu.matmul %63, %65, %cst_84 {dimension_numbers = #tpu.dot_dimension_numbers<[1], [0], [0], [1], [0, 0, 1, 1], [], []>} : vector<256x128xbf16>, vector<128x128xbf16>, vector<256x128xf32> -> vector<256x128xf32>
    %67 = arith.addf %61, %66 : vector<256x128xf32>
    %c2_85 = arith.constant 2 : index
    %c2_86 = arith.constant 2 : index
    %c0_87 = arith.constant 0 : index
    %68 = vector.load %arg7[%c2_85, %c2_86, %c0_87] : memref<18x18x128xbf16, #tpu.memory_space<vmem>>, vector<16x16x128xbf16>
    %69 = vector.shape_cast %68 : vector<16x16x128xbf16> to vector<256x128xbf16>
    %c2_88 = arith.constant 2 : index
    %c2_89 = arith.constant 2 : index
    %c0_90 = arith.constant 0 : index
    %c0_91 = arith.constant 0 : index
    %70 = vector.load %arg4[%c2_88, %c2_89, %c0_90, %c0_91] : memref<3x3x128x128xbf16, #tpu.memory_space<vmem>>, vector<1x1x128x128xbf16>
    %71 = vector.shape_cast %70 : vector<1x1x128x128xbf16> to vector<128x128xbf16>
    %cst_92 = arith.constant dense<0.000000e+00> : vector<256x128xf32>
    %72 = tpu.matmul %69, %71, %cst_92 {dimension_numbers = #tpu.dot_dimension_numbers<[1], [0], [0], [1], [0, 0, 1, 1], [], []>} : vector<256x128xbf16>, vector<128x128xbf16>, vector<256x128xf32> -> vector<256x128xf32>
    %73 = arith.addf %67, %72 : vector<256x128xf32>
    %74 = vector.shape_cast %73 : vector<256x128xf32> to vector<1x16x16x128xf32>
    %75 = arith.truncf %74 : vector<1x16x16x128xf32> to vector<1x16x16x128xbf16>
    %c0_93 = arith.constant 0 : index
    %c0_94 = arith.constant 0 : index
    %c0_95 = arith.constant 0 : index
    %c0_96 = arith.constant 0 : index
    %76 = vector.load %arg5[%c0_93, %c0_94, %c0_95, %c0_96] : memref<1x16x16x128xbf16, #tpu.memory_space<vmem>>, vector<1x16x16x128xbf16>
    tpu.vector_store %arg5[%c0_93, %c0_94, %c0_95, %c0_96], %75 {strides = array<i32>} : memref<1x16x16x128xbf16, #tpu.memory_space<vmem>>, vector<1x16x16x128xbf16>,
    %cst_97 = arith.constant dense<0.000000e+00> : vector<128xf32>
    %77 = vector.multi_reduction <add>, %73, %cst_97 [0] : vector<256x128xf32> to vector<128xf32>
    %78 = vector.shape_cast %77 : vector<128xf32> to vector<1x128xf32>
    %79 = arith.mulf %73, %73 : vector<256x128xf32>
    %cst_98 = arith.constant dense<0.000000e+00> : vector<128xf32>
    %80 = vector.multi_reduction <add>, %79, %cst_98 [0] : vector<256x128xf32> to vector<128xf32>
    %81 = vector.shape_cast %80 : vector<128xf32> to vector<1x128xf32>
    %82 = tpu.iota {dimensions = array<i32: 0>} : vector<8x128xi32>
    %c4_i32 = arith.constant 4 : i32
    %83 = vector.broadcast %c4_i32 : i32 to vector<8x128xi32>
    %84 = arith.cmpi slt, %82, %83 : vector<8x128xi32>
    %85 = vector.shape_cast %78 : vector<1x128xf32> to vector<1x128xf32>
    %86 = vector.broadcast %85 : vector<1x128xf32> to vector<8x128xf32>
    %87 = vector.shape_cast %81 : vector<1x128xf32> to vector<1x128xf32>
    %88 = vector.broadcast %87 : vector<1x128xf32> to vector<8x128xf32>
    %89 = arith.select %84, %86, %88 : vector<8x128xi1>, vector<8x128xf32>
    %90 = vector.shape_cast %89 : vector<8x128xf32> to vector<1x8x128xf32>
    %c0_99 = arith.constant 0 : index
    %c0_100 = arith.constant 0 : index
    %c0_101 = arith.constant 0 : index
    %91 = vector.load %arg6[%c0_99, %c0_100, %c0_101] : memref<1x8x128xf32, #tpu.memory_space<vmem>>, vector<1x8x128xf32>
    tpu.vector_store %arg6[%c0_99, %c0_100, %c0_101], %90 {strides = array<i32>} : memref<1x8x128xf32, #tpu.memory_space<vmem>>, vector<1x8x128xf32>,
    return
  }
  func.func @transform_0(%arg0: i32) -> (i32, i32, i32, i32) {
    %c0_i32 = arith.constant 0 : i32
    %c0_i32_0 = arith.constant 0 : i32
    %c0_i32_1 = arith.constant 0 : i32
    %c0_i32_2 = arith.constant 0 : i32
    return %arg0, %c0_i32, %c0_i32_0, %c0_i32_1 : i32, i32, i32, i32
  }
  func.func @transform_1(%arg0: i32) -> (i32, i32) {
    %c0_i32 = arith.constant 0 : i32
    %c0_i32_0 = arith.constant 0 : i32
    %c0_i32_1 = arith.constant 0 : i32
    return %c0_i32, %c0_i32_0 : i32, i32
  }
  func.func @transform_2(%arg0: i32) -> (i32, i32) {
    %c0_i32 = arith.constant 0 : i32
    %c0_i32_0 = arith.constant 0 : i32
    %c0_i32_1 = arith.constant 0 : i32
    return %c0_i32, %c0_i32_0 : i32, i32
  }
  func.func @transform_3(%arg0: i32) -> (i32, i32, i32, i32) {
    %c0_i32 = arith.constant 0 : i32
    %c0_i32_0 = arith.constant 0 : i32
    %c0_i32_1 = arith.constant 0 : i32
    %c0_i32_2 = arith.constant 0 : i32
    %c0_i32_3 = arith.constant 0 : i32
    return %c0_i32, %c0_i32_0, %c0_i32_1, %c0_i32_2 : i32, i32, i32, i32
  }
  func.func @transform_4(%arg0: i32) -> (i32, i32, i32, i32) {
    %c0_i32 = arith.constant 0 : i32
    %c0_i32_0 = arith.constant 0 : i32
    %c0_i32_1 = arith.constant 0 : i32
    %c0_i32_2 = arith.constant 0 : i32
    return %arg0, %c0_i32, %c0_i32_0, %c0_i32_1 : i32, i32, i32, i32
  }
  func.func @transform_5(%arg0: i32) -> (i32, i32, i32) {
    %c0_i32 = arith.constant 0 : i32
    %c0_i32_0 = arith.constant 0 : i32
    %c0_i32_1 = arith.constant 0 : i32
    return %arg0, %c0_i32, %c0_i32_0 : i32, i32, i32
  }
}

module attributes {stable_mosaic.version = 11 : i64} {
  func.func @_conv1x1_bn_proj_kernel(%arg0: i32, %arg1: memref<512x128xbf16, #tpu.memory_space<vmem>>, %arg2: memref<512x128xbf16, #tpu.memory_space<vmem>>, %arg3: memref<1x128xf32, #tpu.memory_space<vmem>>, %arg4: memref<1x128xf32, #tpu.memory_space<vmem>>, %arg5: memref<128x128xbf16, #tpu.memory_space<vmem>>, %arg6: memref<128x128xbf16, #tpu.memory_space<vmem>>, %arg7: memref<512x128xbf16, #tpu.memory_space<vmem>>, %arg8: memref<512x128xbf16, #tpu.memory_space<vmem>>, %arg9: memref<1x8x128xf32, #tpu.memory_space<vmem>>, %arg10: memref<1x8x128xf32, #tpu.memory_space<vmem>>) attributes {dimension_semantics = [#tpu.dimension_semantics<parallel>], iteration_bounds = array<i64: 1>, scalar_prefetch = 0 : i64, scratch_operands = 0 : i64, tpu.core_type = #tpu.core_type<tc>, window_params = [{transform_indices = @transform_0, window_bounds = array<i64: 512, 128>}, {transform_indices = @transform_1, window_bounds = array<i64: 512, 128>}, {pipeline_mode = #tpu.pipeline_mode<synchronous>, transform_indices = @transform_2, window_bounds = array<i64: 1, 128>}, {pipeline_mode = #tpu.pipeline_mode<synchronous>, transform_indices = @transform_3, window_bounds = array<i64: 1, 128>}, {pipeline_mode = #tpu.pipeline_mode<synchronous>, transform_indices = @transform_4, window_bounds = array<i64: 128, 128>}, {pipeline_mode = #tpu.pipeline_mode<synchronous>, transform_indices = @transform_5, window_bounds = array<i64: 128, 128>}, {transform_indices = @transform_6, window_bounds = array<i64: 512, 128>}, {transform_indices = @transform_7, window_bounds = array<i64: 512, 128>}, {transform_indices = @transform_8, window_bounds = array<i64: 1, 8, 128>}, {transform_indices = @transform_9, window_bounds = array<i64: 1, 8, 128>}]} {
    %c0 = arith.constant 0 : index
    %c0_0 = arith.constant 0 : index
    %0 = vector.load %arg1[%c0, %c0_0] : memref<512x128xbf16, #tpu.memory_space<vmem>>, vector<512x128xbf16>
    %1 = arith.extf %0 : vector<512x128xbf16> to vector<512x128xf32>
    %c0_1 = arith.constant 0 : index
    %c0_2 = arith.constant 0 : index
    %2 = vector.load %arg3[%c0_1, %c0_2] : memref<1x128xf32, #tpu.memory_space<vmem>>, vector<1x128xf32>
    %3 = vector.broadcast %2 : vector<1x128xf32> to vector<512x128xf32>
    %4 = arith.mulf %1, %3 : vector<512x128xf32>
    %c0_3 = arith.constant 0 : index
    %c0_4 = arith.constant 0 : index
    %5 = vector.load %arg4[%c0_3, %c0_4] : memref<1x128xf32, #tpu.memory_space<vmem>>, vector<1x128xf32>
    %6 = vector.broadcast %5 : vector<1x128xf32> to vector<512x128xf32>
    %7 = arith.addf %4, %6 : vector<512x128xf32>
    %cst = arith.constant 0.000000e+00 : f32
    %8 = vector.broadcast %cst : f32 to vector<512x128xf32>
    %9 = arith.maximumf %7, %8 : vector<512x128xf32>
    %10 = arith.truncf %9 : vector<512x128xf32> to vector<512x128xbf16>
    %c0_5 = arith.constant 0 : index
    %c0_6 = arith.constant 0 : index
    %11 = vector.load %arg5[%c0_5, %c0_6] : memref<128x128xbf16, #tpu.memory_space<vmem>>, vector<128x128xbf16>
    %cst_7 = arith.constant dense<0.000000e+00> : vector<512x128xf32>
    %12 = tpu.matmul %10, %11, %cst_7 {dimension_numbers = #tpu.dot_dimension_numbers<[1], [0], [0], [1], [0, 0, 1, 1], [], []>} : vector<512x128xbf16>, vector<128x128xbf16>, vector<512x128xf32> -> vector<512x128xf32>
    %c0_8 = arith.constant 0 : index
    %c0_9 = arith.constant 0 : index
    %13 = vector.load %arg2[%c0_8, %c0_9] : memref<512x128xbf16, #tpu.memory_space<vmem>>, vector<512x128xbf16>
    %c0_10 = arith.constant 0 : index
    %c0_11 = arith.constant 0 : index
    %14 = vector.load %arg6[%c0_10, %c0_11] : memref<128x128xbf16, #tpu.memory_space<vmem>>, vector<128x128xbf16>
    %cst_12 = arith.constant dense<0.000000e+00> : vector<512x128xf32>
    %15 = tpu.matmul %13, %14, %cst_12 {dimension_numbers = #tpu.dot_dimension_numbers<[1], [0], [0], [1], [0, 0, 1, 1], [], []>} : vector<512x128xbf16>, vector<128x128xbf16>, vector<512x128xf32> -> vector<512x128xf32>
    %16 = arith.truncf %12 : vector<512x128xf32> to vector<512x128xbf16>
    %c0_13 = arith.constant 0 : index
    %c0_14 = arith.constant 0 : index
    %17 = vector.load %arg7[%c0_13, %c0_14] : memref<512x128xbf16, #tpu.memory_space<vmem>>, vector<512x128xbf16>
    tpu.vector_store %arg7[%c0_13, %c0_14], %16 {strides = array<i32>} : memref<512x128xbf16, #tpu.memory_space<vmem>>, vector<512x128xbf16>,
    %18 = arith.truncf %15 : vector<512x128xf32> to vector<512x128xbf16>
    %c0_15 = arith.constant 0 : index
    %c0_16 = arith.constant 0 : index
    %19 = vector.load %arg8[%c0_15, %c0_16] : memref<512x128xbf16, #tpu.memory_space<vmem>>, vector<512x128xbf16>
    tpu.vector_store %arg8[%c0_15, %c0_16], %18 {strides = array<i32>} : memref<512x128xbf16, #tpu.memory_space<vmem>>, vector<512x128xbf16>,
    %cst_17 = arith.constant dense<0.000000e+00> : vector<128xf32>
    %20 = vector.multi_reduction <add>, %12, %cst_17 [0] : vector<512x128xf32> to vector<128xf32>
    %21 = vector.shape_cast %20 : vector<128xf32> to vector<1x128xf32>
    %22 = arith.mulf %12, %12 : vector<512x128xf32>
    %cst_18 = arith.constant dense<0.000000e+00> : vector<128xf32>
    %23 = vector.multi_reduction <add>, %22, %cst_18 [0] : vector<512x128xf32> to vector<128xf32>
    %24 = vector.shape_cast %23 : vector<128xf32> to vector<1x128xf32>
    %25 = tpu.iota {dimensions = array<i32: 0>} : vector<8x128xi32>
    %c4_i32 = arith.constant 4 : i32
    %26 = vector.broadcast %c4_i32 : i32 to vector<8x128xi32>
    %27 = arith.cmpi slt, %25, %26 : vector<8x128xi32>
    %28 = vector.shape_cast %21 : vector<1x128xf32> to vector<1x128xf32>
    %29 = vector.broadcast %28 : vector<1x128xf32> to vector<8x128xf32>
    %30 = vector.shape_cast %24 : vector<1x128xf32> to vector<1x128xf32>
    %31 = vector.broadcast %30 : vector<1x128xf32> to vector<8x128xf32>
    %32 = arith.select %27, %29, %31 : vector<8x128xi1>, vector<8x128xf32>
    %33 = vector.shape_cast %32 : vector<8x128xf32> to vector<1x8x128xf32>
    %c0_19 = arith.constant 0 : index
    %c0_20 = arith.constant 0 : index
    %c0_21 = arith.constant 0 : index
    %34 = vector.load %arg9[%c0_19, %c0_20, %c0_21] : memref<1x8x128xf32, #tpu.memory_space<vmem>>, vector<1x8x128xf32>
    tpu.vector_store %arg9[%c0_19, %c0_20, %c0_21], %33 {strides = array<i32>} : memref<1x8x128xf32, #tpu.memory_space<vmem>>, vector<1x8x128xf32>,
    %cst_22 = arith.constant dense<0.000000e+00> : vector<128xf32>
    %35 = vector.multi_reduction <add>, %15, %cst_22 [0] : vector<512x128xf32> to vector<128xf32>
    %36 = vector.shape_cast %35 : vector<128xf32> to vector<1x128xf32>
    %37 = arith.mulf %15, %15 : vector<512x128xf32>
    %cst_23 = arith.constant dense<0.000000e+00> : vector<128xf32>
    %38 = vector.multi_reduction <add>, %37, %cst_23 [0] : vector<512x128xf32> to vector<128xf32>
    %39 = vector.shape_cast %38 : vector<128xf32> to vector<1x128xf32>
    %40 = tpu.iota {dimensions = array<i32: 0>} : vector<8x128xi32>
    %c4_i32_24 = arith.constant 4 : i32
    %41 = vector.broadcast %c4_i32_24 : i32 to vector<8x128xi32>
    %42 = arith.cmpi slt, %40, %41 : vector<8x128xi32>
    %43 = vector.shape_cast %36 : vector<1x128xf32> to vector<1x128xf32>
    %44 = vector.broadcast %43 : vector<1x128xf32> to vector<8x128xf32>
    %45 = vector.shape_cast %39 : vector<1x128xf32> to vector<1x128xf32>
    %46 = vector.broadcast %45 : vector<1x128xf32> to vector<8x128xf32>
    %47 = arith.select %42, %44, %46 : vector<8x128xi1>, vector<8x128xf32>
    %48 = vector.shape_cast %47 : vector<8x128xf32> to vector<1x8x128xf32>
    %c0_25 = arith.constant 0 : index
    %c0_26 = arith.constant 0 : index
    %c0_27 = arith.constant 0 : index
    %49 = vector.load %arg10[%c0_25, %c0_26, %c0_27] : memref<1x8x128xf32, #tpu.memory_space<vmem>>, vector<1x8x128xf32>
    tpu.vector_store %arg10[%c0_25, %c0_26, %c0_27], %48 {strides = array<i32>} : memref<1x8x128xf32, #tpu.memory_space<vmem>>, vector<1x8x128xf32>,
    return
  }
  func.func @transform_0(%arg0: i32) -> (i32, i32) {
    %c0_i32 = arith.constant 0 : i32
    %c0_i32_0 = arith.constant 0 : i32
    return %arg0, %c0_i32 : i32, i32
  }
  func.func @transform_1(%arg0: i32) -> (i32, i32) {
    %c0_i32 = arith.constant 0 : i32
    %c0_i32_0 = arith.constant 0 : i32
    return %arg0, %c0_i32 : i32, i32
  }
  func.func @transform_2(%arg0: i32) -> (i32, i32) {
    %c0_i32 = arith.constant 0 : i32
    %c0_i32_0 = arith.constant 0 : i32
    %c0_i32_1 = arith.constant 0 : i32
    return %c0_i32, %c0_i32_0 : i32, i32
  }
  func.func @transform_3(%arg0: i32) -> (i32, i32) {
    %c0_i32 = arith.constant 0 : i32
    %c0_i32_0 = arith.constant 0 : i32
    %c0_i32_1 = arith.constant 0 : i32
    return %c0_i32, %c0_i32_0 : i32, i32
  }
  func.func @transform_4(%arg0: i32) -> (i32, i32) {
    %c0_i32 = arith.constant 0 : i32
    %c0_i32_0 = arith.constant 0 : i32
    %c0_i32_1 = arith.constant 0 : i32
    return %c0_i32, %c0_i32_0 : i32, i32
  }
  func.func @transform_5(%arg0: i32) -> (i32, i32) {
    %c0_i32 = arith.constant 0 : i32
    %c0_i32_0 = arith.constant 0 : i32
    %c0_i32_1 = arith.constant 0 : i32
    return %c0_i32, %c0_i32_0 : i32, i32
  }
  func.func @transform_6(%arg0: i32) -> (i32, i32) {
    %c0_i32 = arith.constant 0 : i32
    %c0_i32_0 = arith.constant 0 : i32
    return %arg0, %c0_i32 : i32, i32
  }
  func.func @transform_7(%arg0: i32) -> (i32, i32) {
    %c0_i32 = arith.constant 0 : i32
    %c0_i32_0 = arith.constant 0 : i32
    return %arg0, %c0_i32 : i32, i32
  }
  func.func @transform_8(%arg0: i32) -> (i32, i32, i32) {
    %c0_i32 = arith.constant 0 : i32
    %c0_i32_0 = arith.constant 0 : i32
    %c0_i32_1 = arith.constant 0 : i32
    return %arg0, %c0_i32, %c0_i32_0 : i32, i32, i32
  }
  func.func @transform_9(%arg0: i32) -> (i32, i32, i32) {
    %c0_i32 = arith.constant 0 : i32
    %c0_i32_0 = arith.constant 0 : i32
    %c0_i32_1 = arith.constant 0 : i32
    return %arg0, %c0_i32, %c0_i32_0 : i32, i32, i32
  }
}

module attributes {stable_mosaic.version = 11 : i64} {
  func.func @_add_relu_proj_kernel(%arg0: i32, %arg1: memref<512x128xbf16, #tpu.memory_space<vmem>>, %arg2: memref<512x128xbf16, #tpu.memory_space<vmem>>, %arg3: memref<1x128xf32, #tpu.memory_space<vmem>>, %arg4: memref<1x128xf32, #tpu.memory_space<vmem>>, %arg5: memref<1x128xf32, #tpu.memory_space<vmem>>, %arg6: memref<1x128xf32, #tpu.memory_space<vmem>>, %arg7: memref<512x128xbf16, #tpu.memory_space<vmem>>) attributes {dimension_semantics = [#tpu.dimension_semantics<parallel>], iteration_bounds = array<i64: 1>, scalar_prefetch = 0 : i64, scratch_operands = 0 : i64, tpu.core_type = #tpu.core_type<tc>, window_params = [{transform_indices = @transform_0, window_bounds = array<i64: 512, 128>}, {transform_indices = @transform_1, window_bounds = array<i64: 512, 128>}, {pipeline_mode = #tpu.pipeline_mode<synchronous>, transform_indices = @transform_2, window_bounds = array<i64: 1, 128>}, {pipeline_mode = #tpu.pipeline_mode<synchronous>, transform_indices = @transform_3, window_bounds = array<i64: 1, 128>}, {pipeline_mode = #tpu.pipeline_mode<synchronous>, transform_indices = @transform_4, window_bounds = array<i64: 1, 128>}, {pipeline_mode = #tpu.pipeline_mode<synchronous>, transform_indices = @transform_5, window_bounds = array<i64: 1, 128>}, {transform_indices = @transform_6, window_bounds = array<i64: 512, 128>}]} {
    %c0 = arith.constant 0 : index
    %c0_0 = arith.constant 0 : index
    %0 = vector.load %arg1[%c0, %c0_0] : memref<512x128xbf16, #tpu.memory_space<vmem>>, vector<512x128xbf16>
    %1 = arith.extf %0 : vector<512x128xbf16> to vector<512x128xf32>
    %c0_1 = arith.constant 0 : index
    %c0_2 = arith.constant 0 : index
    %2 = vector.load %arg3[%c0_1, %c0_2] : memref<1x128xf32, #tpu.memory_space<vmem>>, vector<1x128xf32>
    %3 = vector.broadcast %2 : vector<1x128xf32> to vector<512x128xf32>
    %4 = arith.mulf %1, %3 : vector<512x128xf32>
    %c0_3 = arith.constant 0 : index
    %c0_4 = arith.constant 0 : index
    %5 = vector.load %arg4[%c0_3, %c0_4] : memref<1x128xf32, #tpu.memory_space<vmem>>, vector<1x128xf32>
    %6 = vector.broadcast %5 : vector<1x128xf32> to vector<512x128xf32>
    %7 = arith.addf %4, %6 : vector<512x128xf32>
    %c0_5 = arith.constant 0 : index
    %c0_6 = arith.constant 0 : index
    %8 = vector.load %arg2[%c0_5, %c0_6] : memref<512x128xbf16, #tpu.memory_space<vmem>>, vector<512x128xbf16>
    %9 = arith.extf %8 : vector<512x128xbf16> to vector<512x128xf32>
    %c0_7 = arith.constant 0 : index
    %c0_8 = arith.constant 0 : index
    %10 = vector.load %arg5[%c0_7, %c0_8] : memref<1x128xf32, #tpu.memory_space<vmem>>, vector<1x128xf32>
    %11 = vector.broadcast %10 : vector<1x128xf32> to vector<512x128xf32>
    %12 = arith.mulf %9, %11 : vector<512x128xf32>
    %c0_9 = arith.constant 0 : index
    %c0_10 = arith.constant 0 : index
    %13 = vector.load %arg6[%c0_9, %c0_10] : memref<1x128xf32, #tpu.memory_space<vmem>>, vector<1x128xf32>
    %14 = vector.broadcast %13 : vector<1x128xf32> to vector<512x128xf32>
    %15 = arith.addf %12, %14 : vector<512x128xf32>
    %16 = arith.addf %7, %15 : vector<512x128xf32>
    %cst = arith.constant 0.000000e+00 : f32
    %17 = vector.broadcast %cst : f32 to vector<512x128xf32>
    %18 = arith.maximumf %16, %17 : vector<512x128xf32>
    %19 = arith.truncf %18 : vector<512x128xf32> to vector<512x128xbf16>
    %c0_11 = arith.constant 0 : index
    %c0_12 = arith.constant 0 : index
    %20 = vector.load %arg7[%c0_11, %c0_12] : memref<512x128xbf16, #tpu.memory_space<vmem>>, vector<512x128xbf16>
    tpu.vector_store %arg7[%c0_11, %c0_12], %19 {strides = array<i32>} : memref<512x128xbf16, #tpu.memory_space<vmem>>, vector<512x128xbf16>,
    return
  }
  func.func @transform_0(%arg0: i32) -> (i32, i32) {
    %c0_i32 = arith.constant 0 : i32
    %c0_i32_0 = arith.constant 0 : i32
    return %arg0, %c0_i32 : i32, i32
  }
  func.func @transform_1(%arg0: i32) -> (i32, i32) {
    %c0_i32 = arith.constant 0 : i32
    %c0_i32_0 = arith.constant 0 : i32
    return %arg0, %c0_i32 : i32, i32
  }
  func.func @transform_2(%arg0: i32) -> (i32, i32) {
    %c0_i32 = arith.constant 0 : i32
    %c0_i32_0 = arith.constant 0 : i32
    %c0_i32_1 = arith.constant 0 : i32
    return %c0_i32, %c0_i32_0 : i32, i32
  }
  func.func @transform_3(%arg0: i32) -> (i32, i32) {
    %c0_i32 = arith.constant 0 : i32
    %c0_i32_0 = arith.constant 0 : i32
    %c0_i32_1 = arith.constant 0 : i32
    return %c0_i32, %c0_i32_0 : i32, i32
  }
  func.func @transform_4(%arg0: i32) -> (i32, i32) {
    %c0_i32 = arith.constant 0 : i32
    %c0_i32_0 = arith.constant 0 : i32
    %c0_i32_1 = arith.constant 0 : i32
    return %c0_i32, %c0_i32_0 : i32, i32
  }
  func.func @transform_5(%arg0: i32) -> (i32, i32) {
    %c0_i32 = arith.constant 0 : i32
    %c0_i32_0 = arith.constant 0 : i32
    %c0_i32_1 = arith.constant 0 : i32
    return %c0_i32, %c0_i32_0 : i32, i32
  }
  func.func @transform_6(%arg0: i32) -> (i32, i32) {
    %c0_i32 = arith.constant 0 : i32
    %c0_i32_0 = arith.constant 0 : i32
    return %arg0, %c0_i32 : i32, i32
  }
}

</mosaic_0001>

<bundles_post_ra>
// kernel: bottleneck_forward.4
= control target key start
LH: loop header
LB: loop body
LE: loop exit
PB: predicated region body
PF: predicated region fallthrough
CT: control target
= control target key end

     0   :  { %s1787_s1 = inlined_call_operand.vmem [shape: bf16[128,128], index: 1, kind: input, shape index: {}]   ;;  %s1788_s0 = inlined_call_operand.vmem [shape: bf16[512,128], index: 0, kind: input, shape index: {}]   ;;  %s1789_s2 = inlined_call_operand.vmem [shape: bf16[512,128], index: 2, kind: output, shape index: {0}]   ;;  %s1790_s3 = inlined_call_operand.vmem [shape: f32[1,8,128], index: 3, kind: output, shape index: {1}]  }
   0x1   :  { %v1044_v0 = vld [vmem:[%s1787_s1 + $0x38] sm:$0xff]  ;;  %v1043_v1 = vld [vmem:[%s1787_s1 + $0x30] sm:$0xff]  ;;  %v1042_v2 = vld [vmem:[%s1787_s1 + $0x28] sm:$0xff] }
   0x2   :  { %333 = vmatpush.bf16.msra.mxu0 %v1044_v0  ;;  %1236 = vmatpush.bf16.msra.mxu1 %v1044_v0  ;;  %v1041_v3 = vld [vmem:[%s1787_s1 + $0x20] sm:$0xff]  ;;  %v1040_v4 = vld [vmem:[%s1787_s1 + $0x18] sm:$0xff]  ;;  %v1039_v5 = vld [vmem:[%s1787_s1 + $0x10] sm:$0xff] }
   0x3   :  { %1237 = vmatpush.bf16.msra.mxu2 %v1044_v0  ;;  %1238 = vmatpush.bf16.msra.mxu3 %v1044_v0  ;;  %v1038_v6 = vld [vmem:[%s1787_s1 + $0x8] sm:$0xff]  ;;  %v1037_v7 = vld [vmem:[%s1787_s1] sm:$0xff]  ;;  %v1007_v13 = vld [vmem:[%s1788_s0 + $0x10] sm:$0xff] }
   0x4   :  { %v1005_v8 = vld [vmem:[%s1788_s0] sm:$0xff]  ;;  %v1006_v10 = vld [vmem:[%s1788_s0 + $0x8] sm:$0xff]  ;;  %v1015_v14 = vld [vmem:[%s1788_s0 + $0x50] sm:$0xff] }
   0x5   :  { %v1013_v9 = vld [vmem:[%s1788_s0 + $0x40] sm:$0xff]  ;;  %v1014_v11 = vld [vmem:[%s1788_s0 + $0x48] sm:$0xff]  ;;  %v1008_v16 = vld [vmem:[%s1788_s0 + $0x18] sm:$0xff] }
   0x6   :  { %334 = vmatpush.bf16.msra.mxu0 %v1043_v1  ;;  %1239 = vmatpush.bf16.msra.mxu1 %v1043_v1  ;;  %v1021_v12 = vld [vmem:[%s1788_s0 + $0x80] sm:$0xff]  ;;  %v1022_v15 = vld [vmem:[%s1788_s0 + $0x88] sm:$0xff]  ;;  %v1016_v17 = vld [vmem:[%s1788_s0 + $0x58] sm:$0xff] }
   0x7   :  { %1240 = vmatpush.bf16.msra.mxu2 %v1043_v1  ;;  %1241 = vmatpush.bf16.msra.mxu3 %v1043_v1  ;;  %v1023_v18 = vld [vmem:[%s1788_s0 + $0x90] sm:$0xff]  ;;  %v1029_v19 = vld [vmem:[%s1788_s0 + $0xc0] sm:$0xff]  ;;  %v1024_v22 = vld [vmem:[%s1788_s0 + $0x98] sm:$0xff] }
   0x8   :  { %v1009_v20 = vld [vmem:[%s1788_s0 + $0x20] sm:$0xff]  ;;  %v1030_v23 = vld [vmem:[%s1788_s0 + $0xc8] sm:$0xff]  ;;  %v1031_v27 = vld [vmem:[%s1788_s0 + $0xd0] sm:$0xff] }
   0x9   :  { %v1017_v21 = vld [vmem:[%s1788_s0 + $0x60] sm:$0xff]  ;;  %v1010_v24 = vld [vmem:[%s1788_s0 + $0x28] sm:$0xff]  ;;  %v1011_v28 = vld [vmem:[%s1788_s0 + $0x30] sm:$0xff] }
   0xa   :  { %335 = vmatpush.bf16.msra.mxu0 %v1042_v2  ;;  %1242 = vmatpush.bf16.msra.mxu1 %v1042_v2  ;;  %v1018_v25 = vld [vmem:[%s1788_s0 + $0x68] sm:$0xff]  ;;  %v1025_v26 = vld [vmem:[%s1788_s0 + $0xa0] sm:$0xff]  ;;  %v1019_v29 = vld [vmem:[%s1788_s0 + $0x70] sm:$0xff] }
   0xb   :  { %1243 = vmatpush.bf16.msra.mxu2 %v1042_v2  ;;  %1244 = vmatpush.bf16.msra.mxu3 %v1042_v2  ;;  %v1026_v30 = vld [vmem:[%s1788_s0 + $0xa8] sm:$0xff]  ;;  %v1032_v31 = vld [vmem:[%s1788_s0 + $0xd8] sm:$0xff]  ;;  %v1027_v34 = vld [vmem:[%s1788_s0 + $0xb0] sm:$0xff] }
   0xc   :  { %v1012_v32 = vld [vmem:[%s1788_s0 + $0x38] sm:$0xff]  ;;  %v1033_v35 = vld [vmem:[%s1788_s0 + $0xe0] sm:$0xff]  ;;  %v1034_v39 = vld [vmem:[%s1788_s0 + $0xe8] sm:$0xff] }
   0xd   :  { %v1020_v33 = vld [vmem:[%s1788_s0 + $0x78] sm:$0xff]  ;;  %v1035_v53 = vld [vmem:[%s1788_s0 + $0xf0] sm:$0xff] }
   0xe   :  { %336 = vmatpush.bf16.msra.mxu0 %v1041_v3  ;;  %1245 = vmatpush.bf16.msra.mxu1 %v1041_v3  ;;  %v1028_v38 = vld [vmem:[%s1788_s0 + $0xb8] sm:$0xff] }
   0xf   :  { %1246 = vmatpush.bf16.msra.mxu2 %v1041_v3  ;;  %1247 = vmatpush.bf16.msra.mxu3 %v1041_v3 }
  0x12   :  { %337 = vmatpush.bf16.msra.mxu0 %v1040_v4  ;;  %1248 = vmatpush.bf16.msra.mxu1 %v1040_v4 }
  0x13   :  { %1249 = vmatpush.bf16.msra.mxu2 %v1040_v4  ;;  %1250 = vmatpush.bf16.msra.mxu3 %v1040_v4 }
  0x16   :  { %338 = vmatpush.bf16.msra.mxu0 %v1039_v5  ;;  %1251 = vmatpush.bf16.msra.mxu1 %v1039_v5 }
  0x17   :  { %1252 = vmatpush.bf16.msra.mxu2 %v1039_v5  ;;  %1253 = vmatpush.bf16.msra.mxu3 %v1039_v5  ;;  %v1036_v5 = vld [vmem:[%s1788_s0 + $0xf8] sm:$0xff] }
  0x1a   :  { %339 = vmatpush.bf16.msra.mxu0 %v1038_v6  ;;  %1254 = vmatpush.bf16.msra.mxu1 %v1038_v6 }
  0x1b   :  { %1255 = vmatpush.bf16.msra.mxu2 %v1038_v6  ;;  %1256 = vmatpush.bf16.msra.mxu3 %v1038_v6 }
  0x1e   :  { %340 = vmatpush.bf16.msra.mxu0 %v1037_v7  ;;  %1257 = vmatpush.bf16.msra.mxu1 %v1037_v7 }
  0x1f   :  { %1258 = vmatpush.bf16.msra.mxu2 %v1037_v7  ;;  %1259 = vmatpush.bf16.msra.mxu3 %v1037_v7 }
  0x21   :  { %341 = vmatmul.bf16.vlgmr.msra.gmra.mxu0 %v1005_v8  ;;  %381 = vmatmul.bf16.vlgmr.msra.gmra.mxu1 %v1013_v9 }
  0x22   :  { %421 = vmatmul.bf16.vlgmr.msra.gmra.mxu2 %v1021_v12  ;;  %461 = vmatmul.bf16.vlgmr.msra.gmra.mxu3 %v1029_v19 }
  0x31   :  { %346 = vmatmul.bf16.gmra.mxu0 %v1006_v10  ;;  %386 = vmatmul.bf16.gmra.mxu1 %v1014_v11 }
  0x32   :  { %426 = vmatmul.bf16.gmra.mxu2 %v1022_v15  ;;  %466 = vmatmul.bf16.gmra.mxu3 %v1030_v23 }
  0x41   :  { %351 = vmatmul.bf16.gmra.mxu0 %v1007_v13  ;;  %391 = vmatmul.bf16.gmra.mxu1 %v1015_v14 }
  0x42   :  { %431 = vmatmul.bf16.gmra.mxu2 %v1023_v18  ;;  %471 = vmatmul.bf16.gmra.mxu3 %v1031_v27 }
  0x51   :  { %356 = vmatmul.bf16.gmra.mxu0 %v1008_v16  ;;  %396 = vmatmul.bf16.gmra.mxu1 %v1016_v17 }
  0x52   :  { %436 = vmatmul.bf16.gmra.mxu2 %v1024_v22  ;;  %476 = vmatmul.bf16.gmra.mxu3 %v1032_v31 }
  0x61   :  { %361 = vmatmul.bf16.gmra.mxu0 %v1009_v20  ;;  %401 = vmatmul.bf16.gmra.mxu1 %v1017_v21 }
  0x62   :  { %441 = vmatmul.bf16.gmra.mxu2 %v1025_v26  ;;  %481 = vmatmul.bf16.gmra.mxu3 %v1033_v35 }
  0x71   :  { %366 = vmatmul.bf16.gmra.mxu0 %v1010_v24  ;;  %406 = vmatmul.bf16.gmra.mxu1 %v1018_v25 }
  0x72   :  { %446 = vmatmul.bf16.gmra.mxu2 %v1026_v30  ;;  %486 = vmatmul.bf16.gmra.mxu3 %v1034_v39 }
  0x81   :  { %371 = vmatmul.bf16.gmra.mxu0 %v1011_v28  ;;  %411 = vmatmul.bf16.gmra.mxu1 %v1019_v29 }
  0x82   :  { %451 = vmatmul.bf16.gmra.mxu2 %v1027_v34  ;;  %491 = vmatmul.bf16.gmra.mxu3 %v1035_v53 }
  0x91   :  { %376 = vmatmul.bf16.gmra.mxu0 %v1012_v32  ;;  %416 = vmatmul.bf16.gmra.mxu1 %v1020_v33 }
  0x92   :  { %456 = vmatmul.bf16.gmra.mxu2 %v1028_v38  ;;  %496 = vmatmul.bf16.gmra.mxu3 %v1036_v5 }
  0x9e   :  { %v342_v36 = vpop.f32.mrf.mxu0  ;;  %v1388_v37 = vpop.f32.mrf.mxu1 }
  0x9f   :  { %v699_v40 = vmul.f32 %v342_v36, %v342_v36 }
  0xa5   :  { %v1415_v60 = vpop.f32.mrf.mxu2  ;;  %v1466_v20 = vpop.f32.mrf.mxu3 }
  0xa6   :  { %v344_v41 = vpop.f32.mrf.mxu0  ;;  %v1396_v42 = vpop.f32.mrf.mxu1 }
  0xa7   :  { %v1048_v43 = vpack.c.bf16 %v344_v41, %v342_v36  ;;  %v630_v44 = vadd.f32 %v344_v41, %v342_v36  ;;  %v700_v45 = vmul.f32 %v344_v41, %v344_v41  ;;  %v1088_v46 = vpack.c.bf16 %v1396_v42, %v1388_v37 }
  0xa9   :  { %1049 = vst [vmem:[%s1789_s2] sm:$0xff] %v1048_v43   ;;  %v763_v47 = vadd.f32 %v700_v45, %v699_v40 }
  0xaa   :  { %1212 = vst [vmem:[%s1789_s2 + $0x40] sm:$0xff] %v1088_v46  }
  0xad   :  { %v1427_v2 = vpop.f32.mrf.mxu2  ;;  %v1478_v24 = vpop.f32.mrf.mxu3 }
  0xae   :  { %v347_v48 = vpop.f32.mrf.mxu0  ;;  %v1406_v49 = vpop.f32.mrf.mxu1  ;;  %v1128_v3 = vpack.c.bf16 %v1427_v2, %v1415_v60  ;;  %v1168_v26 = vpack.c.bf16 %v1478_v24, %v1466_v20 }
  0xaf   :  { %v631_v50 = vadd.f32 %v630_v44, %v347_v48  ;;  %v701_v51 = vmul.f32 %v347_v48, %v347_v48 }
  0xb0   :  { %1220 = vst [vmem:[%s1789_s2 + $0x80] sm:$0xff] %v1128_v3  }
  0xb1   :  { %v764_v52 = vadd.f32 %v763_v47, %v701_v51  ;;  %1228 = vst [vmem:[%s1789_s2 + $0xc0] sm:$0xff] %v1168_v26  }
  0xb5   :  { %v1443_v10 = vpop.f32.mrf.mxu2  ;;  %v1496_v32 = vpop.f32.mrf.mxu3 }
  0xb6   :  { %v349_v54 = vpop.f32.mrf.mxu0  ;;  %v1411_v55 = vpop.f32.mrf.mxu1 }
  0xb7   :  { %v1053_v56 = vpack.c.bf16 %v349_v54, %v347_v48  ;;  %v632_v57 = vadd.f32 %v631_v50, %v349_v54  ;;  %v702_v58 = vmul.f32 %v349_v54, %v349_v54  ;;  %v1093_v59 = vpack.c.bf16 %v1411_v55, %v1406_v49 }
  0xb9   :  { %1205 = vst [vmem:[%s1789_s2 + $0x8] sm:$0xff] %v1053_v56   ;;  %v765_v61 = vadd.f32 %v764_v52, %v702_v58 }
  0xba   :  { %1213 = vst [vmem:[%s1789_s2 + $0x48] sm:$0xff] %v1093_v59  }
  0xbd   :  { %v1453_v13 = vpop.f32.mrf.mxu2  ;;  %v1508_v36 = vpop.f32.mrf.mxu3 }
  0xbe   :  { %v352_v62 = vpop.f32.mrf.mxu0  ;;  %v1423_v63 = vpop.f32.mrf.mxu1  ;;  %v1133_v14 = vpack.c.bf16 %v1453_v13, %v1443_v10  ;;  %v1173_v39 = vpack.c.bf16 %v1508_v36, %v1496_v32 }
  0xbf   :  { %v1425_v0 = vadd.f32 %v632_v57, %v352_v62  ;;  %v703_v1 = vmul.f32 %v352_v62, %v352_v62 }
  0xc0   :  { %1221 = vst [vmem:[%s1789_s2 + $0x88] sm:$0xff] %v1133_v14  }
  0xc1   :  { %v1431_v4 = vadd.f32 %v765_v61, %v703_v1  ;;  %1229 = vst [vmem:[%s1789_s2 + $0xc8] sm:$0xff] %v1173_v39  }
  0xc5   :  { %v1464_v19 = vpop.f32.mrf.mxu2  ;;  %v1526_v46 = vpop.f32.mrf.mxu3 }
  0xc6   :  { %v354_v6 = vpop.f32.mrf.mxu0  ;;  %v1439_v7 = vpop.f32.mrf.mxu1 }
  0xc7   :  { %v1058_v8 = vpack.c.bf16 %v354_v6, %v352_v62  ;;  %v1098_v9 = vpack.c.bf16 %v1439_v7, %v1423_v63  ;;  %v704_v52 = vmul.f32 %v354_v6, %v354_v6  ;;  %v634_v57 = vadd.f32 %v1425_v0, %v354_v6 }
  0xc9   :  { %1206 = vst [vmem:[%s1789_s2 + $0x10] sm:$0xff] %v1058_v8   ;;  %v767_v58 = vadd.f32 %v1431_v4, %v704_v52 }
  0xca   :  { %1214 = vst [vmem:[%s1789_s2 + $0x50] sm:$0xff] %v1098_v9  }
  0xcd   :  { %v1476_v23 = vpop.f32.mrf.mxu2  ;;  %v1538_v51 = vpop.f32.mrf.mxu3 }
  0xce   :  { %v357_v11 = vpop.f32.mrf.mxu0  ;;  %v1451_v12 = vpop.f32.mrf.mxu1  ;;  %v1138_v25 = vpack.c.bf16 %v1476_v23, %v1464_v19  ;;  %v1178_v54 = vpack.c.bf16 %v1538_v51, %v1526_v46 }
  0xcf   :  { %v705_v56 = vmul.f32 %v357_v11, %v357_v11  ;;  %v635_v61 = vadd.f32 %v634_v57, %v357_v11 }
  0xd0   :  { %1222 = vst [vmem:[%s1789_s2 + $0x90] sm:$0xff] %v1138_v25  }
  0xd1   :  { %1230 = vst [vmem:[%s1789_s2 + $0xd0] sm:$0xff] %v1178_v54   ;;  %v768_v62 = vadd.f32 %v767_v58, %v705_v56 }
  0xd5   :  { %v1494_v31 = vpop.f32.mrf.mxu2  ;;  %v1558_v0 = vpop.f32.mrf.mxu3 }
  0xd6   :  { %v359_v15 = vpop.f32.mrf.mxu0  ;;  %v1460_v16 = vpop.f32.mrf.mxu1 }
  0xd7   :  { %v1063_v17 = vpack.c.bf16 %v359_v15, %v357_v11  ;;  %v1103_v18 = vpack.c.bf16 %v1460_v16, %v1451_v12  ;;  %v706_v59 = vmul.f32 %v359_v15, %v359_v15  ;;  %v636_v8 = vadd.f32 %v635_v61, %v359_v15 }
  0xd9   :  { %1207 = vst [vmem:[%s1789_s2 + $0x18] sm:$0xff] %v1063_v17   ;;  %v769_v6 = vadd.f32 %v768_v62, %v706_v59 }
  0xda   :  { %1215 = vst [vmem:[%s1789_s2 + $0x58] sm:$0xff] %v1103_v18  }
  0xdd   :  { %v1506_v35 = vpop.f32.mrf.mxu2 }
  0xde   :  { %v362_v21 = vpop.f32.mrf.mxu0  ;;  %v1474_v22 = vpop.f32.mrf.mxu1  ;;  %v1143_v38 = vpack.c.bf16 %v1506_v35, %v1494_v31 }
  0xdf   :  { %v707_v1 = vmul.f32 %v362_v21, %v362_v21  ;;  %v637_v25 = vadd.f32 %v636_v8, %v362_v21 }
  0xe0   :  { %1223 = vst [vmem:[%s1789_s2 + $0x98] sm:$0xff] %v1143_v38  }
  0xe1   :  { %v770_v4 = vadd.f32 %v769_v6, %v707_v1 }
  0xe5   :  { %v1524_v45 = vpop.f32.mrf.mxu2 }
  0xe6   :  { %v364_v27 = vpop.f32.mrf.mxu0  ;;  %v1490_v28 = vpop.f32.mrf.mxu1 }
  0xe7   :  { %v1068_v29 = vpack.c.bf16 %v364_v27, %v362_v21  ;;  %v1108_v30 = vpack.c.bf16 %v1490_v28, %v1474_v22  ;;  %v708_v18 = vmul.f32 %v364_v27, %v364_v27  ;;  %v638_v15 = vadd.f32 %v637_v25, %v364_v27 }
  0xe9   :  { %1208 = vst [vmem:[%s1789_s2 + $0x20] sm:$0xff] %v1068_v29   ;;  %v771_v26 = vadd.f32 %v770_v4, %v708_v18 }
  0xea   :  { %1216 = vst [vmem:[%s1789_s2 + $0x60] sm:$0xff] %v1108_v30  }
  0xed   :  { %v1536_v50 = vpop.f32.mrf.mxu2 }
  0xee   :  { %v367_v33 = vpop.f32.mrf.mxu0  ;;  %v1504_v34 = vpop.f32.mrf.mxu1  ;;  %v1148_v53 = vpack.c.bf16 %v1536_v50, %v1524_v45 }
  0xef   :  { %v709_v11 = vmul.f32 %v367_v33, %v367_v33  ;;  %v639_v30 = vadd.f32 %v638_v15, %v367_v33 }
  0xf0   :  { %1224 = vst [vmem:[%s1789_s2 + $0xa0] sm:$0xff] %v1148_v53   ;;  %v1570_v53 = vpop.f32.mrf.mxu3 }
  0xf1   :  { %v772_v38 = vadd.f32 %v771_v26, %v709_v11  ;;  %v1183_v27 = vpack.c.bf16 %v1570_v53, %v1558_v0  ;;  %v716_v26 = vmul.f32 %v1396_v42, %v1396_v42 }
  0xf3   :  { %1231 = vst [vmem:[%s1789_s2 + $0xd8] sm:$0xff] %v1183_v27  }
  0xf5   :  { %v1556_v17 = vpop.f32.mrf.mxu2 }
  0xf6   :  { %v369_v40 = vpop.f32.mrf.mxu0  ;;  %v1520_v41 = vpop.f32.mrf.mxu1 }
  0xf7   :  { %v1073_v43 = vpack.c.bf16 %v369_v40, %v367_v33  ;;  %v1113_v44 = vpack.c.bf16 %v1520_v41, %v1504_v34  ;;  %v710_v29 = vmul.f32 %v369_v40, %v369_v40  ;;  %v640_v21 = vadd.f32 %v639_v30, %v369_v40 }
  0xf8   :  { %v1588_v4 = vpop.f32.mrf.mxu3 }
  0xf9   :  { %1209 = vst [vmem:[%s1789_s2 + $0x28] sm:$0xff] %v1073_v43   ;;  %v773_v54 = vadd.f32 %v772_v38, %v710_v29  ;;  %v717_v38 = vmul.f32 %v1406_v49, %v1406_v49 }
  0xfa   :  { %1217 = vst [vmem:[%s1789_s2 + $0x68] sm:$0xff] %v1113_v44  }
  0xfd   :  { %v1568_v52 = vpop.f32.mrf.mxu2 }
  0xfe   :  { %v372_v47 = vpop.f32.mrf.mxu0  ;;  %v1534_v48 = vpop.f32.mrf.mxu1  ;;  %v1153_v57 = vpack.c.bf16 %v1568_v52, %v1556_v17 }
  0xff   :  { %v711_v39 = vmul.f32 %v372_v47, %v372_v47  ;;  %v641_v58 = vadd.f32 %v640_v21, %v372_v47 }
 0x100   :  { %1225 = vst [vmem:[%s1789_s2 + $0xa8] sm:$0xff] %v1153_v57   ;;  %v1610_v57 = vpop.f32.mrf.mxu3 }
 0x101   :  { %v774_v33 = vadd.f32 %v773_v54, %v711_v39  ;;  %v1188_v27 = vpack.c.bf16 %v1610_v57, %v1588_v4 }
 0x103   :  { %1232 = vst [vmem:[%s1789_s2 + $0xe0] sm:$0xff] %v1188_v27  }
 0x105   :  { %v1586_v25 = vpop.f32.mrf.mxu2 }
 0x106   :  { %v374_v3 = vpop.f32.mrf.mxu0  ;;  %v1552_v5 = vpop.f32.mrf.mxu1 }
 0x107   :  { %v1078_v9 = vpack.c.bf16 %v374_v3, %v372_v47  ;;  %v1118_v14 = vpack.c.bf16 %v1552_v5, %v1534_v48  ;;  %v712_v56 = vmul.f32 %v374_v3, %v374_v3  ;;  %v642_v40 = vadd.f32 %v641_v58, %v374_v3 }
 0x108   :  { %v715_v3 = vmul.f32 %v1388_v37, %v1388_v37  ;;  %v728_v27 = vmul.f32 %v1552_v5, %v1552_v5 }
 0x109   :  { %1210 = vst [vmem:[%s1789_s2 + $0x30] sm:$0xff] %v1078_v9   ;;  %v775_v61 = vadd.f32 %v774_v33, %v712_v56 }
 0x10a   :  { %1218 = vst [vmem:[%s1789_s2 + $0x70] sm:$0xff] %v1118_v14  }
 0x10d   :  { %v1608_v56 = vpop.f32.mrf.mxu2 }
 0x10e   :  { %v377_v43 = vpop.f32.mrf.mxu0  ;;  %v1566_v44 = vpop.f32.mrf.mxu1 }
 0x10f   :  { %v713_v59 = vmul.f32 %v377_v43, %v377_v43  ;;  %v643_v62 = vadd.f32 %v642_v40, %v377_v43 }
 0x111   :  { %v776_v1 = vadd.f32 %v775_v61, %v713_v59  ;;  %v721_v61 = vmul.f32 %v1451_v12, %v1451_v12 }
 0x116   :  { %v379_v8 = vpop.f32.mrf.mxu0  ;;  %v1582_v9 = vpop.f32.mrf.mxu1 }
 0x117   :  { %v1083_v14 = vpack.c.bf16 %v379_v8, %v377_v43  ;;  %v644_v6 = vadd.f32 %v643_v62, %v379_v8  ;;  %v714_v47 = vmul.f32 %v379_v8, %v379_v8  ;;  %v1123_v18 = vpack.c.bf16 %v1582_v9, %v1566_v44 }
 0x119   :  { %1211 = vst [vmem:[%s1789_s2 + $0x38] sm:$0xff] %v1083_v14   ;;  %v645_v11 = vadd.f32 %v644_v6, %v1388_v37  ;;  %v777_v15 = vadd.f32 %v776_v1, %v714_v47  ;;  %v718_v37 = vmul.f32 %v1411_v55, %v1411_v55  ;;  %v722_v1 = vmul.f32 %v1460_v16, %v1460_v16  ;;  %v1634_v6 = vpop.f32.mrf.mxu2 }
 0x11a   :  { %1219 = vst [vmem:[%s1789_s2 + $0x78] sm:$0xff] %v1123_v18   ;;  %v723_v47 = vmul.f32 %v1474_v22, %v1474_v22 }
 0x11b   :  { %v646_v29 = vadd.f32 %v645_v11, %v1396_v42  ;;  %v778_v30 = vadd.f32 %v777_v15, %v715_v3  ;;  %v1158_v42 = vpack.c.bf16 %v1608_v56, %v1586_v25  ;;  %v724_v11 = vmul.f32 %v1490_v28, %v1490_v28 }
 0x11d   :  { %v647_v39 = vadd.f32 %v646_v29, %v1406_v49  ;;  %v779_v43 = vadd.f32 %v778_v30, %v716_v26  ;;  %v719_v49 = vmul.f32 %v1423_v63, %v1423_v63  ;;  %1226 = vst [vmem:[%s1789_s2 + $0xb0] sm:$0xff] %v1158_v42   ;;  %v726_v30 = vmul.f32 %v1520_v41, %v1520_v41 }
 0x11f   :  { %v648_v21 = vadd.f32 %v647_v39, %v1411_v55  ;;  %v780_v54 = vadd.f32 %v779_v43, %v717_v38  ;;  %v720_v55 = vmul.f32 %v1439_v7, %v1439_v7 }
 0x121   :  { %v649_v58 = vadd.f32 %v648_v21, %v1423_v63  ;;  %v781_v33 = vadd.f32 %v780_v54, %v718_v37 }
 0x123   :  { %v650_v59 = vadd.f32 %v649_v58, %v1439_v7  ;;  %v782_v40 = vadd.f32 %v781_v33, %v719_v49  ;;  %v1636_v7 = vpop.f32.mrf.mxu3 }
 0x125   :  { %v783_v62 = vadd.f32 %v782_v40, %v720_v55  ;;  %v651_v63 = vadd.f32 %v650_v59, %v1451_v12  ;;  %v730_v59 = vmul.f32 %v1582_v9, %v1582_v9 }
 0x127   :  { %v652_v8 = vadd.f32 %v651_v63, %v1460_v16  ;;  %v784_v14 = vadd.f32 %v783_v62, %v721_v61  ;;  %v725_v16 = vmul.f32 %v1504_v34, %v1504_v34  ;;  %v732_v63 = vmul.f32 %v1427_v2, %v1427_v2 }
 0x129   :  { %v653_v18 = vadd.f32 %v652_v8, %v1474_v22  ;;  %v785_v3 = vadd.f32 %v784_v14, %v722_v1  ;;  %v1650_v22 = vpop.f32.mrf.mxu2  ;;  %v733_v8 = vmul.f32 %v1443_v10, %v1443_v10 }
 0x12b   :  { %v654_v12 = vadd.f32 %v653_v18, %v1490_v28  ;;  %v786_v15 = vadd.f32 %v785_v3, %v723_v47  ;;  %v1652_v43 = vpop.f32.mrf.mxu3  ;;  %v1163_v28 = vpack.c.bf16 %v1650_v22, %v1634_v6  ;;  %v734_v47 = vmul.f32 %v1453_v13, %v1453_v13 }
 0x12c   :  { %v1193_v37 = vpack.c.bf16 %v1652_v43, %v1636_v7 }
 0x12d   :  { %v655_v26 = vadd.f32 %v654_v12, %v1504_v34  ;;  %v787_v29 = vadd.f32 %v786_v15, %v724_v11  ;;  %v727_v34 = vmul.f32 %v1534_v48, %v1534_v48  ;;  %1227 = vst [vmem:[%s1789_s2 + $0xb8] sm:$0xff] %v1163_v28  }
 0x12e   :  { %1233 = vst [vmem:[%s1789_s2 + $0xe8] sm:$0xff] %v1193_v37   ;;  %v739_v37 = vmul.f32 %v1524_v45, %v1524_v45 }
 0x12f   :  { %v656_v38 = vadd.f32 %v655_v26, %v1520_v41  ;;  %v788_v39 = vadd.f32 %v787_v29, %v725_v16  ;;  %v737_v26 = vmul.f32 %v1494_v31, %v1494_v31 }
 0x131   :  { %v657_v21 = vadd.f32 %v656_v38, %v1534_v48  ;;  %v789_v54 = vadd.f32 %v788_v39, %v726_v30  ;;  %v729_v48 = vmul.f32 %v1566_v44, %v1566_v44 }
 0x133   :  { %v790_v41 = vadd.f32 %v789_v54, %v727_v34  ;;  %v658_v42 = vadd.f32 %v657_v21, %v1552_v5  ;;  %v1676_v40 = vpop.f32.mrf.mxu3  ;;  %v731_v5 = vmul.f32 %v1415_v60, %v1415_v60  ;;  %v740_v34 = vmul.f32 %v1536_v50, %v1536_v50 }
 0x135   :  { %v791_v49 = vadd.f32 %v790_v41, %v728_v27  ;;  %v659_v58 = vadd.f32 %v658_v42, %v1566_v44  ;;  %v741_v41 = vmul.f32 %v1556_v17, %v1556_v17 }
 0x137   :  { %v792_v33 = vadd.f32 %v791_v49, %v729_v48  ;;  %v660_v55 = vadd.f32 %v659_v58, %v1582_v9  ;;  %v742_v49 = vmul.f32 %v1568_v52, %v1568_v52 }
 0x139   :  { %v661_v61 = vadd.f32 %v660_v55, %v1415_v60  ;;  %v793_v62 = vadd.f32 %v792_v33, %v730_v59 }
 0x13b   :  { %v662_v1 = vadd.f32 %v661_v61, %v1427_v2  ;;  %v794_v44 = vadd.f32 %v793_v62, %v731_v5  ;;  %v1690_v60 = vpop.f32.mrf.mxu3  ;;  %v735_v2 = vmul.f32 %v1464_v19, %v1464_v19  ;;  %v745_v62 = vmul.f32 %v1634_v6, %v1634_v6 }
 0x13c   :  { %v1198_v11 = vpack.c.bf16 %v1690_v60, %v1676_v40 }
 0x13d   :  { %v663_v14 = vadd.f32 %v662_v1, %v1443_v10  ;;  %v795_v9 = vadd.f32 %v794_v44, %v732_v63  ;;  %v736_v10 = vmul.f32 %v1476_v23, %v1476_v23  ;;  %v747_v44 = vmul.f32 %v1466_v20, %v1466_v20 }
 0x13e   :  { %1234 = vst [vmem:[%s1789_s2 + $0xf0] sm:$0xff] %v1198_v11  }
 0x13f   :  { %v664_v18 = vadd.f32 %v663_v14, %v1453_v13  ;;  %v796_v3 = vadd.f32 %v795_v9, %v733_v8 }
 0x141   :  { %v665_v12 = vadd.f32 %v664_v18, %v1464_v19  ;;  %v797_v15 = vadd.f32 %v796_v3, %v734_v47  ;;  %v738_v19 = vmul.f32 %v1506_v35, %v1506_v35 }
 0x143   :  { %v666_v13 = vadd.f32 %v665_v12, %v1476_v23  ;;  %v798_v16 = vadd.f32 %v797_v15, %v735_v2  ;;  %v1709_v28 = vpop.f32.mrf.mxu3 }
 0x145   :  { %v799_v29 = vadd.f32 %v798_v16, %v736_v10  ;;  %v667_v30 = vadd.f32 %v666_v13, %v1494_v31 }
 0x147   :  { %v668_v38 = vadd.f32 %v667_v30, %v1506_v35  ;;  %v800_v39 = vadd.f32 %v799_v29, %v737_v26 }
 0x149   :  { %v669_v23 = vadd.f32 %v668_v38, %v1524_v45  ;;  %v801_v21 = vadd.f32 %v800_v39, %v738_v19 }
 0x14b   :  { %v670_v54 = vadd.f32 %v669_v23, %v1536_v50  ;;  %v802_v31 = vadd.f32 %v801_v21, %v739_v37  ;;  %v499_v45 = vpop.f32.mrf.mxu3  ;;  %v743_v50 = vmul.f32 %v1586_v25, %v1586_v25 }
 0x14c   :  { %v1203_v48 = vpack.c.bf16 %v499_v45, %v1709_v28 }
 0x14d   :  { %v671_v35 = vadd.f32 %v670_v54, %v1556_v17  ;;  %v803_v42 = vadd.f32 %v802_v31, %v740_v34  ;;  %v758_v34 = vmul.f32 %v1652_v43, %v1652_v43 }
 0x14e   :  { %1235 = vst [vmem:[%s1789_s2 + $0xf8] sm:$0xff] %v1203_v48   ;;  %v762_v48 = vmul.f32 %v499_v45, %v499_v45 }
 0x14f   :  { %v672_v27 = vadd.f32 %v671_v35, %v1568_v52  ;;  %v804_v58 = vadd.f32 %v803_v42, %v741_v41  ;;  %v744_v52 = vmul.f32 %v1608_v56, %v1608_v56  ;;  %v759_v41 = vmul.f32 %v1676_v40, %v1676_v40 }
 0x150   :  { %v760_v42 = vmul.f32 %v1690_v60, %v1690_v60 }
 0x151   :  { %v805_v33 = vadd.f32 %v804_v58, %v742_v49  ;;  %v673_v55 = vadd.f32 %v672_v27, %v1586_v25  ;;  %v746_v25 = vmul.f32 %v1650_v22, %v1650_v22  ;;  %v761_v49 = vmul.f32 %v1709_v28, %v1709_v28 }
 0x153   :  { %v806_v17 = vadd.f32 %v805_v33, %v743_v50  ;;  %v674_v59 = vadd.f32 %v673_v55, %v1608_v56  ;;  %v748_v56 = vmul.f32 %v1478_v24, %v1478_v24 }
 0x155   :  { %v807_v5 = vadd.f32 %v806_v17, %v744_v52  ;;  %v675_v61 = vadd.f32 %v674_v59, %v1634_v6  ;;  %v749_v6 = vmul.f32 %v1496_v32, %v1496_v32 }
 0x157   :  { %v808_v63 = vadd.f32 %v807_v5, %v745_v62  ;;  %v676_v1 = vadd.f32 %v675_v61, %v1650_v22  ;;  %v750_v22 = vmul.f32 %v1508_v36, %v1508_v36 }
 0x159   :  { %v677_v8 = vadd.f32 %v676_v1, %v1466_v20  ;;  %v809_v14 = vadd.f32 %v808_v63, %v746_v25  ;;  %v751_v20 = vmul.f32 %v1526_v46, %v1526_v46 }
 0x15b   :  { %v678_v9 = vadd.f32 %v677_v8, %v1478_v24  ;;  %v810_v47 = vadd.f32 %v809_v14, %v747_v44  ;;  %v752_v24 = vmul.f32 %v1538_v51, %v1538_v51 }
 0x15d   :  { %v679_v18 = vadd.f32 %v678_v9, %v1496_v32  ;;  %v811_v3 = vadd.f32 %v810_v47, %v748_v56  ;;  %v753_v32 = vmul.f32 %v1558_v0, %v1558_v0 }
 0x15f   :  { %v680_v11 = vadd.f32 %v679_v18, %v1508_v36  ;;  %v812_v2 = vadd.f32 %v811_v3, %v749_v6  ;;  %v754_v36 = vmul.f32 %v1570_v53, %v1570_v53 }
 0x161   :  { %v681_v12 = vadd.f32 %v680_v11, %v1526_v46  ;;  %v813_v15 = vadd.f32 %v812_v2, %v750_v22  ;;  %v755_v46 = vmul.f32 %v1588_v4, %v1588_v4 }
 0x163   :  { %v682_v10 = vadd.f32 %v681_v12, %v1538_v51  ;;  %v814_v13 = vadd.f32 %v813_v15, %v751_v20  ;;  %v756_v51 = vmul.f32 %v1610_v57, %v1610_v57 }
 0x165   :  { %v815_v16 = vadd.f32 %v814_v13, %v752_v24  ;;  %v683_v26 = vadd.f32 %v682_v10, %v1558_v0  ;;  %v757_v0 = vmul.f32 %v1636_v7, %v1636_v7 }
 0x167   :  { %v684_v29 = vadd.f32 %v683_v26, %v1570_v53  ;;  %v816_v30 = vadd.f32 %v815_v16, %v753_v32 }
 0x169   :  { %v685_v19 = vadd.f32 %v684_v29, %v1588_v4  ;;  %v817_v38 = vadd.f32 %v816_v30, %v754_v36 }
 0x16b   :  { %v686_v39 = vadd.f32 %v685_v19, %v1610_v57  ;;  %v818_v37 = vadd.f32 %v817_v38, %v755_v46 }
 0x16d   :  { %v687_v23 = vadd.f32 %v686_v39, %v1636_v7  ;;  %v819_v21 = vadd.f32 %v818_v37, %v756_v51 }
 0x16f   :  { %v688_v53 = vadd.f32 %v687_v23, %v1652_v43  ;;  %v820_v54 = vadd.f32 %v819_v21, %v757_v0 }
 0x171   :  { %v821_v4 = vadd.f32 %v820_v54, %v758_v34  ;;  %v689_v31 = vadd.f32 %v688_v53, %v1676_v40  ;;  %v832_v40 = vlaneseq }
 0x173   :  { %v822_v57 = vadd.f32 %v821_v4, %v759_v41  ;;  %v690_v35 = vadd.f32 %v689_v31, %v1690_v60  ;;  %v833_v62 = vshrl.u32 %v832_v40, 7 }
 0x175   :  { %v823_v7 = vadd.f32 %v822_v57, %v760_v42  ;;  %v691_v27 = vadd.f32 %v690_v35, %v1709_v28  ;;  %vm834_vm0 = vcmp.lt.s32.totalorder %v833_v62, 4 }
 0x177   :  { %v824_v43 = vadd.f32 %v823_v7, %v761_v49  ;;  %v692_v58 = vadd.f32 %v691_v27, %v499_v45 }
 0x179   :  { %v693_v33 = vrot.slane %v692_v58, 4  ;;  %v825_v55 = vadd.f32 %v824_v43, %v762_v48 }
 0x17b   :  { %v694_v50 = vadd.f32 %v693_v33, %v692_v58  ;;  %v826_v17 = vrot.slane %v825_v55, 4 }
 0x17d   :  { %v695_v59 = vrot.slane %v694_v50, 2  ;;  %v827_v52 = vadd.f32 %v826_v17, %v825_v55 }
 0x17f   :  { %v696_v5 = vadd.f32 %v695_v59, %v694_v50  ;;  %v828_v61 = vrot.slane %v827_v52, 2 }
 0x181   :  { %v697_v60 = vrot.slane %v696_v5, 1  ;;  %v829_v63 = vadd.f32 %v828_v61, %v827_v52 }
 0x183   :  { %v830_v1 = vrot.slane %v829_v63, 1  ;;  %v698_v25 = vadd.f32 %v697_v60, %v696_v5 }
 0x185   :  { %v831_v44 = vadd.f32 %v830_v1, %v829_v63 }
 0x187   :  { %v835_v28 = vsel %vm834_vm0, %v698_v25, %v831_v44 }
 0x188   :  { %836 = vst [vmem:[%s1790_s3] sm:$0xff] %v835_v28 }

// kernel: bottleneck_forward.7
= control target key start
LH: loop header
LB: loop body
LE: loop exit
PB: predicated region body
PF: predicated region fallthrough
CT: control target
= control target key end

     0   :  { %s1947_s0 = inlined_call_operand.vmem [shape: bf16[512,128], index: 0, kind: input, shape index: {}]   ;;  %s1948_s1 = inlined_call_operand.vmem [shape: bf16[512,128], index: 1, kind: input, shape index: {}]   ;;  %s1949_s2 = inlined_call_operand.vmem [shape: f32[1,128], index: 2, kind: input, shape index: {}]   ;;  %s1950_s3 = inlined_call_operand.vmem [shape: f32[1,128], index: 3, kind: input, shape index: {}]   ;;  %s1951_s4 = inlined_call_operand.vmem [shape: f32[1,128], index: 4, kind: input, shape index: {}]   ;;  %s1952_s5 = inlined_call_operand.vmem [shape: f32[1,128], index: 5, kind: input, shape index: {}]   ;;  %s1953_s6 = inlined_call_operand.vmem [shape: bf16[512,128], index: 6, kind: output, shape index: {}]  }
   0x1   :  { %v812_v0 = vld [vmem:[%s1947_s0] sm:$0xff]   ;;  %v1227_v12 = vld [vmem:[%s1947_s0 + $0x8] sm:$0xff]   ;;  %v1228_v18 = vld [vmem:[%s1947_s0 + $0x10] sm:$0xff]  }
   0x2   :  { %v1369_v1 = vld [vmem:[%s1949_s2] ss:$0 sm:$0xff]  ;;  %v813_v2 = vunpack.c.l.bf16 %v812_v0  ;;  %v814_v3 = vunpack.c.h.bf16 %v812_v0  ;;  %v1258_v13 = vld [vmem:[%s1948_s1 + $0x8] sm:$0xff]   ;;  %v817_v16 = vunpack.c.l.bf16 %v1227_v12  ;;  %v818_v17 = vunpack.c.h.bf16 %v1227_v12  ;;  %v1259_v31 = vld [vmem:[%s1948_s1 + $0x10] sm:$0xff]  }
   0x3   :  { %v1374_v4 = vld [vmem:[%s1950_s3] ss:$0 sm:$0xff]  ;;  %v945_v21 = vunpack.c.l.bf16 %v1258_v13  ;;  %v946_v22 = vunpack.c.h.bf16 %v1258_v13  ;;  %v821_v29 = vunpack.c.l.bf16 %v1228_v18  ;;  %v822_v30 = vunpack.c.h.bf16 %v1228_v18  ;;  %v1229_v40 = vld [vmem:[%s1947_s0 + $0x18] sm:$0xff]  }
   0x4   :  { %v940_v5 = vld [vmem:[%s1948_s1] sm:$0xff]   ;;  %v155_v9 = vmul.f32 %v1369_v1, %v813_v2  ;;  %v156_v10 = vmul.f32 %v1369_v1, %v814_v3  ;;  %v157_v25 = vmul.f32 %v1369_v1, %v817_v16  ;;  %v158_v26 = vmul.f32 %v1369_v1, %v818_v17  ;;  %v1260_v45 = vld [vmem:[%s1948_s1 + $0x18] sm:$0xff]   ;;  %v1231_v16 = vld [vmem:[%s1947_s0 + $0x28] sm:$0xff]  }
   0x5   :  { %v941_v6 = vunpack.c.l.bf16 %v940_v5  ;;  %v942_v7 = vunpack.c.h.bf16 %v940_v5  ;;  %v1382_v8 = vld [vmem:[%s1951_s4] ss:$0 sm:$0xff]  ;;  %v159_v38 = vmul.f32 %v1369_v1, %v821_v29  ;;  %v160_v39 = vmul.f32 %v1369_v1, %v822_v30  ;;  %v1232_v30 = vld [vmem:[%s1947_s0 + $0x30] sm:$0xff]  }
   0x6   :  { %v1389_v11 = vld [vmem:[%s1952_s5] ss:$0 sm:$0xff]  ;;  %v223_v19 = vadd.f32 %v1374_v4, %v155_v9  ;;  %v224_v20 = vadd.f32 %v1374_v4, %v156_v10  ;;  %v421_v27 = vmul.f32 %v1382_v8, %v945_v21  ;;  %v422_v28 = vmul.f32 %v1382_v8, %v946_v22 }
   0x7   :  { %v419_v14 = vmul.f32 %v1382_v8, %v941_v6  ;;  %v420_v15 = vmul.f32 %v1382_v8, %v942_v7  ;;  %v225_v34 = vadd.f32 %v1374_v4, %v157_v25  ;;  %v226_v35 = vadd.f32 %v1374_v4, %v158_v26  ;;  %v1230_v54 = vld [vmem:[%s1947_s0 + $0x20] sm:$0xff]   ;;  %v1262_v25 = vld [vmem:[%s1948_s1 + $0x28] sm:$0xff]  }
   0x8   :  { %v489_v36 = vadd.f32 %v1389_v11, %v421_v27  ;;  %v490_v37 = vadd.f32 %v1389_v11, %v422_v28  ;;  %v949_v43 = vunpack.c.l.bf16 %v1259_v31  ;;  %v950_v44 = vunpack.c.h.bf16 %v1259_v31  ;;  %v1261_v5 = vld [vmem:[%s1948_s1 + $0x20] sm:$0xff]  }
   0x9   :  { %v487_v23 = vadd.f32 %v1389_v11, %v419_v14  ;;  %v488_v24 = vadd.f32 %v1389_v11, %v420_v15  ;;  %v227_v48 = vadd.f32 %v1374_v4, %v159_v38  ;;  %v228_v49 = vadd.f32 %v1374_v4, %v160_v39 }
   0xa   :  { %v553_v46 = vadd.f32 %v489_v36, %v225_v34  ;;  %v554_v47 = vadd.f32 %v490_v37, %v226_v35  ;;  %v423_v51 = vmul.f32 %v1382_v8, %v949_v43  ;;  %v424_v52 = vmul.f32 %v1382_v8, %v950_v44  ;;  %v1263_v43 = vld [vmem:[%s1948_s1 + $0x30] sm:$0xff]  }
   0xb   :  { %v551_v32 = vadd.f32 %v487_v23, %v223_v19  ;;  %v552_v33 = vadd.f32 %v488_v24, %v224_v20  ;;  %v825_v53 = vunpack.c.l.bf16 %v1229_v40  ;;  %v826_v57 = vunpack.c.h.bf16 %v1229_v40 }
   0xc   :  { %v617_v55 = vmax.f32 %v553_v46, 0.0  ;;  %v618_v56 = vmax.f32 %v554_v47, 0.0  ;;  %v953_v58 = vunpack.c.l.bf16 %v1260_v45  ;;  %v491_v59 = vadd.f32 %v1389_v11, %v423_v51 }
   0xd   :  { %v615_v41 = vmax.f32 %v551_v32, 0.0  ;;  %v616_v42 = vmax.f32 %v552_v33, 0.0  ;;  %v492_v60 = vadd.f32 %v1389_v11, %v424_v52  ;;  %v161_v61 = vmul.f32 %v1369_v1, %v825_v53  ;;  %v1233_v52 = vld [vmem:[%s1947_s0 + $0x38] sm:$0xff]  }
   0xe   :  { %v954_v62 = vunpack.c.h.bf16 %v1260_v45  ;;  %v1075_v63 = vpack.c.bf16 %v618_v56, %v617_v55  ;;  %v162_v0 = vmul.f32 %v1369_v1, %v826_v57  ;;  %v425_v2 = vmul.f32 %v1382_v8, %v953_v58 }
   0xf   :  { %v1070_v50 = vpack.c.bf16 %v616_v42, %v615_v41  ;;  %v829_v3 = vunpack.c.l.bf16 %v1230_v54  ;;  %v555_v6 = vadd.f32 %v491_v59, %v227_v48  ;;  %v556_v7 = vadd.f32 %v492_v60, %v228_v49 }
  0x10   :  { %v229_v9 = vadd.f32 %v1374_v4, %v161_v61  ;;  %v426_v10 = vmul.f32 %v1382_v8, %v954_v62  ;;  %1289 = vst [vmem:[%s1953_s6 + $0x8] sm:$0xff] %v1075_v63   ;;  %v230_v12 = vadd.f32 %v1374_v4, %v162_v0  ;;  %v493_v13 = vadd.f32 %v1389_v11, %v425_v2  ;;  %v1264_v2 = vld [vmem:[%s1948_s1 + $0x38] sm:$0xff]  }
  0x11   :  { %1071 = vst [vmem:[%s1953_s6] sm:$0xff] %v1070_v50   ;;  %v830_v14 = vunpack.c.h.bf16 %v1230_v54  ;;  %v163_v15 = vmul.f32 %v1369_v1, %v829_v3  ;;  %v619_v17 = vmax.f32 %v555_v6, 0.0  ;;  %v620_v18 = vmax.f32 %v556_v7, 0.0 }
  0x12   :  { %v494_v19 = vadd.f32 %v1389_v11, %v426_v10  ;;  %v957_v20 = vunpack.c.l.bf16 %v1261_v5  ;;  %v557_v21 = vadd.f32 %v493_v13, %v229_v9  ;;  %v958_v24 = vunpack.c.h.bf16 %v1261_v5  ;;  %v1234_v9 = vld [vmem:[%s1947_s0 + $0x40] sm:$0xff]  }
  0x13   :  { %v164_v22 = vmul.f32 %v1369_v1, %v830_v14  ;;  %v231_v23 = vadd.f32 %v1374_v4, %v163_v15  ;;  %v1080_v26 = vpack.c.bf16 %v620_v18, %v619_v17  ;;  %v833_v29 = vunpack.c.l.bf16 %v1231_v16 }
  0x14   :  { %v558_v27 = vadd.f32 %v494_v19, %v230_v12  ;;  %v427_v28 = vmul.f32 %v1382_v8, %v957_v20  ;;  %v621_v31 = vmax.f32 %v557_v21, 0.0  ;;  %v428_v33 = vmul.f32 %v1382_v8, %v958_v24 }
  0x15   :  { %v232_v32 = vadd.f32 %v1374_v4, %v164_v22  ;;  %v834_v34 = vunpack.c.h.bf16 %v1231_v16  ;;  %1290 = vst [vmem:[%s1953_s6 + $0x10] sm:$0xff] %v1080_v26   ;;  %v165_v37 = vmul.f32 %v1369_v1, %v833_v29  ;;  %v961_v38 = vunpack.c.l.bf16 %v1262_v25 }
  0x16   :  { %v622_v35 = vmax.f32 %v558_v27, 0.0  ;;  %v495_v36 = vadd.f32 %v1389_v11, %v427_v28  ;;  %v496_v39 = vadd.f32 %v1389_v11, %v428_v33  ;;  %v962_v41 = vunpack.c.h.bf16 %v1262_v25  ;;  %v1235_v28 = vld [vmem:[%s1947_s0 + $0x48] sm:$0xff]  }
  0x17   :  { %v166_v40 = vmul.f32 %v1369_v1, %v834_v34  ;;  %v837_v42 = vunpack.c.l.bf16 %v1232_v30  ;;  %v233_v46 = vadd.f32 %v1374_v4, %v165_v37  ;;  %v429_v47 = vmul.f32 %v1382_v8, %v961_v38 }
  0x18   :  { %v1085_v44 = vpack.c.bf16 %v622_v35, %v621_v31  ;;  %v559_v45 = vadd.f32 %v495_v36, %v231_v23  ;;  %v560_v48 = vadd.f32 %v496_v39, %v232_v32  ;;  %v430_v50 = vmul.f32 %v1382_v8, %v962_v41  ;;  %v1265_v23 = vld [vmem:[%s1948_s1 + $0x40] sm:$0xff]   ;;  %v1266_v41 = vld [vmem:[%s1948_s1 + $0x48] sm:$0xff]  }
  0x19   :  { %v234_v49 = vadd.f32 %v1374_v4, %v166_v40  ;;  %v838_v51 = vunpack.c.h.bf16 %v1232_v30  ;;  %v497_v54 = vadd.f32 %v1389_v11, %v429_v47  ;;  %v167_v55 = vmul.f32 %v1369_v1, %v837_v42 }
  0x1a   :  { %1291 = vst [vmem:[%s1953_s6 + $0x18] sm:$0xff] %v1085_v44   ;;  %v623_v53 = vmax.f32 %v559_v45, 0.0  ;;  %v965_v56 = vunpack.c.l.bf16 %v1263_v43  ;;  %v624_v57 = vmax.f32 %v560_v48, 0.0  ;;  %v498_v58 = vadd.f32 %v1389_v11, %v430_v50  ;;  %v1236_v50 = vld [vmem:[%s1947_s0 + $0x50] sm:$0xff]  }
  0x1b   :  { %v168_v59 = vmul.f32 %v1369_v1, %v838_v51  ;;  %v966_v60 = vunpack.c.h.bf16 %v1263_v43  ;;  %v561_v61 = vadd.f32 %v497_v54, %v233_v46  ;;  %v235_v62 = vadd.f32 %v1374_v4, %v167_v55 }
  0x1c   :  { %v431_v63 = vmul.f32 %v1382_v8, %v965_v56  ;;  %v841_v0 = vunpack.c.l.bf16 %v1233_v52  ;;  %v1090_v3 = vpack.c.bf16 %v624_v57, %v623_v53  ;;  %v562_v5 = vadd.f32 %v498_v58, %v234_v49 }
  0x1d   :  { %v236_v6 = vadd.f32 %v1374_v4, %v168_v59  ;;  %v432_v7 = vmul.f32 %v1382_v8, %v966_v60  ;;  %v625_v10 = vmax.f32 %v561_v61, 0.0  ;;  %v842_v13 = vunpack.c.h.bf16 %v1233_v52  ;;  %v1267_v59 = vld [vmem:[%s1948_s1 + $0x50] sm:$0xff]  }
  0x1e   :  { %v499_v12 = vadd.f32 %v1389_v11, %v431_v63  ;;  %v169_v14 = vmul.f32 %v1369_v1, %v841_v0  ;;  %1292 = vst [vmem:[%s1953_s6 + $0x20] sm:$0xff] %v1090_v3   ;;  %v626_v15 = vmax.f32 %v562_v5, 0.0  ;;  %v969_v17 = vunpack.c.l.bf16 %v1264_v2 }
  0x1f   :  { %v500_v16 = vadd.f32 %v1389_v11, %v432_v7  ;;  %v970_v18 = vunpack.c.h.bf16 %v1264_v2  ;;  %v170_v20 = vmul.f32 %v1369_v1, %v842_v13  ;;  %v845_v22 = vunpack.c.l.bf16 %v1234_v9 }
  0x20   :  { %v563_v19 = vadd.f32 %v499_v12, %v235_v62  ;;  %v237_v21 = vadd.f32 %v1374_v4, %v169_v14  ;;  %v1095_v24 = vpack.c.bf16 %v626_v15, %v625_v10  ;;  %v433_v26 = vmul.f32 %v1382_v8, %v969_v17 }
  0x21   :  { %v564_v25 = vadd.f32 %v500_v16, %v236_v6  ;;  %v434_v27 = vmul.f32 %v1382_v8, %v970_v18  ;;  %v238_v30 = vadd.f32 %v1374_v4, %v170_v20  ;;  %v846_v31 = vunpack.c.h.bf16 %v1234_v9  ;;  %v1237_v6 = vld [vmem:[%s1947_s0 + $0x58] sm:$0xff]  }
  0x22   :  { %v627_v29 = vmax.f32 %v563_v19, 0.0  ;;  %v171_v32 = vmul.f32 %v1369_v1, %v845_v22  ;;  %1293 = vst [vmem:[%s1953_s6 + $0x28] sm:$0xff] %v1095_v24   ;;  %v501_v34 = vadd.f32 %v1389_v11, %v433_v26  ;;  %v973_v36 = vunpack.c.l.bf16 %v1265_v23  ;;  %v1238_v26 = vld [vmem:[%s1947_s0 + $0x60] sm:$0xff]  }
  0x23   :  { %v628_v33 = vmax.f32 %v564_v25, 0.0  ;;  %v502_v35 = vadd.f32 %v1389_v11, %v434_v27  ;;  %v172_v37 = vmul.f32 %v1369_v1, %v846_v31  ;;  %v974_v39 = vunpack.c.h.bf16 %v1265_v23 }
  0x24   :  { %v239_v38 = vadd.f32 %v1374_v4, %v171_v32  ;;  %v849_v40 = vunpack.c.l.bf16 %v1235_v28  ;;  %v565_v43 = vadd.f32 %v501_v34, %v237_v21  ;;  %v435_v45 = vmul.f32 %v1382_v8, %v973_v36  ;;  %v1268_v21 = vld [vmem:[%s1948_s1 + $0x58] sm:$0xff]  }
  0x25   :  { %v1100_v42 = vpack.c.bf16 %v628_v33, %v627_v29  ;;  %v566_v44 = vadd.f32 %v502_v35, %v238_v30  ;;  %v240_v46 = vadd.f32 %v1374_v4, %v172_v37  ;;  %v436_v47 = vmul.f32 %v1382_v8, %v974_v39  ;;  %v1269_v39 = vld [vmem:[%s1948_s1 + $0x60] sm:$0xff]  }
  0x26   :  { %v850_v48 = vunpack.c.h.bf16 %v1235_v28  ;;  %v173_v49 = vmul.f32 %v1369_v1, %v849_v40  ;;  %v629_v51 = vmax.f32 %v565_v43, 0.0  ;;  %v503_v53 = vadd.f32 %v1389_v11, %v435_v45 }
  0x27   :  { %1294 = vst [vmem:[%s1953_s6 + $0x30] sm:$0xff] %v1100_v42   ;;  %v630_v52 = vmax.f32 %v566_v44, 0.0  ;;  %v977_v54 = vunpack.c.l.bf16 %v1266_v41  ;;  %v504_v55 = vadd.f32 %v1389_v11, %v436_v47  ;;  %v978_v58 = vunpack.c.h.bf16 %v1266_v41  ;;  %v1239_v44 = vld [vmem:[%s1947_s0 + $0x68] sm:$0xff]  }
  0x28   :  { %v174_v56 = vmul.f32 %v1369_v1, %v850_v48  ;;  %v241_v57 = vadd.f32 %v1374_v4, %v173_v49  ;;  %v567_v61 = vadd.f32 %v503_v53, %v239_v38  ;;  %v853_v63 = vunpack.c.l.bf16 %v1236_v50 }
  0x29   :  { %v1105_v60 = vpack.c.bf16 %v630_v52, %v629_v51  ;;  %v437_v62 = vmul.f32 %v1382_v8, %v977_v54  ;;  %v568_v0 = vadd.f32 %v504_v55, %v240_v46  ;;  %v438_v3 = vmul.f32 %v1382_v8, %v978_v58 }
  0x2a   :  { %v242_v2 = vadd.f32 %v1374_v4, %v174_v56  ;;  %v854_v5 = vunpack.c.h.bf16 %v1236_v50  ;;  %v631_v7 = vmax.f32 %v567_v61, 0.0  ;;  %v175_v10 = vmul.f32 %v1369_v1, %v853_v63 }
  0x2b   :  { %1295 = vst [vmem:[%s1953_s6 + $0x38] sm:$0xff] %v1105_v60   ;;  %v505_v9 = vadd.f32 %v1389_v11, %v437_v62  ;;  %v981_v12 = vunpack.c.l.bf16 %v1267_v59  ;;  %v632_v13 = vmax.f32 %v568_v0, 0.0  ;;  %v506_v14 = vadd.f32 %v1389_v11, %v438_v3  ;;  %v1240_v3 = vld [vmem:[%s1947_s0 + $0x70] sm:$0xff]  }
  0x2c   :  { %v176_v15 = vmul.f32 %v1369_v1, %v854_v5  ;;  %v982_v16 = vunpack.c.h.bf16 %v1267_v59  ;;  %v243_v18 = vadd.f32 %v1374_v4, %v175_v10  ;;  %v857_v20 = vunpack.c.l.bf16 %v1237_v6 }
  0x2d   :  { %v569_v17 = vadd.f32 %v505_v9, %v241_v57  ;;  %v439_v19 = vmul.f32 %v1382_v8, %v981_v12  ;;  %v1110_v22 = vpack.c.bf16 %v632_v13, %v631_v7  ;;  %v570_v23 = vadd.f32 %v506_v14, %v242_v2  ;;  %v1270_v57 = vld [vmem:[%s1948_s1 + $0x68] sm:$0xff]  }
  0x2e   :  { %v244_v24 = vadd.f32 %v1374_v4, %v176_v15  ;;  %v440_v25 = vmul.f32 %v1382_v8, %v982_v16  ;;  %v858_v29 = vunpack.c.h.bf16 %v1237_v6  ;;  %v177_v30 = vmul.f32 %v1369_v1, %v857_v20  ;;  %v1271_v15 = vld [vmem:[%s1948_s1 + $0x70] sm:$0xff]  }
  0x2f   :  { %v633_v27 = vmax.f32 %v569_v17, 0.0  ;;  %v507_v28 = vadd.f32 %v1389_v11, %v439_v19  ;;  %1296 = vst [vmem:[%s1953_s6 + $0x40] sm:$0xff] %v1110_v22   ;;  %v634_v31 = vmax.f32 %v570_v23, 0.0  ;;  %v985_v33 = vunpack.c.l.bf16 %v1268_v21 }
  0x30   :  { %v508_v32 = vadd.f32 %v1389_v11, %v440_v25  ;;  %v986_v34 = vunpack.c.h.bf16 %v1268_v21  ;;  %v178_v36 = vmul.f32 %v1369_v1, %v858_v29  ;;  %v245_v37 = vadd.f32 %v1374_v4, %v177_v30 }
  0x31   :  { %v571_v35 = vadd.f32 %v507_v28, %v243_v18  ;;  %v861_v38 = vunpack.c.l.bf16 %v1238_v26  ;;  %v1115_v40 = vpack.c.bf16 %v634_v31, %v633_v27  ;;  %v441_v42 = vmul.f32 %v1382_v8, %v985_v33 }
  0x32   :  { %v572_v41 = vadd.f32 %v508_v32, %v244_v24  ;;  %v442_v43 = vmul.f32 %v1382_v8, %v986_v34  ;;  %v246_v46 = vadd.f32 %v1374_v4, %v178_v36  ;;  %v862_v47 = vunpack.c.h.bf16 %v1238_v26  ;;  %v1241_v24 = vld [vmem:[%s1947_s0 + $0x78] sm:$0xff]  }
  0x33   :  { %v635_v45 = vmax.f32 %v571_v35, 0.0  ;;  %v179_v48 = vmul.f32 %v1369_v1, %v861_v38  ;;  %1297 = vst [vmem:[%s1953_s6 + $0x48] sm:$0xff] %v1115_v40   ;;  %v509_v50 = vadd.f32 %v1389_v11, %v441_v42  ;;  %v989_v52 = vunpack.c.l.bf16 %v1269_v39  ;;  %v1242_v42 = vld [vmem:[%s1947_s0 + $0x80] sm:$0xff]  }
  0x34   :  { %v636_v49 = vmax.f32 %v572_v41, 0.0  ;;  %v510_v51 = vadd.f32 %v1389_v11, %v442_v43  ;;  %v180_v53 = vmul.f32 %v1369_v1, %v862_v47  ;;  %v990_v55 = vunpack.c.h.bf16 %v1269_v39 }
  0x35   :  { %v247_v54 = vadd.f32 %v1374_v4, %v179_v48  ;;  %v865_v56 = vunpack.c.l.bf16 %v1239_v44  ;;  %v573_v59 = vadd.f32 %v509_v50, %v245_v37  ;;  %v443_v61 = vmul.f32 %v1382_v8, %v989_v52  ;;  %v1272_v37 = vld [vmem:[%s1948_s1 + $0x78] sm:$0xff]  }
  0x36   :  { %v1120_v58 = vpack.c.bf16 %v636_v49, %v635_v45  ;;  %v574_v60 = vadd.f32 %v510_v51, %v246_v46  ;;  %v248_v62 = vadd.f32 %v1374_v4, %v180_v53  ;;  %v444_v63 = vmul.f32 %v1382_v8, %v990_v55  ;;  %v1273_v55 = vld [vmem:[%s1948_s1 + $0x80] sm:$0xff]  }
  0x37   :  { %v866_v0 = vunpack.c.h.bf16 %v1239_v44  ;;  %v181_v2 = vmul.f32 %v1369_v1, %v865_v56  ;;  %v637_v5 = vmax.f32 %v573_v59, 0.0  ;;  %v511_v7 = vadd.f32 %v1389_v11, %v443_v61 }
  0x38   :  { %1298 = vst [vmem:[%s1953_s6 + $0x50] sm:$0xff] %v1120_v58   ;;  %v638_v6 = vmax.f32 %v574_v60, 0.0  ;;  %v993_v9 = vunpack.c.l.bf16 %v1270_v57  ;;  %v512_v10 = vadd.f32 %v1389_v11, %v444_v63  ;;  %v994_v14 = vunpack.c.h.bf16 %v1270_v57  ;;  %v1243_v60 = vld [vmem:[%s1947_s0 + $0x88] sm:$0xff]  }
  0x39   :  { %v182_v12 = vmul.f32 %v1369_v1, %v866_v0  ;;  %v249_v13 = vadd.f32 %v1374_v4, %v181_v2  ;;  %v575_v17 = vadd.f32 %v511_v7, %v247_v54  ;;  %v869_v19 = vunpack.c.l.bf16 %v1240_v3 }
  0x3a   :  { %v1125_v16 = vpack.c.bf16 %v638_v6, %v637_v5  ;;  %v445_v18 = vmul.f32 %v1382_v8, %v993_v9  ;;  %v576_v20 = vadd.f32 %v512_v10, %v248_v62  ;;  %v446_v22 = vmul.f32 %v1382_v8, %v994_v14 }
  0x3b   :  { %v250_v21 = vadd.f32 %v1374_v4, %v182_v12  ;;  %v870_v23 = vunpack.c.h.bf16 %v1240_v3  ;;  %v639_v25 = vmax.f32 %v575_v17, 0.0  ;;  %v183_v27 = vmul.f32 %v1369_v1, %v869_v19 }
  0x3c   :  { %1299 = vst [vmem:[%s1953_s6 + $0x58] sm:$0xff] %v1125_v16   ;;  %v513_v26 = vadd.f32 %v1389_v11, %v445_v18  ;;  %v997_v28 = vunpack.c.l.bf16 %v1271_v15  ;;  %v640_v29 = vmax.f32 %v576_v20, 0.0  ;;  %v514_v30 = vadd.f32 %v1389_v11, %v446_v22  ;;  %v1244_v22 = vld [vmem:[%s1947_s0 + $0x90] sm:$0xff]  }
  0x3d   :  { %v184_v31 = vmul.f32 %v1369_v1, %v870_v23  ;;  %v998_v32 = vunpack.c.h.bf16 %v1271_v15  ;;  %v251_v34 = vadd.f32 %v1374_v4, %v183_v27  ;;  %v873_v36 = vunpack.c.l.bf16 %v1241_v24 }
  0x3e   :  { %v577_v33 = vadd.f32 %v513_v26, %v249_v13  ;;  %v447_v35 = vmul.f32 %v1382_v8, %v997_v28  ;;  %v1130_v38 = vpack.c.bf16 %v640_v29, %v639_v25  ;;  %v578_v39 = vadd.f32 %v514_v30, %v250_v21  ;;  %v1274_v13 = vld [vmem:[%s1948_s1 + $0x88] sm:$0xff]  }
  0x3f   :  { %v252_v40 = vadd.f32 %v1374_v4, %v184_v31  ;;  %v448_v41 = vmul.f32 %v1382_v8, %v998_v32  ;;  %v874_v45 = vunpack.c.h.bf16 %v1241_v24  ;;  %v185_v46 = vmul.f32 %v1369_v1, %v873_v36  ;;  %v1275_v31 = vld [vmem:[%s1948_s1 + $0x90] sm:$0xff]  }
  0x40   :  { %v641_v43 = vmax.f32 %v577_v33, 0.0  ;;  %v515_v44 = vadd.f32 %v1389_v11, %v447_v35  ;;  %1300 = vst [vmem:[%s1953_s6 + $0x60] sm:$0xff] %v1130_v38   ;;  %v642_v47 = vmax.f32 %v578_v39, 0.0  ;;  %v1001_v49 = vunpack.c.l.bf16 %v1272_v37 }
  0x41   :  { %v516_v48 = vadd.f32 %v1389_v11, %v448_v41  ;;  %v1002_v50 = vunpack.c.h.bf16 %v1272_v37  ;;  %v186_v52 = vmul.f32 %v1369_v1, %v874_v45  ;;  %v253_v53 = vadd.f32 %v1374_v4, %v185_v46 }
  0x42   :  { %v579_v51 = vadd.f32 %v515_v44, %v251_v34  ;;  %v877_v54 = vunpack.c.l.bf16 %v1242_v42  ;;  %v1135_v56 = vpack.c.bf16 %v642_v47, %v641_v43  ;;  %v449_v58 = vmul.f32 %v1382_v8, %v1001_v49 }
  0x43   :  { %v580_v57 = vadd.f32 %v516_v48, %v252_v40  ;;  %v450_v59 = vmul.f32 %v1382_v8, %v1002_v50  ;;  %v254_v62 = vadd.f32 %v1374_v4, %v186_v52  ;;  %v878_v63 = vunpack.c.h.bf16 %v1242_v42  ;;  %v1245_v40 = vld [vmem:[%s1947_s0 + $0x98] sm:$0xff]  }
  0x44   :  { %v643_v61 = vmax.f32 %v579_v51, 0.0  ;;  %v187_v0 = vmul.f32 %v1369_v1, %v877_v54  ;;  %1301 = vst [vmem:[%s1953_s6 + $0x68] sm:$0xff] %v1135_v56   ;;  %v517_v3 = vadd.f32 %v1389_v11, %v449_v58  ;;  %v1005_v6 = vunpack.c.l.bf16 %v1273_v55  ;;  %v1246_v58 = vld [vmem:[%s1947_s0 + $0xa0] sm:$0xff]  }
  0x45   :  { %v644_v2 = vmax.f32 %v580_v57, 0.0  ;;  %v518_v5 = vadd.f32 %v1389_v11, %v450_v59  ;;  %v188_v7 = vmul.f32 %v1369_v1, %v878_v63  ;;  %v1006_v10 = vunpack.c.h.bf16 %v1273_v55 }
  0x46   :  { %v255_v9 = vadd.f32 %v1374_v4, %v187_v0  ;;  %v881_v12 = vunpack.c.l.bf16 %v1243_v60  ;;  %v581_v15 = vadd.f32 %v517_v3, %v253_v53  ;;  %v451_v17 = vmul.f32 %v1382_v8, %v1005_v6  ;;  %v1276_v53 = vld [vmem:[%s1948_s1 + $0x98] sm:$0xff]  }
  0x47   :  { %v1140_v14 = vpack.c.bf16 %v644_v2, %v643_v61  ;;  %v582_v16 = vadd.f32 %v518_v5, %v254_v62  ;;  %v256_v18 = vadd.f32 %v1374_v4, %v188_v7  ;;  %v452_v19 = vmul.f32 %v1382_v8, %v1006_v10  ;;  %v1277_v10 = vld [vmem:[%s1948_s1 + $0xa0] sm:$0xff]  }
  0x48   :  { %v882_v20 = vunpack.c.h.bf16 %v1243_v60  ;;  %v189_v21 = vmul.f32 %v1369_v1, %v881_v12  ;;  %v645_v23 = vmax.f32 %v581_v15, 0.0  ;;  %v519_v25 = vadd.f32 %v1389_v11, %v451_v17 }
  0x49   :  { %1302 = vst [vmem:[%s1953_s6 + $0x70] sm:$0xff] %v1140_v14   ;;  %v646_v24 = vmax.f32 %v582_v16, 0.0  ;;  %v1009_v26 = vunpack.c.l.bf16 %v1274_v13  ;;  %v520_v27 = vadd.f32 %v1389_v11, %v452_v19  ;;  %v1010_v30 = vunpack.c.h.bf16 %v1274_v13  ;;  %v1247_v16 = vld [vmem:[%s1947_s0 + $0xa8] sm:$0xff]  }
  0x4a   :  { %v190_v28 = vmul.f32 %v1369_v1, %v882_v20  ;;  %v257_v29 = vadd.f32 %v1374_v4, %v189_v21  ;;  %v583_v33 = vadd.f32 %v519_v25, %v255_v9  ;;  %v885_v35 = vunpack.c.l.bf16 %v1244_v22 }
  0x4b   :  { %v1145_v32 = vpack.c.bf16 %v646_v24, %v645_v23  ;;  %v453_v34 = vmul.f32 %v1382_v8, %v1009_v26  ;;  %v584_v36 = vadd.f32 %v520_v27, %v256_v18  ;;  %v454_v38 = vmul.f32 %v1382_v8, %v1010_v30 }
  0x4c   :  { %v258_v37 = vadd.f32 %v1374_v4, %v190_v28  ;;  %v886_v39 = vunpack.c.h.bf16 %v1244_v22  ;;  %v647_v41 = vmax.f32 %v583_v33, 0.0  ;;  %v191_v43 = vmul.f32 %v1369_v1, %v885_v35 }
  0x4d   :  { %1303 = vst [vmem:[%s1953_s6 + $0x78] sm:$0xff] %v1145_v32   ;;  %v521_v42 = vadd.f32 %v1389_v11, %v453_v34  ;;  %v1013_v44 = vunpack.c.l.bf16 %v1275_v31  ;;  %v648_v45 = vmax.f32 %v584_v36, 0.0  ;;  %v522_v46 = vadd.f32 %v1389_v11, %v454_v38  ;;  %v1248_v38 = vld [vmem:[%s1947_s0 + $0xb0] sm:$0xff]  }
  0x4e   :  { %v192_v47 = vmul.f32 %v1369_v1, %v886_v39  ;;  %v1014_v48 = vunpack.c.h.bf16 %v1275_v31  ;;  %v259_v50 = vadd.f32 %v1374_v4, %v191_v43  ;;  %v889_v52 = vunpack.c.l.bf16 %v1245_v40 }
  0x4f   :  { %v585_v49 = vadd.f32 %v521_v42, %v257_v29  ;;  %v455_v51 = vmul.f32 %v1382_v8, %v1013_v44  ;;  %v1150_v54 = vpack.c.bf16 %v648_v45, %v647_v41  ;;  %v586_v55 = vadd.f32 %v522_v46, %v258_v37  ;;  %v1278_v29 = vld [vmem:[%s1948_s1 + $0xa8] sm:$0xff]  }
  0x50   :  { %v260_v56 = vadd.f32 %v1374_v4, %v192_v47  ;;  %v456_v57 = vmul.f32 %v1382_v8, %v1014_v48  ;;  %v890_v61 = vunpack.c.h.bf16 %v1245_v40  ;;  %v193_v62 = vmul.f32 %v1369_v1, %v889_v52  ;;  %v1279_v47 = vld [vmem:[%s1948_s1 + $0xb0] sm:$0xff]  }
  0x51   :  { %v649_v59 = vmax.f32 %v585_v49, 0.0  ;;  %v523_v60 = vadd.f32 %v1389_v11, %v455_v51  ;;  %1304 = vst [vmem:[%s1953_s6 + $0x80] sm:$0xff] %v1150_v54   ;;  %v650_v63 = vmax.f32 %v586_v55, 0.0  ;;  %v1017_v2 = vunpack.c.l.bf16 %v1276_v53 }
  0x52   :  { %v524_v0 = vadd.f32 %v1389_v11, %v456_v57  ;;  %v1018_v3 = vunpack.c.h.bf16 %v1276_v53  ;;  %v194_v6 = vmul.f32 %v1369_v1, %v890_v61  ;;  %v261_v7 = vadd.f32 %v1374_v4, %v193_v62 }
  0x53   :  { %v587_v5 = vadd.f32 %v523_v60, %v259_v50  ;;  %v893_v9 = vunpack.c.l.bf16 %v1246_v58  ;;  %v1155_v12 = vpack.c.bf16 %v650_v63, %v649_v59  ;;  %v457_v14 = vmul.f32 %v1382_v8, %v1017_v2 }
  0x54   :  { %v588_v13 = vadd.f32 %v524_v0, %v260_v56  ;;  %v458_v15 = vmul.f32 %v1382_v8, %v1018_v3  ;;  %v262_v18 = vadd.f32 %v1374_v4, %v194_v6  ;;  %v894_v19 = vunpack.c.h.bf16 %v1246_v58  ;;  %v1249_v56 = vld [vmem:[%s1947_s0 + $0xb8] sm:$0xff]  }
  0x55   :  { %v651_v17 = vmax.f32 %v587_v5, 0.0  ;;  %v195_v20 = vmul.f32 %v1369_v1, %v893_v9  ;;  %1305 = vst [vmem:[%s1953_s6 + $0x88] sm:$0xff] %v1155_v12   ;;  %v525_v22 = vadd.f32 %v1389_v11, %v457_v14  ;;  %v1021_v24 = vunpack.c.l.bf16 %v1277_v10  ;;  %v1250_v14 = vld [vmem:[%s1947_s0 + $0xc0] sm:$0xff]  }
  0x56   :  { %v652_v21 = vmax.f32 %v588_v13, 0.0  ;;  %v526_v23 = vadd.f32 %v1389_v11, %v458_v15  ;;  %v196_v25 = vmul.f32 %v1369_v1, %v894_v19  ;;  %v1022_v27 = vunpack.c.h.bf16 %v1277_v10 }
  0x57   :  { %v263_v26 = vadd.f32 %v1374_v4, %v195_v20  ;;  %v897_v28 = vunpack.c.l.bf16 %v1247_v16  ;;  %v589_v31 = vadd.f32 %v525_v22, %v261_v7  ;;  %v459_v33 = vmul.f32 %v1382_v8, %v1021_v24  ;;  %v1280_v7 = vld [vmem:[%s1948_s1 + $0xb8] sm:$0xff]  }
  0x58   :  { %v1160_v30 = vpack.c.bf16 %v652_v21, %v651_v17  ;;  %v590_v32 = vadd.f32 %v526_v23, %v262_v18  ;;  %v264_v34 = vadd.f32 %v1374_v4, %v196_v25  ;;  %v460_v35 = vmul.f32 %v1382_v8, %v1022_v27  ;;  %v1281_v27 = vld [vmem:[%s1948_s1 + $0xc0] sm:$0xff]  }
  0x59   :  { %v898_v36 = vunpack.c.h.bf16 %v1247_v16  ;;  %v197_v37 = vmul.f32 %v1369_v1, %v897_v28  ;;  %v653_v39 = vmax.f32 %v589_v31, 0.0  ;;  %v527_v41 = vadd.f32 %v1389_v11, %v459_v33 }
  0x5a   :  { %1306 = vst [vmem:[%s1953_s6 + $0x90] sm:$0xff] %v1160_v30   ;;  %v654_v40 = vmax.f32 %v590_v32, 0.0  ;;  %v1025_v42 = vunpack.c.l.bf16 %v1278_v29  ;;  %v528_v43 = vadd.f32 %v1389_v11, %v460_v35  ;;  %v1026_v46 = vunpack.c.h.bf16 %v1278_v29  ;;  %v1251_v32 = vld [vmem:[%s1947_s0 + $0xc8] sm:$0xff]  }
  0x5b   :  { %v198_v44 = vmul.f32 %v1369_v1, %v898_v36  ;;  %v265_v45 = vadd.f32 %v1374_v4, %v197_v37  ;;  %v591_v49 = vadd.f32 %v527_v41, %v263_v26  ;;  %v901_v51 = vunpack.c.l.bf16 %v1248_v38 }
  0x5c   :  { %v1165_v48 = vpack.c.bf16 %v654_v40, %v653_v39  ;;  %v461_v50 = vmul.f32 %v1382_v8, %v1025_v42  ;;  %v592_v52 = vadd.f32 %v528_v43, %v264_v34  ;;  %v462_v54 = vmul.f32 %v1382_v8, %v1026_v46 }
  0x5d   :  { %v266_v53 = vadd.f32 %v1374_v4, %v198_v44  ;;  %v902_v55 = vunpack.c.h.bf16 %v1248_v38  ;;  %v655_v57 = vmax.f32 %v591_v49, 0.0  ;;  %v199_v59 = vmul.f32 %v1369_v1, %v901_v51 }
  0x5e   :  { %1307 = vst [vmem:[%s1953_s6 + $0x98] sm:$0xff] %v1165_v48   ;;  %v529_v58 = vadd.f32 %v1389_v11, %v461_v50  ;;  %v1029_v60 = vunpack.c.l.bf16 %v1279_v47  ;;  %v656_v61 = vmax.f32 %v592_v52, 0.0  ;;  %v530_v62 = vadd.f32 %v1389_v11, %v462_v54  ;;  %v1252_v54 = vld [vmem:[%s1947_s0 + $0xd0] sm:$0xff]  }
  0x5f   :  { %v200_v63 = vmul.f32 %v1369_v1, %v902_v55  ;;  %v1030_v0 = vunpack.c.h.bf16 %v1279_v47  ;;  %v267_v3 = vadd.f32 %v1374_v4, %v199_v59  ;;  %v905_v6 = vunpack.c.l.bf16 %v1249_v56 }
  0x60   :  { %v593_v2 = vadd.f32 %v529_v58, %v265_v45  ;;  %v463_v5 = vmul.f32 %v1382_v8, %v1029_v60  ;;  %v1170_v9 = vpack.c.bf16 %v656_v61, %v655_v57  ;;  %v594_v10 = vadd.f32 %v530_v62, %v266_v53  ;;  %v1282_v45 = vld [vmem:[%s1948_s1 + $0xc8] sm:$0xff]  }
  0x61   :  { %v268_v12 = vadd.f32 %v1374_v4, %v200_v63  ;;  %v464_v13 = vmul.f32 %v1382_v8, %v1030_v0  ;;  %v906_v17 = vunpack.c.h.bf16 %v1249_v56  ;;  %v201_v18 = vmul.f32 %v1369_v1, %v905_v6  ;;  %v1283_v63 = vld [vmem:[%s1948_s1 + $0xd0] sm:$0xff]  }
  0x62   :  { %v657_v15 = vmax.f32 %v593_v2, 0.0  ;;  %v531_v16 = vadd.f32 %v1389_v11, %v463_v5  ;;  %1308 = vst [vmem:[%s1953_s6 + $0xa0] sm:$0xff] %v1170_v9   ;;  %v658_v19 = vmax.f32 %v594_v10, 0.0  ;;  %v1033_v21 = vunpack.c.l.bf16 %v1280_v7 }
  0x63   :  { %v532_v20 = vadd.f32 %v1389_v11, %v464_v13  ;;  %v1034_v22 = vunpack.c.h.bf16 %v1280_v7  ;;  %v202_v24 = vmul.f32 %v1369_v1, %v906_v17  ;;  %v269_v25 = vadd.f32 %v1374_v4, %v201_v18 }
  0x64   :  { %v595_v23 = vadd.f32 %v531_v16, %v267_v3  ;;  %v909_v26 = vunpack.c.l.bf16 %v1250_v14  ;;  %v1175_v28 = vpack.c.bf16 %v658_v19, %v657_v15  ;;  %v465_v30 = vmul.f32 %v1382_v8, %v1033_v21  ;;  %v1836_v16 = vld [vmem:[%s1952_s5] ss:$0 sm:$0xff] }
  0x65   :  { %v596_v29 = vadd.f32 %v532_v20, %v268_v12  ;;  %v466_v31 = vmul.f32 %v1382_v8, %v1034_v22  ;;  %v270_v34 = vadd.f32 %v1374_v4, %v202_v24  ;;  %v910_v35 = vunpack.c.h.bf16 %v1250_v14  ;;  %v1830_v14 = vld [vmem:[%s1949_s2] ss:$0 sm:$0xff] }
  0x66   :  { %v659_v33 = vmax.f32 %v595_v23, 0.0  ;;  %v203_v36 = vmul.f32 %v1369_v1, %v909_v26  ;;  %1309 = vst [vmem:[%s1953_s6 + $0xa8] sm:$0xff] %v1175_v28   ;;  %v533_v38 = vadd.f32 %v1389_v11, %v465_v30  ;;  %v1037_v40 = vunpack.c.l.bf16 %v1281_v27  ;;  %v1843_v20 = vld [vmem:[%s1950_s3] ss:$0 sm:$0xff] }
  0x67   :  { %v660_v37 = vmax.f32 %v596_v29, 0.0  ;;  %v534_v39 = vadd.f32 %v1389_v11, %v466_v31  ;;  %v204_v41 = vmul.f32 %v1369_v1, %v910_v35  ;;  %v1038_v43 = vunpack.c.h.bf16 %v1281_v27  ;;  %v1849_v22 = vld [vmem:[%s1951_s4] ss:$0 sm:$0xff] }
  0x68   :  { %v271_v42 = vadd.f32 %v1374_v4, %v203_v36  ;;  %v913_v44 = vunpack.c.l.bf16 %v1251_v32  ;;  %v597_v47 = vadd.f32 %v533_v38, %v269_v25  ;;  %v467_v49 = vmul.f32 %v1382_v8, %v1037_v40  ;;  %v1284_v25 = vld [vmem:[%s1948_s1 + $0xd8] sm:$0xff]   ;;  %v1254_v30 = vld [vmem:[%s1947_s0 + $0xe0] sm:$0xff]  }
  0x69   :  { %v1180_v46 = vpack.c.bf16 %v660_v37, %v659_v33  ;;  %v598_v48 = vadd.f32 %v534_v39, %v270_v34  ;;  %v272_v50 = vadd.f32 %v1374_v4, %v204_v41  ;;  %v468_v51 = vmul.f32 %v1382_v8, %v1038_v43  ;;  %v1285_v43 = vld [vmem:[%s1948_s1 + $0xe0] sm:$0xff]  }
  0x6a   :  { %v914_v52 = vunpack.c.h.bf16 %v1251_v32  ;;  %v205_v53 = vmul.f32 %v1369_v1, %v913_v44  ;;  %v661_v55 = vmax.f32 %v597_v47, 0.0  ;;  %v535_v57 = vadd.f32 %v1389_v11, %v467_v49 }
  0x6b   :  { %1310 = vst [vmem:[%s1953_s6 + $0xb0] sm:$0xff] %v1180_v46   ;;  %v662_v56 = vmax.f32 %v598_v48, 0.0  ;;  %v1041_v58 = vunpack.c.l.bf16 %v1282_v45  ;;  %v536_v59 = vadd.f32 %v1389_v11, %v468_v51  ;;  %v1042_v62 = vunpack.c.h.bf16 %v1282_v45  ;;  %v1255_v48 = vld [vmem:[%s1947_s0 + $0xe8] sm:$0xff]  }
  0x6c   :  { %v206_v60 = vmul.f32 %v1369_v1, %v914_v52  ;;  %v273_v61 = vadd.f32 %v1374_v4, %v205_v53  ;;  %v599_v2 = vadd.f32 %v535_v57, %v271_v42  ;;  %v917_v5 = vunpack.c.l.bf16 %v1252_v54  ;;  %v1253_v1 = vld [vmem:[%s1947_s0 + $0xd8] sm:$0xff]  }
  0x6d   :  { %v1185_v0 = vpack.c.bf16 %v662_v56, %v661_v55  ;;  %v469_v3 = vmul.f32 %v1382_v8, %v1041_v58  ;;  %v600_v6 = vadd.f32 %v536_v59, %v272_v50  ;;  %v470_v9 = vmul.f32 %v1382_v8, %v1042_v62 }
  0x6e   :  { %v274_v7 = vadd.f32 %v1374_v4, %v206_v60  ;;  %v918_v10 = vunpack.c.h.bf16 %v1252_v54  ;;  %v663_v12 = vmax.f32 %v599_v2, 0.0  ;;  %v207_v4 = vmul.f32 %v1830_v14, %v917_v5 }
  0x6f   :  { %1311 = vst [vmem:[%s1953_s6 + $0xb8] sm:$0xff] %v1185_v0   ;;  %v537_v13 = vadd.f32 %v1389_v11, %v469_v3  ;;  %v1045_v8 = vunpack.c.l.bf16 %v1283_v63  ;;  %v664_v15 = vmax.f32 %v600_v6, 0.0  ;;  %v538_v17 = vadd.f32 %v1836_v16, %v470_v9  ;;  %v1256_v9 = vld [vmem:[%s1947_s0 + $0xf0] sm:$0xff]  }
  0x70   :  { %v208_v18 = vmul.f32 %v1830_v14, %v918_v10  ;;  %v1046_v19 = vunpack.c.h.bf16 %v1283_v63  ;;  %v275_v21 = vadd.f32 %v1843_v20, %v207_v4  ;;  %v921_v24 = vunpack.c.l.bf16 %v1253_v1 }
  0x71   :  { %v601_v11 = vadd.f32 %v537_v13, %v273_v61  ;;  %v471_v23 = vmul.f32 %v1849_v22, %v1045_v8  ;;  %v1190_v26 = vpack.c.bf16 %v664_v15, %v663_v12  ;;  %v602_v27 = vadd.f32 %v538_v17, %v274_v7  ;;  %v1286_v61 = vld [vmem:[%s1948_s1 + $0xe8] sm:$0xff]  }
  0x72   :  { %v276_v28 = vadd.f32 %v1843_v20, %v208_v18  ;;  %v472_v29 = vmul.f32 %v1849_v22, %v1046_v19  ;;  %v922_v33 = vunpack.c.h.bf16 %v1253_v1  ;;  %v209_v34 = vmul.f32 %v1830_v14, %v921_v24  ;;  %v1287_v18 = vld [vmem:[%s1948_s1 + $0xf0] sm:$0xff]  }
  0x73   :  { %v665_v31 = vmax.f32 %v601_v11, 0.0  ;;  %v539_v32 = vadd.f32 %v1836_v16, %v471_v23  ;;  %1312 = vst [vmem:[%s1953_s6 + $0xc0] sm:$0xff] %v1190_v26   ;;  %v666_v35 = vmax.f32 %v602_v27, 0.0  ;;  %v1049_v37 = vunpack.c.l.bf16 %v1284_v25 }
  0x74   :  { %v540_v36 = vadd.f32 %v1836_v16, %v472_v29  ;;  %v1050_v38 = vunpack.c.h.bf16 %v1284_v25  ;;  %v210_v40 = vmul.f32 %v1830_v14, %v922_v33  ;;  %v277_v41 = vadd.f32 %v1843_v20, %v209_v34 }
  0x75   :  { %v603_v39 = vadd.f32 %v539_v32, %v275_v21  ;;  %v925_v42 = vunpack.c.l.bf16 %v1254_v30  ;;  %v1195_v44 = vpack.c.bf16 %v666_v35, %v665_v31  ;;  %v473_v46 = vmul.f32 %v1849_v22, %v1049_v37 }
  0x76   :  { %v604_v45 = vadd.f32 %v540_v36, %v276_v28  ;;  %v474_v47 = vmul.f32 %v1849_v22, %v1050_v38  ;;  %v278_v50 = vadd.f32 %v1843_v20, %v210_v40  ;;  %v926_v51 = vunpack.c.h.bf16 %v1254_v30  ;;  %v1257_v28 = vld [vmem:[%s1947_s0 + $0xf8] sm:$0xff]  }
  0x77   :  { %v667_v49 = vmax.f32 %v603_v39, 0.0  ;;  %v211_v52 = vmul.f32 %v1830_v14, %v925_v42  ;;  %1313 = vst [vmem:[%s1953_s6 + $0xc8] sm:$0xff] %v1195_v44   ;;  %v541_v54 = vadd.f32 %v1836_v16, %v473_v46  ;;  %v1053_v56 = vunpack.c.l.bf16 %v1285_v43 }
  0x78   :  { %v668_v53 = vmax.f32 %v604_v45, 0.0  ;;  %v542_v55 = vadd.f32 %v1836_v16, %v474_v47  ;;  %v212_v57 = vmul.f32 %v1830_v14, %v926_v51  ;;  %v1054_v59 = vunpack.c.h.bf16 %v1285_v43 }
  0x79   :  { %v279_v58 = vadd.f32 %v1843_v20, %v211_v52  ;;  %v929_v60 = vunpack.c.l.bf16 %v1255_v48  ;;  %v605_v63 = vadd.f32 %v541_v54, %v277_v41  ;;  %v475_v2 = vmul.f32 %v1849_v22, %v1053_v56  ;;  %v1288_v41 = vld [vmem:[%s1948_s1 + $0xf8] sm:$0xff]  }
  0x7a   :  { %v1200_v62 = vpack.c.bf16 %v668_v53, %v667_v49  ;;  %v606_v0 = vadd.f32 %v542_v55, %v278_v50  ;;  %v280_v3 = vadd.f32 %v1843_v20, %v212_v57  ;;  %v476_v5 = vmul.f32 %v1849_v22, %v1054_v59 }
  0x7b   :  { %v930_v6 = vunpack.c.h.bf16 %v1255_v48  ;;  %v213_v7 = vmul.f32 %v1830_v14, %v929_v60  ;;  %v669_v10 = vmax.f32 %v605_v63, 0.0  ;;  %v543_v12 = vadd.f32 %v1836_v16, %v475_v2 }
  0x7c   :  { %1314 = vst [vmem:[%s1953_s6 + $0xd0] sm:$0xff] %v1200_v62   ;;  %v670_v1 = vmax.f32 %v606_v0, 0.0  ;;  %v1057_v13 = vunpack.c.l.bf16 %v1286_v61  ;;  %v544_v4 = vadd.f32 %v1836_v16, %v476_v5  ;;  %v1058_v17 = vunpack.c.h.bf16 %v1286_v61 }
  0x7d   :  { %v214_v8 = vmul.f32 %v1830_v14, %v930_v6  ;;  %v281_v15 = vadd.f32 %v1843_v20, %v213_v7  ;;  %v607_v11 = vadd.f32 %v543_v12, %v279_v58  ;;  %v933_v23 = vunpack.c.l.bf16 %v1256_v9 }
  0x7e   :  { %v1205_v19 = vpack.c.bf16 %v670_v1, %v669_v10  ;;  %v477_v21 = vmul.f32 %v1849_v22, %v1057_v13  ;;  %v608_v24 = vadd.f32 %v544_v4, %v280_v3  ;;  %v478_v26 = vmul.f32 %v1849_v22, %v1058_v17 }
  0x7f   :  { %v282_v25 = vadd.f32 %v1843_v20, %v214_v8  ;;  %v934_v27 = vunpack.c.h.bf16 %v1256_v9  ;;  %v671_v29 = vmax.f32 %v607_v11, 0.0  ;;  %v215_v31 = vmul.f32 %v1830_v14, %v933_v23 }
  0x80   :  { %1315 = vst [vmem:[%s1953_s6 + $0xd8] sm:$0xff] %v1205_v19   ;;  %v545_v30 = vadd.f32 %v1836_v16, %v477_v21  ;;  %v1061_v32 = vunpack.c.l.bf16 %v1287_v18  ;;  %v672_v33 = vmax.f32 %v608_v24, 0.0  ;;  %v546_v34 = vadd.f32 %v1836_v16, %v478_v26 }
  0x81   :  { %v216_v35 = vmul.f32 %v1830_v14, %v934_v27  ;;  %v1062_v36 = vunpack.c.h.bf16 %v1287_v18  ;;  %v283_v38 = vadd.f32 %v1843_v20, %v215_v31  ;;  %v937_v40 = vunpack.c.l.bf16 %v1257_v28 }
  0x82   :  { %v609_v37 = vadd.f32 %v545_v30, %v281_v15  ;;  %v479_v39 = vmul.f32 %v1849_v22, %v1061_v32  ;;  %v1210_v42 = vpack.c.bf16 %v672_v33, %v671_v29  ;;  %v610_v43 = vadd.f32 %v546_v34, %v282_v25 }
  0x83   :  { %v284_v44 = vadd.f32 %v1843_v20, %v216_v35  ;;  %v480_v45 = vmul.f32 %v1849_v22, %v1062_v36  ;;  %v938_v48 = vunpack.c.h.bf16 %v1257_v28  ;;  %v217_v49 = vmul.f32 %v1830_v14, %v937_v40 }
  0x84   :  { %v673_v46 = vmax.f32 %v609_v37, 0.0  ;;  %v547_v47 = vadd.f32 %v1836_v16, %v479_v39  ;;  %1316 = vst [vmem:[%s1953_s6 + $0xe0] sm:$0xff] %v1210_v42   ;;  %v674_v50 = vmax.f32 %v610_v43, 0.0  ;;  %v1065_v52 = vunpack.c.l.bf16 %v1288_v41 }
  0x85   :  { %v548_v51 = vadd.f32 %v1836_v16, %v480_v45  ;;  %v1066_v53 = vunpack.c.h.bf16 %v1288_v41  ;;  %v218_v55 = vmul.f32 %v1830_v14, %v938_v48  ;;  %v285_v56 = vadd.f32 %v1843_v20, %v217_v49 }
  0x86   :  { %v611_v54 = vadd.f32 %v547_v47, %v283_v38  ;;  %v1215_v57 = vpack.c.bf16 %v674_v50, %v673_v46  ;;  %v481_v59 = vmul.f32 %v1849_v22, %v1065_v52 }
  0x87   :  { %v612_v58 = vadd.f32 %v548_v51, %v284_v44  ;;  %v482_v60 = vmul.f32 %v1849_v22, %v1066_v53  ;;  %v286_v62 = vadd.f32 %v1843_v20, %v218_v55 }
  0x88   :  { %v675_v61 = vmax.f32 %v611_v54, 0.0  ;;  %1317 = vst [vmem:[%s1953_s6 + $0xe8] sm:$0xff] %v1215_v57   ;;  %v549_v0 = vadd.f32 %v1836_v16, %v481_v59 }
  0x89   :  { %v676_v63 = vmax.f32 %v612_v58, 0.0  ;;  %v550_v14 = vadd.f32 %v1836_v16, %v482_v60 }
  0x8a   :  { %v613_v3 = vadd.f32 %v549_v0, %v285_v56 }
  0x8b   :  { %v1220_v2 = vpack.c.bf16 %v676_v63, %v675_v61  ;;  %v614_v5 = vadd.f32 %v550_v14, %v286_v62 }
  0x8c   :  { %v677_v22 = vmax.f32 %v613_v3, 0.0 }
  0x8d   :  { %1318 = vst [vmem:[%s1953_s6 + $0xf0] sm:$0xff] %v1220_v2   ;;  %v678_v6 = vmax.f32 %v614_v5, 0.0 }
  0x8f   :  { %v1225_v7 = vpack.c.bf16 %v678_v6, %v677_v22 }
  0x91   :  { %1319 = vst [vmem:[%s1953_s6 + $0xf8] sm:$0xff] %v1225_v7  }

// kernel: bottleneck_forward.6
= control target key start
LH: loop header
LB: loop body
LE: loop exit
PB: predicated region body
PF: predicated region fallthrough
CT: control target
= control target key end

     0   :  { %s3721_s4 = inlined_call_operand.vmem [shape: bf16[128,128], index: 4, kind: input, shape index: {}]   ;;  %s3722_s5 = inlined_call_operand.vmem [shape: bf16[128,128], index: 5, kind: input, shape index: {}]   ;;  %s3723_s2 = inlined_call_operand.vmem [shape: f32[1,128], index: 2, kind: input, shape index: {}]   ;;  %s3724_s3 = inlined_call_operand.vmem [shape: f32[1,128], index: 3, kind: input, shape index: {}]   ;;  %s3725_s0 = inlined_call_operand.vmem [shape: bf16[512,128], index: 0, kind: input, shape index: {}]   ;;  %s3726_s1 = inlined_call_operand.vmem [shape: bf16[512,128], index: 1, kind: input, shape index: {}]   ;;  %s3727_s6 = inlined_call_operand.vmem [shape: bf16[512,128], index: 6, kind: output, shape index: {0}]   ;;  %s3728_s7 = inlined_call_operand.vmem [shape: bf16[512,128], index: 7, kind: output, shape index: {1}]   ;;  %s3729_s8 = inlined_call_operand.vmem [shape: f32[1,8,128], index: 8, kind: output, shape index: {2}]   ;;  %s3730_s9 = inlined_call_operand.vmem [shape: f32[1,8,128], index: 9, kind: output, shape index: {3}]  }
   0x1   :  { %v1991_v0 = vld [vmem:[%s3721_s4 + $0x38] sm:$0xff]  ;;  %v1990_v2 = vld [vmem:[%s3721_s4 + $0x30] sm:$0xff]  ;;  %v1989_v4 = vld [vmem:[%s3721_s4 + $0x28] sm:$0xff] }
   0x2   :  { %v2031_v1 = vld [vmem:[%s3722_s5 + $0x38] sm:$0xff]  ;;  %451 = vmatpush.bf16.msra.mxu0 %v1991_v0  ;;  %v2030_v3 = vld [vmem:[%s3722_s5 + $0x30] sm:$0xff]  ;;  %2573 = vmatpush.bf16.msra.mxu2 %v1991_v0  ;;  %v2029_v5 = vld [vmem:[%s3722_s5 + $0x28] sm:$0xff] }
   0x3   :  { %940 = vmatpush.bf16.msra.mxu1 %v2031_v1  ;;  %2581 = vmatpush.bf16.msra.mxu3 %v2031_v1  ;;  %v1988_v6 = vld [vmem:[%s3721_s4 + $0x20] sm:$0xff]  ;;  %v1987_v12 = vld [vmem:[%s3721_s4 + $0x18] sm:$0xff]  ;;  %v1986_v17 = vld [vmem:[%s3721_s4 + $0x10] sm:$0xff] }
   0x4   :  { %v2028_v7 = vld [vmem:[%s3722_s5 + $0x20] sm:$0xff]  ;;  %v2027_v13 = vld [vmem:[%s3722_s5 + $0x18] sm:$0xff]  ;;  %v2026_v18 = vld [vmem:[%s3722_s5 + $0x10] sm:$0xff] }
   0x5   :  { %v2033_v8 = vld [vmem:[%s3725_s0] sm:$0xff]   ;;  %v1985_v21 = vld [vmem:[%s3721_s4 + $0x8] sm:$0xff]  ;;  %v2481_v39 = vld [vmem:[%s3725_s0 + $0x10] sm:$0xff]  }
   0x6   :  { %452 = vmatpush.bf16.msra.mxu0 %v1990_v2  ;;  %2574 = vmatpush.bf16.msra.mxu2 %v1990_v2  ;;  %v2034_v9 = vunpack.c.l.bf16 %v2033_v8  ;;  %v2035_v10 = vunpack.c.h.bf16 %v2033_v8  ;;  %v2673_v11 = vld [vmem:[%s3723_s2] ss:$0 sm:$0xff]  ;;  %v2025_v22 = vld [vmem:[%s3722_s5 + $0x8] sm:$0xff]  ;;  %v2042_v44 = vunpack.c.l.bf16 %v2481_v39  ;;  %v2043_v45 = vunpack.c.h.bf16 %v2481_v39  ;;  %v2482_v63 = vld [vmem:[%s3725_s0 + $0x18] sm:$0xff]  }
   0x7   :  { %941 = vmatpush.bf16.msra.mxu1 %v2030_v3  ;;  %2582 = vmatpush.bf16.msra.mxu3 %v2030_v3  ;;  %v2686_v16 = vld [vmem:[%s3724_s3] ss:$0 sm:$0xff]  ;;  %v2480_v27 = vld [vmem:[%s3725_s0 + $0x8] sm:$0xff]   ;;  %v1994_v3 = vld [vmem:[%s3726_s1 + $0x10] sm:$0xff] }
   0x8   :  { %v159_v14 = vmul.f32 %v2673_v11, %v2034_v9  ;;  %v160_v15 = vmul.f32 %v2673_v11, %v2035_v10  ;;  %v1984_v25 = vld [vmem:[%s3721_s4] sm:$0xff]  ;;  %v2038_v30 = vunpack.c.l.bf16 %v2480_v27  ;;  %v2039_v31 = vunpack.c.h.bf16 %v2480_v27  ;;  %v1993_v47 = vld [vmem:[%s3726_s1 + $0x8] sm:$0xff] }
   0x9   :  { %v2024_v26 = vld [vmem:[%s3722_s5] sm:$0xff]  ;;  %v163_v52 = vmul.f32 %v2673_v11, %v2042_v44  ;;  %v164_v53 = vmul.f32 %v2673_v11, %v2043_v45  ;;  %v2496_v60 = vld [vmem:[%s3725_s0 + $0x88] sm:$0xff]  }
   0xa   :  { %453 = vmatpush.bf16.msra.mxu0 %v1989_v4  ;;  %2575 = vmatpush.bf16.msra.mxu2 %v1989_v4  ;;  %v227_v19 = vadd.f32 %v2686_v16, %v159_v14  ;;  %v228_v20 = vadd.f32 %v2686_v16, %v160_v15  ;;  %v1992_v29 = vld [vmem:[%s3726_s1] sm:$0xff]  ;;  %v161_v32 = vmul.f32 %v2673_v11, %v2038_v30  ;;  %v2102_v61 = vunpack.c.l.bf16 %v2496_v60  ;;  %v2009_v14 = vld [vmem:[%s3726_s1 + $0x88] sm:$0xff] }
   0xb   :  { %942 = vmatpush.bf16.msra.mxu1 %v2029_v5  ;;  %2583 = vmatpush.bf16.msra.mxu3 %v2029_v5  ;;  %v162_v33 = vmul.f32 %v2673_v11, %v2039_v31  ;;  %v2495_v36 = vld [vmem:[%s3725_s0 + $0x80] sm:$0xff]   ;;  %v231_v56 = vadd.f32 %v2686_v16, %v163_v52  ;;  %v232_v57 = vadd.f32 %v2686_v16, %v164_v53  ;;  %v2103_v62 = vunpack.c.h.bf16 %v2496_v60  ;;  %v2484_v45 = vld [vmem:[%s3725_s0 + $0x28] sm:$0xff]  }
   0xc   :  { %v291_v23 = vmax.f32 %v227_v19, 0.0  ;;  %v292_v24 = vmax.f32 %v228_v20, 0.0  ;;  %v229_v34 = vadd.f32 %v2686_v16, %v161_v32  ;;  %v2098_v40 = vunpack.c.l.bf16 %v2495_v36  ;;  %v2008_v55 = vld [vmem:[%s3726_s1 + $0x80] sm:$0xff] }
   0xd   :  { %v230_v35 = vadd.f32 %v2686_v16, %v162_v33  ;;  %v2099_v41 = vunpack.c.h.bf16 %v2495_v36  ;;  %v295_v58 = vmax.f32 %v231_v56, 0.0  ;;  %v296_v59 = vmax.f32 %v232_v57, 0.0 }
   0xe   :  { %454 = vmatpush.bf16.msra.mxu0 %v1988_v6  ;;  %2576 = vmatpush.bf16.msra.mxu2 %v1988_v6  ;;  %v355_v28 = vpack.c.bf16 %v292_v24, %v291_v23  ;;  %v293_v37 = vmax.f32 %v229_v34, 0.0  ;;  %v191_v42 = vmul.f32 %v2673_v11, %v2098_v40  ;;  %v193_v0 = vmul.f32 %v2673_v11, %v2102_v61 }
   0xf   :  { %943 = vmatpush.bf16.msra.mxu1 %v2028_v7  ;;  %2584 = vmatpush.bf16.msra.mxu3 %v2028_v7  ;;  %v294_v38 = vmax.f32 %v230_v35, 0.0  ;;  %v192_v43 = vmul.f32 %v2673_v11, %v2099_v41  ;;  %v194_v1 = vmul.f32 %v2673_v11, %v2103_v62  ;;  %v357_v2 = vpack.c.bf16 %v296_v59, %v295_v58  ;;  %v2011_v59 = vld [vmem:[%s3726_s1 + $0x98] sm:$0xff]  ;;  %v2499_v62 = vld [vmem:[%s3725_s0 + $0xa0] sm:$0xff]  }
  0x10   :  { %v259_v48 = vadd.f32 %v2686_v16, %v191_v42  ;;  %v2046_v4 = vunpack.c.l.bf16 %v2482_v63  ;;  %v2047_v5 = vunpack.c.h.bf16 %v2482_v63  ;;  %v261_v6 = vadd.f32 %v2686_v16, %v193_v0  ;;  %v2498_v42 = vld [vmem:[%s3725_s0 + $0x98] sm:$0xff]  }
  0x11   :  { %v356_v46 = vpack.c.bf16 %v294_v38, %v293_v37  ;;  %v260_v49 = vadd.f32 %v2686_v16, %v192_v43  ;;  %v262_v7 = vadd.f32 %v2686_v16, %v194_v1  ;;  %v2010_v37 = vld [vmem:[%s3726_s1 + $0x90] sm:$0xff]  ;;  %v2110_v43 = vunpack.c.l.bf16 %v2498_v42 }
  0x12   :  { %455 = vmatpush.bf16.msra.mxu0 %v1987_v12  ;;  %2577 = vmatpush.bf16.msra.mxu2 %v1987_v12  ;;  %v323_v50 = vmax.f32 %v259_v48, 0.0  ;;  %v325_v8 = vmax.f32 %v261_v6, 0.0  ;;  %v165_v10 = vmul.f32 %v2673_v11, %v2046_v4  ;;  %v166_v12 = vmul.f32 %v2673_v11, %v2047_v5  ;;  %v2485_v1 = vld [vmem:[%s3725_s0 + $0x30] sm:$0xff]  }
  0x13   :  { %944 = vmatpush.bf16.msra.mxu1 %v2027_v13  ;;  %2585 = vmatpush.bf16.msra.mxu3 %v2027_v13  ;;  %v324_v51 = vmax.f32 %v260_v49, 0.0  ;;  %v326_v9 = vmax.f32 %v262_v7, 0.0  ;;  %v2111_v44 = vunpack.c.h.bf16 %v2498_v42  ;;  %v1996_v49 = vld [vmem:[%s3726_s1 + $0x20] sm:$0xff]  ;;  %v2058_v6 = vunpack.c.l.bf16 %v2485_v1 }
  0x14   :  { %v233_v15 = vadd.f32 %v2686_v16, %v165_v10  ;;  %v2059_v7 = vunpack.c.h.bf16 %v2485_v1 }
  0x15   :  { %v371_v54 = vpack.c.bf16 %v324_v51, %v323_v50  ;;  %v372_v13 = vpack.c.bf16 %v326_v9, %v325_v8  ;;  %v2054_v50 = vunpack.c.l.bf16 %v2484_v45  ;;  %v2055_v51 = vunpack.c.h.bf16 %v2484_v45  ;;  %v1997_v9 = vld [vmem:[%s3726_s1 + $0x28] sm:$0xff] }
  0x16   :  { %456 = vmatpush.bf16.msra.mxu0 %v1986_v17  ;;  %2578 = vmatpush.bf16.msra.mxu2 %v1986_v17  ;;  %v234_v17 = vadd.f32 %v2686_v16, %v166_v12  ;;  %v297_v19 = vmax.f32 %v233_v15, 0.0  ;;  %v171_v15 = vmul.f32 %v2673_v11, %v2058_v6 }
  0x17   :  { %945 = vmatpush.bf16.msra.mxu1 %v2026_v18  ;;  %2586 = vmatpush.bf16.msra.mxu3 %v2026_v18  ;;  %v2497_v18 = vld [vmem:[%s3725_s0 + $0x90] sm:$0xff]   ;;  %v169_v56 = vmul.f32 %v2673_v11, %v2054_v50  ;;  %v170_v57 = vmul.f32 %v2673_v11, %v2055_v51 }
  0x18   :  { %v298_v20 = vmax.f32 %v234_v17, 0.0  ;;  %v2107_v23 = vunpack.c.h.bf16 %v2497_v18  ;;  %v172_v17 = vmul.f32 %v2673_v11, %v2059_v7 }
  0x19   :  { %v237_v60 = vadd.f32 %v2686_v16, %v169_v56  ;;  %v238_v61 = vadd.f32 %v2686_v16, %v170_v57 }
  0x1a   :  { %457 = vmatpush.bf16.msra.mxu0 %v1985_v21  ;;  %2579 = vmatpush.bf16.msra.mxu2 %v1985_v21  ;;  %v2483_v21 = vld [vmem:[%s3725_s0 + $0x20] sm:$0xff]  }
  0x1b   :  { %946 = vmatpush.bf16.msra.mxu1 %v2025_v22  ;;  %2587 = vmatpush.bf16.msra.mxu3 %v2025_v22  ;;  %v2106_v22 = vunpack.c.l.bf16 %v2497_v18  ;;  %v2051_v27 = vunpack.c.h.bf16 %v2483_v21  ;;  %v301_v63 = vmax.f32 %v237_v60, 0.0  ;;  %v302_v0 = vmax.f32 %v238_v61, 0.0 }
  0x1d   :  { %v195_v24 = vmul.f32 %v2673_v11, %v2106_v22  ;;  %v168_v35 = vmul.f32 %v2673_v11, %v2051_v27  ;;  %v360_v8 = vpack.c.bf16 %v302_v0, %v301_v63  ;;  %v2486_v27 = vld [vmem:[%s3725_s0 + $0x38] sm:$0xff]  }
  0x1e   :  { %458 = vmatpush.bf16.msra.mxu0 %v1984_v25  ;;  %2580 = vmatpush.bf16.msra.mxu2 %v1984_v25  ;;  %v196_v25 = vmul.f32 %v2673_v11, %v2107_v23 }
  0x1f   :  { %947 = vmatpush.bf16.msra.mxu1 %v2024_v26  ;;  %2588 = vmatpush.bf16.msra.mxu3 %v2024_v26  ;;  %v2050_v26 = vunpack.c.l.bf16 %v2483_v21  ;;  %v263_v30 = vadd.f32 %v2686_v16, %v195_v24  ;;  %v236_v39 = vadd.f32 %v2686_v16, %v168_v35  ;;  %v240_v21 = vadd.f32 %v2686_v16, %v172_v17  ;;  %v2500_v24 = vld [vmem:[%s3725_s0 + $0xa8] sm:$0xff]  }
  0x20   :  { %v264_v31 = vadd.f32 %v2686_v16, %v196_v25  ;;  %v2118_v25 = vunpack.c.l.bf16 %v2500_v24 }
  0x21   :  { %459 = vmatmul.bf16.vlgmr.msra.gmra.mxu0 %v355_v28  ;;  %539 = vmatmul.bf16.vlgmr.msra.gmra.mxu2 %v371_v54  ;;  %v358_v28 = vpack.c.bf16 %v298_v20, %v297_v19  ;;  %v327_v32 = vmax.f32 %v263_v30, 0.0  ;;  %v167_v34 = vmul.f32 %v2673_v11, %v2050_v26  ;;  %v300_v41 = vmax.f32 %v236_v39, 0.0  ;;  %v2012_v19 = vld [vmem:[%s3726_s1 + $0xa0] sm:$0xff] }
  0x22   :  { %948 = vmatmul.bf16.vlgmr.msra.gmra.mxu1 %v1992_v29  ;;  %1028 = vmatmul.bf16.vlgmr.msra.gmra.mxu3 %v2008_v55  ;;  %v1995_v29 = vld [vmem:[%s3726_s1 + $0x18] sm:$0xff]  ;;  %v328_v33 = vmax.f32 %v264_v31, 0.0  ;;  %v239_v20 = vadd.f32 %v2686_v16, %v171_v15  ;;  %v304_v23 = vmax.f32 %v240_v21, 0.0  ;;  %v2119_v26 = vunpack.c.h.bf16 %v2500_v24  ;;  %v1998_v31 = vld [vmem:[%s3726_s1 + $0x30] sm:$0xff] }
  0x23   :  { %v235_v38 = vadd.f32 %v2686_v16, %v167_v34  ;;  %v2015_v24 = vld [vmem:[%s3726_s1 + $0xb8] sm:$0xff] }
  0x24   :  { %v373_v36 = vpack.c.bf16 %v328_v33, %v327_v32  ;;  %v303_v22 = vmax.f32 %v239_v20, 0.0  ;;  %v2062_v32 = vunpack.c.l.bf16 %v2486_v27  ;;  %v2063_v33 = vunpack.c.h.bf16 %v2486_v27 }
  0x25   :  { %v299_v40 = vmax.f32 %v235_v38, 0.0 }
  0x26   :  { %v361_v30 = vpack.c.bf16 %v304_v23, %v303_v22  ;;  %v173_v38 = vmul.f32 %v2673_v11, %v2062_v32  ;;  %v174_v39 = vmul.f32 %v2673_v11, %v2063_v33 }
  0x27   :  { %v359_v48 = vpack.c.bf16 %v300_v41, %v299_v40  ;;  %v2013_v41 = vld [vmem:[%s3726_s1 + $0xa8] sm:$0xff] }
  0x28   :  { %v241_v42 = vadd.f32 %v2686_v16, %v173_v38 }
  0x31   :  { %464 = vmatmul.bf16.gmra.mxu0 %v356_v46  ;;  %544 = vmatmul.bf16.gmra.mxu2 %v372_v13  ;;  %v197_v46 = vmul.f32 %v2673_v11, %v2110_v43  ;;  %v242_v43 = vadd.f32 %v2686_v16, %v174_v39 }
  0x32   :  { %953 = vmatmul.bf16.gmra.mxu1 %v1993_v47  ;;  %1033 = vmatmul.bf16.gmra.mxu3 %v2009_v14  ;;  %v198_v47 = vmul.f32 %v2673_v11, %v2111_v44  ;;  %v305_v44 = vmax.f32 %v241_v42, 0.0  ;;  %v2489_v42 = vld [vmem:[%s3725_s0 + $0x50] sm:$0xff]  }
  0x33   :  { %v265_v52 = vadd.f32 %v2686_v16, %v197_v46  ;;  %v306_v45 = vmax.f32 %v242_v43, 0.0  ;;  %v2501_v46 = vld [vmem:[%s3725_s0 + $0xb0] sm:$0xff]   ;;  %v2503_v43 = vld [vmem:[%s3725_s0 + $0xc0] sm:$0xff]  }
  0x34   :  { %v266_v53 = vadd.f32 %v2686_v16, %v198_v47  ;;  %v2487_v47 = vld [vmem:[%s3725_s0 + $0x40] sm:$0xff]  }
  0x35   :  { %v329_v54 = vmax.f32 %v265_v52, 0.0  ;;  %v362_v52 = vpack.c.bf16 %v306_v45, %v305_v44  ;;  %v2130_v44 = vunpack.c.l.bf16 %v2503_v43  ;;  %v2131_v45 = vunpack.c.h.bf16 %v2503_v43 }
  0x36   :  { %v330_v55 = vmax.f32 %v266_v53, 0.0  ;;  %v1999_v53 = vld [vmem:[%s3726_s1 + $0x38] sm:$0xff] }
  0x38   :  { %v374_v58 = vpack.c.bf16 %v330_v55, %v329_v54  ;;  %v2066_v54 = vunpack.c.l.bf16 %v2487_v47  ;;  %v2067_v55 = vunpack.c.h.bf16 %v2487_v47  ;;  %v207_v47 = vmul.f32 %v2673_v11, %v2130_v44 }
  0x3a   :  { %v175_v60 = vmul.f32 %v2673_v11, %v2066_v54  ;;  %v176_v61 = vmul.f32 %v2673_v11, %v2067_v55  ;;  %v275_v54 = vadd.f32 %v2686_v16, %v207_v47  ;;  %v2017_v47 = vld [vmem:[%s3726_s1 + $0xc8] sm:$0xff] }
  0x3c   :  { %v243_v0 = vadd.f32 %v2686_v16, %v175_v60  ;;  %v244_v1 = vadd.f32 %v2686_v16, %v176_v61  ;;  %v339_v61 = vmax.f32 %v275_v54, 0.0 }
  0x41   :  { %469 = vmatmul.bf16.gmra.mxu0 %v357_v2  ;;  %549 = vmatmul.bf16.gmra.mxu2 %v373_v36  ;;  %v2114_v2 = vunpack.c.l.bf16 %v2499_v62 }
  0x42   :  { %958 = vmatmul.bf16.gmra.mxu1 %v1994_v3  ;;  %1038 = vmatmul.bf16.gmra.mxu3 %v2010_v37  ;;  %v2115_v3 = vunpack.c.h.bf16 %v2499_v62  ;;  %v2014_v62 = vld [vmem:[%s3726_s1 + $0xb0] sm:$0xff] }
  0x43   :  { %v199_v4 = vmul.f32 %v2673_v11, %v2114_v2  ;;  %v307_v2 = vmax.f32 %v243_v0, 0.0 }
  0x44   :  { %v200_v5 = vmul.f32 %v2673_v11, %v2115_v3  ;;  %v308_v3 = vmax.f32 %v244_v1, 0.0 }
  0x45   :  { %v267_v10 = vadd.f32 %v2686_v16, %v199_v4  ;;  %v2502_v4 = vld [vmem:[%s3725_s0 + $0xb8] sm:$0xff]  }
  0x46   :  { %v268_v12 = vadd.f32 %v2686_v16, %v200_v5  ;;  %v2488_v5 = vld [vmem:[%s3725_s0 + $0x48] sm:$0xff]   ;;  %v2126_v6 = vunpack.c.l.bf16 %v2502_v4  ;;  %v2127_v7 = vunpack.c.h.bf16 %v2502_v4 }
  0x47   :  { %v331_v13 = vmax.f32 %v267_v10, 0.0  ;;  %v363_v10 = vpack.c.bf16 %v308_v3, %v307_v2  ;;  %v2016_v2 = vld [vmem:[%s3726_s1 + $0xc0] sm:$0xff] }
  0x48   :  { %v332_v14 = vmax.f32 %v268_v12, 0.0  ;;  %v2000_v12 = vld [vmem:[%s3726_s1 + $0x40] sm:$0xff] }
  0x4a   :  { %v375_v18 = vpack.c.bf16 %v332_v14, %v331_v13  ;;  %v2070_v13 = vunpack.c.l.bf16 %v2488_v5  ;;  %v2071_v14 = vunpack.c.h.bf16 %v2488_v5 }
  0x4c   :  { %v177_v22 = vmul.f32 %v2673_v11, %v2070_v13  ;;  %v178_v23 = vmul.f32 %v2673_v11, %v2071_v14 }
  0x4e   :  { %v246_v27 = vadd.f32 %v2686_v16, %v178_v23  ;;  %v2504_v23 = vld [vmem:[%s3725_s0 + $0xc8] sm:$0xff]  }
  0x51   :  { %474 = vmatmul.bf16.gmra.mxu0 %v358_v28  ;;  %554 = vmatmul.bf16.gmra.mxu2 %v374_v58  ;;  %v201_v28 = vmul.f32 %v2673_v11, %v2118_v25 }
  0x52   :  { %963 = vmatmul.bf16.gmra.mxu1 %v1995_v29  ;;  %1043 = vmatmul.bf16.gmra.mxu3 %v2011_v59  ;;  %v202_v29 = vmul.f32 %v2673_v11, %v2119_v26  ;;  %v245_v26 = vadd.f32 %v2686_v16, %v177_v22  ;;  %v2490_v22 = vld [vmem:[%s3725_s0 + $0x58] sm:$0xff]  }
  0x53   :  { %v269_v34 = vadd.f32 %v2686_v16, %v201_v28 }
  0x54   :  { %v270_v35 = vadd.f32 %v2686_v16, %v202_v29 }
  0x55   :  { %v333_v36 = vmax.f32 %v269_v34, 0.0 }
  0x56   :  { %v334_v37 = vmax.f32 %v270_v35, 0.0 }
  0x58   :  { %v376_v40 = vpack.c.bf16 %v334_v37, %v333_v36 }
  0x61   :  { %479 = vmatmul.bf16.gmra.mxu0 %v359_v48  ;;  %559 = vmatmul.bf16.gmra.mxu2 %v375_v18  ;;  %v2122_v48 = vunpack.c.l.bf16 %v2501_v46 }
  0x62   :  { %968 = vmatmul.bf16.gmra.mxu1 %v1996_v49  ;;  %1048 = vmatmul.bf16.gmra.mxu3 %v2012_v19  ;;  %v2123_v49 = vunpack.c.h.bf16 %v2501_v46  ;;  %v2074_v46 = vunpack.c.l.bf16 %v2489_v42 }
  0x63   :  { %v203_v50 = vmul.f32 %v2673_v11, %v2122_v48  ;;  %v208_v48 = vmul.f32 %v2673_v11, %v2131_v45 }
  0x64   :  { %v204_v51 = vmul.f32 %v2673_v11, %v2123_v49  ;;  %v179_v60 = vmul.f32 %v2673_v11, %v2074_v46 }
  0x65   :  { %v271_v56 = vadd.f32 %v2686_v16, %v203_v50  ;;  %v2001_v50 = vld [vmem:[%s3726_s1 + $0x48] sm:$0xff]  ;;  %v276_v55 = vadd.f32 %v2686_v16, %v208_v48 }
  0x66   :  { %v272_v57 = vadd.f32 %v2686_v16, %v204_v51  ;;  %v2075_v51 = vunpack.c.h.bf16 %v2489_v42  ;;  %v247_v4 = vadd.f32 %v2686_v16, %v179_v60 }
  0x67   :  { %v335_v58 = vmax.f32 %v271_v56, 0.0 }
  0x68   :  { %v336_v59 = vmax.f32 %v272_v57, 0.0  ;;  %v180_v1 = vmul.f32 %v2673_v11, %v2075_v51 }
  0x6a   :  { %v377_v63 = vpack.c.bf16 %v336_v59, %v335_v58  ;;  %v248_v5 = vadd.f32 %v2686_v16, %v180_v1 }
  0x71   :  { %484 = vmatmul.bf16.gmra.mxu0 %v360_v8  ;;  %564 = vmatmul.bf16.gmra.mxu2 %v376_v40  ;;  %v205_v8 = vmul.f32 %v2673_v11, %v2126_v6  ;;  %v309_v40 = vmax.f32 %v245_v26, 0.0  ;;  %v2078_v26 = vunpack.c.l.bf16 %v2490_v22 }
  0x72   :  { %973 = vmatmul.bf16.gmra.mxu1 %v1997_v9  ;;  %1053 = vmatmul.bf16.gmra.mxu3 %v2013_v41  ;;  %v206_v9 = vmul.f32 %v2673_v11, %v2127_v7  ;;  %v310_v41 = vmax.f32 %v246_v27, 0.0 }
  0x73   :  { %v273_v18 = vadd.f32 %v2686_v16, %v205_v8 }
  0x74   :  { %v274_v19 = vadd.f32 %v2686_v16, %v206_v9  ;;  %v364_v49 = vpack.c.bf16 %v310_v41, %v309_v40  ;;  %v181_v41 = vmul.f32 %v2673_v11, %v2078_v26 }
  0x75   :  { %v337_v20 = vmax.f32 %v273_v18, 0.0 }
  0x76   :  { %v338_v21 = vmax.f32 %v274_v19, 0.0  ;;  %v249_v51 = vadd.f32 %v2686_v16, %v181_v41 }
  0x78   :  { %v378_v25 = vpack.c.bf16 %v338_v21, %v337_v20  ;;  %v311_v20 = vmax.f32 %v247_v4, 0.0  ;;  %v312_v21 = vmax.f32 %v248_v5, 0.0  ;;  %v2491_v4 = vld [vmem:[%s3725_s0 + $0x60] sm:$0xff]   ;;  %v2505_v5 = vld [vmem:[%s3725_s0 + $0xd0] sm:$0xff]  }
  0x81   :  { %489 = vmatmul.bf16.gmra.mxu0 %v361_v30  ;;  %569 = vmatmul.bf16.gmra.mxu2 %v377_v63 }
  0x82   :  { %978 = vmatmul.bf16.gmra.mxu1 %v1998_v31  ;;  %1058 = vmatmul.bf16.gmra.mxu3 %v2014_v62  ;;  %v340_v62 = vmax.f32 %v276_v55, 0.0 }
  0x84   :  { %v379_v3 = vpack.c.bf16 %v340_v62, %v339_v61 }
  0x91   :  { %494 = vmatmul.bf16.gmra.mxu0 %v362_v52  ;;  %574 = vmatmul.bf16.gmra.mxu2 %v378_v25  ;;  %v2135_v25 = vunpack.c.h.bf16 %v2504_v23 }
  0x92   :  { %983 = vmatmul.bf16.gmra.mxu1 %v1999_v53  ;;  %1063 = vmatmul.bf16.gmra.mxu3 %v2015_v24  ;;  %v2134_v24 = vunpack.c.l.bf16 %v2504_v23 }
  0x94   :  { %v209_v27 = vmul.f32 %v2673_v11, %v2134_v24 }
  0x9e   :  { %v460_v15 = vpop.f32.mrf.mxu0 }
  0x9f   :  { %v949_v17 = vpop.f32.mrf.mxu1  ;;  %v1434_v28 = vmul.f32 %v460_v15, %v460_v15 }
  0xa0   :  { %v1641_v29 = vmul.f32 %v949_v17, %v949_v17 }
  0xa1   :  { %499 = vmatmul.bf16.gmra.mxu0 %v363_v10  ;;  %579 = vmatmul.bf16.gmra.mxu2 %v379_v3 }
  0xa2   :  { %988 = vmatmul.bf16.gmra.mxu1 %v2000_v12  ;;  %1068 = vmatmul.bf16.gmra.mxu3 %v2016_v2  ;;  %v313_v2 = vmax.f32 %v249_v51, 0.0 }
  0xa4   :  { %v2904_v13 = vpop.f32.mrf.mxu2 }
  0xa5   :  { %v2906_v14 = vpop.f32.mrf.mxu3 }
  0xa6   :  { %v462_v30 = vpop.f32.mrf.mxu0 }
  0xa7   :  { %v951_v31 = vpop.f32.mrf.mxu1  ;;  %v2163_v32 = vpack.c.bf16 %v462_v30, %v460_v15  ;;  %v1435_v33 = vmul.f32 %v462_v30, %v462_v30  ;;  %v1365_v36 = vadd.f32 %v462_v30, %v460_v15  ;;  %v2079_v30 = vunpack.c.h.bf16 %v2490_v22 }
  0xa8   :  { %v2323_v34 = vpack.c.bf16 %v951_v31, %v949_v17  ;;  %v1642_v35 = vmul.f32 %v951_v31, %v951_v31  ;;  %v1572_v37 = vadd.f32 %v951_v31, %v949_v17 }
  0xa9   :  { %2164 = vst [vmem:[%s3727_s6] sm:$0xff] %v2163_v32   ;;  %v1498_v38 = vadd.f32 %v1435_v33, %v1434_v28  ;;  %v365_v28 = vpack.c.bf16 %v312_v21, %v311_v20  ;;  %v210_v33 = vmul.f32 %v2673_v11, %v2135_v25  ;;  %v182_v46 = vmul.f32 %v2673_v11, %v2079_v30 }
  0xaa   :  { %v1705_v39 = vadd.f32 %v1642_v35, %v1641_v29  ;;  %2324 = vst [vmem:[%s3728_s7] sm:$0xff] %v2323_v34   ;;  %v2002_v29 = vld [vmem:[%s3726_s1 + $0x50] sm:$0xff]  ;;  %v277_v34 = vadd.f32 %v2686_v16, %v209_v27 }
  0xab   :  { %v278_v48 = vadd.f32 %v2686_v16, %v210_v33  ;;  %v2018_v33 = vld [vmem:[%s3726_s1 + $0xd0] sm:$0xff] }
  0xad   :  { %v2928_v40 = vpop.f32.mrf.mxu3 }
  0xae   :  { %v465_v52 = vpop.f32.mrf.mxu0  ;;  %v2403_v43 = vpack.c.bf16 %v2928_v40, %v2906_v14 }
  0xaf   :  { %v954_v53 = vpop.f32.mrf.mxu1  ;;  %v1366_v56 = vadd.f32 %v1365_v36, %v465_v52  ;;  %v1436_v57 = vmul.f32 %v465_v52, %v465_v52 }
  0xb0   :  { %v1573_v58 = vadd.f32 %v1572_v37, %v954_v53  ;;  %v1643_v59 = vmul.f32 %v954_v53, %v954_v53  ;;  %2557 = vst [vmem:[%s3728_s7 + $0x80] sm:$0xff] %v2403_v43  }
  0xb1   :  { %v1499_v63 = vadd.f32 %v1498_v38, %v1436_v57  ;;  %504 = vmatmul.bf16.gmra.mxu0 %v364_v49  ;;  %v341_v49 = vmax.f32 %v277_v34, 0.0 }
  0xb2   :  { %v1706_v0 = vadd.f32 %v1705_v39, %v1643_v59  ;;  %993 = vmatmul.bf16.gmra.mxu1 %v2001_v50  ;;  %v2926_v39 = vpop.f32.mrf.mxu2  ;;  %1073 = vmatmul.bf16.gmra.mxu3 %v2017_v47  ;;  %v342_v50 = vmax.f32 %v278_v48, 0.0 }
  0xb3   :  { %v2243_v42 = vpack.c.bf16 %v2926_v39, %v2904_v13 }
  0xb4   :  { %v380_v55 = vpack.c.bf16 %v342_v50, %v341_v49 }
  0xb5   :  { %2526 = vst [vmem:[%s3727_s6 + $0x80] sm:$0xff] %v2243_v42   ;;  %v2950_v61 = vpop.f32.mrf.mxu3 }
  0xb6   :  { %v467_v6 = vpop.f32.mrf.mxu0  ;;  %584 = vmatmul.bf16.gmra.mxu2 %v380_v55 }
  0xb7   :  { %v956_v7 = vpop.f32.mrf.mxu1  ;;  %v2168_v8 = vpack.c.bf16 %v467_v6, %v465_v52  ;;  %v1437_v9 = vmul.f32 %v467_v6, %v467_v6  ;;  %v1367_v15 = vadd.f32 %v1366_v56, %v467_v6  ;;  %v250_v52 = vadd.f32 %v2686_v16, %v182_v46 }
  0xb8   :  { %v2328_v10 = vpack.c.bf16 %v956_v7, %v954_v53  ;;  %v1644_v12 = vmul.f32 %v956_v7, %v956_v7  ;;  %v1574_v17 = vadd.f32 %v1573_v58, %v956_v7  ;;  %v2138_v6 = vunpack.c.l.bf16 %v2505_v5 }
  0xb9   :  { %2511 = vst [vmem:[%s3727_s6 + $0x8] sm:$0xff] %v2168_v8   ;;  %v1500_v18 = vadd.f32 %v1499_v63, %v1437_v9  ;;  %v314_v3 = vmax.f32 %v250_v52, 0.0  ;;  %v2139_v7 = vunpack.c.h.bf16 %v2505_v5  ;;  %v2082_v8 = vunpack.c.l.bf16 %v2491_v4 }
  0xba   :  { %v1707_v19 = vadd.f32 %v1706_v0, %v1644_v12  ;;  %2542 = vst [vmem:[%s3728_s7 + $0x8] sm:$0xff] %v2328_v10   ;;  %v2948_v60 = vpop.f32.mrf.mxu2  ;;  %v211_v9 = vmul.f32 %v2673_v11, %v2138_v6  ;;  %v2003_v12 = vld [vmem:[%s3726_s1 + $0x58] sm:$0xff] }
  0xbb   :  { %v366_v10 = vpack.c.bf16 %v314_v3, %v313_v2  ;;  %v183_v27 = vmul.f32 %v2673_v11, %v2082_v8 }
  0xbc   :  { %v279_v20 = vadd.f32 %v2686_v16, %v211_v9 }
  0xbd   :  { %v2972_v26 = vpop.f32.mrf.mxu3 }
  0xbe   :  { %v470_v31 = vpop.f32.mrf.mxu0 }
  0xbf   :  { %v959_v32 = vpop.f32.mrf.mxu1  ;;  %v1368_v35 = vadd.f32 %v1367_v15, %v470_v31  ;;  %v1438_v36 = vmul.f32 %v470_v31, %v470_v31  ;;  %v2083_v15 = vunpack.c.h.bf16 %v2491_v4 }
  0xc0   :  { %v1575_v37 = vadd.f32 %v1574_v17, %v959_v32  ;;  %v1645_v38 = vmul.f32 %v959_v32, %v959_v32 }
  0xc1   :  { %v1501_v44 = vadd.f32 %v1500_v18, %v1438_v36  ;;  %509 = vmatmul.bf16.gmra.mxu0 %v365_v28 }
  0xc2   :  { %v1708_v45 = vadd.f32 %v1707_v19, %v1645_v38  ;;  %998 = vmatmul.bf16.gmra.mxu1 %v2002_v29  ;;  %v212_v19 = vmul.f32 %v2673_v11, %v2139_v7  ;;  %v2970_v25 = vpop.f32.mrf.mxu2  ;;  %v2408_v29 = vpack.c.bf16 %v2972_v26, %v2950_v61  ;;  %1078 = vmatmul.bf16.gmra.mxu3 %v2018_v33 }
  0xc3   :  { %v2248_v28 = vpack.c.bf16 %v2970_v25, %v2948_v60 }
  0xc4   :  { %v280_v34 = vadd.f32 %v2686_v16, %v212_v19  ;;  %2558 = vst [vmem:[%s3728_s7 + $0x88] sm:$0xff] %v2408_v29  }
  0xc5   :  { %2527 = vst [vmem:[%s3727_s6 + $0x88] sm:$0xff] %v2248_v28   ;;  %v2994_v49 = vpop.f32.mrf.mxu3 }
  0xc6   :  { %v472_v53 = vpop.f32.mrf.mxu0  ;;  %v344_v36 = vmax.f32 %v280_v34, 0.0 }
  0xc7   :  { %v961_v54 = vpop.f32.mrf.mxu1  ;;  %v2173_v56 = vpack.c.bf16 %v472_v53, %v470_v31  ;;  %v1439_v57 = vmul.f32 %v472_v53, %v472_v53  ;;  %v1369_v62 = vadd.f32 %v1368_v35, %v472_v53  ;;  %v343_v35 = vmax.f32 %v279_v20, 0.0 }
  0xc8   :  { %v2333_v58 = vpack.c.bf16 %v961_v54, %v959_v32  ;;  %v1646_v59 = vmul.f32 %v961_v54, %v961_v54  ;;  %v1576_v63 = vadd.f32 %v1575_v37, %v961_v54  ;;  %v184_v32 = vmul.f32 %v2673_v11, %v2083_v15 }
  0xc9   :  { %2512 = vst [vmem:[%s3727_s6 + $0x10] sm:$0xff] %v2173_v56   ;;  %v1502_v0 = vadd.f32 %v1501_v44, %v1439_v57  ;;  %v251_v37 = vadd.f32 %v2686_v16, %v183_v27  ;;  %v381_v43 = vpack.c.bf16 %v344_v36, %v343_v35  ;;  %v2492_v56 = vld [vmem:[%s3725_s0 + $0x68] sm:$0xff]   ;;  %v2506_v57 = vld [vmem:[%s3725_s0 + $0xd8] sm:$0xff]  }
  0xca   :  { %v1709_v1 = vadd.f32 %v1708_v45, %v1646_v59  ;;  %2543 = vst [vmem:[%s3728_s7 + $0x10] sm:$0xff] %v2333_v58   ;;  %v252_v38 = vadd.f32 %v2686_v16, %v184_v32  ;;  %v2992_v48 = vpop.f32.mrf.mxu2  ;;  %v2142_v58 = vunpack.c.l.bf16 %v2506_v57  ;;  %v2143_v59 = vunpack.c.h.bf16 %v2506_v57 }
  0xcb   :  { %589 = vmatmul.bf16.gmra.mxu2 %v381_v43  ;;  %v315_v54 = vmax.f32 %v251_v37, 0.0  ;;  %v2087_v2 = vunpack.c.h.bf16 %v2492_v56 }
  0xcc   :  { %v316_v55 = vmax.f32 %v252_v38, 0.0  ;;  %v214_v5 = vmul.f32 %v2673_v11, %v2143_v59 }
  0xcd   :  { %v3016_v15 = vpop.f32.mrf.mxu3 }
  0xce   :  { %v475_v17 = vpop.f32.mrf.mxu0  ;;  %v2413_v19 = vpack.c.bf16 %v3016_v15, %v2994_v49 }
  0xcf   :  { %v964_v18 = vpop.f32.mrf.mxu1  ;;  %v1370_v21 = vadd.f32 %v1369_v62, %v475_v17  ;;  %v1440_v22 = vmul.f32 %v475_v17, %v475_v17  ;;  %v2086_v62 = vunpack.c.l.bf16 %v2492_v56  ;;  %v2005_v56 = vld [vmem:[%s3726_s1 + $0x68] sm:$0xff] }
  0xd0   :  { %v1577_v23 = vadd.f32 %v1576_v63, %v964_v18  ;;  %v1647_v24 = vmul.f32 %v964_v18, %v964_v18  ;;  %v213_v63 = vmul.f32 %v2673_v11, %v2142_v58  ;;  %2559 = vst [vmem:[%s3728_s7 + $0x90] sm:$0xff] %v2413_v19  }
  0xd1   :  { %v1503_v30 = vadd.f32 %v1502_v0, %v1440_v22  ;;  %514 = vmatmul.bf16.gmra.mxu0 %v366_v10  ;;  %v367_v0 = vpack.c.bf16 %v316_v55, %v315_v54  ;;  %v186_v22 = vmul.f32 %v2673_v11, %v2087_v2 }
  0xd2   :  { %v1710_v31 = vadd.f32 %v1709_v1, %v1647_v24  ;;  %1003 = vmatmul.bf16.gmra.mxu1 %v2003_v12  ;;  %v2004_v1 = vld [vmem:[%s3726_s1 + $0x60] sm:$0xff]  ;;  %v281_v6 = vadd.f32 %v2686_v16, %v213_v63  ;;  %v3014_v12 = vpop.f32.mrf.mxu2  ;;  %v282_v24 = vadd.f32 %v2686_v16, %v214_v5 }
  0xd4   :  { %v345_v27 = vmax.f32 %v281_v6, 0.0  ;;  %v346_v28 = vmax.f32 %v282_v24, 0.0 }
  0xd6   :  { %v477_v41 = vpop.f32.mrf.mxu0  ;;  %v382_v33 = vpack.c.bf16 %v346_v28, %v345_v27 }
  0xd7   :  { %v966_v42 = vpop.f32.mrf.mxu1  ;;  %v2178_v44 = vpack.c.bf16 %v477_v41, %v475_v17  ;;  %v1441_v45 = vmul.f32 %v477_v41, %v477_v41  ;;  %v1371_v50 = vadd.f32 %v1370_v21, %v477_v41  ;;  %v185_v17 = vmul.f32 %v2673_v11, %v2086_v62  ;;  %v3038_v41 = vpop.f32.mrf.mxu3 }
  0xd8   :  { %v2338_v46 = vpack.c.bf16 %v966_v42, %v964_v18  ;;  %v1648_v47 = vmul.f32 %v966_v42, %v966_v42  ;;  %v1578_v51 = vadd.f32 %v1577_v23, %v966_v42  ;;  %v2253_v18 = vpack.c.bf16 %v3014_v12, %v2992_v48  ;;  %v2019_v23 = vld [vmem:[%s3726_s1 + $0xd8] sm:$0xff] }
  0xd9   :  { %2513 = vst [vmem:[%s3727_s6 + $0x18] sm:$0xff] %v2178_v44   ;;  %v1504_v52 = vadd.f32 %v1503_v30, %v1441_v45  ;;  %1083 = vmatmul.bf16.gmra.mxu3 %v2019_v23  ;;  %v253_v29 = vadd.f32 %v2686_v16, %v185_v17  ;;  %v254_v30 = vadd.f32 %v2686_v16, %v186_v22  ;;  %v3082_v23 = vld [vmem:[%s3724_s3] ss:$0 sm:$0xff] }
  0xda   :  { %v1711_v53 = vadd.f32 %v1710_v31, %v1648_v47  ;;  %2544 = vst [vmem:[%s3728_s7 + $0x18] sm:$0xff] %v2338_v46   ;;  %v3036_v38 = vpop.f32.mrf.mxu2  ;;  %v2493_v47 = vld [vmem:[%s3725_s0 + $0x70] sm:$0xff]  }
  0xdb   :  { %2528 = vst [vmem:[%s3727_s6 + $0x90] sm:$0xff] %v2253_v18   ;;  %594 = vmatmul.bf16.gmra.mxu2 %v382_v33  ;;  %v317_v45 = vmax.f32 %v253_v29, 0.0  ;;  %v318_v46 = vmax.f32 %v254_v30, 0.0  ;;  %v2090_v54 = vunpack.c.l.bf16 %v2493_v47  ;;  %v2091_v57 = vunpack.c.h.bf16 %v2493_v47  ;;  %v2020_v18 = vld [vmem:[%s3726_s1 + $0xe0] sm:$0xff] }
  0xdd   :  { %v368_v55 = vpack.c.bf16 %v318_v46, %v317_v45  ;;  %v187_v6 = vmul.f32 %v2673_v11, %v2090_v54  ;;  %v188_v17 = vmul.f32 %v2673_v11, %v2091_v57  ;;  %v2508_v45 = vld [vmem:[%s3725_s0 + $0xe8] sm:$0xff]   ;;  %v2006_v57 = vld [vmem:[%s3726_s1 + $0x70] sm:$0xff] }
  0xde   :  { %v480_v3 = vpop.f32.mrf.mxu0  ;;  %v2150_v47 = vunpack.c.l.bf16 %v2508_v45 }
  0xdf   :  { %v969_v4 = vpop.f32.mrf.mxu1  ;;  %v1372_v7 = vadd.f32 %v1371_v50, %v480_v3  ;;  %v1442_v8 = vmul.f32 %v480_v3, %v480_v3  ;;  %v2507_v50 = vld [vmem:[%s3725_s0 + $0xe0] sm:$0xff]   ;;  %v3059_v5 = vpop.f32.mrf.mxu3  ;;  %v256_v24 = vadd.f32 %v3082_v23, %v188_v17 }
  0xe0   :  { %v1579_v9 = vadd.f32 %v1578_v51, %v969_v4  ;;  %v1649_v10 = vmul.f32 %v969_v4, %v969_v4 }
  0xe1   :  { %v1505_v20 = vadd.f32 %v1504_v52, %v1442_v8  ;;  %519 = vmatmul.bf16.gmra.mxu0 %v367_v0  ;;  %v2146_v52 = vunpack.c.l.bf16 %v2507_v50  ;;  %v2418_v8 = vpack.c.bf16 %v3059_v5, %v3038_v41 }
  0xe2   :  { %v1712_v21 = vadd.f32 %v1711_v53, %v1649_v10  ;;  %1008 = vmatmul.bf16.gmra.mxu1 %v2004_v1  ;;  %v2147_v53 = vunpack.c.h.bf16 %v2507_v50  ;;  %v2151_v50 = vunpack.c.h.bf16 %v2508_v45 }
  0xe3   :  { %v215_v62 = vmul.f32 %v2673_v11, %v2146_v52  ;;  %2560 = vst [vmem:[%s3728_s7 + $0x98] sm:$0xff] %v2418_v8  }
  0xe4   :  { %v216_v63 = vmul.f32 %v2673_v11, %v2147_v53  ;;  %v255_v11 = vadd.f32 %v2686_v16, %v187_v6  ;;  %v3104_v53 = vld [vmem:[%s3723_s2] ss:$0 sm:$0xff] }
  0xe5   :  { %v283_v19 = vadd.f32 %v2686_v16, %v215_v62  ;;  %v217_v54 = vmul.f32 %v3104_v53, %v2150_v47 }
  0xe6   :  { %v482_v31 = vpop.f32.mrf.mxu0 }
  0xe7   :  { %v971_v32 = vpop.f32.mrf.mxu1  ;;  %v2183_v34 = vpack.c.bf16 %v482_v31, %v480_v3  ;;  %v1373_v35 = vadd.f32 %v1372_v7, %v482_v31  ;;  %v1443_v36 = vmul.f32 %v482_v31, %v482_v31  ;;  %v285_v62 = vadd.f32 %v3082_v23, %v217_v54 }
  0xe8   :  { %v2343_v37 = vpack.c.bf16 %v971_v32, %v969_v4  ;;  %v1580_v42 = vadd.f32 %v1579_v9, %v971_v32  ;;  %v1650_v43 = vmul.f32 %v971_v32, %v971_v32  ;;  %v3057_v4 = vpop.f32.mrf.mxu2 }
  0xe9   :  { %2514 = vst [vmem:[%s3727_s6 + $0x20] sm:$0xff] %v2183_v34   ;;  %v1506_v44 = vadd.f32 %v1505_v20, %v1443_v36  ;;  %v2258_v7 = vpack.c.bf16 %v3057_v4, %v3036_v38  ;;  %v284_v20 = vadd.f32 %v2686_v16, %v216_v63  ;;  %1088 = vmatmul.bf16.gmra.mxu3 %v2020_v18 }
  0xea   :  { %2545 = vst [vmem:[%s3728_s7 + $0x20] sm:$0xff] %v2343_v37   ;;  %v1713_v51 = vadd.f32 %v1712_v21, %v1650_v43  ;;  %v347_v21 = vmax.f32 %v283_v19, 0.0  ;;  %v320_v43 = vmax.f32 %v256_v24, 0.0 }
  0xeb   :  { %2529 = vst [vmem:[%s3727_s6 + $0x98] sm:$0xff] %v2258_v7   ;;  %v348_v22 = vmax.f32 %v284_v20, 0.0  ;;  %v349_v20 = vmax.f32 %v285_v62, 0.0 }
  0xed   :  { %v383_v29 = vpack.c.bf16 %v348_v22, %v347_v21  ;;  %v2021_v22 = vld [vmem:[%s3726_s1 + $0xe8] sm:$0xff] }
  0xee   :  { %v485_v58 = vpop.f32.mrf.mxu0 }
  0xef   :  { %v974_v59 = vpop.f32.mrf.mxu1  ;;  %v1374_v0 = vadd.f32 %v1373_v35, %v485_v58  ;;  %v1444_v1 = vmul.f32 %v485_v58, %v485_v58  ;;  %v3087_v35 = vpop.f32.mrf.mxu3  ;;  %599 = vmatmul.bf16.gmra.mxu2 %v383_v29 }
  0xf0   :  { %v1581_v2 = vadd.f32 %v1580_v42, %v974_v59  ;;  %v1651_v3 = vmul.f32 %v974_v59, %v974_v59  ;;  %v3085_v34 = vpop.f32.mrf.mxu2  ;;  %v319_v42 = vmax.f32 %v255_v11, 0.0 }
  0xf1   :  { %v1507_v9 = vadd.f32 %v1506_v44, %v1444_v1  ;;  %524 = vmatmul.bf16.gmra.mxu0 %v368_v55  ;;  %v2494_v44 = vld [vmem:[%s3725_s0 + $0x78] sm:$0xff]   ;;  %v218_v55 = vmul.f32 %v3104_v53, %v2151_v50 }
  0xf2   :  { %v1714_v10 = vadd.f32 %v1713_v51, %v1651_v3  ;;  %1013 = vmatmul.bf16.gmra.mxu1 %v2005_v56  ;;  %v2094_v51 = vunpack.c.l.bf16 %v2494_v44  ;;  %v2095_v52 = vunpack.c.h.bf16 %v2494_v44  ;;  %v369_v56 = vpack.c.bf16 %v320_v43, %v319_v42 }
  0xf3   :  { %v286_v63 = vadd.f32 %v3082_v23, %v218_v55 }
  0xf4   :  { %v189_v8 = vmul.f32 %v3104_v53, %v2094_v51 }
  0xf5   :  { %v350_v21 = vmax.f32 %v286_v63, 0.0 }
  0xf6   :  { %v487_v27 = vpop.f32.mrf.mxu0  ;;  %v257_v24 = vadd.f32 %v3082_v23, %v189_v8 }
  0xf7   :  { %v976_v28 = vpop.f32.mrf.mxu1  ;;  %v2188_v30 = vpack.c.bf16 %v487_v27, %v485_v58  ;;  %v1375_v31 = vadd.f32 %v1374_v0, %v487_v27  ;;  %v1445_v32 = vmul.f32 %v487_v27, %v487_v27  ;;  %v3115_v7 = vpop.f32.mrf.mxu3  ;;  %v384_v11 = vpack.c.bf16 %v350_v21, %v349_v20  ;;  %v2022_v21 = vld [vmem:[%s3726_s1 + $0xf0] sm:$0xff] }
  0xf8   :  { %v2348_v33 = vpack.c.bf16 %v976_v28, %v974_v59  ;;  %v1582_v36 = vadd.f32 %v1581_v2, %v976_v28  ;;  %v1652_v16 = vmul.f32 %v976_v28, %v976_v28  ;;  %v3113_v6 = vpop.f32.mrf.mxu2  ;;  %v2423_v17 = vpack.c.bf16 %v3115_v7, %v3087_v35 }
  0xf9   :  { %2515 = vst [vmem:[%s3727_s6 + $0x28] sm:$0xff] %v2188_v30   ;;  %v1508_v37 = vadd.f32 %v1507_v9, %v1445_v32  ;;  %v190_v9 = vmul.f32 %v3104_v53, %v2095_v52  ;;  %1093 = vmatmul.bf16.gmra.mxu3 %v2021_v22  ;;  %v321_v44 = vmax.f32 %v257_v24, 0.0 }
  0xfa   :  { %2546 = vst [vmem:[%s3728_s7 + $0x28] sm:$0xff] %v2348_v33   ;;  %v1715_v46 = vadd.f32 %v1714_v10, %v1652_v16  ;;  %v2263_v10 = vpack.c.bf16 %v3113_v6, %v3085_v34 }
  0xfb   :  { %2561 = vst [vmem:[%s3728_s7 + $0xa0] sm:$0xff] %v2423_v17   ;;  %v258_v27 = vadd.f32 %v3082_v23, %v190_v9 }
  0xfc   :  { %2530 = vst [vmem:[%s3727_s6 + $0xa0] sm:$0xff] %v2263_v10  }
  0xfd   :  { %v322_v45 = vmax.f32 %v258_v27, 0.0 }
  0xfe   :  { %v490_v58 = vpop.f32.mrf.mxu0 }
  0xff   :  { %v979_v59 = vpop.f32.mrf.mxu1  ;;  %v1376_v0 = vadd.f32 %v1375_v31, %v490_v58  ;;  %v1446_v1 = vmul.f32 %v490_v58, %v490_v58  ;;  %v3136_v16 = vpop.f32.mrf.mxu3  ;;  %604 = vmatmul.bf16.gmra.mxu2 %v384_v11  ;;  %v370_v55 = vpack.c.bf16 %v322_v45, %v321_v44 }
 0x100   :  { %v1583_v2 = vadd.f32 %v1582_v36, %v979_v59  ;;  %v1653_v3 = vmul.f32 %v979_v59, %v979_v59  ;;  %v3134_v36 = vpop.f32.mrf.mxu2 }
 0x101   :  { %v1509_v18 = vadd.f32 %v1508_v37, %v1446_v1  ;;  %529 = vmatmul.bf16.gmra.mxu0 %v369_v56  ;;  %v2007_v56 = vld [vmem:[%s3726_s1 + $0x78] sm:$0xff] }
 0x102   :  { %v1716_v19 = vadd.f32 %v1715_v46, %v1653_v3  ;;  %1018 = vmatmul.bf16.gmra.mxu1 %v2006_v57  ;;  %v2509_v46 = vld [vmem:[%s3725_s0 + $0xf0] sm:$0xff]  }
 0x103   :  { %v2154_v50 = vunpack.c.l.bf16 %v2509_v46  ;;  %v2155_v51 = vunpack.c.h.bf16 %v2509_v46 }
 0x105   :  { %v219_v52 = vmul.f32 %v3104_v53, %v2154_v50  ;;  %v220_v54 = vmul.f32 %v3104_v53, %v2155_v51 }
 0x106   :  { %v492_v28 = vpop.f32.mrf.mxu0 }
 0x107   :  { %v981_v29 = vpop.f32.mrf.mxu1  ;;  %v2193_v30 = vpack.c.bf16 %v492_v28, %v490_v58  ;;  %v1377_v31 = vadd.f32 %v1376_v0, %v492_v28  ;;  %v1447_v32 = vmul.f32 %v492_v28, %v492_v28  ;;  %v288_v62 = vadd.f32 %v3082_v23, %v220_v54  ;;  %v3156_v8 = vpop.f32.mrf.mxu3 }
 0x108   :  { %v2353_v33 = vpack.c.bf16 %v981_v29, %v979_v59  ;;  %v1584_v37 = vadd.f32 %v1583_v2, %v981_v29  ;;  %v1654_v42 = vmul.f32 %v981_v29, %v981_v29  ;;  %v287_v59 = vadd.f32 %v3082_v23, %v219_v52  ;;  %v3154_v3 = vpop.f32.mrf.mxu2 }
 0x109   :  { %2516 = vst [vmem:[%s3727_s6 + $0x30] sm:$0xff] %v2193_v30   ;;  %v1510_v43 = vadd.f32 %v1509_v18, %v1447_v32  ;;  %v2268_v9 = vpack.c.bf16 %v3154_v3, %v3134_v36  ;;  %v2428_v10 = vpack.c.bf16 %v3156_v8, %v3136_v16  ;;  %v352_v20 = vmax.f32 %v288_v62, 0.0  ;;  %1098 = vmatmul.bf16.gmra.mxu3 %v2022_v21 }
 0x10a   :  { %2547 = vst [vmem:[%s3728_s7 + $0x30] sm:$0xff] %v2353_v33   ;;  %v1717_v47 = vadd.f32 %v1716_v19, %v1654_v42  ;;  %v351_v19 = vmax.f32 %v287_v59, 0.0 }
 0x10b   :  { %2531 = vst [vmem:[%s3727_s6 + $0xa8] sm:$0xff] %v2268_v9  }
 0x10c   :  { %2562 = vst [vmem:[%s3728_s7 + $0xa8] sm:$0xff] %v2428_v10   ;;  %v385_v22 = vpack.c.bf16 %v352_v20, %v351_v19 }
 0x10e   :  { %v495_v57 = vpop.f32.mrf.mxu0 }
 0x10f   :  { %v984_v58 = vpop.f32.mrf.mxu1  ;;  %v1378_v63 = vadd.f32 %v1377_v31, %v495_v57  ;;  %v1448_v0 = vmul.f32 %v495_v57, %v495_v57  ;;  %v3173_v32 = vpop.f32.mrf.mxu3  ;;  %609 = vmatmul.bf16.gmra.mxu2 %v385_v22 }
 0x110   :  { %v1585_v1 = vadd.f32 %v1584_v37, %v984_v58  ;;  %v1655_v2 = vmul.f32 %v984_v58, %v984_v58  ;;  %v3171_v31 = vpop.f32.mrf.mxu2 }
 0x111   :  { %v1511_v17 = vadd.f32 %v1510_v43, %v1448_v0  ;;  %534 = vmatmul.bf16.gmra.mxu0 %v370_v55  ;;  %v2510_v43 = vld [vmem:[%s3725_s0 + $0xf8] sm:$0xff]  }
 0x112   :  { %v1718_v18 = vadd.f32 %v1717_v47, %v1655_v2  ;;  %1023 = vmatmul.bf16.gmra.mxu1 %v2007_v56  ;;  %v2158_v45 = vunpack.c.l.bf16 %v2510_v43  ;;  %v2159_v46 = vunpack.c.h.bf16 %v2510_v43 }
 0x114   :  { %v221_v47 = vmul.f32 %v3104_v53, %v2158_v45  ;;  %v222_v50 = vmul.f32 %v3104_v53, %v2159_v46 }
 0x116   :  { %v497_v11 = vpop.f32.mrf.mxu0  ;;  %v289_v54 = vadd.f32 %v3082_v23, %v221_v47  ;;  %v290_v55 = vadd.f32 %v3082_v23, %v222_v50  ;;  %v2023_v23 = vld [vmem:[%s3726_s1 + $0xf8] sm:$0xff] }
 0x117   :  { %v986_v24 = vpop.f32.mrf.mxu1  ;;  %v2198_v27 = vpack.c.bf16 %v497_v11, %v495_v57  ;;  %v1379_v28 = vadd.f32 %v1378_v63, %v497_v11  ;;  %v1449_v29 = vmul.f32 %v497_v11, %v497_v11  ;;  %v3190_v63 = vpop.f32.mrf.mxu3 }
 0x118   :  { %v2358_v30 = vpack.c.bf16 %v986_v24, %v984_v58  ;;  %v1586_v33 = vadd.f32 %v1585_v1, %v986_v24  ;;  %v1656_v37 = vmul.f32 %v986_v24, %v986_v24  ;;  %v3188_v62 = vpop.f32.mrf.mxu2  ;;  %v2433_v53 = vpack.c.bf16 %v3190_v63, %v3173_v32 }
 0x119   :  { %2517 = vst [vmem:[%s3727_s6 + $0x38] sm:$0xff] %v2198_v27   ;;  %v1512_v42 = vadd.f32 %v1511_v17, %v1449_v29  ;;  %v2273_v0 = vpack.c.bf16 %v3188_v62, %v3171_v31  ;;  %v353_v9 = vmax.f32 %v289_v54, 0.0  ;;  %v354_v10 = vmax.f32 %v290_v55, 0.0  ;;  %1103 = vmatmul.bf16.gmra.mxu3 %v2023_v23 }
 0x11a   :  { %2548 = vst [vmem:[%s3728_s7 + $0x38] sm:$0xff] %v2358_v30   ;;  %v1719_v44 = vadd.f32 %v1718_v18, %v1656_v37 }
 0x11b   :  { %2532 = vst [vmem:[%s3727_s6 + $0xb0] sm:$0xff] %v2273_v0   ;;  %v386_v17 = vpack.c.bf16 %v354_v10, %v353_v9 }
 0x11c   :  { %2563 = vst [vmem:[%s3728_s7 + $0xb0] sm:$0xff] %v2433_v53  }
 0x11e   :  { %v500_v51 = vpop.f32.mrf.mxu0 }
 0x11f   :  { %v989_v52 = vpop.f32.mrf.mxu1  ;;  %v1380_v56 = vadd.f32 %v1379_v28, %v500_v51  ;;  %v1450_v57 = vmul.f32 %v500_v51, %v500_v51  ;;  %v3207_v27 = vpop.f32.mrf.mxu3  ;;  %614 = vmatmul.bf16.gmra.mxu2 %v386_v17 }
 0x120   :  { %v1587_v58 = vadd.f32 %v1586_v33, %v989_v52  ;;  %v1657_v59 = vmul.f32 %v989_v52, %v989_v52  ;;  %v3205_v24 = vpop.f32.mrf.mxu2 }
 0x121   :  { %v1513_v1 = vadd.f32 %v1512_v42, %v1450_v57 }
 0x122   :  { %v1720_v2 = vadd.f32 %v1719_v44, %v1657_v59 }
 0x126   :  { %v502_v18 = vpop.f32.mrf.mxu0 }
 0x127   :  { %v991_v19 = vpop.f32.mrf.mxu1  ;;  %v2203_v20 = vpack.c.bf16 %v502_v18, %v500_v51  ;;  %v1381_v21 = vadd.f32 %v1380_v56, %v502_v18  ;;  %v1451_v22 = vmul.f32 %v502_v18, %v502_v18  ;;  %v3217_v50 = vpop.f32.mrf.mxu3 }
 0x128   :  { %v2363_v11 = vpack.c.bf16 %v991_v19, %v989_v52  ;;  %v1588_v28 = vadd.f32 %v1587_v58, %v991_v19  ;;  %v1658_v29 = vmul.f32 %v991_v19, %v991_v19  ;;  %v3215_v47 = vpop.f32.mrf.mxu2  ;;  %3771 = vst [vmem:[#allocation2_spill] sm:$0xff] %v3217_v50  ;;  %v2438_v52 = vpack.c.bf16 %v3217_v50, %v3207_v27 }
 0x129   :  { %2518 = vst [vmem:[%s3727_s6 + $0x40] sm:$0xff] %v2203_v20   ;;  %v1514_v30 = vadd.f32 %v1513_v1, %v1451_v22  ;;  %v2278_v51 = vpack.c.bf16 %v3215_v47, %v3205_v24 }
 0x12a   :  { %2549 = vst [vmem:[%s3728_s7 + $0x40] sm:$0xff] %v2363_v11   ;;  %v1721_v33 = vadd.f32 %v1720_v2, %v1658_v29 }
 0x12b   :  { %2533 = vst [vmem:[%s3727_s6 + $0xb8] sm:$0xff] %v2278_v51  }
 0x12c   :  { %2564 = vst [vmem:[%s3728_s7 + $0xb8] sm:$0xff] %v2438_v52  }
 0x12e   :  { %v505_v37 = vpop.f32.mrf.mxu0 }
 0x12f   :  { %v994_v42 = vpop.f32.mrf.mxu1  ;;  %v1382_v43 = vadd.f32 %v1381_v21, %v505_v37  ;;  %v1452_v44 = vmul.f32 %v505_v37, %v505_v37  ;;  %v3231_v2 = vpop.f32.mrf.mxu3 }
 0x130   :  { %v1589_v45 = vadd.f32 %v1588_v28, %v994_v42  ;;  %v1659_v46 = vmul.f32 %v994_v42, %v994_v42  ;;  %v3229_v1 = vpop.f32.mrf.mxu2  ;;  %3773 = vst [vmem:[#allocation4_spill] sm:$0xff] %v3231_v2 }
 0x131   :  { %v1515_v54 = vadd.f32 %v1514_v30, %v1452_v44  ;;  %3772 = vst [vmem:[#allocation3_spill] sm:$0xff] %v3229_v1 }
 0x132   :  { %v1722_v55 = vadd.f32 %v1721_v33, %v1659_v46 }
 0x136   :  { %v507_v56 = vpop.f32.mrf.mxu0 }
 0x137   :  { %v996_v57 = vpop.f32.mrf.mxu1  ;;  %v2208_v58 = vpack.c.bf16 %v507_v56, %v505_v37  ;;  %v1383_v59 = vadd.f32 %v1382_v43, %v507_v56  ;;  %v1453_v0 = vmul.f32 %v507_v56, %v507_v56  ;;  %v3245_v29 = vpop.f32.mrf.mxu3 }
 0x138   :  { %v2368_v53 = vpack.c.bf16 %v996_v57, %v994_v42  ;;  %v1590_v9 = vadd.f32 %v1589_v45, %v996_v57  ;;  %v1660_v10 = vmul.f32 %v996_v57, %v996_v57  ;;  %v3243_v28 = vpop.f32.mrf.mxu2  ;;  %3775 = vst [vmem:[#allocation6_spill] sm:$0xff] %v3245_v29  ;;  %v2443_v33 = vpack.c.bf16 %v3245_v29, %v3231_v2 }
 0x139   :  { %2519 = vst [vmem:[%s3727_s6 + $0x48] sm:$0xff] %v2208_v58   ;;  %v1516_v23 = vadd.f32 %v1515_v54, %v1453_v0  ;;  %v2283_v30 = vpack.c.bf16 %v3243_v28, %v3229_v1 }
 0x13a   :  { %2550 = vst [vmem:[%s3728_s7 + $0x48] sm:$0xff] %v2368_v53   ;;  %v1723_v17 = vadd.f32 %v1722_v55, %v1660_v10 }
 0x13b   :  { %3774 = vst [vmem:[#allocation5_spill] sm:$0xff] %v3243_v28 }
 0x13c   :  { %2534 = vst [vmem:[%s3727_s6 + $0xc0] sm:$0xff] %v2283_v30  }
 0x13d   :  { %2565 = vst [vmem:[%s3728_s7 + $0xc0] sm:$0xff] %v2443_v33  }
 0x13e   :  { %v510_v18 = vpop.f32.mrf.mxu0 }
 0x13f   :  { %v999_v19 = vpop.f32.mrf.mxu1  ;;  %v3239_v20 = vadd.f32 %v1383_v59, %v510_v18  ;;  %v1454_v21 = vmul.f32 %v510_v18, %v510_v18  ;;  %v3267_v51 = vpop.f32.mrf.mxu3 }
 0x140   :  { %v3241_v22 = vadd.f32 %v1590_v9, %v999_v19  ;;  %v1661_v11 = vmul.f32 %v999_v19, %v999_v19  ;;  %3776 = vst [vmem:[#allocation7_spill] sm:$0xff] %v3267_v51  ;;  %v3275_v52 = vpop.f32.mrf.mxu2 }
 0x141   :  { %v3251_v37 = vadd.f32 %v1516_v23, %v1454_v21  ;;  %3777 = vst [vmem:[#allocation8_spill] sm:$0xff] %v3275_v52 }
 0x142   :  { %v3253_v42 = vadd.f32 %v1723_v17, %v1661_v11 }
 0x146   :  { %v3261_v43 = vpop.f32.mrf.mxu0 }
 0x147   :  { %v3263_v44 = vpop.f32.mrf.mxu1  ;;  %v2213_v45 = vpack.c.bf16 %v3261_v43, %v510_v18  ;;  %v3281_v56 = vpop.f32.mrf.mxu3  ;;  %v1385_v29 = vadd.f32 %v3239_v20, %v3261_v43 }
 0x148   :  { %v2373_v46 = vpack.c.bf16 %v3263_v44, %v999_v19  ;;  %3778 = vst [vmem:[#allocation9_spill] sm:$0xff] %v3281_v56  ;;  %v2448_v57 = vpack.c.bf16 %v3281_v56, %v3267_v51  ;;  %v3288_v58 = vpop.f32.mrf.mxu2  ;;  %v1662_v51 = vmul.f32 %v3263_v44, %v3263_v44  ;;  %v1592_v28 = vadd.f32 %v3241_v22, %v3263_v44 }
 0x149   :  { %2520 = vst [vmem:[%s3727_s6 + $0x50] sm:$0xff] %v2213_v45   ;;  %v2288_v59 = vpack.c.bf16 %v3288_v58, %v3275_v52 }
 0x14a   :  { %2551 = vst [vmem:[%s3728_s7 + $0x50] sm:$0xff] %v2373_v46  }
 0x14b   :  { %2566 = vst [vmem:[%s3728_s7 + $0xc8] sm:$0xff] %v2448_v57  }
 0x14c   :  { %3779 = vst [vmem:[#allocation10_spill] sm:$0xff] %v3288_v58  ;;  %v1455_v58 = vmul.f32 %v3261_v43, %v3261_v43 }
 0x14d   :  { %2535 = vst [vmem:[%s3727_s6 + $0xc8] sm:$0xff] %v2288_v59  }
 0x14e   :  { %v3277_v54 = vpop.f32.mrf.mxu0 }
 0x14f   :  { %v3279_v55 = vpop.f32.mrf.mxu1  ;;  %v3303_v23 = vpop.f32.mrf.mxu3 }
 0x150   :  { %3780 = vst [vmem:[#allocation11_spill] sm:$0xff] %v3303_v23  ;;  %v3311_v17 = vpop.f32.mrf.mxu2  ;;  %v1663_v52 = vmul.f32 %v3279_v55, %v3279_v55  ;;  %v1593_v22 = vadd.f32 %v1592_v28, %v3279_v55 }
 0x151   :  { %3781 = vst [vmem:[#allocation12_spill] sm:$0xff] %v3311_v17 }
 0x156   :  { %v3292_v0 = vpop.f32.mrf.mxu0 }
 0x157   :  { %v3294_v53 = vpop.f32.mrf.mxu1  ;;  %v2218_v9 = vpack.c.bf16 %v3292_v0, %v3277_v54  ;;  %v3317_v21 = vpop.f32.mrf.mxu3  ;;  %v1457_v1 = vmul.f32 %v3292_v0, %v3292_v0 }
 0x158   :  { %v2378_v10 = vpack.c.bf16 %v3294_v53, %v3279_v55  ;;  %3782 = vst [vmem:[#allocation13_spill] sm:$0xff] %v3317_v21  ;;  %v2453_v11 = vpack.c.bf16 %v3317_v21, %v3303_v23  ;;  %v3324_v30 = vpop.f32.mrf.mxu2  ;;  %v1664_v20 = vmul.f32 %v3294_v53, %v3294_v53  ;;  %v1594_v55 = vadd.f32 %v1593_v22, %v3294_v53 }
 0x159   :  { %2521 = vst [vmem:[%s3727_s6 + $0x58] sm:$0xff] %v2218_v9   ;;  %v2293_v33 = vpack.c.bf16 %v3324_v30, %v3311_v17 }
 0x15a   :  { %2552 = vst [vmem:[%s3728_s7 + $0x58] sm:$0xff] %v2378_v10  }
 0x15b   :  { %2567 = vst [vmem:[%s3728_s7 + $0xd0] sm:$0xff] %v2453_v11  }
 0x15c   :  { %3783 = vst [vmem:[#allocation14_spill] sm:$0xff] %v3324_v30 }
 0x15d   :  { %2536 = vst [vmem:[%s3727_s6 + $0xd0] sm:$0xff] %v2293_v33  }
 0x15e   :  { %v3313_v18 = vpop.f32.mrf.mxu0 }
 0x15f   :  { %v3315_v19 = vpop.f32.mrf.mxu1  ;;  %v3339_v9 = vpop.f32.mrf.mxu3 }
 0x160   :  { %3784 = vst [vmem:[#allocation15_spill] sm:$0xff] %v3339_v9  ;;  %v3347_v10 = vpop.f32.mrf.mxu2 }
 0x161   :  { %3785 = vst [vmem:[#allocation16_spill] sm:$0xff] %v3347_v10 }
 0x166   :  { %v3328_v45 = vpop.f32.mrf.mxu0 }
 0x167   :  { %v3330_v46 = vpop.f32.mrf.mxu1  ;;  %v2223_v57 = vpack.c.bf16 %v3328_v45, %v3313_v18  ;;  %v3353_v21 = vpop.f32.mrf.mxu3 }
 0x168   :  { %v2383_v59 = vpack.c.bf16 %v3330_v46, %v3315_v19  ;;  %3786 = vst [vmem:[#allocation17_spill] sm:$0xff] %v3353_v21  ;;  %v2458_v30 = vpack.c.bf16 %v3353_v21, %v3339_v9 }
 0x169   :  { %2522 = vst [vmem:[%s3727_s6 + $0x60] sm:$0xff] %v2223_v57   ;;  %v3360_v57 = vpop.f32.mrf.mxu2 }
 0x16a   :  { %2553 = vst [vmem:[%s3728_s7 + $0x60] sm:$0xff] %v2383_v59   ;;  %v2298_v59 = vpack.c.bf16 %v3360_v57, %v3347_v10 }
 0x16b   :  { %2568 = vst [vmem:[%s3728_s7 + $0xd8] sm:$0xff] %v2458_v30  }
 0x16c   :  { %3787 = vst [vmem:[#allocation18_spill] sm:$0xff] %v3360_v57 }
 0x16d   :  { %2537 = vst [vmem:[%s3727_s6 + $0xd8] sm:$0xff] %v2298_v59  }
 0x16e   :  { %v3349_v11 = vpop.f32.mrf.mxu0 }
 0x16f   :  { %v3351_v33 = vpop.f32.mrf.mxu1  ;;  %v3375_v30 = vpop.f32.mrf.mxu3 }
 0x170   :  { %3788 = vst [vmem:[#allocation19_spill] sm:$0xff] %v3375_v30 }
 0x172   :  { %v3383_v57 = vpop.f32.mrf.mxu2 }
 0x176   :  { %v3364_v23 = vpop.f32.mrf.mxu0 }
 0x177   :  { %v3366_v17 = vpop.f32.mrf.mxu1  ;;  %v2228_v21 = vpack.c.bf16 %v3364_v23, %v3349_v11  ;;  %v3389_v56 = vpop.f32.mrf.mxu3 }
 0x178   :  { %v2388_v9 = vpack.c.bf16 %v3366_v17, %v3351_v33  ;;  %3789 = vst [vmem:[#allocation20_spill] sm:$0xff] %v3389_v56 }
 0x179   :  { %2523 = vst [vmem:[%s3727_s6 + $0x68] sm:$0xff] %v2228_v21   ;;  %v2463_v21 = vpack.c.bf16 %v3389_v56, %v3375_v30  ;;  %v1518_v56 = vadd.f32 %v3251_v37, %v1455_v58  ;;  %v1725_v30 = vadd.f32 %v3253_v42, %v1662_v51  ;;  %v1458_v37 = vmul.f32 %v3313_v18, %v3313_v18 }
 0x17a   :  { %2554 = vst [vmem:[%s3728_s7 + $0x68] sm:$0xff] %v2388_v9   ;;  %v1456_v9 = vmul.f32 %v3277_v54, %v3277_v54  ;;  %v3408_v2 = vpop.f32.mrf.mxu2 }
 0x17b   :  { %2569 = vst [vmem:[%s3728_s7 + $0xe0] sm:$0xff] %v2463_v21   ;;  %v2303_v50 = vpack.c.bf16 %v3408_v2, %v3383_v57  ;;  %v1386_v21 = vadd.f32 %v1385_v29, %v3277_v54  ;;  %v1726_v44 = vadd.f32 %v1725_v30, %v1663_v52  ;;  %v1665_v29 = vmul.f32 %v3315_v19, %v3315_v19 }
 0x17c   :  { %3790 = vst [vmem:[#allocation21_spill] sm:$0xff] %v3408_v2  ;;  %v1519_v43 = vadd.f32 %v1518_v56, %v1456_v9  ;;  %v1459_v30 = vmul.f32 %v3328_v45, %v3328_v45  ;;  %v1595_v2 = vadd.f32 %v1594_v55, %v3315_v19  ;;  %v1461_v19 = vmul.f32 %v3364_v23, %v3364_v23 }
 0x17d   :  { %2538 = vst [vmem:[%s3727_s6 + $0xe0] sm:$0xff] %v2303_v50   ;;  %v1387_v51 = vadd.f32 %v1386_v21, %v3292_v0  ;;  %v1727_v9 = vadd.f32 %v1726_v44, %v1664_v20  ;;  %v1666_v0 = vmul.f32 %v3330_v46, %v3330_v46  ;;  %v1667_v20 = vmul.f32 %v3351_v33, %v3351_v33 }
 0x17e   :  { %v3385_v10 = vpop.f32.mrf.mxu0  ;;  %v1520_v52 = vadd.f32 %v1519_v43, %v1457_v1  ;;  %v1460_v1 = vmul.f32 %v3349_v11, %v3349_v11  ;;  %v1596_v44 = vadd.f32 %v1595_v2, %v3330_v46 }
 0x17f   :  { %v3387_v59 = vpop.f32.mrf.mxu1  ;;  %v3430_v28 = vpop.f32.mrf.mxu3  ;;  %v1388_v50 = vadd.f32 %v1387_v51, %v3313_v18  ;;  %v1728_v53 = vadd.f32 %v1727_v9, %v1665_v29 }
 0x180   :  { %v1521_v21 = vadd.f32 %v1520_v52, %v1458_v37  ;;  %v1669_v46 = vmul.f32 %v3387_v59, %v3387_v59 }
 0x181   :  { %v1389_v18 = vadd.f32 %v1388_v50, %v3328_v45  ;;  %v1729_v37 = vadd.f32 %v1728_v53, %v1666_v0  ;;  %v1597_v45 = vadd.f32 %v1596_v44, %v3351_v33 }
 0x182   :  { %v3450_v43 = vpop.f32.mrf.mxu2  ;;  %v1522_v22 = vadd.f32 %v1521_v21, %v1459_v30 }
 0x183   :  { %v1390_v51 = vadd.f32 %v1389_v18, %v3349_v11  ;;  %v1730_v30 = vadd.f32 %v1729_v37, %v1667_v20  ;;  %v1598_v50 = vadd.f32 %v1597_v45, %v3366_v17 }
 0x184   :  { %v1523_v29 = vadd.f32 %v1522_v22, %v1460_v1 }
 0x185   :  { %v1391_v2 = vadd.f32 %v1390_v51, %v3364_v23  ;;  %v1599_v18 = vadd.f32 %v1598_v50, %v3387_v59 }
 0x186   :  { %v532_v58 = vpop.f32.mrf.mxu0  ;;  %v1524_v11 = vadd.f32 %v1523_v29, %v1461_v19 }
 0x187   :  { %v1021_v42 = vpop.f32.mrf.mxu1  ;;  %v2233_v54 = vpack.c.bf16 %v532_v58, %v3385_v10  ;;  %v3464_v9 = vpop.f32.mrf.mxu3  ;;  %v1463_v0 = vmul.f32 %v532_v58, %v532_v58  ;;  %v1392_v1 = vadd.f32 %v1391_v2, %v3385_v10 }
 0x188   :  { %v2393_v56 = vpack.c.bf16 %v1021_v42, %v3387_v59  ;;  %v2468_v33 = vpack.c.bf16 %v3464_v9, %v3430_v28  ;;  %v1670_v20 = vmul.f32 %v1021_v42, %v1021_v42  ;;  %v1600_v37 = vadd.f32 %v1599_v18, %v1021_v42 }
 0x189   :  { %2524 = vst [vmem:[%s3727_s6 + $0x70] sm:$0xff] %v2233_v54   ;;  %v1668_v54 = vmul.f32 %v3366_v17, %v3366_v17  ;;  %v1393_v44 = vadd.f32 %v1392_v1, %v532_v58 }
 0x18a   :  { %2555 = vst [vmem:[%s3728_s7 + $0x70] sm:$0xff] %v2393_v56   ;;  %v1462_v56 = vmul.f32 %v3385_v10, %v3385_v10  ;;  %v3474_v19 = vpop.f32.mrf.mxu2 }
 0x18b   :  { %v1731_v21 = vadd.f32 %v1730_v30, %v1668_v54  ;;  %2570 = vst [vmem:[%s3728_s7 + $0xe8] sm:$0xff] %v2468_v33   ;;  %v2308_v54 = vpack.c.bf16 %v3474_v19, %v3450_v43 }
 0x18c   :  { %v1525_v53 = vadd.f32 %v1524_v11, %v1462_v56 }
 0x18d   :  { %v1732_v22 = vadd.f32 %v1731_v21, %v1669_v46  ;;  %2539 = vst [vmem:[%s3727_s6 + $0xe8] sm:$0xff] %v2308_v54   ;;  %v1466_v21 = vmul.f32 %v2904_v13, %v2904_v13 }
 0x18e   :  { %v535_v52 = vpop.f32.mrf.mxu0  ;;  %v1526_v17 = vadd.f32 %v1525_v53, %v1463_v0 }
 0x18f   :  { %v1024_v55 = vpop.f32.mrf.mxu1  ;;  %v1464_v23 = vmul.f32 %v535_v52, %v535_v52  ;;  %v1394_v10 = vadd.f32 %v1393_v44, %v535_v52  ;;  %v1733_v29 = vadd.f32 %v1732_v22, %v1670_v20  ;;  %v3481_v50 = vpop.f32.mrf.mxu3  ;;  %v1467_v20 = vmul.f32 %v2926_v39, %v2926_v39 }
 0x190   :  { %v1671_v51 = vmul.f32 %v1024_v55, %v1024_v55  ;;  %v1601_v59 = vadd.f32 %v1600_v37, %v1024_v55 }
 0x191   :  { %v1527_v45 = vadd.f32 %v1526_v17, %v1464_v23 }
 0x192   :  { %v1734_v42 = vadd.f32 %v1733_v29, %v1671_v51  ;;  %v3498_v44 = vpop.f32.mrf.mxu2  ;;  %v1468_v51 = vmul.f32 %v2948_v60, %v2948_v60 }
 0x196   :  { %v537_v56 = vpop.f32.mrf.mxu0 }
 0x197   :  { %v1026_v30 = vpop.f32.mrf.mxu1  ;;  %v2238_v2 = vpack.c.bf16 %v537_v56, %v535_v52  ;;  %v1395_v58 = vadd.f32 %v1394_v10, %v537_v56  ;;  %v1465_v46 = vmul.f32 %v537_v56, %v537_v56  ;;  %v1673_v52 = vmul.f32 %v2906_v14, %v2906_v14 }
 0x198   :  { %v2398_v11 = vpack.c.bf16 %v1026_v30, %v1024_v55  ;;  %v1602_v0 = vadd.f32 %v1601_v59, %v1026_v30  ;;  %v1672_v33 = vmul.f32 %v1026_v30, %v1026_v30  ;;  %v1675_v10 = vmul.f32 %v2950_v61, %v2950_v61 }
 0x199   :  { %2525 = vst [vmem:[%s3727_s6 + $0x78] sm:$0xff] %v2238_v2   ;;  %v1396_v1 = vadd.f32 %v1395_v58, %v2904_v13  ;;  %v1528_v53 = vadd.f32 %v1527_v45, %v1465_v46  ;;  %v1674_v13 = vmul.f32 %v2928_v40, %v2928_v40  ;;  %v1469_v45 = vmul.f32 %v2970_v25, %v2970_v25 }
 0x19a   :  { %2556 = vst [vmem:[%s3728_s7 + $0x78] sm:$0xff] %v2398_v11   ;;  %v1603_v55 = vadd.f32 %v1602_v0, %v2906_v14  ;;  %v1735_v18 = vadd.f32 %v1734_v42, %v1672_v33  ;;  %v1676_v30 = vmul.f32 %v2972_v26, %v2972_v26  ;;  %v1470_v58 = vmul.f32 %v2992_v48, %v2992_v48 }
 0x19b   :  { %v1397_v23 = vadd.f32 %v1396_v1, %v2926_v39  ;;  %v1529_v22 = vadd.f32 %v1528_v53, %v1466_v21  ;;  %v1471_v33 = vmul.f32 %v3014_v12, %v3014_v12  ;;  %v3528_v1 = vpop.f32.mrf.mxu2 }
 0x19c   :  { %v1604_v17 = vadd.f32 %v1603_v55, %v2928_v40  ;;  %v1736_v37 = vadd.f32 %v1735_v18, %v1673_v52  ;;  %v3512_v40 = vpop.f32.mrf.mxu3  ;;  %v1472_v55 = vmul.f32 %v3036_v38, %v3036_v38 }
 0x19d   :  { %v1398_v14 = vadd.f32 %v1397_v23, %v2948_v60  ;;  %v1530_v54 = vadd.f32 %v1529_v22, %v1467_v20  ;;  %v2473_v11 = vpack.c.bf16 %v3512_v40, %v3481_v50  ;;  %v1679_v20 = vmul.f32 %v3038_v41, %v3038_v41 }
 0x19e   :  { %v1605_v39 = vadd.f32 %v1604_v17, %v2950_v61  ;;  %v1737_v29 = vadd.f32 %v1736_v37, %v1674_v13 }
 0x19f   :  { %v1399_v59 = vadd.f32 %v1398_v14, %v2970_v25  ;;  %v1531_v56 = vadd.f32 %v1530_v54, %v1468_v51  ;;  %v1677_v25 = vmul.f32 %v2994_v49, %v2994_v49  ;;  %2571 = vst [vmem:[%s3728_s7 + $0xf0] sm:$0xff] %v2473_v11   ;;  %v1477_v11 = vmul.f32 %v3154_v3, %v3154_v3 }
 0x1a0   :  { %v1606_v60 = vadd.f32 %v1605_v39, %v2972_v26  ;;  %v1738_v2 = vadd.f32 %v1737_v29, %v1675_v10  ;;  %v1681_v39 = vmul.f32 %v3087_v35, %v3087_v35 }
 0x1a1   :  { %v1400_v61 = vadd.f32 %v1399_v59, %v2992_v48  ;;  %v1532_v46 = vadd.f32 %v1531_v56, %v1469_v45  ;;  %v1678_v48 = vmul.f32 %v3016_v15, %v3016_v15  ;;  %v1475_v45 = vmul.f32 %v3113_v6, %v3113_v6 }
 0x1a2   :  { %v1607_v42 = vadd.f32 %v1606_v60, %v2994_v49  ;;  %v1739_v0 = vadd.f32 %v1738_v2, %v1676_v30  ;;  %v2313_v49 = vpack.c.bf16 %v3528_v1, %v3498_v44  ;;  %v1682_v30 = vmul.f32 %v3115_v7, %v3115_v7 }
 0x1a3   :  { %v1401_v26 = vadd.f32 %v1400_v61, %v3014_v12  ;;  %v1533_v21 = vadd.f32 %v1532_v46, %v1470_v58  ;;  %v1476_v2 = vmul.f32 %v3134_v36, %v3134_v36  ;;  %v1683_v61 = vmul.f32 %v3136_v16, %v3136_v16 }
 0x1a4   :  { %v1608_v53 = vadd.f32 %v1607_v42, %v3016_v15  ;;  %v1740_v52 = vadd.f32 %v1739_v0, %v1677_v25  ;;  %2540 = vst [vmem:[%s3727_s6 + $0xf0] sm:$0xff] %v2313_v49   ;;  %v1473_v15 = vmul.f32 %v3057_v4, %v3057_v4  ;;  %v3550_v37 = vpop.f32.mrf.mxu3  ;;  %v1684_v0 = vmul.f32 %v3156_v8, %v3156_v8 }
 0x1a5   :  { %v1402_v12 = vadd.f32 %v1401_v26, %v3036_v38  ;;  %v1534_v18 = vadd.f32 %v1533_v21, %v1471_v33  ;;  %v1680_v38 = vmul.f32 %v3059_v5, %v3059_v5  ;;  %v1478_v26 = vmul.f32 %v3171_v31, %v3171_v31 }
 0x1a6   :  { %v1609_v23 = vadd.f32 %v1608_v53, %v3038_v41  ;;  %v1741_v22 = vadd.f32 %v1740_v52, %v1678_v48  ;;  %v1474_v41 = vmul.f32 %v3085_v34, %v3085_v34  ;;  %v1479_v49 = vmul.f32 %v3188_v62, %v3188_v62 }
 0x1a7   :  { %v1403_v13 = vadd.f32 %v1402_v12, %v3057_v4  ;;  %v1535_v17 = vadd.f32 %v1534_v18, %v1472_v55 }
 0x1a8   :  { %v1610_v51 = vadd.f32 %v1609_v23, %v3059_v5  ;;  %v1742_v14 = vadd.f32 %v1741_v22, %v1679_v20  ;;  %v3564_v5 = vpop.f32.mrf.mxu2  ;;  %v1480_v23 = vmul.f32 %v3205_v24, %v3205_v24 }
 0x1a9   :  { %v1404_v54 = vadd.f32 %v1403_v13, %v3085_v34  ;;  %v1536_v10 = vadd.f32 %v1535_v17, %v1473_v15  ;;  %v1687_v15 = vmul.f32 %v3207_v27, %v3207_v27 }
 0x1aa   :  { %v1611_v4 = vadd.f32 %v1610_v51, %v3087_v35  ;;  %v1743_v29 = vadd.f32 %v1742_v14, %v1680_v38  ;;  %v3791_v14 = vld [vmem:[#allocation2_spill] sm:$0xff] }
 0x1ab   :  { %v1405_v59 = vadd.f32 %v1404_v54, %v3113_v6  ;;  %v1537_v56 = vadd.f32 %v1536_v10, %v1474_v41  ;;  %v3792_v10 = vld [vmem:[#allocation3_spill] sm:$0xff] }
 0x1ac   :  { %v1612_v34 = vadd.f32 %v1611_v4, %v3115_v7  ;;  %v1744_v60 = vadd.f32 %v1743_v29, %v1681_v39  ;;  %v3578_v7 = vpop.f32.mrf.mxu3  ;;  %v3793_v29 = vld [vmem:[#allocation4_spill] sm:$0xff] }
 0x1ad   :  { %v1406_v35 = vadd.f32 %v1405_v59, %v3134_v36  ;;  %v1538_v58 = vadd.f32 %v1537_v56, %v1475_v45  ;;  %v2478_v48 = vpack.c.bf16 %v3578_v7, %v3550_v37  ;;  %v1689_v45 = vmul.f32 %v3793_v29, %v3793_v29 }
 0x1ae   :  { %v1613_v6 = vadd.f32 %v1612_v34, %v3136_v16  ;;  %v1745_v46 = vadd.f32 %v1744_v60, %v1682_v30 }
 0x1af   :  { %v1407_v25 = vadd.f32 %v1406_v35, %v3154_v3  ;;  %v1539_v42 = vadd.f32 %v1538_v58, %v1476_v2  ;;  %v1685_v3 = vmul.f32 %v3173_v32, %v3173_v32  ;;  %2572 = vst [vmem:[%s3728_s7 + $0xf8] sm:$0xff] %v2478_v48   ;;  %v3795_v2 = vld [vmem:[#allocation6_spill] sm:$0xff] }
 0x1b0   :  { %v1614_v36 = vadd.f32 %v1613_v6, %v3156_v8  ;;  %v1746_v33 = vadd.f32 %v1745_v46, %v1683_v61  ;;  %v3594_v12 = vpop.f32.mrf.mxu2  ;;  %v1690_v35 = vmul.f32 %v3795_v2, %v3795_v2  ;;  %v3796_v6 = vld [vmem:[#allocation8_spill] sm:$0xff] }
 0x1b1   :  { %v1540_v21 = vadd.f32 %v1539_v42, %v1477_v11  ;;  %v1408_v16 = vadd.f32 %v1407_v25, %v3171_v31  ;;  %v1686_v31 = vmul.f32 %v3190_v63, %v3190_v63  ;;  %v1484_v46 = vmul.f32 %v3796_v6, %v3796_v6  ;;  %v3797_v42 = vld [vmem:[#allocation7_spill] sm:$0xff] }
 0x1b2   :  { %v1747_v53 = vadd.f32 %v1746_v33, %v1684_v0  ;;  %v1615_v52 = vadd.f32 %v1614_v36, %v3173_v32  ;;  %v2318_v32 = vpack.c.bf16 %v3594_v12, %v3564_v5  ;;  %v1691_v0 = vmul.f32 %v3797_v42, %v3797_v42 }
 0x1b3   :  { %v1409_v8 = vadd.f32 %v1408_v16, %v3188_v62  ;;  %v1541_v55 = vadd.f32 %v1540_v21, %v1478_v26  ;;  %v3798_v26 = vld [vmem:[#allocation10_spill] sm:$0xff] }
 0x1b4   :  { %v1616_v18 = vadd.f32 %v1615_v52, %v3190_v63  ;;  %v1748_v20 = vadd.f32 %v1747_v53, %v1685_v3  ;;  %2541 = vst [vmem:[%s3727_s6 + $0xf8] sm:$0xff] %v2318_v32   ;;  %v1481_v63 = vmul.f32 %v3215_v47, %v3215_v47  ;;  %v1485_v21 = vmul.f32 %v3798_v26, %v3798_v26  ;;  %v3799_v3 = vld [vmem:[#allocation9_spill] sm:$0xff] }
 0x1b5   :  { %v1410_v62 = vadd.f32 %v1409_v8, %v3205_v24  ;;  %v1542_v22 = vadd.f32 %v1541_v55, %v1479_v49  ;;  %v1688_v24 = vmul.f32 %v3791_v14, %v3791_v14  ;;  %v1692_v53 = vmul.f32 %v3799_v3, %v3799_v3  ;;  %v3800_v8 = vld [vmem:[#allocation12_spill] sm:$0xff] }
 0x1b6   :  { %v1617_v13 = vadd.f32 %v1616_v18, %v3207_v27  ;;  %v1749_v17 = vadd.f32 %v1748_v20, %v1686_v31  ;;  %v1482_v27 = vmul.f32 %v3792_v10, %v3792_v10  ;;  %v1486_v55 = vmul.f32 %v3800_v8, %v3800_v8  ;;  %v3801_v20 = vld [vmem:[#allocation11_spill] sm:$0xff] }
 0x1b7   :  { %v1411_v38 = vadd.f32 %v1410_v62, %v3215_v47  ;;  %v1543_v51 = vadd.f32 %v1542_v22, %v1480_v23  ;;  %v3794_v47 = vld [vmem:[#allocation5_spill] sm:$0xff]  ;;  %v1693_v32 = vmul.f32 %v3801_v20, %v3801_v20  ;;  %v3802_v22 = vld [vmem:[#allocation14_spill] sm:$0xff] }
 0x1b8   :  { %v1618_v41 = vadd.f32 %v1617_v13, %v3791_v14  ;;  %v1750_v54 = vadd.f32 %v1749_v17, %v1687_v15  ;;  %v1483_v30 = vmul.f32 %v3794_v47, %v3794_v47  ;;  %v1487_v15 = vmul.f32 %v3802_v22, %v3802_v22 }
 0x1b9   :  { %v1412_v39 = vadd.f32 %v1411_v38, %v3792_v10  ;;  %v1544_v4 = vadd.f32 %v1543_v51, %v1481_v63  ;;  %v3803_v63 = vld [vmem:[#allocation13_spill] sm:$0xff] }
 0x1ba   :  { %v1619_v59 = vadd.f32 %v1618_v41, %v3793_v29  ;;  %v1751_v56 = vadd.f32 %v1750_v54, %v1688_v24  ;;  %v1694_v38 = vmul.f32 %v3803_v63, %v3803_v63  ;;  %v3804_v24 = vld [vmem:[#allocation16_spill] sm:$0xff] }
 0x1bb   :  { %v1413_v34 = vadd.f32 %v1412_v39, %v3794_v47  ;;  %v1545_v60 = vadd.f32 %v1544_v4, %v1482_v27  ;;  %v1488_v41 = vmul.f32 %v3804_v24, %v3804_v24  ;;  %v3805_v27 = vld [vmem:[#allocation15_spill] sm:$0xff] }
 0x1bc   :  { %v1620_v58 = vadd.f32 %v1619_v59, %v3795_v2  ;;  %v1752_v61 = vadd.f32 %v1751_v56, %v1689_v45  ;;  %v1695_v39 = vmul.f32 %v3805_v27, %v3805_v27  ;;  %v3806_v45 = vld [vmem:[#allocation18_spill] sm:$0xff] }
 0x1bd   :  { %v1414_v11 = vadd.f32 %v1413_v34, %v3796_v6  ;;  %v1546_v25 = vadd.f32 %v1545_v60, %v1483_v30  ;;  %v1489_v59 = vmul.f32 %v3806_v45, %v3806_v45  ;;  %v3807_v30 = vld [vmem:[#allocation17_spill] sm:$0xff]  ;;  %v3808_v6 = vld [vmem:[#allocation19_spill] sm:$0xff] }
 0x1be   :  { %v1621_v36 = vadd.f32 %v1620_v58, %v3797_v42  ;;  %v1753_v33 = vadd.f32 %v1752_v61, %v1690_v35  ;;  %v1696_v34 = vmul.f32 %v3807_v30, %v3807_v30  ;;  %v1490_v58 = vmul.f32 %v3383_v57, %v3383_v57 }
 0x1bf   :  { %v1415_v16 = vadd.f32 %v1414_v11, %v3798_v26  ;;  %v1547_v48 = vadd.f32 %v1546_v25, %v1484_v46  ;;  %v1697_v11 = vmul.f32 %v3808_v6, %v3808_v6 }
 0x1c0   :  { %v1622_v52 = vadd.f32 %v1621_v36, %v3799_v3  ;;  %v1754_v49 = vadd.f32 %v1753_v33, %v1691_v0  ;;  %v3809_v0 = vld [vmem:[#allocation21_spill] sm:$0xff] }
 0x1c1   :  { %v1416_v31 = vadd.f32 %v1415_v16, %v3800_v8  ;;  %v1548_v18 = vadd.f32 %v1547_v48, %v1485_v21  ;;  %v1491_v33 = vmul.f32 %v3809_v0, %v3809_v0  ;;  %v3810_v21 = vld [vmem:[#allocation20_spill] sm:$0xff]  ;;  %v1699_v8 = vmul.f32 %v3430_v28, %v3430_v28 }
 0x1c2   :  { %v1623_v23 = vadd.f32 %v1622_v52, %v3801_v20  ;;  %v1755_v62 = vadd.f32 %v1754_v49, %v1692_v53  ;;  %v1698_v48 = vmul.f32 %v3810_v21, %v3810_v21  ;;  %v1492_v53 = vmul.f32 %v3450_v43, %v3450_v43 }
 0x1c3   :  { %v1417_v13 = vadd.f32 %v1416_v31, %v3802_v22  ;;  %v1549_v17 = vadd.f32 %v1548_v18, %v1486_v55  ;;  %v1493_v18 = vmul.f32 %v3474_v19, %v3474_v19  ;;  %v1494_v22 = vmul.f32 %v3498_v44, %v3498_v44 }
 0x1c4   :  { %v1624_v51 = vadd.f32 %v1623_v23, %v3803_v63  ;;  %v1756_v14 = vadd.f32 %v1755_v62, %v1693_v32  ;;  %v1700_v23 = vmul.f32 %v3464_v9, %v3464_v9  ;;  %v1495_v63 = vmul.f32 %v3528_v1, %v3528_v1 }
 0x1c5   :  { %v1418_v54 = vadd.f32 %v1417_v13, %v3804_v24  ;;  %v1550_v10 = vadd.f32 %v1549_v17, %v1487_v15  ;;  %v1701_v13 = vmul.f32 %v3481_v50, %v3481_v50  ;;  %v1496_v24 = vmul.f32 %v3564_v5, %v3564_v5 }
 0x1c6   :  { %v1625_v4 = vadd.f32 %v1624_v51, %v3805_v27  ;;  %v1757_v29 = vadd.f32 %v1756_v14, %v1694_v38  ;;  %v1702_v51 = vmul.f32 %v3512_v40, %v3512_v40  ;;  %v1497_v27 = vmul.f32 %v3594_v12, %v3594_v12 }
 0x1c7   :  { %v1419_v56 = vadd.f32 %v1418_v54, %v3806_v45  ;;  %v1551_v47 = vadd.f32 %v1550_v10, %v1488_v41  ;;  %v1703_v54 = vmul.f32 %v3550_v37, %v3550_v37 }
 0x1c8   :  { %v1626_v60 = vadd.f32 %v1625_v4, %v3807_v30  ;;  %v1758_v2 = vadd.f32 %v1757_v29, %v1695_v39  ;;  %v1704_v4 = vmul.f32 %v3578_v7, %v3578_v7  ;;  %v1567_v30 = vlaneseq }
 0x1c9   :  { %v1420_v35 = vadd.f32 %v1419_v56, %v3383_v57  ;;  %v1552_v61 = vadd.f32 %v1551_v47, %v1489_v59 }
 0x1ca   :  { %v1627_v46 = vadd.f32 %v1626_v60, %v3808_v6  ;;  %v1759_v25 = vadd.f32 %v1758_v2, %v1696_v34  ;;  %v1568_v6 = vshrl.u32 %v1567_v30, 7 }
 0x1cb   :  { %v1553_v42 = vadd.f32 %v1552_v61, %v1490_v58  ;;  %v1421_v36 = vadd.f32 %v1420_v35, %v3809_v0 }
 0x1cc   :  { %v1760_v26 = vadd.f32 %v1759_v25, %v1697_v11  ;;  %v1628_v16 = vadd.f32 %v1627_v46, %v3810_v21  ;;  %vm1569_vm0 = vcmp.lt.s32.totalorder %v1568_v6, 4 }
 0x1cd   :  { %v1554_v57 = vadd.f32 %v1553_v42, %v1491_v33  ;;  %v1422_v3 = vadd.f32 %v1421_v36, %v3450_v43 }
 0x1ce   :  { %v1761_v52 = vadd.f32 %v1760_v26, %v1698_v48  ;;  %v1629_v49 = vadd.f32 %v1628_v16, %v3430_v28 }
 0x1cf   :  { %v1555_v55 = vadd.f32 %v1554_v57, %v1492_v53  ;;  %v1423_v31 = vadd.f32 %v1422_v3, %v3474_v19 }
 0x1d0   :  { %v1762_v20 = vadd.f32 %v1761_v52, %v1699_v8  ;;  %v1630_v32 = vadd.f32 %v1629_v49, %v3464_v9 }
 0x1d1   :  { %v1556_v62 = vadd.f32 %v1555_v55, %v1493_v18  ;;  %v1424_v43 = vadd.f32 %v1423_v31, %v3498_v44 }
 0x1d2   :  { %v1763_v15 = vadd.f32 %v1762_v20, %v1700_v23  ;;  %v1631_v28 = vadd.f32 %v1630_v32, %v3481_v50 }
 0x1d3   :  { %v1557_v17 = vadd.f32 %v1556_v62, %v1494_v22  ;;  %v1425_v19 = vadd.f32 %v1424_v43, %v3528_v1 }
 0x1d4   :  { %v1764_v38 = vadd.f32 %v1763_v15, %v1701_v13  ;;  %v1632_v9 = vadd.f32 %v1631_v28, %v3512_v40 }
 0x1d5   :  { %v1558_v14 = vadd.f32 %v1557_v17, %v1495_v63  ;;  %v1426_v44 = vadd.f32 %v1425_v19, %v3564_v5 }
 0x1d6   :  { %v1765_v41 = vadd.f32 %v1764_v38, %v1702_v51  ;;  %v1633_v50 = vadd.f32 %v1632_v9, %v3550_v37 }
 0x1d7   :  { %v1559_v10 = vadd.f32 %v1558_v14, %v1496_v24  ;;  %v1427_v1 = vadd.f32 %v1426_v44, %v3594_v12 }
 0x1d8   :  { %v1766_v39 = vadd.f32 %v1765_v41, %v1703_v54  ;;  %v1634_v40 = vadd.f32 %v1633_v50, %v3578_v7 }
 0x1d9   :  { %v1428_v29 = vrot.slane %v1427_v1, 4  ;;  %v1560_v5 = vadd.f32 %v1559_v10, %v1497_v27 }
 0x1da   :  { %v1635_v45 = vrot.slane %v1634_v40, 4  ;;  %v1767_v59 = vadd.f32 %v1766_v39, %v1704_v4 }
 0x1db   :  { %v1429_v56 = vadd.f32 %v1428_v29, %v1427_v1  ;;  %v1561_v47 = vrot.slane %v1560_v5, 4 }
 0x1dc   :  { %v1636_v37 = vadd.f32 %v1635_v45, %v1634_v40  ;;  %v1768_v34 = vrot.slane %v1767_v59, 4 }
 0x1dd   :  { %v1430_v60 = vrot.slane %v1429_v56, 2  ;;  %v1562_v2 = vadd.f32 %v1561_v47, %v1560_v5 }
 0x1de   :  { %v1637_v35 = vrot.slane %v1636_v37, 2  ;;  %v1769_v58 = vadd.f32 %v1768_v34, %v1767_v59 }
 0x1df   :  { %v1431_v12 = vadd.f32 %v1430_v60, %v1429_v56  ;;  %v1563_v61 = vrot.slane %v1562_v2, 2 }
 0x1e0   :  { %v1638_v46 = vadd.f32 %v1637_v35, %v1636_v37  ;;  %v1770_v11 = vrot.slane %v1769_v58, 2 }
 0x1e1   :  { %v1432_v25 = vrot.slane %v1431_v12, 1  ;;  %v1564_v7 = vadd.f32 %v1563_v61, %v1562_v2 }
 0x1e2   :  { %v1639_v42 = vrot.slane %v1638_v46, 1  ;;  %v1771_v0 = vadd.f32 %v1770_v11, %v1769_v58 }
 0x1e3   :  { %v1565_v36 = vrot.slane %v1564_v7, 1  ;;  %v1433_v26 = vadd.f32 %v1432_v25, %v1431_v12 }
 0x1e4   :  { %v1772_v33 = vrot.slane %v1771_v0, 1  ;;  %v1640_v16 = vadd.f32 %v1639_v42, %v1638_v46 }
 0x1e5   :  { %v1566_v21 = vadd.f32 %v1565_v36, %v1564_v7 }
 0x1e6   :  { %v1773_v48 = vadd.f32 %v1772_v33, %v1771_v0 }
 0x1e7   :  { %v1570_v57 = vsel %vm1569_vm0, %v1433_v26, %v1566_v21 }
 0x1e8   :  { %1571 = vst [vmem:[%s3729_s8] sm:$0xff] %v1570_v57  ;;  %v1774_v3 = vsel %vm1569_vm0, %v1640_v16, %v1773_v48 }
 0x1e9   :  { %1775 = vst [vmem:[%s3730_s9] sm:$0xff] %v1774_v3 }

// kernel: bottleneck_forward.5
= control target key start
LH: loop header
LB: loop body
LE: loop exit
PB: predicated region body
PF: predicated region fallthrough
CT: control target
= control target key end

     0   :  { %s6513_s18 = smov 0   ;;  %s8047_s0 = inlined_call_operand.vmem [shape: bf16[2,16,16,128], index: 0, kind: input, shape index: {}]   ;;  %s8048_s1 = inlined_call_operand.vmem [shape: f32[1,128], index: 1, kind: input, shape index: {}]   ;;  %s8049_s2 = inlined_call_operand.vmem [shape: f32[1,128], index: 2, kind: input, shape index: {}]   ;;  %s8050_s3 = inlined_call_operand.vmem [shape: bf16[3,3,128,128], index: 3, kind: input, shape index: {}]   ;;  %s8051_s4 = inlined_call_operand.vmem [shape: bf16[2,16,16,128], index: 4, kind: output, shape index: {0}]   ;;  %s8052_s5 = inlined_call_operand.vmem [shape: f32[2,8,128], index: 5, kind: output, shape index: {1}]  }
   0x1 LB: > { %s5415_s19 = sadd.s32 4294967295, %s6480_s18   ;;  %p5419_p0 = scmp.ge.s32.totalorder %s6480_s18, 1  ;;  %s6480_s18 = sphi %s6513_s18, %s16_s18  }
   0x2   : > { %p190_p1 = scmp.lt.s32.totalorder %s6480_s18, 3 }
   0x4   : > { %p191_p2 = pnand %p5419_p0, %p190_p1 }
   0x6   : > { %194 = sbr.rel (%p191_p2) target bundleno = 873 (0x369), region = 36 }
   0xb   : > { %v6116_v0 = vld [vmem:[%s8050_s3 + $0x78] sm:$0xff]  ;;  %p222_p3 = scmp.lt.s32.totalorder %s5415_s19, 1  ;;  %vm246_vm0 = vcmask 1040384   ;;  %vm247_vm1 = vsmask.f32 256  ;;  %v6115_v1 = vld [vmem:[%s8050_s3 + $0x70] sm:$0xff] }
   0xc   : > { %6379 = vmatpush.bf16.msra.mxu1 %v6116_v0  ;;  %6380 = vmatpush.bf16.msra.mxu2 %v6116_v0  ;;  %vm6530_vm2 = vmand %vm246_vm0, %vm247_vm1  ;;  %v261_v3 = vld [vmem:[#allocation2 + $0x30] sm:$0x1]  ;;  %vm303_vm3 = vsmask.f32 7938  ;;  %v317_v6 = vld [vmem:[#allocation2 + $0x38] sm:$0x1] }
   0xd   : > { %s8094_s19 = smov (!%p222_p3, %s5415_s19), 1  ;;  %6381 = vmatpush.bf16.msra.mxu3 %v6116_v0  ;;  %1574 = vmatpush.bf16.msra.mxu0 %v6116_v0  ;;  %v262_v4 = vsel %vm6530_vm2, 0, %v261_v3  ;;  %vm6538_vm4 = vmand %vm246_vm0, %vm303_vm3  ;;  %v6554_v8 = vld [vmem:[%s8048_s1] ss:$0 sm:$0xff]  ;;  %v6114_v9 = vld [vmem:[%s8050_s3 + $0x68] sm:$0xff]  ;;  %vm880_vm5 = vcmask 1043456  }
   0xe   : > { %s6083_s24 = sshll.u32 %s8094_s19, 7  ;;  %263 = vst [vmem:[#allocation2 + $0x30] sm:$0x1] %v262_v4  ;;  %v318_v7 = vsel %vm6538_vm4, 0, %v317_v6  ;;  %v6564_v14 = vld [vmem:[%s8049_s2] ss:$0 sm:$0xff]  ;;  %vm6612_vm7 = vmand %vm880_vm5, %vm303_vm3 }
   0xf   : > { %s6547_s27 = scalar_lea.vmem %s8047_s0, %s6083_s24  ;;  %319 = vst [vmem:[#allocation2 + $0x38] sm:$0x1] %v318_v7  ;;  %v273_v15 = vld [vmem:[#allocation2 + $0x60] sm:$0x1]  ;;  %v329_v18 = vld [vmem:[#allocation2 + $0x68] sm:$0x1]  ;;  %s7845_s9 = scalar_lea.vmem %s8051_s4, %s6083_s24 }
  0x10   : > { %6382 = vmatpush.bf16.msra.mxu1 %v6115_v1  ;;  %6383 = vmatpush.bf16.msra.mxu2 %v6115_v1  ;;  %v6351_v10 = vld [vmem:[%s6547_s27 + $0x18] sm:$0xff]   ;;  %v6113_v16 = vld [vmem:[%s8050_s3 + $0x60] sm:$0xff]  ;;  %v274_v17 = vsel %vm6530_vm2, 0, %v273_v15  ;;  %v285_v21 = vld [vmem:[#allocation2 + $0x90] sm:$0x1]  ;;  %v330_v24 = vsel %vm6538_vm4, 0, %v329_v18 }
  0x11   : > { %v6355_v11 = vld [vmem:[%s6547_s27 + $0x38] sm:$0xff]   ;;  %6384 = vmatpush.bf16.msra.mxu3 %v6115_v1  ;;  %1575 = vmatpush.bf16.msra.mxu0 %v6115_v1  ;;  %v6219_v12 = vunpack.c.l.bf16 %v6351_v10  ;;  %v6220_v13 = vunpack.c.h.bf16 %v6351_v10  ;;  %275 = vst [vmem:[#allocation2 + $0x60] sm:$0x1] %v274_v17  ;;  %v286_v25 = vsel %vm6530_vm2, 0, %v285_v21  ;;  %v6352_v36 = vld [vmem:[%s6547_s27 + $0x20] sm:$0xff]   ;;  %v6482_v46 = vmov 0  }
  0x12   : > { %v6235_v19 = vunpack.c.l.bf16 %v6355_v11  ;;  %v6236_v20 = vunpack.c.h.bf16 %v6355_v11  ;;  %v341_v26 = vld [vmem:[#allocation2 + $0x98] sm:$0x1]  ;;  %331 = vst [vmem:[#allocation2 + $0x68] sm:$0x1] %v330_v24  ;;  %v6582_v31 = vld [vmem:[#allocation2 + $0x3c] sm:$0x1]  ;;  %v6223_v40 = vunpack.c.l.bf16 %v6352_v36  ;;  %v6224_v50 = vunpack.c.h.bf16 %v6352_v36 }
  0x13   : > { %v432_v22 = vmul.f32 %v6554_v8, %v6219_v12  ;;  %v433_v23 = vmul.f32 %v6554_v8, %v6220_v13  ;;  %v342_v29 = vsel %vm6538_vm4, 0, %v341_v26  ;;  %v6359_v30 = vld [vmem:[%s6547_s27 + $0x58] sm:$0xff]   ;;  %287 = vst [vmem:[#allocation2 + $0x90] sm:$0x1] %v286_v25  ;;  %v265_v39 = vsel %vm6530_vm2, 0, %v6582_v31  ;;  %v6111_v59 = vld [vmem:[%s8050_s3 + $0x50] sm:$0xff] }
  0x14   : > { %6385 = vmatpush.bf16.msra.mxu1 %v6114_v9  ;;  %6386 = vmatpush.bf16.msra.mxu2 %v6114_v9  ;;  %v440_v27 = vmul.f32 %v6554_v8, %v6235_v19  ;;  %v441_v28 = vmul.f32 %v6554_v8, %v6236_v20  ;;  %v6251_v34 = vunpack.c.l.bf16 %v6359_v30  ;;  %v6252_v35 = vunpack.c.h.bf16 %v6359_v30  ;;  %343 = vst [vmem:[#allocation2 + $0x98] sm:$0x1] %v342_v29  ;;  %v6112_v41 = vld [vmem:[%s8050_s3 + $0x58] sm:$0xff]  ;;  %v6597_v49 = vld [vmem:[#allocation2 + $0x44] sm:$0x1]  ;;  %v6110_v17 = vld [vmem:[%s8050_s3 + $0x48] sm:$0xff] }
  0x15   : > { %6387 = vmatpush.bf16.msra.mxu3 %v6114_v9  ;;  %1576 = vmatpush.bf16.msra.mxu0 %v6114_v9  ;;  %v467_v32 = vadd.f32 %v6564_v14, %v432_v22  ;;  %v468_v33 = vadd.f32 %v6564_v14, %v433_v23  ;;  %239 = vst [vmem:[#allocation2] sm:$0xf] %v6482_v46  ;;  %vm557_vm6 = vsmask.f32 4368  ;;  %v321_v58 = vsel %vm6538_vm4, 0, %v6597_v49  ;;  %s5424_s24 = sshll.u32 %s8094_s19, 3 }
  0x16   : > { %v475_v37 = vadd.f32 %v6564_v14, %v440_v27  ;;  %v476_v38 = vadd.f32 %v6564_v14, %v441_v28  ;;  %v448_v44 = vmul.f32 %v6554_v8, %v6251_v34  ;;  %v449_v45 = vmul.f32 %v6554_v8, %v6252_v35  ;;  %240 = vst [vmem:[#allocation2 + $0x4] sm:$0xf] %v6482_v46  ;;  %v903_v0 = vld [vmem:[#allocation2 + $0x30] sm:$0xf]  ;;  %v907_v1 = vld [vmem:[#allocation2 + $0x38] sm:$0x1]  ;;  %vm6622_vm8 = vmor %vm247_vm1, %vm557_vm6  ;;  %s235_s12 = scalar_lea.vmem %s8052_s5, %s5424_s24 }
  0x17   : > { %v499_v42 = vmax.f32 %v467_v32, 0.0  ;;  %v500_v43 = vmax.f32 %v468_v33, 0.0  ;;  %v434_v51 = vmul.f32 %v6554_v8, %v6223_v40  ;;  %241 = vst [vmem:[#allocation2 + $0x8] sm:$0x1] %v6482_v46  ;;  %v435_v22 = vmul.f32 %v6554_v8, %v6224_v50  ;;  %v6356_v40 = vld [vmem:[%s6547_s27 + $0x40] sm:$0xff]  }
  0x18   : > { %6388 = vmatpush.bf16.msra.mxu1 %v6113_v16  ;;  %6389 = vmatpush.bf16.msra.mxu2 %v6113_v16  ;;  %v507_v47 = vmax.f32 %v475_v37, 0.0  ;;  %v508_v48 = vmax.f32 %v476_v38, 0.0  ;;  %v6601_v54 = vadd.f32 %v6564_v14, %v448_v44  ;;  %v484_v57 = vadd.f32 %v6564_v14, %v449_v45  ;;  %243 = vst [vmem:[#allocation2 + $0xcc] sm:$0xf] %v6482_v46  ;;  %v931_v12 = vld [vmem:[#allocation2 + $0x60] sm:$0xf] }
  0x19   : > { %6390 = vmatpush.bf16.msra.mxu3 %v6113_v16  ;;  %1577 = vmatpush.bf16.msra.mxu0 %v6113_v16  ;;  %v531_v52 = vpack.c.bf16 %v499_v42, %v499_v42  ;;  %v532_v53 = vpack.c.bf16 %v500_v43, %v500_v43  ;;  %v935_v13 = vld [vmem:[#allocation2 + $0x68] sm:$0x1]  ;;  %244 = vst [vmem:[#allocation2 + $0xd0] sm:$0xf] %v6482_v46  ;;  %vm1058_vm9 = vsmask.f32 3328 }
  0x1a   : > { %v539_v55 = vpack.c.bf16 %v507_v47, %v507_v47  ;;  %v540_v56 = vpack.c.bf16 %v508_v48, %v508_v48  ;;  %v515_v15 = vmax.f32 %v6601_v54, 0.0  ;;  %v516_v16 = vmax.f32 %v484_v57, 0.0  ;;  %245 = vst [vmem:[#allocation2 + $0xd4] sm:$0x1] %v6482_v46  ;;  %v6658_v47 = vld [vmem:[%s6547_s27 + $0x60] sm:$0xff]  }
  0x1b   : > { %v611_v60 = vshrl.u32 %v531_v52, 16  ;;  %v614_v61 = vshll.u32 %v531_v52, 16  ;;  %v619_v62 = vshrl.u32 %v532_v53, 16  ;;  %v622_v63 = vshll.u32 %v532_v53, 16  ;;  %266 = vst [vmem:[#allocation2 + $0x3c] sm:$0x1] %v265_v39 }
  0x1c   : > { %6391 = vmatpush.bf16.msra.mxu1 %v6112_v41  ;;  %6392 = vmatpush.bf16.msra.mxu2 %v6112_v41  ;;  %v679_v3 = vshrl.u32 %v539_v55, 16  ;;  %v682_v4 = vshll.u32 %v539_v55, 16  ;;  %v687_v6 = vshrl.u32 %v540_v56, 16  ;;  %v690_v7 = vshll.u32 %v540_v56, 16  ;;  %v6626_v21 = vld [vmem:[#allocation2] sm:$0x1] }
  0x1d   : > { %6393 = vmatpush.bf16.msra.mxu3 %v6112_v41  ;;  %1578 = vmatpush.bf16.msra.mxu0 %v6112_v41  ;;  %v613_v9 = vrot.slane %v611_v60, 7  ;;  %v621_v10 = vrot.slane %v619_v62, 7  ;;  %v6630_v23 = vadd.f32 %v6564_v14, %v434_v51  ;;  %v995_v28 = vld [vmem:[#allocation2 + $0x4] sm:$0xf]  ;;  %v250_v38 = vsel %vm6530_vm2, 0, %v6626_v21  ;;  %v6124_v62 = vld [vmem:[%s8050_s3 + $0xb8] sm:$0xff] }
  0x1e   : > { %v681_v19 = vrot.slane %v679_v3, 7  ;;  %v689_v20 = vrot.slane %v687_v6, 7  ;;  %v6632_v34 = vld [vmem:[#allocation2 + $0x8] sm:$0x1]  ;;  %v547_v42 = vpack.c.bf16 %v515_v15, %v515_v15  ;;  %v548_v43 = vpack.c.bf16 %v516_v16, %v516_v16  ;;  %v6109_v48 = vld [vmem:[%s8050_s3 + $0x40] sm:$0xff]  ;;  %v6123_v16 = vld [vmem:[%s8050_s3 + $0xb0] sm:$0xff] }
  0x1f   : > { %v616_v24 = vor.u32 %v614_v61, %v613_v9  ;;  %v617_v25 = vrot.slane %v613_v9, 4  ;;  %v624_v26 = vor.u32 %v622_v63, %v621_v10  ;;  %v626_v27 = vrot.slane %v621_v10, 4  ;;  %v959_v56 = vld [vmem:[#allocation2 + $0x90] sm:$0xf]  ;;  %v963_v61 = vld [vmem:[#allocation2 + $0x98] sm:$0x1] }
  0x20   : > { %6394 = vmatpush.bf16.msra.mxu1 %v6111_v59  ;;  %6395 = vmatpush.bf16.msra.mxu2 %v6111_v59  ;;  %v684_v29 = vor.u32 %v682_v4, %v681_v19  ;;  %v685_v30 = vrot.slane %v681_v19, 4  ;;  %v692_v32 = vor.u32 %v690_v7, %v689_v20  ;;  %v694_v33 = vrot.slane %v689_v20, 4  ;;  %v6148_v63 = vld [vmem:[%s8050_s3 + $0xf8] sm:$0xff]  ;;  %251 = vst [vmem:[#allocation2] sm:$0x1] %v250_v38 }
  0x21   : > { %6396 = vmatpush.bf16.msra.mxu3 %v6111_v59  ;;  %1579 = vmatpush.bf16.msra.mxu0 %v6111_v59  ;;  %v625_v35 = vsel %vm6622_vm8, %v617_v25, %v624_v26  ;;  %v904_v36 = vsel %vm6612_vm7, %v616_v24, %v903_v0  ;;  %v908_v37 = vsel %vm6530_vm2, %v626_v27, %v907_v1  ;;  %v306_v44 = vsel %vm6538_vm4, 0, %v6632_v34  ;;  %v6108_v7 = vld [vmem:[%s8050_s3 + $0x38] sm:$0xff]  ;;  %v6107_v25 = vld [vmem:[%s8050_s3 + $0x30] sm:$0xff] }
  0x22   : > { %905 = vst [vmem:[#allocation2 + $0x30] sm:$0xf] %v904_v36  ;;  %v693_v31 = vsel %vm6622_vm8, %v685_v30, %v692_v32  ;;  %v932_v39 = vsel %vm6612_vm7, %v684_v29, %v931_v12  ;;  %v936_v41 = vsel %vm6530_vm2, %v694_v33, %v935_v13  ;;  %v1071_v45 = vshll.u32 %v995_v28, 16  ;;  %v6156_v9 = vld [vmem:[%s8050_s3 + $0x138] sm:$0xff] }
  0x23   : > { %906 = vst [vmem:[#allocation2 + $0x34] sm:$0xf] %v625_v35  ;;  %v1075_v46 = vshrl.u32 %v995_v28, 16  ;;  %vm1059_vm10 = vsmask.f32 7440  ;;  %v747_v50 = vshrl.u32 %v547_v42, 16  ;;  %v470_v52 = vadd.f32 %v6564_v14, %v435_v22 }
  0x24   : > { %6397 = vmatpush.bf16.msra.mxu1 %v6110_v17  ;;  %6398 = vmatpush.bf16.msra.mxu2 %v6110_v17  ;;  %909 = vst [vmem:[#allocation2 + $0x38] sm:$0x1] %v908_v37  ;;  %v750_v51 = vshll.u32 %v547_v42, 16  ;;  %v6239_v53 = vunpack.c.l.bf16 %v6356_v40  ;;  %v755_v54 = vshrl.u32 %v548_v43, 16  ;;  %v758_v55 = vshll.u32 %v548_v43, 16  ;;  %vm6716_vm11 = vmor %vm1058_vm9, %vm1059_vm10 }
  0x25   : > { %6399 = vmatpush.bf16.msra.mxu3 %v6110_v17  ;;  %1580 = vmatpush.bf16.msra.mxu0 %v6110_v17  ;;  %933 = vst [vmem:[#allocation2 + $0x60] sm:$0xf] %v932_v39  ;;  %v6664_v57 = vrot.slane %v1071_v45, 5  ;;  %v1077_v59 = vrot.slane %v1075_v46, 4  ;;  %v749_v60 = vrot.slane %v747_v50, 7  ;;  %v6240_v0 = vunpack.c.h.bf16 %v6356_v40  ;;  %v6147_v17 = vld [vmem:[%s8050_s3 + $0xf0] sm:$0xff] }
  0x26   : > { %934 = vst [vmem:[#allocation2 + $0x64] sm:$0xf] %v693_v31  ;;  %v6673_v1 = vmul.f32 %v6554_v8, %v6239_v53  ;;  %v6255_v3 = vunpack.c.l.bf16 %v6658_v47  ;;  %v757_v4 = vrot.slane %v755_v54, 7  ;;  %v501_v10 = vmax.f32 %v6630_v23, 0.0 }
  0x27   : > { %937 = vst [vmem:[#allocation2 + $0x68] sm:$0x1] %v936_v41  ;;  %v1078_v6 = vor.u32 %v1077_v59, %v6664_v57  ;;  %v6256_v12 = vunpack.c.h.bf16 %v6658_v47  ;;  %v752_v13 = vor.u32 %v750_v51, %v749_v60  ;;  %v753_v15 = vrot.slane %v749_v60, 4 }
  0x28   : > { %6400 = vmatpush.bf16.msra.mxu1 %v6109_v48  ;;  %6401 = vmatpush.bf16.msra.mxu2 %v6109_v48  ;;  %v502_v19 = vmax.f32 %v470_v52, 0.0  ;;  %v6692_v20 = vmul.f32 %v6554_v8, %v6240_v0  ;;  %v760_v22 = vor.u32 %v758_v55, %v757_v4  ;;  %v762_v23 = vrot.slane %v757_v4, 4  ;;  %307 = vst [vmem:[#allocation2 + $0x8] sm:$0x1] %v306_v44 }
  0x29   : > { %6402 = vmatpush.bf16.msra.mxu3 %v6109_v48  ;;  %1581 = vmatpush.bf16.msra.mxu0 %v6109_v48  ;;  %v1002_v21 = vld [vmem:[#allocation2 + $0x30] sm:$0xf]  ;;  %v6694_v24 = vrot.slane %v1078_v6, 4  ;;  %v6699_v26 = vpack.c.bf16 %v501_v10, %v501_v10  ;;  %v960_v30 = vsel %vm6612_vm7, %v752_v13, %v959_v56  ;;  %322 = vst [vmem:[#allocation2 + $0x44] sm:$0x1] %v321_v58  ;;  %vm1944_vm12 = vcmask 1042432  }
  0x2a   : > { %v1003_v27 = vld [vmem:[#allocation2 + $0x34] sm:$0xf]  ;;  %v1158_v28 = vshrl.u32 %v1002_v21, 16  ;;  %v1161_v29 = vshll.u32 %v1002_v21, 16  ;;  %v6707_v32 = vpack.c.bf16 %v502_v19, %v502_v19  ;;  %v761_v36 = vsel %vm6622_vm8, %v753_v15, %v760_v22  ;;  %961 = vst [vmem:[#allocation2 + $0x90] sm:$0xf] %v960_v30 }
  0x2b   : > { %v1046_v33 = vld [vmem:[#allocation2 + $0x38] sm:$0x1]  ;;  %v1167_v34 = vshll.u32 %v1003_v27, 16  ;;  %v1171_v35 = vshrl.u32 %v1003_v27, 16  ;;  %v964_v37 = vsel %vm6530_vm2, %v762_v23, %v963_v61  ;;  %v628_v49 = vshrl.u32 %v6699_v26, 16 }
  0x2c   : > { %2188 = vmatpush.bf16.msrb.mxu2 %v6124_v62  ;;  %1807 = vmatpush.bf16.msrb.mxu1 %v6108_v7  ;;  %v1160_v38 = vrot.slane %v1158_v28, 4  ;;  %v1163_v40 = vrot.slane %v1161_v29, 5  ;;  %v1177_v31 = vshll.u32 %v1046_v33, 16  ;;  %v1010_v39 = vld [vmem:[#allocation2 + $0x60] sm:$0xf]  ;;  %v6724_v7 = vadd.f32 %v6564_v14, %v6673_v1 }
  0x2d   : > { %2502 = vmatpush.bf16.msrb.mxu3 %v6148_v63  ;;  %3184 = vmatpush.bf16.msrb.mxu0 %v6156_v9  ;;  %v1169_v58 = vrot.slane %v1167_v34, 5  ;;  %v1173_v41 = vrot.slane %v1171_v35, 4  ;;  %v1011_v42 = vld [vmem:[#allocation2 + $0x64] sm:$0xf]  ;;  %v1254_v43 = vshrl.u32 %v1010_v39, 16  ;;  %v1257_v44 = vshll.u32 %v1010_v39, 16 }
  0x2e   : > { %v1164_v45 = vor.u32 %v1163_v40, %v1160_v38  ;;  %v1179_v46 = vrot.slane %v1177_v31, 5  ;;  %v1050_v48 = vld [vmem:[#allocation2 + $0x68] sm:$0x1]  ;;  %v1263_v50 = vshll.u32 %v1011_v42, 16  ;;  %v1267_v51 = vshrl.u32 %v1011_v42, 16 }
  0x2f   : > { %v1174_v53 = vor.u32 %v1173_v41, %v1169_v58  ;;  %v1256_v54 = vrot.slane %v1254_v43, 4  ;;  %v1259_v55 = vrot.slane %v1257_v44, 5  ;;  %v1273_v56 = vshll.u32 %v1050_v48, 16  ;;  %962 = vst [vmem:[#allocation2 + $0x94] sm:$0xf] %v761_v36 }
  0x30   : > { %2189 = vmatpush.bf16.msrb.mxu2 %v6123_v16  ;;  %1808 = vmatpush.bf16.msrb.mxu1 %v6107_v25  ;;  %v1165_v59 = vrot.slane %v1164_v45, 4  ;;  %v1265_v60 = vrot.slane %v1263_v50, 5  ;;  %v1269_v61 = vrot.slane %v1267_v51, 4  ;;  %965 = vst [vmem:[#allocation2 + $0x98] sm:$0x1] %v964_v37  ;;  %v6720_v62 = vrot.slane %v628_v49, 7 }
  0x31   : > { %2503 = vmatpush.bf16.msrb.mxu3 %v6147_v17  ;;  %v1175_v63 = vrot.slane %v1174_v53, 4  ;;  %v1260_v0 = vor.u32 %v1259_v55, %v1256_v54  ;;  %v1275_v4 = vrot.slane %v1273_v56, 5  ;;  %v994_v6 = vld [vmem:[#allocation2] sm:$0xf]  ;;  %v1018_v13 = vld [vmem:[#allocation2 + $0x90] sm:$0xf] }
  0x32   : > { %v1170_v9 = vsel %vm6716_vm11, %v1165_v59, %v1169_v58  ;;  %v1270_v10 = vor.u32 %v1269_v61, %v1265_v60  ;;  %v1042_v15 = vld [vmem:[#allocation2 + $0x8] sm:$0x1]  ;;  %v1062_v16 = vshrl.u32 %v994_v6, 16  ;;  %v1065_v17 = vshll.u32 %v994_v6, 16  ;;  %v910_v59 = vld [vmem:[#allocation2 + $0x3c] sm:$0xf] }
  0x33   : > { %v1180_v19 = vsel %vm6716_vm11, %v1175_v63, %v1179_v46  ;;  %v1470_v21 = vunpack.c.l.b16 %v1170_v9  ;;  %v1261_v22 = vrot.slane %v1260_v0, 4  ;;  %v1350_v23 = vshrl.u32 %v1018_v13, 16 }
  0x34   : > { %v1471_v25 = vunpack.c.l.b16 %v1180_v19  ;;  %v1271_v27 = vrot.slane %v1270_v10, 4  ;;  %v1353_v28 = vshll.u32 %v1018_v13, 16  ;;  %v1064_v29 = vrot.slane %v1062_v16, 4  ;;  %v288_v13 = vld [vmem:[#allocation2 + $0x9c] sm:$0x1] }
  0x35   : > { %v1266_v1 = vsel %vm6716_vm11, %v1261_v22, %v1265_v60  ;;  %v1352_v30 = vrot.slane %v1350_v23, 4  ;;  %v1067_v33 = vrot.slane %v1065_v17, 5  ;;  %v1081_v34 = vshll.u32 %v1042_v15, 16  ;;  %v276_v60 = vld [vmem:[#allocation2 + $0x6c] sm:$0x1] }
  0x36   : > { %v1498_v35 = vpack.c.b16 %v1471_v25, %v1470_v21  ;;  %v1276_v36 = vsel %vm6716_vm11, %v1271_v27, %v1275_v4  ;;  %v1478_v37 = vunpack.c.l.b16 %v1266_v1  ;;  %v1019_v38 = vld [vmem:[#allocation2 + $0x94] sm:$0xf]  ;;  %v1355_v40 = vrot.slane %v1353_v28, 5  ;;  %v344_v15 = vld [vmem:[#allocation2 + $0xa4] sm:$0x1] }
  0x37   : > { %v1479_v31 = vunpack.c.l.b16 %v1276_v36  ;;  %v1054_v39 = vld [vmem:[#allocation2 + $0x98] sm:$0x1]  ;;  %v1359_v49 = vshll.u32 %v1019_v38, 16  ;;  %v1363_v58 = vshrl.u32 %v1019_v38, 16  ;;  %v1068_v41 = vor.u32 %v1067_v33, %v1064_v29  ;;  %v332_v4 = vld [vmem:[#allocation2 + $0x74] sm:$0x1] }
  0x38   : > { %1602 = vmatmul.bf16.vlgmr.msra.gmra.mxu1 %v1498_v35  ;;  %v1356_v42 = vor.u32 %v1355_v40, %v1352_v30  ;;  %v1369_v43 = vshll.u32 %v1054_v39, 16  ;;  %v1083_v44 = vrot.slane %v1081_v34, 5  ;;  %v631_v45 = vshll.u32 %v6699_v26, 16  ;;  %v252_v25 = vld [vmem:[#allocation2 + $0xc] sm:$0x1]  ;;  %v6206_v40 = vld [vmem:[%s6547_s27] sm:$0xff]  }
  0x39   : > { %v1502_v46 = vpack.c.b16 %v1479_v31, %v1478_v37  ;;  %v1361_v48 = vrot.slane %v1359_v49, 5  ;;  %v1365_v50 = vrot.slane %v1363_v58, 4  ;;  %v1069_v51 = vrot.slane %v1068_v41, 4  ;;  %v6770_v38 = vld [vmem:[#allocation2 + $0x14] sm:$0x1] }
  0x3a   : > { %v1357_v53 = vrot.slane %v1356_v42, 4  ;;  %v1371_v54 = vrot.slane %v1369_v43, 5  ;;  %v1084_v55 = vsel %vm6716_vm11, %v6694_v24, %v1083_v44  ;;  %v633_v56 = vor.u32 %v631_v45, %v6720_v62 }
  0x3b   : > { %1622 = vmatmul.bf16.vlgmr.msra.gmra.mxu2 %v1502_v46  ;;  %v1366_v61 = vor.u32 %v1365_v50, %v1361_v48  ;;  %v1074_v26 = vsel %vm6716_vm11, %v1069_v51, %v6664_v57  ;;  %v1463_v63 = vunpack.c.l.b16 %v1084_v55  ;;  %v634_v0 = vrot.slane %v6720_v62, 4  ;;  %v914_v57 = vld [vmem:[#allocation2 + $0x44] sm:$0x1] }
  0x3c   : > { %v1362_v6 = vsel %vm6716_vm11, %v1357_v53, %v1361_v48  ;;  %v1462_v9 = vunpack.c.l.b16 %v1074_v26  ;;  %v636_v24 = vshrl.u32 %v6707_v32, 16  ;;  %v639_v10 = vshll.u32 %v6707_v32, 16 }
  0x3d   : > { %v1367_v16 = vrot.slane %v1366_v61, 4  ;;  %v1486_v17 = vunpack.c.l.b16 %v1362_v6  ;;  %v911_v19 = vsel %vm6612_vm7, %v633_v56, %v910_v59  ;;  %v277_v62 = vsel %vm6530_vm2, 0, %v276_v60  ;;  %v6122_v6 = vld [vmem:[%s8050_s3 + $0xa8] sm:$0xff] }
  0x3e   : > { %v1494_v21 = vpack.c.b16 %v1463_v63, %v1462_v9  ;;  %v638_v22 = vrot.slane %v636_v24, 7  ;;  %912 = vst [vmem:[#allocation2 + $0x3c] sm:$0xf] %v911_v19  ;;  %v333_v23 = vsel %vm6538_vm4, 0, %v332_v4  ;;  %v478_v32 = vadd.f32 %v6564_v14, %v6692_v20  ;;  %2190 = vmatpush.bf16.msrb.mxu2 %v6122_v6 }
  0x3f   : > { %v1372_v27 = vsel %vm6716_vm11, %v1367_v16, %v1371_v54  ;;  %278 = vst [vmem:[#allocation2 + $0x6c] sm:$0x1] %v277_v62  ;;  %v509_v28 = vmax.f32 %v6724_v7, 0.0  ;;  %v289_v29 = vsel %vm6530_vm2, 0, %v288_v13  ;;  %v345_v1 = vsel %vm6538_vm4, 0, %v344_v15 }
  0x40   : > { %v1487_v30 = vunpack.c.l.b16 %v1372_v27  ;;  %1582 = vmatmul.bf16.vlgmr.msra.gmra.mxu0 %v1494_v21  ;;  %v641_v33 = vor.u32 %v639_v10, %v638_v22  ;;  %v643_v34 = vrot.slane %v638_v22, 4  ;;  %334 = vst [vmem:[#allocation2 + $0x74] sm:$0x1] %v333_v23  ;;  %v510_v20 = vmax.f32 %v478_v32, 0.0 }
  0x41   : > { %v541_v35 = vpack.c.bf16 %v509_v28, %v509_v28  ;;  %290 = vst [vmem:[#allocation2 + $0x9c] sm:$0x1] %v289_v29  ;;  %v450_v36 = vmul.f32 %v6554_v8, %v6255_v3  ;;  %v451_v7 = vmul.f32 %v6554_v8, %v6256_v12  ;;  %v253_v37 = vsel %vm6530_vm2, 0, %v252_v25 }
  0x42   : > { %v1506_v31 = vpack.c.b16 %v1487_v30, %v1486_v17  ;;  %v642_v39 = vsel %vm6622_vm8, %v634_v0, %v641_v33  ;;  %v915_v49 = vsel %vm6530_vm2, %v643_v34, %v914_v57  ;;  %v542_v58 = vpack.c.bf16 %v510_v20, %v510_v20  ;;  %346 = vst [vmem:[#allocation2 + $0xa4] sm:$0x1] %v345_v1 }
  0x43   : > { %913 = vst [vmem:[#allocation2 + $0x40] sm:$0xf] %v642_v39  ;;  %v696_v3 = vshrl.u32 %v541_v35, 16  ;;  %v699_v47 = vshll.u32 %v541_v35, 16  ;;  %v485_v12 = vadd.f32 %v6564_v14, %v450_v36  ;;  %v486_v41 = vadd.f32 %v6564_v14, %v451_v7 }
  0x44   : > { %1642 = vmatmul.bf16.vlgmr.msra.gmra.mxu3 %v1506_v31  ;;  %916 = vst [vmem:[#allocation2 + $0x44] sm:$0x1] %v915_v49  ;;  %v704_v42 = vshrl.u32 %v542_v58, 16  ;;  %v707_v43 = vshll.u32 %v542_v58, 16  ;;  %v309_v44 = vsel %vm6538_vm4, 0, %v6770_v38  ;;  %v6207_v45 = vunpack.c.l.bf16 %v6206_v40 }
  0x45   : > { %v1004_v46 = vld [vmem:[#allocation2 + $0x3c] sm:$0xf]  ;;  %v698_v48 = vrot.slane %v696_v3, 7  ;;  %v517_v50 = vmax.f32 %v485_v12, 0.0  ;;  %v518_v51 = vmax.f32 %v486_v41, 0.0  ;;  %v6208_v53 = vunpack.c.h.bf16 %v6206_v40 }
  0x46   : > { %v1182_v54 = vshrl.u32 %v1004_v46, 16  ;;  %v1185_v55 = vshll.u32 %v1004_v46, 16  ;;  %v706_v56 = vrot.slane %v704_v42, 7  ;;  %v938_v59 = vld [vmem:[#allocation2 + $0x6c] sm:$0xf]  ;;  %v426_v60 = vmul.f32 %v6554_v8, %v6207_v45 }
  0x47   : > { %v701_v61 = vor.u32 %v699_v47, %v698_v48  ;;  %v702_v26 = vrot.slane %v698_v48, 4  ;;  %v942_v63 = vld [vmem:[#allocation2 + $0x74] sm:$0x1]  ;;  %v549_v0 = vpack.c.bf16 %v517_v50, %v517_v50  ;;  %v550_v4 = vpack.c.bf16 %v518_v51, %v518_v51  ;;  %254 = vst [vmem:[#allocation2 + $0xc] sm:$0x1] %v253_v37  ;;  %v6353_v42 = vld [vmem:[%s6547_s27 + $0x28] sm:$0xff]  }
  0x48   : > { %v1184_v9 = vrot.slane %v1182_v54, 4  ;;  %v1187_v24 = vrot.slane %v1185_v55, 5  ;;  %v709_v10 = vor.u32 %v707_v43, %v706_v56  ;;  %v711_v13 = vrot.slane %v706_v56, 4  ;;  %v966_v28 = vld [vmem:[#allocation2 + $0x9c] sm:$0xf]  ;;  %v6803_v48 = vld [vmem:[%s6547_s27 + $0x48] sm:$0xff]  }
  0x49   : > { %v939_v15 = vsel %vm6612_vm7, %v701_v61, %v938_v59  ;;  %v764_v16 = vshrl.u32 %v549_v0, 16  ;;  %v767_v17 = vshll.u32 %v549_v0, 16  ;;  %v772_v19 = vshrl.u32 %v550_v4, 16  ;;  %310 = vst [vmem:[#allocation2 + $0x14] sm:$0x1] %v309_v44 }
  0x4a   : > { %v1005_v57 = vld [vmem:[#allocation2 + $0x40] sm:$0xf]  ;;  %v1188_v62 = vor.u32 %v1187_v24, %v1184_v9  ;;  %v710_v21 = vsel %vm6622_vm8, %v702_v26, %v709_v10  ;;  %940 = vst [vmem:[#allocation2 + $0x6c] sm:$0xf] %v939_v15  ;;  %v943_v22 = vsel %vm6530_vm2, %v711_v13, %v942_v63  ;;  %v775_v23 = vshll.u32 %v550_v4, 16 }
  0x4b   : > { %v1047_v32 = vld [vmem:[#allocation2 + $0x44] sm:$0x1]  ;;  %v1191_v25 = vshll.u32 %v1005_v57, 16  ;;  %v1195_v27 = vshrl.u32 %v1005_v57, 16  ;;  %941 = vst [vmem:[#allocation2 + $0x70] sm:$0xf] %v710_v21  ;;  %v427_v29 = vmul.f32 %v6554_v8, %v6208_v53  ;;  %v461_v1 = vadd.f32 %v6564_v14, %v426_v60 }
  0x4c   : > { %v1189_v30 = vrot.slane %v1188_v62, 4  ;;  %v1201_v33 = vshll.u32 %v1047_v32, 16  ;;  %944 = vst [vmem:[#allocation2 + $0x74] sm:$0x1] %v943_v22  ;;  %v766_v34 = vrot.slane %v764_v16, 7  ;;  %v774_v20 = vrot.slane %v772_v19, 7 }
  0x4d   : > { %v1193_v35 = vrot.slane %v1191_v25, 5  ;;  %v1197_v36 = vrot.slane %v1195_v27, 4  ;;  %v462_v7 = vadd.f32 %v6564_v14, %v427_v29  ;;  %v493_v37 = vmax.f32 %v461_v1, 0.0  ;;  %v970_v49 = vld [vmem:[#allocation2 + $0xa4] sm:$0x1]  ;;  %v6146_v21 = vld [vmem:[%s8050_s3 + $0xe8] sm:$0xff] }
  0x4e   : > { %v1203_v38 = vrot.slane %v1201_v33, 5  ;;  %v769_v40 = vor.u32 %v767_v17, %v766_v34  ;;  %v770_v31 = vrot.slane %v766_v34, 4  ;;  %v777_v39 = vor.u32 %v775_v23, %v774_v20  ;;  %v267_v58 = vld [vmem:[#allocation2 + $0x48] sm:$0x1]  ;;  %v323_v16 = vld [vmem:[#allocation2 + $0x50] sm:$0x1]  ;;  %2504 = vmatpush.bf16.msrb.mxu3 %v6146_v21 }
  0x4f   : > { %v1194_v3 = vsel %vm6716_vm11, %v1189_v30, %v1193_v35  ;;  %v1198_v47 = vor.u32 %v1197_v36, %v1193_v35  ;;  %v779_v12 = vrot.slane %v774_v20, 4  ;;  %v494_v41 = vmax.f32 %v462_v7, 0.0  ;;  %v6155_v22 = vld [vmem:[%s8050_s3 + $0x130] sm:$0xff]  ;;  %v6121_v29 = vld [vmem:[%s8050_s3 + $0xa0] sm:$0xff]  ;;  %v6154_v20 = vld [vmem:[%s8050_s3 + $0x128] sm:$0xff] }
  0x50   : > { %v1472_v43 = vunpack.c.l.b16 %v1194_v3  ;;  %v778_v44 = vsel %vm6622_vm8, %v770_v31, %v777_v39  ;;  %v967_v45 = vsel %vm6612_vm7, %v769_v40, %v966_v28  ;;  %v525_v46 = vpack.c.bf16 %v493_v37, %v493_v37  ;;  %v6106_v28 = vld [vmem:[%s8050_s3 + $0x28] sm:$0xff]  ;;  %3185 = vmatpush.bf16.msrb.mxu0 %v6155_v22  ;;  %v6145_v34 = vld [vmem:[%s8050_s3 + $0xe0] sm:$0xff]  ;;  %2191 = vmatpush.bf16.msrb.mxu2 %v6121_v29 }
  0x51   : > { %v1199_v50 = vrot.slane %v1198_v47, 4  ;;  %v1012_v51 = vld [vmem:[#allocation2 + $0x6c] sm:$0xf]  ;;  %968 = vst [vmem:[#allocation2 + $0x9c] sm:$0xf] %v967_v45  ;;  %v971_v53 = vsel %vm6530_vm2, %v779_v12, %v970_v49  ;;  %v6807_v54 = vpack.c.bf16 %v494_v41, %v494_v41  ;;  %v268_v55 = vsel %vm6530_vm2, 0, %v267_v58  ;;  %1809 = vmatpush.bf16.msrb.mxu1 %v6106_v28 }
  0x52   : > { %v1013_v56 = vld [vmem:[#allocation2 + $0x70] sm:$0xf]  ;;  %v1278_v59 = vshrl.u32 %v1012_v51, 16  ;;  %v1281_v60 = vshll.u32 %v1012_v51, 16  ;;  %969 = vst [vmem:[#allocation2 + $0xa0] sm:$0xf] %v778_v44  ;;  %v6227_v61 = vunpack.c.l.bf16 %v6353_v42  ;;  %v6228_v26 = vunpack.c.h.bf16 %v6353_v42  ;;  %2505 = vmatpush.bf16.msrb.mxu3 %v6145_v34 }
  0x53   : > { %v1204_v63 = vsel %vm6716_vm11, %v1199_v50, %v1203_v38  ;;  %v1051_v0 = vld [vmem:[#allocation2 + $0x74] sm:$0x1]  ;;  %v1287_v4 = vshll.u32 %v1013_v56, 16  ;;  %v1291_v6 = vshrl.u32 %v1013_v56, 16  ;;  %972 = vst [vmem:[#allocation2 + $0xa4] sm:$0x1] %v971_v53  ;;  %v6243_v9 = vunpack.c.l.bf16 %v6803_v48 }
  0x54   : > { %v1473_v24 = vunpack.c.l.b16 %v1204_v63  ;;  %v1280_v10 = vrot.slane %v1278_v59, 4  ;;  %v1283_v13 = vrot.slane %v1281_v60, 5  ;;  %v1297_v15 = vshll.u32 %v1051_v0, 16  ;;  %269 = vst [vmem:[#allocation2 + $0x48] sm:$0x1] %v268_v55  ;;  %v6105_v12 = vld [vmem:[%s8050_s3 + $0x20] sm:$0xff]  ;;  %3186 = vmatpush.bf16.msrb.mxu0 %v6154_v20 }
  0x55   : > { %v1289_v17 = vrot.slane %v1287_v4, 5  ;;  %v1293_v19 = vrot.slane %v1291_v6, 4  ;;  %v560_v57 = vshrl.u32 %v525_v46, 16  ;;  %v563_v62 = vshll.u32 %v525_v46, 16  ;;  %v882_v38 = vld [vmem:[#allocation2 + $0xc] sm:$0xf]  ;;  %1810 = vmatpush.bf16.msrb.mxu1 %v6105_v12 }
  0x56   : > { %v1499_v23 = vpack.c.b16 %v1473_v24, %v1472_v43  ;;  %v1284_v32 = vor.u32 %v1283_v13, %v1280_v10  ;;  %v1299_v25 = vrot.slane %v1297_v15, 5  ;;  %v568_v27 = vshrl.u32 %v6807_v54, 16  ;;  %v886_v60 = vld [vmem:[#allocation2 + $0x14] sm:$0x1]  ;;  %v279_v4 = vld [vmem:[#allocation2 + $0x78] sm:$0x1] }
  0x57   : > { %v1294_v1 = vor.u32 %v1293_v19, %v1289_v17  ;;  %v562_v30 = vrot.slane %v560_v57, 7  ;;  %v571_v33 = vshll.u32 %v6807_v54, 16  ;;  %v436_v35 = vmul.f32 %v6554_v8, %v6227_v61  ;;  %v335_v6 = vld [vmem:[#allocation2 + $0x80] sm:$0x1] }
  0x58   : > { %1607 = vmatmul.bf16.gmra.mxu1 %v1499_v23  ;;  %v1285_v36 = vrot.slane %v1284_v32, 4  ;;  %v1020_v7 = vld [vmem:[#allocation2 + $0x9c] sm:$0xf]  ;;  %v570_v37 = vrot.slane %v568_v27, 7  ;;  %v324_v40 = vsel %vm6538_vm4, 0, %v323_v16  ;;  %v437_v31 = vmul.f32 %v6554_v8, %v6228_v26 }
  0x59   : > { %v1295_v39 = vrot.slane %v1294_v1, 4  ;;  %v1021_v49 = vld [vmem:[#allocation2 + $0xa0] sm:$0xf]  ;;  %v1374_v58 = vshrl.u32 %v1020_v7, 16  ;;  %v1377_v3 = vshll.u32 %v1020_v7, 16  ;;  %v565_v47 = vor.u32 %v563_v62, %v562_v30 }
  0x5a   : > { %v1290_v41 = vsel %vm6716_vm11, %v1285_v36, %v1289_v17  ;;  %v1055_v42 = vld [vmem:[#allocation2 + $0xa4] sm:$0x1]  ;;  %v1383_v43 = vshll.u32 %v1021_v49, 16  ;;  %v1387_v44 = vshrl.u32 %v1021_v49, 16  ;;  %v566_v45 = vrot.slane %v562_v30, 4  ;;  %v6864_v30 = vld [vmem:[%s6547_s27 + $0x68] sm:$0xff]  }
  0x5b   : > { %v1300_v46 = vsel %vm6716_vm11, %v1295_v39, %v1299_v25  ;;  %v1480_v50 = vunpack.c.l.b16 %v1290_v41  ;;  %v1376_v51 = vrot.slane %v1374_v58, 4  ;;  %v1379_v53 = vrot.slane %v1377_v3, 5  ;;  %325 = vst [vmem:[#allocation2 + $0x50] sm:$0x1] %v324_v40  ;;  %v291_v62 = vld [vmem:[#allocation2 + $0xa8] sm:$0x1] }
  0x5c   : > { %v1481_v54 = vunpack.c.l.b16 %v1300_v46  ;;  %v1385_v55 = vrot.slane %v1383_v43, 5  ;;  %v1389_v56 = vrot.slane %v1387_v44, 4  ;;  %v1393_v59 = vshll.u32 %v1055_v42, 16  ;;  %v347_v1 = vld [vmem:[#allocation2 + $0xb0] sm:$0x1] }
  0x5d   : > { %v1380_v61 = vor.u32 %v1379_v53, %v1376_v51  ;;  %v573_v26 = vor.u32 %v571_v33, %v570_v37  ;;  %v575_v63 = vrot.slane %v570_v37, 4  ;;  %v883_v0 = vsel %vm6612_vm7, %v565_v47, %v882_v38  ;;  %v6883_v47 = vld [vmem:[%s8049_s2] ss:$0 sm:$0xff]  ;;  %v917_v46 = vld [vmem:[#allocation2 + $0x48] sm:$0xf] }
  0x5e   : > { %v1503_v24 = vpack.c.b16 %v1481_v54, %v1480_v50  ;;  %v1390_v10 = vor.u32 %v1389_v56, %v1385_v55  ;;  %v1395_v13 = vrot.slane %v1393_v59, 5  ;;  %884 = vst [vmem:[#allocation2 + $0xc] sm:$0xf] %v883_v0  ;;  %v471_v15 = vadd.f32 %v6564_v14, %v436_v35 }
  0x5f   : > { %v1381_v16 = vrot.slane %v1380_v61, 4  ;;  %v574_v17 = vsel %vm6622_vm8, %v566_v45, %v573_v26  ;;  %v887_v19 = vsel %vm6530_vm2, %v575_v63, %v886_v60  ;;  %v472_v57 = vadd.f32 %v6564_v14, %v437_v31 }
  0x60   : > { %1627 = vmatmul.bf16.gmra.mxu2 %v1503_v24  ;;  %v1391_v21 = vrot.slane %v1390_v10, 4  ;;  %885 = vst [vmem:[#allocation2 + $0x10] sm:$0xf] %v574_v17  ;;  %v503_v22 = vmax.f32 %v471_v15, 0.0  ;;  %v280_v23 = vsel %vm6530_vm2, 0, %v279_v4  ;;  %v336_v32 = vsel %vm6538_vm4, 0, %v335_v6 }
  0x61   : > { %v1386_v25 = vsel %vm6716_vm11, %v1381_v16, %v1385_v55  ;;  %888 = vst [vmem:[#allocation2 + $0x14] sm:$0x1] %v887_v19  ;;  %v504_v27 = vmax.f32 %v472_v57, 0.0  ;;  %v6244_v28 = vunpack.c.h.bf16 %v6803_v48  ;;  %v444_v29 = vmul.f32 %v6554_v8, %v6243_v9  ;;  %v6873_v48 = vld [vmem:[%s8048_s1] ss:$0 sm:$0xff] }
  0x62   : > { %v1396_v33 = vsel %vm6716_vm11, %v1391_v21, %v1395_v13  ;;  %v1488_v34 = vunpack.c.l.b16 %v1386_v25  ;;  %v535_v20 = vpack.c.bf16 %v503_v22, %v503_v22  ;;  %281 = vst [vmem:[#allocation2 + $0x78] sm:$0x1] %v280_v23  ;;  %v292_v35 = vsel %vm6530_vm2, 0, %v291_v62  ;;  %v921_v4 = vld [vmem:[#allocation2 + $0x50] sm:$0x1] }
  0x63   : > { %v1489_v36 = vunpack.c.l.b16 %v1396_v33  ;;  %v536_v7 = vpack.c.bf16 %v504_v27, %v504_v27  ;;  %337 = vst [vmem:[#allocation2 + $0x80] sm:$0x1] %v336_v32  ;;  %v445_v8 = vmul.f32 %v6873_v48, %v6244_v28  ;;  %v479_v9 = vadd.f32 %v6564_v14, %v444_v29  ;;  %v255_v23 = vld [vmem:[#allocation2 + $0x18] sm:$0x1]  ;;  %v311_v29 = vld [vmem:[#allocation2 + $0x20] sm:$0x1] }
  0x64   : > { %v645_v37 = vshrl.u32 %v535_v20, 16  ;;  %v648_v38 = vshll.u32 %v535_v20, 16  ;;  %293 = vst [vmem:[#allocation2 + $0xa8] sm:$0x1] %v292_v35  ;;  %v348_v40 = vsel %vm6538_vm4, 0, %v347_v1  ;;  %v6259_v31 = vunpack.c.l.bf16 %v6864_v30 }
  0x65   : > { %v1507_v39 = vpack.c.b16 %v1489_v36, %v1488_v34  ;;  %v996_v49 = vld [vmem:[#allocation2 + $0xc] sm:$0xf]  ;;  %v653_v58 = vshrl.u32 %v536_v7, 16  ;;  %v656_v3 = vshll.u32 %v536_v7, 16  ;;  %v480_v12 = vadd.f32 %v6883_v47, %v445_v8  ;;  %349 = vst [vmem:[#allocation2 + $0xb0] sm:$0x1] %v348_v40 }
  0x66   : > { %v1086_v14 = vshrl.u32 %v996_v49, 16  ;;  %v1089_v41 = vshll.u32 %v996_v49, 16  ;;  %v647_v42 = vrot.slane %v645_v37, 7  ;;  %v511_v43 = vmax.f32 %v479_v9, 0.0  ;;  %v6349_v8 = vld [vmem:[%s6547_s27 + $0x8] sm:$0xff]  }
  0x67   : > { %1647 = vmatmul.bf16.gmra.mxu3 %v1507_v39  ;;  %v6886_v44 = vld [vmem:[#allocation2 + $0x10] sm:$0xf]  ;;  %v655_v45 = vrot.slane %v653_v58, 7  ;;  %v512_v50 = vmax.f32 %v480_v12, 0.0  ;;  %v6260_v51 = vunpack.c.h.bf16 %v6864_v30  ;;  %v452_v53 = vmul.f32 %v6873_v48, %v6259_v31 }
  0x68   : > { %v6890_v54 = vld [vmem:[#allocation2 + $0x14] sm:$0x1]  ;;  %v1088_v55 = vrot.slane %v1086_v14, 4  ;;  %v1091_v56 = vrot.slane %v1089_v41, 5  ;;  %v1095_v59 = vshll.u32 %v6886_v44, 16  ;;  %v1099_v60 = vshrl.u32 %v6886_v44, 16 }
  0x69   : > { %v1105_v61 = vshll.u32 %v6890_v54, 16  ;;  %v650_v26 = vor.u32 %v648_v38, %v647_v42  ;;  %v651_v63 = vrot.slane %v647_v42, 4  ;;  %v658_v0 = vor.u32 %v656_v3, %v655_v45  ;;  %v945_v38 = vld [vmem:[#allocation2 + $0x78] sm:$0xf] }
  0x6a   : > { %v1092_v6 = vor.u32 %v1091_v56, %v1088_v55  ;;  %v1097_v24 = vrot.slane %v1095_v59, 5  ;;  %v1101_v10 = vrot.slane %v1099_v60, 4  ;;  %v660_v13 = vrot.slane %v655_v45, 4  ;;  %v949_v3 = vld [vmem:[#allocation2 + $0x80] sm:$0x1] }
  0x6b   : > { %v1107_v15 = vrot.slane %v1105_v61, 5  ;;  %v659_v16 = vsel %vm6622_vm8, %v651_v63, %v658_v0  ;;  %v918_v17 = vsel %vm6612_vm7, %v650_v26, %v917_v46  ;;  %v543_v19 = vpack.c.bf16 %v511_v43, %v511_v43 }
  0x6c   : > { %v1093_v57 = vrot.slane %v1092_v6, 4  ;;  %v1102_v62 = vor.u32 %v1101_v10, %v1097_v24  ;;  %919 = vst [vmem:[#allocation2 + $0x48] sm:$0xf] %v918_v17  ;;  %v922_v21 = vsel %vm6530_vm2, %v660_v13, %v921_v4  ;;  %v544_v22 = vpack.c.bf16 %v512_v50, %v512_v50 }
  0x6d   : > { %920 = vst [vmem:[#allocation2 + $0x4c] sm:$0xf] %v659_v16  ;;  %v713_v32 = vshrl.u32 %v543_v19, 16  ;;  %v716_v25 = vshll.u32 %v543_v19, 16  ;;  %v453_v27 = vmul.f32 %v6873_v48, %v6260_v51  ;;  %v487_v28 = vadd.f32 %v6883_v47, %v452_v53 }
  0x6e   : > { %v1098_v1 = vsel %vm6716_vm11, %v1093_v57, %v1097_v24  ;;  %v1103_v30 = vrot.slane %v1102_v62, 4  ;;  %923 = vst [vmem:[#allocation2 + $0x50] sm:$0x1] %v922_v21  ;;  %v721_v33 = vshrl.u32 %v544_v22, 16  ;;  %v724_v34 = vshll.u32 %v544_v22, 16  ;;  %v6120_v21 = vld [vmem:[%s8050_s3 + $0x98] sm:$0xff] }
  0x6f   : > { %v1464_v20 = vunpack.c.l.b16 %v1098_v1  ;;  %v715_v35 = vrot.slane %v713_v32, 7  ;;  %v488_v36 = vadd.f32 %v6883_v47, %v453_v27  ;;  %v519_v7 = vmax.f32 %v487_v28, 0.0  ;;  %v270_v24 = vld [vmem:[#allocation2 + $0x54] sm:$0x1]  ;;  %2192 = vmatpush.bf16.msrb.mxu2 %v6120_v21 }
  0x70   : > { %v1108_v9 = vsel %vm6716_vm11, %v1103_v30, %v1107_v15  ;;  %v723_v37 = vrot.slane %v721_v33, 7  ;;  %v256_v40 = vsel %vm6530_vm2, 0, %v255_v23  ;;  %v312_v31 = vsel %vm6538_vm4, 0, %v311_v29  ;;  %v973_v29 = vld [vmem:[#allocation2 + $0xa8] sm:$0xf] }
  0x71   : > { %v1465_v39 = vunpack.c.l.b16 %v1108_v9  ;;  %v718_v49 = vor.u32 %v716_v25, %v715_v35  ;;  %v719_v58 = vrot.slane %v715_v35, 4  ;;  %v520_v12 = vmax.f32 %v488_v36, 0.0  ;;  %257 = vst [vmem:[#allocation2 + $0x18] sm:$0x1] %v256_v40  ;;  %v977_v35 = vld [vmem:[#allocation2 + $0xb0] sm:$0x1] }
  0x72   : > { %v726_v14 = vor.u32 %v724_v34, %v723_v37  ;;  %v728_v41 = vrot.slane %v723_v37, 4  ;;  %v551_v42 = vpack.c.bf16 %v519_v7, %v519_v7  ;;  %313 = vst [vmem:[#allocation2 + $0x20] sm:$0x1] %v312_v31  ;;  %v6211_v43 = vunpack.c.l.bf16 %v6349_v8 }
  0x73   : > { %v1495_v45 = vpack.c.b16 %v1465_v39, %v1464_v20  ;;  %v1006_v46 = vld [vmem:[#allocation2 + $0x48] sm:$0xf]  ;;  %v946_v50 = vsel %vm6612_vm7, %v718_v49, %v945_v38  ;;  %v552_v51 = vpack.c.bf16 %v520_v12, %v520_v12  ;;  %v6212_v53 = vunpack.c.h.bf16 %v6349_v8 }
  0x74   : > { %v1007_v55 = vld [vmem:[#allocation2 + $0x4c] sm:$0xf]  ;;  %v1206_v56 = vshrl.u32 %v1006_v46, 16  ;;  %v1209_v59 = vshll.u32 %v1006_v46, 16  ;;  %v727_v60 = vsel %vm6622_vm8, %v719_v58, %v726_v14  ;;  %947 = vst [vmem:[#allocation2 + $0x78] sm:$0xf] %v946_v50  ;;  %v950_v61 = vsel %vm6530_vm2, %v728_v41, %v949_v3 }
  0x75   : > { %1587 = vmatmul.bf16.gmra.mxu0 %v1495_v45  ;;  %v1048_v26 = vld [vmem:[#allocation2 + $0x50] sm:$0x1]  ;;  %v1215_v63 = vshll.u32 %v1007_v55, 16  ;;  %v1219_v0 = vshrl.u32 %v1007_v55, 16  ;;  %948 = vst [vmem:[#allocation2 + $0x7c] sm:$0xf] %v727_v60  ;;  %v428_v4 = vmul.f32 %v6873_v48, %v6211_v43  ;;  %v429_v6 = vmul.f32 %v6873_v48, %v6212_v53 }
  0x76   : > { %v1208_v10 = vrot.slane %v1206_v56, 4  ;;  %v1211_v13 = vrot.slane %v1209_v59, 5  ;;  %v1225_v15 = vshll.u32 %v1048_v26, 16  ;;  %951 = vst [vmem:[#allocation2 + $0x80] sm:$0x1] %v950_v61  ;;  %v781_v16 = vshrl.u32 %v551_v42, 16 }
  0x77   : > { %v1217_v17 = vrot.slane %v1215_v63, 5  ;;  %v1221_v19 = vrot.slane %v1219_v0, 4  ;;  %v784_v57 = vshll.u32 %v551_v42, 16  ;;  %v789_v62 = vshrl.u32 %v552_v51, 16  ;;  %v6354_v53 = vld [vmem:[%s6547_s27 + $0x30] sm:$0xff]  }
  0x78   : > { %v1212_v22 = vor.u32 %v1211_v13, %v1208_v10  ;;  %v1227_v23 = vrot.slane %v1225_v15, 5  ;;  %v783_v32 = vrot.slane %v781_v16, 7  ;;  %v792_v25 = vshll.u32 %v552_v51, 16  ;;  %v326_v51 = vld [vmem:[#allocation2 + $0x5c] sm:$0x1]  ;;  %v6940_v61 = vld [vmem:[%s6547_s27 + $0x50] sm:$0xff]  }
  0x79   : > { %v1222_v27 = vor.u32 %v1221_v19, %v1217_v17  ;;  %v791_v28 = vrot.slane %v789_v62, 7  ;;  %v463_v1 = vadd.f32 %v6883_v47, %v428_v4  ;;  %v464_v30 = vadd.f32 %v6883_v47, %v429_v6  ;;  %v6144_v10 = vld [vmem:[%s8050_s3 + $0xd8] sm:$0xff]  ;;  %v6153_v13 = vld [vmem:[%s8050_s3 + $0x120] sm:$0xff]  ;;  %v6119_v62 = vld [vmem:[%s8050_s3 + $0x90] sm:$0xff] }
  0x7a   : > { %v1213_v33 = vrot.slane %v1212_v22, 4  ;;  %v786_v34 = vor.u32 %v784_v57, %v783_v32  ;;  %v787_v20 = vrot.slane %v783_v32, 4  ;;  %v271_v36 = vsel %vm6530_vm2, 0, %v270_v24  ;;  %v6104_v15 = vld [vmem:[%s8050_s3 + $0x18] sm:$0xff]  ;;  %v282_v22 = vld [vmem:[#allocation2 + $0x84] sm:$0x1]  ;;  %2506 = vmatpush.bf16.msrb.mxu3 %v6144_v10  ;;  %3187 = vmatpush.bf16.msrb.mxu0 %v6153_v13 }
  0x7b   : > { %v1223_v7 = vrot.slane %v1222_v27, 4  ;;  %v1014_v8 = vld [vmem:[#allocation2 + $0x78] sm:$0xf]  ;;  %v794_v9 = vor.u32 %v792_v25, %v791_v28  ;;  %v796_v37 = vrot.slane %v791_v28, 4  ;;  %v495_v38 = vmax.f32 %v463_v1, 0.0  ;;  %v6143_v28 = vld [vmem:[%s8050_s3 + $0xd0] sm:$0xff]  ;;  %1811 = vmatpush.bf16.msrb.mxu1 %v6104_v15  ;;  %2193 = vmatpush.bf16.msrb.mxu2 %v6119_v62 }
  0x7c   : > { %v1218_v40 = vsel %vm6716_vm11, %v1213_v33, %v1217_v17  ;;  %v1015_v31 = vld [vmem:[#allocation2 + $0x7c] sm:$0xf]  ;;  %v1302_v39 = vshrl.u32 %v1014_v8, 16  ;;  %v1305_v49 = vshll.u32 %v1014_v8, 16  ;;  %v974_v58 = vsel %vm6612_vm7, %v786_v34, %v973_v29  ;;  %272 = vst [vmem:[#allocation2 + $0x54] sm:$0x1] %v271_v36 }
  0x7d   : > { %v1228_v3 = vsel %vm6716_vm11, %v1223_v7, %v1227_v23  ;;  %v1474_v12 = vunpack.c.l.b16 %v1218_v40  ;;  %v1052_v14 = vld [vmem:[#allocation2 + $0x80] sm:$0x1]  ;;  %v1311_v41 = vshll.u32 %v1015_v31, 16  ;;  %v1315_v42 = vshrl.u32 %v1015_v31, 16  ;;  %975 = vst [vmem:[#allocation2 + $0xa8] sm:$0xf] %v974_v58 }
  0x7e   : > { %v1475_v43 = vunpack.c.l.b16 %v1228_v3  ;;  %v1304_v45 = vrot.slane %v1302_v39, 4  ;;  %v1307_v46 = vrot.slane %v1305_v49, 5  ;;  %v1321_v50 = vshll.u32 %v1052_v14, 16  ;;  %v6152_v29 = vld [vmem:[%s8050_s3 + $0x118] sm:$0xff]  ;;  %2507 = vmatpush.bf16.msrb.mxu3 %v6143_v28 }
  0x7f   : > { %v1313_v55 = vrot.slane %v1311_v41, 5  ;;  %v1317_v56 = vrot.slane %v1315_v42, 4  ;;  %v795_v59 = vsel %vm6622_vm8, %v787_v20, %v794_v9  ;;  %v978_v60 = vsel %vm6530_vm2, %v796_v37, %v977_v35  ;;  %v6103_v35 = vld [vmem:[%s8050_s3 + $0x10] sm:$0xff]  ;;  %v889_v39 = vld [vmem:[#allocation2 + $0x18] sm:$0xf]  ;;  %3188 = vmatpush.bf16.msrb.mxu0 %v6152_v29 }
  0x80   : > { %v1500_v26 = vpack.c.b16 %v1475_v43, %v1474_v12  ;;  %v1308_v63 = vor.u32 %v1307_v46, %v1304_v45  ;;  %v1323_v0 = vrot.slane %v1321_v50, 5  ;;  %976 = vst [vmem:[#allocation2 + $0xac] sm:$0xf] %v795_v59  ;;  %v496_v4 = vmax.f32 %v464_v30, 0.0  ;;  %1812 = vmatpush.bf16.msrb.mxu1 %v6103_v35  ;;  %v893_v59 = vld [vmem:[#allocation2 + $0x20] sm:$0x1] }
  0x81   : > { %v1318_v6 = vor.u32 %v1317_v56, %v1313_v55  ;;  %979 = vst [vmem:[#allocation2 + $0xb0] sm:$0x1] %v978_v60  ;;  %v527_v24 = vpack.c.bf16 %v495_v38, %v495_v38  ;;  %v327_v16 = vsel %vm6538_vm4, 0, %v326_v51  ;;  %v6231_v17 = vunpack.c.l.bf16 %v6354_v53  ;;  %v338_v60 = vld [vmem:[#allocation2 + $0x8c] sm:$0x1] }
  0x82   : > { %1612 = vmatmul.bf16.gmra.mxu1 %v1500_v26  ;;  %v1309_v19 = vrot.slane %v1308_v63, 4  ;;  %v528_v57 = vpack.c.bf16 %v496_v4, %v496_v4  ;;  %328 = vst [vmem:[#allocation2 + $0x5c] sm:$0x1] %v327_v16  ;;  %v6232_v21 = vunpack.c.h.bf16 %v6354_v53  ;;  %v6247_v23 = vunpack.c.l.bf16 %v6940_v61 }
  0x83   : > { %v1319_v32 = vrot.slane %v1318_v6, 4  ;;  %v577_v25 = vshrl.u32 %v527_v24, 16  ;;  %v580_v27 = vshll.u32 %v527_v24, 16  ;;  %v438_v1 = vmul.f32 %v6873_v48, %v6231_v17  ;;  %v294_v6 = vld [vmem:[#allocation2 + $0xb4] sm:$0x1] }
  0x84   : > { %v1314_v30 = vsel %vm6716_vm11, %v1309_v19, %v1313_v55  ;;  %v1022_v33 = vld [vmem:[#allocation2 + $0xa8] sm:$0xf]  ;;  %v585_v34 = vshrl.u32 %v528_v57, 16  ;;  %v588_v20 = vshll.u32 %v528_v57, 16  ;;  %v439_v36 = vmul.f32 %v6873_v48, %v6232_v21 }
  0x85   : > { %v1324_v7 = vsel %vm6716_vm11, %v1319_v32, %v1323_v0  ;;  %v1482_v8 = vunpack.c.l.b16 %v1314_v30  ;;  %v1398_v9 = vshrl.u32 %v1022_v33, 16  ;;  %v1401_v37 = vshll.u32 %v1022_v33, 16  ;;  %v6362_v30 = vld [vmem:[%s6547_s27 + $0x70] sm:$0xff]  }
  0x86   : > { %v1483_v38 = vunpack.c.l.b16 %v1324_v7  ;;  %v579_v40 = vrot.slane %v577_v25, 7  ;;  %v587_v31 = vrot.slane %v585_v34, 7  ;;  %v473_v49 = vadd.f32 %v6883_v47, %v438_v1  ;;  %v350_v25 = vld [vmem:[#allocation2 + $0xbc] sm:$0x1] }
  0x87   : > { %v1023_v58 = vld [vmem:[#allocation2 + $0xac] sm:$0xf]  ;;  %v1400_v3 = vrot.slane %v1398_v9, 4  ;;  %v1403_v12 = vrot.slane %v1401_v37, 5  ;;  %v474_v14 = vadd.f32 %v6883_v47, %v439_v36  ;;  %v283_v41 = vsel %vm6530_vm2, 0, %v282_v22 }
  0x88   : > { %v1504_v42 = vpack.c.b16 %v1483_v38, %v1482_v8  ;;  %v1056_v43 = vld [vmem:[#allocation2 + $0xb0] sm:$0x1]  ;;  %v1407_v45 = vshll.u32 %v1023_v58, 16  ;;  %v1411_v46 = vshrl.u32 %v1023_v58, 16  ;;  %v582_v50 = vor.u32 %v580_v27, %v579_v40  ;;  %284 = vst [vmem:[#allocation2 + $0x84] sm:$0x1] %v283_v41 }
  0x89   : > { %v1404_v51 = vor.u32 %v1403_v12, %v1400_v3  ;;  %v1417_v53 = vshll.u32 %v1056_v43, 16  ;;  %v583_v55 = vrot.slane %v579_v40, 4  ;;  %v590_v56 = vor.u32 %v588_v20, %v587_v31  ;;  %v258_v36 = vld [vmem:[#allocation2 + $0x24] sm:$0x1]  ;;  %v924_v38 = vld [vmem:[#allocation2 + $0x54] sm:$0xf] }
  0x8a   : > { %1632 = vmatmul.bf16.gmra.mxu2 %v1504_v42  ;;  %v1409_v26 = vrot.slane %v1407_v45, 5  ;;  %v1413_v63 = vrot.slane %v1411_v46, 4  ;;  %v592_v0 = vrot.slane %v587_v31, 4  ;;  %v890_v4 = vsel %vm6612_vm7, %v582_v50, %v889_v39  ;;  %v928_v58 = vld [vmem:[#allocation2 + $0x5c] sm:$0x1] }
  0x8b   : > { %v1405_v24 = vrot.slane %v1404_v51, 4  ;;  %v1419_v10 = vrot.slane %v1417_v53, 5  ;;  %v591_v13 = vsel %vm6622_vm8, %v583_v55, %v590_v56  ;;  %891 = vst [vmem:[#allocation2 + $0x18] sm:$0xf] %v890_v4  ;;  %v505_v15 = vmax.f32 %v473_v49, 0.0 }
  0x8c   : > { %v1414_v16 = vor.u32 %v1413_v63, %v1409_v26  ;;  %892 = vst [vmem:[#allocation2 + $0x1c] sm:$0xf] %v591_v13  ;;  %v894_v17 = vsel %vm6530_vm2, %v592_v0, %v893_v59  ;;  %v506_v19 = vmax.f32 %v474_v14, 0.0  ;;  %v339_v57 = vsel %vm6538_vm4, 0, %v338_v60  ;;  %v7014_v13 = vld [vmem:[%s6547_s27 + $0x10] sm:$0xff]  }
  0x8d   : > { %v1410_v62 = vsel %vm6716_vm11, %v1405_v24, %v1409_v26  ;;  %895 = vst [vmem:[#allocation2 + $0x20] sm:$0x1] %v894_v17  ;;  %v537_v21 = vpack.c.bf16 %v505_v15, %v505_v15  ;;  %v6248_v22 = vunpack.c.h.bf16 %v6940_v61  ;;  %v446_v32 = vmul.f32 %v6873_v48, %v6247_v23 }
  0x8e   : > { %v1415_v27 = vrot.slane %v1414_v16, 4  ;;  %v1490_v28 = vunpack.c.l.b16 %v1410_v62  ;;  %v538_v29 = vpack.c.bf16 %v506_v19, %v506_v19  ;;  %340 = vst [vmem:[#allocation2 + $0x8c] sm:$0x1] %v339_v57  ;;  %v295_v1 = vsel %vm6530_vm2, 0, %v294_v6 }
  0x8f   : > { %v662_v33 = vshrl.u32 %v537_v21, 16  ;;  %v665_v34 = vshll.u32 %v537_v21, 16  ;;  %v447_v20 = vmul.f32 %v6873_v48, %v6248_v22  ;;  %v481_v35 = vadd.f32 %v6883_v47, %v446_v32  ;;  %296 = vst [vmem:[#allocation2 + $0xb4] sm:$0x1] %v295_v1 }
  0x90   : > { %v1420_v61 = vsel %vm6716_vm11, %v1415_v27, %v1419_v10  ;;  %v670_v23 = vshrl.u32 %v538_v29, 16  ;;  %v673_v7 = vshll.u32 %v538_v29, 16  ;;  %v351_v8 = vsel %vm6538_vm4, 0, %v350_v25  ;;  %v314_v10 = vld [vmem:[#allocation2 + $0x2c] sm:$0x1] }
  0x91   : > { %v1491_v9 = vunpack.c.l.b16 %v1420_v61  ;;  %v664_v37 = vrot.slane %v662_v33, 7  ;;  %v482_v40 = vadd.f32 %v6883_v47, %v447_v20  ;;  %v513_v31 = vmax.f32 %v481_v35, 0.0  ;;  %352 = vst [vmem:[#allocation2 + $0xbc] sm:$0x1] %v351_v8 }
  0x92   : > { %v998_v39 = vld [vmem:[#allocation2 + $0x18] sm:$0xf]  ;;  %v672_v49 = vrot.slane %v670_v23, 7  ;;  %v6263_v3 = vunpack.c.l.bf16 %v6362_v30  ;;  %v6264_v12 = vunpack.c.h.bf16 %v6362_v30  ;;  %v259_v14 = vsel %vm6530_vm2, 0, %v258_v36 }
  0x93   : > { %v1508_v41 = vpack.c.b16 %v1491_v9, %v1490_v28  ;;  %v7002_v42 = vld [vmem:[#allocation2 + $0x1c] sm:$0xf]  ;;  %v1110_v43 = vshrl.u32 %v998_v39, 16  ;;  %v1113_v45 = vshll.u32 %v998_v39, 16  ;;  %v667_v46 = vor.u32 %v665_v34, %v664_v37  ;;  %260 = vst [vmem:[#allocation2 + $0x24] sm:$0x1] %v259_v14 }
  0x94   : > { %v7004_v50 = vld [vmem:[#allocation2 + $0x20] sm:$0x1]  ;;  %v1119_v51 = vshll.u32 %v7002_v42, 16  ;;  %v1123_v53 = vshrl.u32 %v7002_v42, 16  ;;  %v668_v55 = vrot.slane %v664_v37, 4  ;;  %v675_v56 = vor.u32 %v673_v7, %v672_v49 }
  0x95   : > { %1652 = vmatmul.bf16.gmra.mxu3 %v1508_v41  ;;  %v1112_v59 = vrot.slane %v1110_v43, 4  ;;  %v1115_v60 = vrot.slane %v1113_v45, 5  ;;  %v1129_v26 = vshll.u32 %v7004_v50, 16  ;;  %v677_v63 = vrot.slane %v672_v49, 4 }
  0x96   : > { %v1121_v0 = vrot.slane %v1119_v51, 5  ;;  %v1125_v4 = vrot.slane %v1123_v53, 4  ;;  %v676_v6 = vsel %vm6622_vm8, %v668_v55, %v675_v56  ;;  %v925_v24 = vsel %vm6612_vm7, %v667_v46, %v924_v38  ;;  %v952_v38 = vld [vmem:[#allocation2 + $0x84] sm:$0xf]  ;;  %v956_v51 = vld [vmem:[#allocation2 + $0x8c] sm:$0x1] }
  0x97   : > { %v1116_v15 = vor.u32 %v1115_v60, %v1112_v59  ;;  %v1131_v16 = vrot.slane %v1129_v26, 5  ;;  %926 = vst [vmem:[#allocation2 + $0x54] sm:$0xf] %v925_v24  ;;  %v929_v17 = vsel %vm6530_vm2, %v677_v63, %v928_v58  ;;  %v514_v19 = vmax.f32 %v482_v40, 0.0  ;;  %v6118_v26 = vld [vmem:[%s8050_s3 + $0x88] sm:$0xff] }
  0x98   : > { %v1126_v57 = vor.u32 %v1125_v4, %v1121_v0  ;;  %927 = vst [vmem:[#allocation2 + $0x58] sm:$0xf] %v676_v6  ;;  %v545_v62 = vpack.c.bf16 %v513_v31, %v513_v31  ;;  %v454_v21 = vmul.f32 %v6873_v48, %v6263_v3  ;;  %v455_v22 = vmul.f32 %v6873_v48, %v6264_v12 }
  0x99   : > { %v1117_v32 = vrot.slane %v1116_v15, 4  ;;  %930 = vst [vmem:[#allocation2 + $0x5c] sm:$0x1] %v929_v17  ;;  %v546_v25 = vpack.c.bf16 %v514_v19, %v514_v19  ;;  %v315_v27 = vsel %vm6538_vm4, 0, %v314_v10  ;;  %v6215_v28 = vunpack.c.l.bf16 %v7014_v13  ;;  %2194 = vmatpush.bf16.msrb.mxu2 %v6118_v26 }
  0x9a   : > { %v1127_v29 = vrot.slane %v1126_v57, 4  ;;  %v730_v1 = vshrl.u32 %v545_v62, 16  ;;  %v733_v30 = vshll.u32 %v545_v62, 16  ;;  %v489_v33 = vadd.f32 %v6883_v47, %v454_v21  ;;  %316 = vst [vmem:[#allocation2 + $0x2c] sm:$0x1] %v315_v27 }
  0x9b   : > { %v1122_v34 = vsel %vm6716_vm11, %v1117_v32, %v1121_v0  ;;  %v738_v20 = vshrl.u32 %v546_v25, 16  ;;  %v741_v35 = vshll.u32 %v546_v25, 16  ;;  %v490_v36 = vadd.f32 %v6883_v47, %v455_v22 }
  0x9c   : > { %v1132_v61 = vsel %vm6716_vm11, %v1127_v29, %v1131_v16  ;;  %v1466_v23 = vunpack.c.l.b16 %v1122_v34  ;;  %v732_v7 = vrot.slane %v730_v1, 7  ;;  %v521_v8 = vmax.f32 %v489_v33, 0.0 }
  0x9d   : > { %v1467_v9 = vunpack.c.l.b16 %v1132_v61  ;;  %v740_v37 = vrot.slane %v738_v20, 7  ;;  %v522_v40 = vmax.f32 %v490_v36, 0.0  ;;  %v6216_v31 = vunpack.c.h.bf16 %v7014_v13  ;;  %v984_v36 = vld [vmem:[#allocation2 + $0xbc] sm:$0x1] }
  0x9e   : > { %v1008_v39 = vld [vmem:[#allocation2 + $0x54] sm:$0xf]  ;;  %v735_v49 = vor.u32 %v733_v30, %v732_v7  ;;  %v736_v58 = vrot.slane %v732_v7, 4  ;;  %v553_v3 = vpack.c.bf16 %v521_v8, %v521_v8  ;;  %v430_v12 = vmul.f32 %v6873_v48, %v6215_v28 }
  0x9f   : > { %v1496_v14 = vpack.c.b16 %v1467_v9, %v1466_v23  ;;  %v7031_v41 = vld [vmem:[#allocation2 + $0x58] sm:$0xf]  ;;  %v1230_v43 = vshrl.u32 %v1008_v39, 16  ;;  %v1233_v45 = vshll.u32 %v1008_v39, 16  ;;  %v743_v46 = vor.u32 %v741_v35, %v740_v37  ;;  %v980_v30 = vld [vmem:[#allocation2 + $0xb4] sm:$0xf] }
  0xa0   : > { %v7033_v53 = vld [vmem:[#allocation2 + $0x5c] sm:$0x1]  ;;  %v1239_v55 = vshll.u32 %v7031_v41, 16  ;;  %v1243_v56 = vshrl.u32 %v7031_v41, 16  ;;  %v745_v59 = vrot.slane %v740_v37, 4  ;;  %v953_v60 = vsel %vm6612_vm7, %v735_v49, %v952_v38 }
  0xa1   : > { %1592 = vmatmul.bf16.gmra.mxu0 %v1496_v14  ;;  %v1232_v63 = vrot.slane %v1230_v43, 4  ;;  %v1235_v0 = vrot.slane %v1233_v45, 5  ;;  %v1249_v4 = vshll.u32 %v7033_v53, 16  ;;  %v744_v6 = vsel %vm6622_vm8, %v736_v58, %v743_v46  ;;  %954 = vst [vmem:[#allocation2 + $0x84] sm:$0xf] %v953_v60 }
  0xa2   : > { %v1241_v24 = vrot.slane %v1239_v55, 5  ;;  %v1245_v10 = vrot.slane %v1243_v56, 4  ;;  %955 = vst [vmem:[#allocation2 + $0x88] sm:$0xf] %v744_v6  ;;  %v957_v13 = vsel %vm6530_vm2, %v745_v59, %v956_v51  ;;  %v554_v15 = vpack.c.bf16 %v522_v40, %v522_v40 }
  0xa3   : > { %v1236_v16 = vor.u32 %v1235_v0, %v1232_v63  ;;  %v1251_v17 = vrot.slane %v1249_v4, 5  ;;  %958 = vst [vmem:[#allocation2 + $0x8c] sm:$0x1] %v957_v13  ;;  %v798_v19 = vshrl.u32 %v553_v3, 16  ;;  %v801_v57 = vshll.u32 %v553_v3, 16  ;;  %v6151_v13 = vld [vmem:[%s8050_s3 + $0x110] sm:$0xff] }
  0xa4   : > { %v1246_v62 = vor.u32 %v1245_v10, %v1241_v24  ;;  %v806_v21 = vshrl.u32 %v554_v15, 16  ;;  %v809_v22 = vshll.u32 %v554_v15, 16  ;;  %v431_v32 = vmul.f32 %v6873_v48, %v6216_v31  ;;  %v6142_v10 = vld [vmem:[%s8050_s3 + $0xc8] sm:$0xff]  ;;  %3189 = vmatpush.bf16.msrb.mxu0 %v6151_v13 }
  0xa5   : > { %v1237_v25 = vrot.slane %v1236_v16, 4  ;;  %v800_v27 = vrot.slane %v798_v19, 7  ;;  %v465_v28 = vadd.f32 %v6883_v47, %v430_v12  ;;  %v6102_v15 = vld [vmem:[%s8050_s3 + $0x8] sm:$0xff]  ;;  %2508 = vmatpush.bf16.msrb.mxu3 %v6142_v10  ;;  %vm1945_vm13 = vcmask 1046532  }
  0xa6   : > { %v1247_v29 = vrot.slane %v1246_v62, 4  ;;  %v808_v1 = vrot.slane %v806_v21, 7  ;;  %v466_v33 = vadd.f32 %v6883_v47, %v431_v32  ;;  %v6141_v32 = vld [vmem:[%s8050_s3 + $0xc0] sm:$0xff]  ;;  %1813 = vmatpush.bf16.msrb.mxu1 %v6102_v15  ;;  %vm7099_vm14 = vmor %vm1944_vm12, %vm1945_vm13 }
  0xa7   : > { %v1242_v34 = vsel %vm6716_vm11, %v1237_v25, %v1241_v24  ;;  %v803_v20 = vor.u32 %v801_v57, %v800_v27  ;;  %v804_v35 = vrot.slane %v800_v27, 4  ;;  %v497_v61 = vmax.f32 %v465_v28, 0.0  ;;  %v6117_v57 = vld [vmem:[%s8050_s3 + $0x80] sm:$0xff]  ;;  %v6150_v25 = vld [vmem:[%s8050_s3 + $0x108] sm:$0xff] }
  0xa8   : > { %v1252_v23 = vsel %vm6716_vm11, %v1247_v29, %v1251_v17  ;;  %v1476_v48 = vunpack.c.l.b16 %v1242_v34  ;;  %v1016_v7 = vld [vmem:[#allocation2 + $0x84] sm:$0xf]  ;;  %v811_v8 = vor.u32 %v809_v22, %v808_v1  ;;  %v813_v9 = vrot.slane %v808_v1, 4  ;;  %2195 = vmatpush.bf16.msrb.mxu2 %v6117_v57  ;;  %3190 = vmatpush.bf16.msrb.mxu0 %v6150_v25 }
  0xa9   : > { %v1477_v37 = vunpack.c.l.b16 %v1252_v23  ;;  %v1017_v38 = vld [vmem:[#allocation2 + $0x88] sm:$0xf]  ;;  %v1326_v40 = vshrl.u32 %v1016_v7, 16  ;;  %v1329_v31 = vshll.u32 %v1016_v7, 16  ;;  %v981_v47 = vsel %vm6612_vm7, %v803_v20, %v980_v30  ;;  %v6416_v27 = vld [vmem:[#allocation2 + $0x4] sm:$0xf]  ;;  %2509 = vmatpush.bf16.msrb.mxu3 %v6141_v32 }
  0xaa   : > { %v1053_v39 = vld [vmem:[#allocation2 + $0x8c] sm:$0x1]  ;;  %v1335_v49 = vshll.u32 %v1017_v38, 16  ;;  %v1339_v58 = vshrl.u32 %v1017_v38, 16  ;;  %v812_v3 = vsel %vm6622_vm8, %v804_v35, %v811_v8  ;;  %982 = vst [vmem:[#allocation2 + $0xb4] sm:$0xf] %v981_v47  ;;  %v985_v12 = vsel %vm6530_vm2, %v813_v9, %v984_v36 }
  0xab   : > { %v1501_v14 = vpack.c.b16 %v1477_v37, %v1476_v48  ;;  %v1328_v43 = vrot.slane %v1326_v40, 4  ;;  %v1331_v45 = vrot.slane %v1329_v31, 5  ;;  %v1345_v46 = vshll.u32 %v1053_v39, 16  ;;  %983 = vst [vmem:[#allocation2 + $0xb8] sm:$0xf] %v812_v3  ;;  %v6101_v20 = vld [vmem:[%s8050_s3] sm:$0xff] }
  0xac   : > { %v1337_v51 = vrot.slane %v1335_v49, 5  ;;  %v1341_v55 = vrot.slane %v1339_v58, 4  ;;  %986 = vst [vmem:[#allocation2 + $0xbc] sm:$0x1] %v985_v12  ;;  %v498_v56 = vmax.f32 %v466_v33, 0.0  ;;  %v529_v59 = vpack.c.bf16 %v497_v61, %v497_v61  ;;  %v6188_v40 = vld [vmem:[%s8050_s3 + $0x1b8] sm:$0xff]  ;;  %1814 = vmatpush.bf16.msrb.mxu1 %v6101_v20 }
  0xad   : > { %1617 = vmatmul.bf16.gmra.mxu1 %v1501_v14  ;;  %v1332_v60 = vor.u32 %v1331_v45, %v1328_v43  ;;  %v1347_v63 = vrot.slane %v1345_v46, 5  ;;  %v1949_v28 = vrot.slane %v6416_v27, 5  ;;  %v896_v7 = vld [vmem:[#allocation2 + $0x24] sm:$0xf]  ;;  %v1896_v3 = vld [vmem:[#allocation2] sm:$0xe]  ;;  %3925 = vmatpush.bf16.msra.mxu2 %v6188_v40 }
  0xae   : > { %v1342_v26 = vor.u32 %v1341_v55, %v1337_v51  ;;  %v530_v0 = vpack.c.bf16 %v498_v56, %v498_v56  ;;  %v594_v4 = vshrl.u32 %v529_v59, 16  ;;  %v597_v24 = vshll.u32 %v529_v59, 16  ;;  %v6149_v58 = vld [vmem:[%s8050_s3 + $0x100] sm:$0xff]  ;;  %v900_v43 = vld [vmem:[#allocation2 + $0x2c] sm:$0x1] }
  0xaf   : > { %v1333_v6 = vrot.slane %v1332_v60, 4  ;;  %v5569_v59 = vrot.slane %v1896_v3, 9  ;;  %v1951_v60 = vrot.slane %v1949_v28, 4  ;;  %3191 = vmatpush.bf16.msrb.mxu0 %v6149_v58 }
  0xb0   : > { %v1343_v16 = vrot.slane %v1342_v26, 4  ;;  %v596_v17 = vrot.slane %v594_v4, 7  ;;  %v602_v19 = vshrl.u32 %v530_v0, 16  ;;  %v605_v22 = vshll.u32 %v530_v0, 16  ;;  %v6417_v26 = vld [vmem:[#allocation2 + $0x8] sm:$0x1] }
  0xb1   : > { %v1338_v62 = vsel %vm6716_vm11, %v1333_v6, %v1337_v51  ;;  %v1024_v21 = vld [vmem:[#allocation2 + $0xb4] sm:$0xf] }
  0xb2   : > { %v1348_v29 = vsel %vm6716_vm11, %v1343_v16, %v1347_v63  ;;  %v1484_v1 = vunpack.c.l.b16 %v1338_v62  ;;  %v1025_v30 = vld [vmem:[#allocation2 + $0xb8] sm:$0xf]  ;;  %v1422_v33 = vshrl.u32 %v1024_v21, 16  ;;  %v1425_v34 = vshll.u32 %v1024_v21, 16 }
  0xb3   : > { %v1485_v35 = vunpack.c.l.b16 %v1348_v29  ;;  %v1057_v36 = vld [vmem:[#allocation2 + $0xbc] sm:$0x1]  ;;  %v1431_v61 = vshll.u32 %v1025_v30, 16  ;;  %v1435_v23 = vshrl.u32 %v1025_v30, 16  ;;  %v599_v48 = vor.u32 %v597_v24, %v596_v17  ;;  %v6085_v24 = vld [vmem:[#allocation2] sm:$0xff] }
  0xb4   : > { %v1424_v8 = vrot.slane %v1422_v33, 4  ;;  %v1427_v9 = vrot.slane %v1425_v34, 5  ;;  %v1441_v37 = vshll.u32 %v1057_v36, 16  ;;  %v600_v38 = vrot.slane %v596_v17, 4  ;;  %v6196_v30 = vld [vmem:[%s8050_s3 + $0x1f8] sm:$0xff] }
  0xb5   : > { %v1505_v31 = vpack.c.b16 %v1485_v35, %v1484_v1  ;;  %v1433_v47 = vrot.slane %v1431_v61, 5  ;;  %v1437_v39 = vrot.slane %v1435_v23, 4  ;;  %v604_v49 = vrot.slane %v602_v19, 7  ;;  %v2624_v1 = vld [vmem:[#allocation2 + $0x10] sm:$0xf]  ;;  %v6204_v33 = vld [vmem:[%s8050_s3 + $0x238] sm:$0xff]  ;;  %4607 = vmatpush.bf16.msra.mxu3 %v6196_v30 }
  0xb6   : > { %v1428_v12 = vor.u32 %v1427_v9, %v1424_v8  ;;  %v897_v14 = vsel %vm6612_vm7, %v599_v48, %v896_v7  ;;  %v1443_v46 = vrot.slane %v1441_v37, 5  ;;  %v1952_v63 = vrot.slane %v6417_v26, 5  ;;  %5033 = vmatpush.bf16.msra.mxu0 %v6204_v33  ;;  %v6187_v30 = vld [vmem:[%s8050_s3 + $0x1b0] sm:$0xff] }
  0xb7   : > { %1637 = vmatmul.bf16.gmra.mxu2 %v1505_v31  ;;  %v1438_v45 = vor.u32 %v1437_v39, %v1433_v47  ;;  %v607_v51 = vor.u32 %v605_v22, %v604_v49  ;;  %v609_v55 = vrot.slane %v604_v49, 4  ;;  %898 = vst [vmem:[#allocation2 + $0x24] sm:$0xf] %v897_v14  ;;  %v1950_v19 = vsel %vm7099_vm14, %v5569_v59, %v1949_v28  ;;  %v2623_v22 = vld [vmem:[#allocation2 + $0xc] sm:$0xf]  ;;  %v6164_v28 = vld [vmem:[%s8050_s3 + $0x178] sm:$0xff] }
  0xb8   : > { %v1429_v56 = vrot.slane %v1428_v12, 4  ;;  %v1953_v57 = vsel %vm7099_vm14, %v1951_v60, %v1952_v63  ;;  %v2076_v27 = vunpack.c.l.b16 %v1950_v19  ;;  %v2672_v36 = vshrl.u32 %v2623_v22, 16  ;;  %3610 = vmatpush.bf16.msra.mxu1 %v6164_v28  ;;  %v1897_v12 = vld [vmem:[#allocation2 + $0xc] sm:$0xe]  ;;  %v2627_v28 = vld [vmem:[#allocation2 + $0x1c] sm:$0xf]  ;;  %3926 = vmatpush.bf16.msra.mxu2 %v6187_v30 }
  0xb9   : > { %v1439_v0 = vrot.slane %v1438_v45, 4  ;;  %v608_v4 = vsel %vm6622_vm8, %v600_v38, %v607_v51  ;;  %v901_v6 = vsel %vm6530_vm2, %v609_v55, %v900_v43  ;;  %v2077_v29 = vunpack.c.l.b16 %v1953_v57  ;;  %v2625_v55 = vld [vmem:[#allocation2 + $0x14] sm:$0x1] }
  0xba   : > { %v1434_v13 = vsel %vm6716_vm11, %v1429_v56, %v1433_v47  ;;  %899 = vst [vmem:[#allocation2 + $0x28] sm:$0xf] %v608_v4  ;;  %v2675_v61 = vshll.u32 %v2623_v22, 16  ;;  %v2681_v8 = vshll.u32 %v2624_v1, 16  ;;  %v2685_v9 = vshrl.u32 %v2624_v1, 16 }
  0xbb   : > { %v1444_v15 = vsel %vm6716_vm11, %v1439_v0, %v1443_v46  ;;  %v1492_v16 = vunpack.c.l.b16 %v1434_v13  ;;  %902 = vst [vmem:[#allocation2 + $0x2c] sm:$0x1] %v901_v6  ;;  %v2108_v40 = vpack.c.b16 %v2077_v29, %v2076_v27  ;;  %v1956_v39 = vrot.slane %v6886_v44, 5  ;;  %v6086_v44 = vld [vmem:[#allocation2 + $0xc] sm:$0xff]  ;;  %v2626_v29 = vld [vmem:[#allocation2 + $0x18] sm:$0xf] }
  0xbc   : > { %v1493_v17 = vunpack.c.l.b16 %v1444_v15  ;;  %v2674_v58 = vrot.slane %v2672_v36, 4  ;;  %v2677_v3 = vrot.slane %v2675_v61, 5  ;;  %v2683_v45 = vrot.slane %v2681_v8, 5  ;;  %v6125_v15 = vld [vmem:[#allocation2 + $0xc] sm:$0xff] }
  0xbd   : > { %1815 = vmatmul.bf16.vlgmr.msrb.gmra.mxu1 %v6085_v24  ;;  %v2687_v46 = vrot.slane %v2685_v9, 4  ;;  %v5570_v59 = vrot.slane %v1897_v12, 9  ;;  %v1958_v60 = vrot.slane %v1956_v39, 4  ;;  %v1959_v26 = vrot.slane %v6890_v54, 5  ;;  %v6087_v12 = vld [vmem:[#allocation2 + $0x18] sm:$0xff] }
  0xbe   : > { %v1509_v62 = vpack.c.b16 %v1493_v17, %v1492_v16  ;;  %v1000_v21 = vld [vmem:[#allocation2 + $0x24] sm:$0xf]  ;;  %v2678_v4 = vor.u32 %v2677_v3, %v2674_v58  ;;  %v2691_v24 = vshll.u32 %v2625_v55, 16  ;;  %v1966_v27 = vrot.slane %v7004_v50, 5  ;;  %v2628_v3 = vld [vmem:[#allocation2 + $0x20] sm:$0x1] }
  0xbf   : > { %v1134_v32 = vshrl.u32 %v1000_v21, 16  ;;  %v1137_v25 = vshll.u32 %v1000_v21, 16  ;;  %v2688_v6 = vor.u32 %v2687_v46, %v2683_v45  ;;  %v1957_v16 = vsel %vm7099_vm14, %v5570_v59, %v1956_v39  ;;  %v2629_v55 = vld [vmem:[#allocation2 + $0x24] sm:$0xf]  ;;  %v6163_v59 = vld [vmem:[%s8050_s3 + $0x170] sm:$0xff] }
  0xc0   : > { %1657 = vmatmul.bf16.gmra.mxu3 %v1509_v62  ;;  %v1960_v17 = vsel %vm7099_vm14, %v1958_v60, %v1959_v26  ;;  %v2679_v57 = vrot.slane %v2678_v4, 4  ;;  %v2693_v62 = vrot.slane %v2691_v24, 5  ;;  %v2078_v21 = vunpack.c.l.b16 %v1957_v16  ;;  %v6203_v60 = vld [vmem:[%s8050_s3 + $0x230] sm:$0xff]  ;;  %3611 = vmatpush.bf16.msra.mxu1 %v6163_v59  ;;  %v2634_v59 = vld [vmem:[#allocation2 + $0x38] sm:$0x1] }
  0xc1   : > { %v7120_v34 = vld [vmem:[#allocation2 + $0x28] sm:$0xf]  ;;  %v1136_v20 = vrot.slane %v1134_v32, 4  ;;  %v1139_v35 = vrot.slane %v1137_v25, 5  ;;  %v2689_v54 = vrot.slane %v2688_v6, 4  ;;  %v2079_v22 = vunpack.c.l.b16 %v1960_v17  ;;  %5034 = vmatpush.bf16.msra.mxu0 %v6203_v60 }
  0xc2   : > { %v7122_v23 = vld [vmem:[#allocation2 + $0x2c] sm:$0x1]  ;;  %v1143_v48 = vshll.u32 %v7120_v34, 16  ;;  %v1147_v7 = vshrl.u32 %v7120_v34, 16  ;;  %v1898_v32 = vld [vmem:[#allocation2 + $0x18] sm:$0xe] }
  0xc3   : > { %v1140_v37 = vor.u32 %v1139_v35, %v1136_v20  ;;  %v1153_v38 = vshll.u32 %v7122_v23, 16  ;;  %v1963_v25 = vrot.slane %v7002_v42, 5  ;;  %v5571_v1 = vrot.slane %v1898_v32, 9  ;;  %v2631_v32 = vld [vmem:[#allocation2 + $0x2c] sm:$0x1]  ;;  %v6088_v30 = vld [vmem:[#allocation2 + $0x24] sm:$0xff] }
  0xc4   : > { %v1145_v31 = vrot.slane %v1143_v48, 5  ;;  %v1149_v47 = vrot.slane %v1147_v7, 4  ;;  %v2684_v20 = vsel %vm6716_vm11, %v2679_v57, %v2683_v45  ;;  %v2694_v35 = vsel %vm6716_vm11, %v2689_v54, %v2693_v62 }
  0xc5   : > { %v1141_v49 = vrot.slane %v1140_v37, 4  ;;  %v1155_v43 = vrot.slane %v1153_v38, 5  ;;  %v1965_v33 = vrot.slane %v1963_v25, 4  ;;  %v1964_v42 = vsel %vm7099_vm14, %v5571_v1, %v1963_v25 }
  0xc6   : > { %v1150_v14 = vor.u32 %v1149_v47, %v1145_v31  ;;  %v2109_v50 = vpack.c.b16 %v2079_v22, %v2078_v21  ;;  %v2696_v36 = vshrl.u32 %v2626_v29, 16  ;;  %v2080_v48 = vunpack.c.l.b16 %v1964_v42 }
  0xc7   : > { %v1146_v51 = vsel %vm6716_vm11, %v1141_v49, %v1145_v31  ;;  %2196 = vmatmul.bf16.vlgmr.msrb.gmra.mxu2 %v2108_v40  ;;  %v1967_v61 = vsel %vm7099_vm14, %v1965_v33, %v1966_v27  ;;  %v2699_v7 = vshll.u32 %v2626_v29, 16  ;;  %v2705_v8 = vshll.u32 %v2627_v28, 16 }
  0xc8   : > { %v1151_v56 = vrot.slane %v1150_v14, 4  ;;  %v1468_v63 = vunpack.c.l.b16 %v1146_v51  ;;  %v2709_v9 = vshrl.u32 %v2627_v28, 16  ;;  %v2081_v37 = vunpack.c.l.b16 %v1967_v61 }
  0xc9   : > { %v3072_v40 = vunpack.c.l.b16 %v2684_v20  ;;  %v3073_v31 = vunpack.c.l.b16 %v2694_v35  ;;  %v2698_v47 = vrot.slane %v2696_v36, 4  ;;  %v2701_v39 = vrot.slane %v2699_v7, 5  ;;  %v6127_v35 = vld [vmem:[#allocation2 + $0x24] sm:$0xff] }
  0xca   : > { %v1156_v0 = vsel %vm6716_vm11, %v1151_v56, %v1155_v43  ;;  %v2110_v38 = vpack.c.b16 %v2081_v37, %v2080_v48  ;;  %v2707_v49 = vrot.slane %v2705_v8, 5  ;;  %v2711_v58 = vrot.slane %v2709_v9, 4  ;;  %v6126_v43 = vld [vmem:[#allocation2 + $0x18] sm:$0xff]  ;;  %v6195_v56 = vld [vmem:[%s8050_s3 + $0x1f0] sm:$0xff]  ;;  %v6186_v37 = vld [vmem:[%s8050_s3 + $0x1a8] sm:$0xff] }
  0xcb   : > { %v1469_v13 = vunpack.c.l.b16 %v1156_v0  ;;  %v3104_v14 = vpack.c.b16 %v3073_v31, %v3072_v40  ;;  %v2702_v45 = vor.u32 %v2701_v39, %v2698_v47  ;;  %v2715_v51 = vshll.u32 %v2628_v3, 16  ;;  %v2630_v0 = vld [vmem:[#allocation2 + $0x28] sm:$0xf]  ;;  %4608 = vmatpush.bf16.msra.mxu3 %v6195_v56  ;;  %v2632_v8 = vld [vmem:[#allocation2 + $0x30] sm:$0xf]  ;;  %3927 = vmatpush.bf16.msra.mxu2 %v6186_v37 }
  0xcc   : > { %v2712_v46 = vor.u32 %v2711_v58, %v2707_v49  ;;  %v2720_v4 = vshrl.u32 %v2629_v55, 16  ;;  %v2723_v6 = vshll.u32 %v2629_v55, 16  ;;  %v2729_v24 = vshll.u32 %v2630_v0, 16  ;;  %v2633_v9 = vld [vmem:[#allocation2 + $0x34] sm:$0xf] }
  0xcd   : > { %v1497_v19 = vpack.c.b16 %v1469_v13, %v1468_v63  ;;  %1820 = vmatmul.bf16.gmra.mxu1 %v6086_v44  ;;  %v2703_v26 = vrot.slane %v2702_v45, 4  ;;  %v2717_v44 = vrot.slane %v2715_v51, 5  ;;  %v2733_v16 = vshrl.u32 %v2630_v0, 16  ;;  %v6418_v3 = vld [vmem:[#allocation2 + $0x34] sm:$0xf]  ;;  %v7176_v45 = vpop.f32.mrf.mxu1 }
  0xce   : > { %v2713_v63 = vrot.slane %v2712_v46, 4  ;;  %v1970_v17 = vrot.slane %v7120_v34, 5  ;;  %v2722_v57 = vrot.slane %v2720_v4, 4  ;;  %v2725_v54 = vrot.slane %v2723_v6, 5  ;;  %v6089_v4 = vld [vmem:[#allocation2 + $0x30] sm:$0xff] }
  0xcf   : > { %1597 = vmatmul.bf16.gmra.mxu0 %v1497_v19  ;;  %v2708_v13 = vsel %vm6716_vm11, %v2703_v26, %v2707_v49  ;;  %v1899_v19 = vld [vmem:[#allocation2 + $0x24] sm:$0xe]  ;;  %v2731_v22 = vrot.slane %v2729_v24, 5  ;;  %v2735_v25 = vrot.slane %v2733_v16, 4  ;;  %v1973_v1 = vrot.slane %v7122_v23, 5 }
  0xd0   : > { %2510 = vmatmul.bf16.vlgmr.msrb.gmra.mxu3 %v6125_v15  ;;  %v2718_v15 = vsel %vm6716_vm11, %v2713_v63, %v2717_v44  ;;  %v3074_v62 = vunpack.c.l.b16 %v2708_v13  ;;  %v5572_v27 = vrot.slane %v1899_v19, 9  ;;  %v1972_v29 = vrot.slane %v1970_v17, 4  ;;  %v6419_v44 = vld [vmem:[#allocation2 + $0x38] sm:$0x1]  ;;  %v6128_v13 = vld [vmem:[#allocation2 + $0x30] sm:$0xff] }
  0xd1   : > { %v3075_v21 = vunpack.c.l.b16 %v2718_v15  ;;  %v2726_v28 = vor.u32 %v2725_v54, %v2722_v57  ;;  %v2739_v20 = vshll.u32 %v2631_v32, 16  ;;  %v2736_v42 = vor.u32 %v2735_v25, %v2731_v22  ;;  %v2635_v57 = vld [vmem:[#allocation2 + $0x3c] sm:$0xf]  ;;  %v6162_v32 = vld [vmem:[%s8050_s3 + $0x168] sm:$0xff] }
  0xd2   : > { %v1971_v34 = vsel %vm7099_vm14, %v5572_v27, %v1970_v17  ;;  %v2744_v31 = vshrl.u32 %v2632_v8, 16  ;;  %v2747_v47 = vshll.u32 %v2632_v8, 16  ;;  %v2753_v39 = vshll.u32 %v2633_v9, 16  ;;  %v6202_v25 = vld [vmem:[%s8050_s3 + $0x228] sm:$0xff]  ;;  %3612 = vmatpush.bf16.msra.mxu1 %v6162_v32 }
  0xd3   : > { %v3105_v33 = vpack.c.b16 %v3075_v21, %v3074_v62  ;;  %v2727_v36 = vrot.slane %v2726_v28, 4  ;;  %v2741_v61 = vrot.slane %v2739_v20, 5  ;;  %v2082_v48 = vunpack.c.l.b16 %v1971_v34  ;;  %v6194_v21 = vld [vmem:[%s8050_s3 + $0x1e8] sm:$0xff]  ;;  %5035 = vmatpush.bf16.msra.mxu0 %v6202_v25 }
  0xd4   : > { %v2737_v23 = vrot.slane %v2736_v42, 4  ;;  %v2757_v58 = vshrl.u32 %v2633_v9, 16  ;;  %v2746_v51 = vrot.slane %v2744_v31, 4  ;;  %v2749_v55 = vrot.slane %v2747_v47, 5  ;;  %4609 = vmatpush.bf16.msra.mxu3 %v6194_v21  ;;  %v2637_v31 = vld [vmem:[#allocation2 + $0x44] sm:$0x1] }
  0xd5   : > { %v2755_v56 = vrot.slane %v2753_v39, 5  ;;  %v1980_v0 = vrot.slane %v6419_v44, 5  ;;  %v2763_v24 = vshll.u32 %v2634_v59, 16  ;;  %v7193_v28 = vpop.f32.mrf.mxu1  ;;  %v2771_v20 = vshll.u32 %v2635_v57, 16  ;;  %v7209_v44 = vpop.f32.mrf.mxu0 }
  0xd6   : > { %v2742_v49 = vsel %vm6716_vm11, %v2737_v23, %v2741_v61  ;;  %v2759_v60 = vrot.slane %v2757_v58, 4  ;;  %v2750_v15 = vor.u32 %v2749_v55, %v2746_v51  ;;  %v6420_v61 = vld [vmem:[#allocation2 + $0x40] sm:$0xf]  ;;  %v2787_v55 = vshll.u32 %v2637_v31, 16 }
  0xd7   : > { %2201 = vmatmul.bf16.gmra.mxu2 %v2109_v50  ;;  %v1974_v50 = vsel %vm7099_vm14, %v1972_v29, %v1973_v1  ;;  %v3077_v46 = vunpack.c.l.b16 %v2742_v49  ;;  %v2765_v1 = vrot.slane %v2763_v24, 5  ;;  %v2773_v8 = vrot.slane %v2771_v20, 5 }
  0xd8   : > { %v2083_v7 = vunpack.c.l.b16 %v1974_v50  ;;  %v2760_v16 = vor.u32 %v2759_v60, %v2755_v56  ;;  %v2751_v27 = vrot.slane %v2750_v15, 4  ;;  %v2639_v15 = vld [vmem:[#allocation2 + $0x4c] sm:$0xf] }
  0xd9   : > { %v2801_v25 = vshll.u32 %v2639_v15, 16 }
  0xda   : > { %v2111_v40 = vpack.c.b16 %v2083_v7, %v2082_v48  ;;  %v2761_v29 = vrot.slane %v2760_v16, 4  ;;  %v2756_v34 = vsel %vm6716_vm11, %v2751_v27, %v2755_v56  ;;  %v1984_v48 = vrot.slane %v6420_v61, 5  ;;  %v1901_v7 = vld [vmem:[#allocation2 + $0x3c] sm:$0xe] }
  0xdb   : > { %v3078_v9 = vunpack.c.l.b16 %v2756_v34  ;;  %v5574_v58 = vrot.slane %v1901_v7, 9  ;;  %v6129_v56 = vld [vmem:[#allocation2 + $0x3c] sm:$0xff] }
  0xdc   : > { %v2766_v50 = vsel %vm6716_vm11, %v2761_v29, %v2765_v1  ;;  %v2805_v29 = vshrl.u32 %v2639_v15, 16  ;;  %v6422_v1 = vld [vmem:[#allocation2 + $0x4c] sm:$0xf] }
  0xdd   : > { %1825 = vmatmul.bf16.gmra.mxu1 %v6087_v12  ;;  %v1977_v12 = vrot.slane %v6418_v3, 5  ;;  %v3079_v37 = vunpack.c.l.b16 %v2766_v50  ;;  %v7203_v49 = vpop.f32.mrf.mxu1  ;;  %v1986_v3 = vrot.slane %v1984_v48, 4  ;;  %v1985_v60 = vsel %vm7099_vm14, %v5574_v58, %v1984_v48 }
  0xde   : > { %v2803_v50 = vrot.slane %v2801_v25, 5  ;;  %v2807_v61 = vrot.slane %v2805_v29, 4  ;;  %v1998_v29 = vrot.slane %v7031_v41, 5 }
  0xdf   : > { %3192 = vmatmul.bf16.vlgmr.msrb.gmra.mxu0 %v3104_v14  ;;  %v1900_v14 = vld [vmem:[#allocation2 + $0x30] sm:$0xe]  ;;  %v1979_v63 = vrot.slane %v1977_v12, 4  ;;  %v3107_v51 = vpack.c.b16 %v3079_v37, %v3078_v9  ;;  %v7226_v37 = vpop.f32.mrf.mxu0 }
  0xe0   : > { %2515 = vmatmul.bf16.gmra.mxu3 %v6126_v43  ;;  %v5573_v26 = vrot.slane %v1900_v14, 9 }
  0xe1   : > { %v1981_v19 = vsel %vm7099_vm14, %v1979_v63, %v1980_v0  ;;  %v2789_v0 = vrot.slane %v2787_v55, 5  ;;  %v2641_v55 = vld [vmem:[#allocation2 + $0x54] sm:$0xf] }
  0xe2   : > { %v1978_v17 = vsel %vm7099_vm14, %v5573_v26, %v1977_v12  ;;  %v2085_v62 = vunpack.c.l.b16 %v1981_v19  ;;  %v6421_v12 = vld [vmem:[#allocation2 + $0x44] sm:$0x1]  ;;  %v2816_v15 = vshrl.u32 %v2641_v55, 16 }
  0xe3   : > { %v2084_v54 = vunpack.c.l.b16 %v1978_v17  ;;  %v1987_v14 = vrot.slane %v6421_v12, 5  ;;  %v6185_v17 = vld [vmem:[%s8050_s3 + $0x1a0] sm:$0xff] }
  0xe4   : > { %3928 = vmatpush.bf16.msra.mxu2 %v6185_v17  ;;  %v2819_v17 = vshll.u32 %v2641_v55, 16 }
  0xe5   : > { %v1988_v26 = vsel %vm7099_vm14, %v1986_v3, %v1987_v14  ;;  %v7211_v16 = vpop.f32.mrf.mxu1  ;;  %v6130_v3 = vld [vmem:[#allocation2 + $0x48] sm:$0xff]  ;;  %v2808_v14 = vor.u32 %v2807_v61, %v2803_v50 }
  0xe7   : > { %2206 = vmatmul.bf16.gmra.mxu2 %v2110_v38  ;;  %v2732_v38 = vsel %vm6716_vm11, %v2727_v36, %v2731_v22  ;;  %v7185_v22 = vpop.f32.mrf.mxu2 }
  0xe8   : > { %v3076_v43 = vunpack.c.l.b16 %v2732_v38 }
  0xea   : > { %v3106_v6 = vpack.c.b16 %v3077_v46, %v3076_v43  ;;  %v6090_v43 = vld [vmem:[#allocation2 + $0x3c] sm:$0xff] }
  0xed   : > { %1830 = vmatmul.bf16.gmra.mxu1 %v6088_v30  ;;  %v2636_v30 = vld [vmem:[#allocation2 + $0x40] sm:$0xf] }
  0xee   : > { %v2777_v42 = vshll.u32 %v2636_v30, 16  ;;  %v2781_v36 = vshrl.u32 %v2636_v30, 16  ;;  %v1991_v30 = vrot.slane %v6422_v1, 5 }
  0xef   : > { %3197 = vmatmul.bf16.gmra.mxu0 %v3105_v33  ;;  %v2768_v33 = vshrl.u32 %v2635_v57, 16  ;;  %v7201_v39 = vpop.f32.mrf.mxu2 }
  0xf0   : > { %2520 = vmatmul.bf16.gmra.mxu3 %v6127_v35  ;;  %v2112_v35 = vpack.c.b16 %v2085_v62, %v2084_v54  ;;  %v2779_v38 = vrot.slane %v2777_v42, 5  ;;  %v2783_v47 = vrot.slane %v2781_v36, 4  ;;  %v2640_v36 = vld [vmem:[#allocation2 + $0x50] sm:$0x1] }
  0xf1   : > { %v2770_v23 = vrot.slane %v2768_v33, 4  ;;  %v1902_v33 = vld [vmem:[#allocation2 + $0x48] sm:$0xe] }
  0xf2   : > { %v2784_v59 = vor.u32 %v2783_v47, %v2779_v38  ;;  %v5575_v7 = vrot.slane %v1902_v33, 9  ;;  %v2811_v47 = vshll.u32 %v2640_v36, 16  ;;  %v2818_v33 = vrot.slane %v2816_v15, 4 }
  0xf3   : > { %v2774_v46 = vor.u32 %v2773_v8, %v2770_v23  ;;  %v1993_v23 = vrot.slane %v1991_v30, 4  ;;  %v6423_v8 = vld [vmem:[#allocation2 + $0x50] sm:$0x1] }
  0xf4   : > { %v2785_v24 = vrot.slane %v2784_v59, 4  ;;  %v1994_v9 = vrot.slane %v6423_v8, 5  ;;  %v2643_v8 = vld [vmem:[#allocation2 + $0x5c] sm:$0x1] }
  0xf5   : > { %v2775_v63 = vrot.slane %v2774_v46, 4  ;;  %v1992_v46 = vsel %vm7099_vm14, %v5575_v7, %v1991_v30  ;;  %v1903_v30 = vld [vmem:[#allocation2 + $0x54] sm:$0xe] }
  0xf6   : > { %v2790_v27 = vsel %vm6716_vm11, %v2785_v24, %v2789_v0  ;;  %v2642_v24 = vld [vmem:[#allocation2 + $0x58] sm:$0xf]  ;;  %v5576_v7 = vrot.slane %v1903_v30, 9  ;;  %v1904_v30 = vld [vmem:[#allocation2 + $0x60] sm:$0xe] }
  0xf7   : > { %2211 = vmatmul.bf16.gmra.mxu2 %v2111_v40  ;;  %v7199_v40 = vpop.f32.mrf.mxu3  ;;  %v2780_v57 = vsel %vm6716_vm11, %v2775_v63, %v2779_v38  ;;  %v7220_v54 = vpop.f32.mrf.mxu2  ;;  %v6091_v38 = vld [vmem:[#allocation2 + $0x48] sm:$0xff]  ;;  %v6201_v63 = vld [vmem:[%s8050_s3 + $0x220] sm:$0xff] }
  0xf8   : > { %v3080_v20 = vunpack.c.l.b16 %v2780_v57  ;;  %5036 = vmatpush.bf16.msra.mxu0 %v6201_v63  ;;  %v7247_v57 = vpop.f32.mrf.mxu0 }
  0xfd   : > { %1835 = vmatmul.bf16.gmra.mxu1 %v6089_v4  ;;  %v2086_v4 = vunpack.c.l.b16 %v1985_v60  ;;  %v6193_v60 = vld [vmem:[%s8050_s3 + $0x1e0] sm:$0xff] }
  0xfe   : > { %4610 = vmatpush.bf16.msra.mxu3 %v6193_v60 }
  0xff   : > { %3202 = vmatmul.bf16.gmra.mxu0 %v3106_v6  ;;  %v2087_v6 = vunpack.c.l.b16 %v1988_v26  ;;  %v7216_v19 = vpop.f32.mrf.mxu3  ;;  %v7224_v48 = vpop.f32.mrf.mxu1  ;;  %v6161_v26 = vld [vmem:[%s8050_s3 + $0x160] sm:$0xff] }
 0x100   : > { %2525 = vmatmul.bf16.gmra.mxu3 %v6128_v13  ;;  %v2638_v13 = vld [vmem:[#allocation2 + $0x48] sm:$0xf]  ;;  %3613 = vmatpush.bf16.msra.mxu1 %v6161_v26 }
 0x101   : > { %v2113_v62 = vpack.c.b16 %v2087_v6, %v2086_v4  ;;  %v2792_v21 = vshrl.u32 %v2638_v13, 16  ;;  %v2795_v32 = vshll.u32 %v2638_v13, 16  ;;  %v2809_v4 = vrot.slane %v2808_v14, 4 }
 0x102   : > { %v2813_v6 = vrot.slane %v2811_v47, 5  ;;  %v6131_v47 = vld [vmem:[#allocation2 + $0x54] sm:$0xff]  ;;  %v1999_v14 = vsel %vm7099_vm14, %v5576_v7, %v1998_v29 }
 0x103   : > { %v2794_v42 = vrot.slane %v2792_v21, 4  ;;  %v2797_v34 = vrot.slane %v2795_v32, 5  ;;  %v2825_v21 = vshll.u32 %v2642_v24, 16 }
 0x104   : > { %v2814_v25 = vsel %vm6716_vm11, %v2809_v4, %v2813_v6  ;;  %v2645_v4 = vld [vmem:[#allocation2 + $0x64] sm:$0xf] }
 0x105   : > { %v2798_v12 = vor.u32 %v2797_v34, %v2794_v42  ;;  %v3083_v34 = vunpack.c.l.b16 %v2814_v25  ;;  %v2827_v36 = vrot.slane %v2825_v21, 5  ;;  %v2849_v21 = vshll.u32 %v2645_v4, 16 }
 0x106   : > { %v2853_v25 = vshrl.u32 %v2645_v4, 16  ;;  %v6184_v4 = vld [vmem:[%s8050_s3 + $0x198] sm:$0xff] }
 0x107   : > { %2216 = vmatmul.bf16.gmra.mxu2 %v2112_v35  ;;  %v3081_v35 = vunpack.c.l.b16 %v2790_v27  ;;  %v7228_v58 = vpop.f32.mrf.mxu3  ;;  %v2799_v0 = vrot.slane %v2798_v12, 4  ;;  %v7245_v13 = vpop.f32.mrf.mxu1  ;;  %v2829_v27 = vshrl.u32 %v2642_v24, 16  ;;  %v2835_v12 = vshll.u32 %v2643_v8, 16  ;;  %v6425_v8 = vld [vmem:[#allocation2 + $0x68] sm:$0x1] }
 0x108   : > { %v2855_v7 = vrot.slane %v2853_v25, 4  ;;  %3929 = vmatpush.bf16.msra.mxu2 %v6184_v4  ;;  %v2649_v4 = vld [vmem:[#allocation2 + $0x74] sm:$0x1] }
 0x109   : > { %v3108_v31 = vpack.c.b16 %v3081_v35, %v3080_v20  ;;  %v2804_v32 = vsel %vm6716_vm11, %v2799_v0, %v2803_v50  ;;  %v2821_v20 = vrot.slane %v2819_v17, 5  ;;  %v2831_v61 = vrot.slane %v2829_v27, 4  ;;  %v2644_v0 = vld [vmem:[#allocation2 + $0x60] sm:$0xf]  ;;  %v6424_v27 = vld [vmem:[#allocation2 + $0x64] sm:$0xf] }
 0x10a   : > { %v3082_v42 = vunpack.c.l.b16 %v2804_v32  ;;  %v2000_v50 = vrot.slane %v1998_v29, 4  ;;  %v2837_v26 = vrot.slane %v2835_v12, 5  ;;  %v2840_v17 = vshrl.u32 %v2644_v0, 16 }
 0x10b   : > { %v2005_v29 = vrot.slane %v6424_v27, 5 }
 0x10c   : > { %v3109_v41 = vpack.c.b16 %v3083_v34, %v3082_v42  ;;  %v2842_v34 = vrot.slane %v2840_v17, 4  ;;  %v2648_v17 = vld [vmem:[#allocation2 + $0x70] sm:$0xf] }
 0x10d   : > { %1840 = vmatmul.bf16.gmra.mxu1 %v6090_v43  ;;  %v7230_v43 = vpop.f32.mrf.mxu2 }
 0x10f   : > { %3207 = vmatmul.bf16.gmra.mxu0 %v3107_v51  ;;  %v1995_v51 = vsel %vm7099_vm14, %v1993_v23, %v1994_v9  ;;  %v7254_v1 = vpop.f32.mrf.mxu3  ;;  %v2001_v23 = vrot.slane %v7033_v53, 5  ;;  %v2822_v9 = vor.u32 %v2821_v20, %v2818_v33 }
 0x110   : > { %2530 = vmatmul.bf16.gmra.mxu3 %v6129_v56  ;;  %v2088_v56 = vunpack.c.l.b16 %v1992_v46  ;;  %v2089_v59 = vunpack.c.l.b16 %v1995_v51  ;;  %v7265_v51 = vpop.f32.mrf.mxu0 }
 0x111   : > { %v2002_v46 = vsel %vm7099_vm14, %v2000_v50, %v2001_v23  ;;  %v2823_v55 = vrot.slane %v2822_v9, 4  ;;  %v5577_v50 = vrot.slane %v1904_v30, 9  ;;  %v2007_v23 = vrot.slane %v2005_v29, 4 }
 0x112   : > { %v2008_v9 = vrot.slane %v6425_v8, 5 }
 0x113   : > { %v2828_v6 = vsel %vm6716_vm11, %v2823_v55, %v2827_v36  ;;  %v6093_v55 = vld [vmem:[#allocation2 + $0x60] sm:$0xff] }
 0x114   : > { %v3084_v33 = vunpack.c.l.b16 %v2828_v6  ;;  %v2647_v6 = vld [vmem:[#allocation2 + $0x6c] sm:$0xf] }
 0x115   : > { %v7256_v35 = vpop.f32.mrf.mxu2 }
 0x117   : > { %2221 = vmatmul.bf16.gmra.mxu2 %v2113_v62  ;;  %v2114_v62 = vpack.c.b16 %v2089_v59, %v2088_v56  ;;  %v2090_v56 = vunpack.c.l.b16 %v1999_v14  ;;  %v2091_v59 = vunpack.c.l.b16 %v2002_v46 }
 0x118   : > { %v7267_v53 = vpop.f32.mrf.mxu3 }
 0x119   : > { %v2115_v15 = vpack.c.b16 %v2091_v59, %v2090_v56  ;;  %v6132_v56 = vld [vmem:[#allocation2 + $0x60] sm:$0xff] }
 0x11d   : > { %1845 = vmatmul.bf16.gmra.mxu1 %v6091_v38  ;;  %v7269_v63 = vpop.f32.mrf.mxu2 }
 0x11e   : > { %v7277_v20 = vpop.f32.mrf.mxu0 }
 0x11f   : > { %3212 = vmatmul.bf16.gmra.mxu0 %v3108_v31  ;;  %v6092_v31 = vld [vmem:[#allocation2 + $0x54] sm:$0xff] }
 0x120   : > { %2535 = vmatmul.bf16.gmra.mxu3 %v6130_v3  ;;  %v2832_v3 = vor.u32 %v2831_v61, %v2827_v36  ;;  %v2851_v61 = vrot.slane %v2849_v21, 5  ;;  %v6160_v21 = vld [vmem:[%s8050_s3 + $0x158] sm:$0xff] }
 0x121   : > { %3614 = vmatpush.bf16.msra.mxu1 %v6160_v21  ;;  %v2883_v21 = vshll.u32 %v2649_v4, 16 }
 0x122   : > { %v2833_v60 = vrot.slane %v2832_v3, 4  ;;  %v2856_v59 = vor.u32 %v2855_v7, %v2851_v61 }
 0x124   : > { %v2838_v32 = vsel %vm6716_vm11, %v2833_v60, %v2837_v26  ;;  %v2006_v26 = vsel %vm7099_vm14, %v5577_v50, %v2005_v29  ;;  %v2857_v25 = vrot.slane %v2856_v59, 4 }
 0x125   : > { %v3085_v42 = vunpack.c.l.b16 %v2838_v32 }
 0x126   : > { %v7297_v29 = vpop.f32.mrf.mxu0 }
 0x127   : > { %2226 = vmatmul.bf16.gmra.mxu2 %v2114_v62  ;;  %v2843_v62 = vshll.u32 %v2644_v0, 16  ;;  %v3110_v12 = vpack.c.b16 %v3085_v42, %v3084_v33  ;;  %v2009_v0 = vsel %vm7099_vm14, %v2007_v23, %v2008_v9  ;;  %v2864_v33 = vshrl.u32 %v2647_v6, 16 }
 0x128   : > { %v2867_v42 = vshll.u32 %v2647_v6, 16 }
 0x129   : > { %v2845_v36 = vrot.slane %v2843_v62, 5  ;;  %v6192_v62 = vld [vmem:[%s8050_s3 + $0x1d8] sm:$0xff] }
 0x12a   : > { %v7259_v38 = vpop.f32.mrf.mxu1  ;;  %4611 = vmatpush.bf16.msra.mxu3 %v6192_v62 }
 0x12b   : > { %v2846_v14 = vor.u32 %v2845_v36, %v2842_v34  ;;  %v2873_v34 = vshll.u32 %v2648_v17, 16  ;;  %v2877_v36 = vshrl.u32 %v2648_v17, 16 }
 0x12d   : > { %1850 = vmatmul.bf16.gmra.mxu1 %v6092_v31  ;;  %v2646_v31 = vld [vmem:[#allocation2 + $0x68] sm:$0x1]  ;;  %v2847_v32 = vrot.slane %v2846_v14, 4  ;;  %v1905_v14 = vld [vmem:[#allocation2 + $0x6c] sm:$0xe]  ;;  %v2875_v59 = vrot.slane %v2873_v34, 5 }
 0x12e   : > { %v2859_v60 = vshll.u32 %v2646_v31, 16  ;;  %v6200_v31 = vld [vmem:[%s8050_s3 + $0x218] sm:$0xff]  ;;  %v6094_v34 = vld [vmem:[#allocation2 + $0x6c] sm:$0xff] }
 0x12f   : > { %3217 = vmatmul.bf16.gmra.mxu0 %v3109_v41  ;;  %v7279_v41 = vpop.f32.mrf.mxu3  ;;  %v2852_v8 = vsel %vm6716_vm11, %v2847_v32, %v2851_v61  ;;  %v5578_v61 = vrot.slane %v1905_v14, 9 }
 0x130   : > { %2540 = vmatmul.bf16.gmra.mxu3 %v6131_v47  ;;  %v2861_v27 = vrot.slane %v2859_v60, 5  ;;  %v2879_v60 = vrot.slane %v2877_v36, 4  ;;  %5037 = vmatpush.bf16.msra.mxu0 %v6200_v31 }
 0x132   : > { %v7273_v24 = vpop.f32.mrf.mxu1  ;;  %v2862_v9 = vsel %vm6716_vm11, %v2857_v25, %v2861_v27  ;;  %v2880_v62 = vor.u32 %v2879_v60, %v2875_v59 }
 0x134   : > { %v2881_v14 = vrot.slane %v2880_v62, 4 }
 0x137   : > { %2231 = vmatmul.bf16.gmra.mxu2 %v2115_v15  ;;  %v2092_v15 = vunpack.c.l.b16 %v2006_v26  ;;  %v3086_v26 = vunpack.c.l.b16 %v2852_v8 }
 0x13a   : > { %v7281_v47 = vpop.f32.mrf.mxu2  ;;  %v1816_v3 = vpop.f32.mrf.mxu1 }
 0x13b   : > { %v1817_v46 = vadd.f32 %v1816_v3, %v7209_v44  ;;  %v2093_v44 = vunpack.c.l.b16 %v2009_v0  ;;  %v6426_v3 = vld [vmem:[#allocation2 + $0x70] sm:$0xf]  ;;  %v3087_v0 = vunpack.c.l.b16 %v2862_v9 }
 0x13d   : > { %1855 = vmatmul.bf16.gmra.mxu1 %v6093_v55  ;;  %v2116_v23 = vpack.c.b16 %v2093_v44, %v2092_v15  ;;  %v2866_v55 = vrot.slane %v2864_v33, 4  ;;  %v6427_v15 = vld [vmem:[#allocation2 + $0x74] sm:$0x1]  ;;  %v3111_v27 = vpack.c.b16 %v3087_v0, %v3086_v26 }
 0x13e   : > { %v2015_v44 = vrot.slane %v6427_v15, 5 }
 0x13f   : > { %3222 = vmatmul.bf16.gmra.mxu0 %v3110_v12  ;;  %v2012_v12 = vrot.slane %v6426_v3, 5 }
 0x140   : > { %2545 = vmatmul.bf16.gmra.mxu3 %v6132_v56  ;;  %v2869_v56 = vrot.slane %v2867_v42, 5 }
 0x141   : > { %v2014_v6 = vrot.slane %v2012_v12, 4  ;;  %v2013_v8 = vsel %vm7099_vm14, %v5578_v61, %v2012_v12 }
 0x142   : > { %v7299_v30 = vpop.f32.mrf.mxu2  ;;  %v1818_v7 = vpop.f32.mrf.mxu1  ;;  %v2870_v17 = vor.u32 %v2869_v56, %v2866_v55  ;;  %v2885_v55 = vrot.slane %v2883_v21, 5  ;;  %v2094_v56 = vunpack.c.l.b16 %v2013_v8 }
 0x143   : > { %v7301_v50 = vpop.f32.mrf.mxu3  ;;  %v2016_v9 = vsel %vm7099_vm14, %v2014_v6, %v2015_v44  ;;  %v1819_v26 = vadd.f32 %v1818_v7, %v7226_v37  ;;  %v1906_v7 = vld [vmem:[#allocation2 + $0x78] sm:$0xe] }
 0x144   : > { %v2871_v31 = vrot.slane %v2870_v17, 4  ;;  %v2095_v60 = vunpack.c.l.b16 %v2016_v9  ;;  %v2886_v12 = vsel %vm6716_vm11, %v2881_v14, %v2885_v55  ;;  %v5579_v55 = vrot.slane %v1906_v7, 9 }
 0x146   : > { %v2876_v0 = vsel %vm6716_vm11, %v2871_v31, %v2875_v59  ;;  %v2117_v62 = vpack.c.b16 %v2095_v60, %v2094_v56  ;;  %v3089_v59 = vunpack.c.l.b16 %v2886_v12  ;;  %v2652_v60 = vld [vmem:[#allocation2 + $0x80] sm:$0x1] }
 0x147   : > { %2236 = vmatmul.bf16.gmra.mxu2 %v2116_v23  ;;  %v6133_v23 = vld [vmem:[#allocation2 + $0x6c] sm:$0xff] }
 0x14a   : > { %v2197_v32 = vpop.f32.mrf.mxu2  ;;  %v1821_v25 = vpop.f32.mrf.mxu1 }
 0x14b   : > { %v7310_v3 = vpop.f32.mrf.mxu3  ;;  %v2277_v33 = vadd.f32 %v2197_v32, %v1817_v46  ;;  %v1822_v42 = vadd.f32 %v1821_v25, %v7247_v57  ;;  %v2650_v46 = vld [vmem:[#allocation2 + $0x78] sm:$0xf]  ;;  %v2651_v57 = vld [vmem:[#allocation2 + $0x7c] sm:$0xf] }
 0x14c   : > { %8065 = vst [vmem:[#allocation3_spill] sm:$0xff] %v7310_v3  ;;  %v7313_v36 = vpop.f32.mrf.mxu0  ;;  %v2888_v61 = vshrl.u32 %v2650_v46, 16  ;;  %v2891_v6 = vshll.u32 %v2650_v46, 16  ;;  %v2897_v21 = vshll.u32 %v2651_v57, 16  ;;  %v2901_v32 = vshrl.u32 %v2651_v57, 16 }
 0x14d   : > { %1860 = vmatmul.bf16.gmra.mxu1 %v6094_v34  ;;  %v6428_v34 = vld [vmem:[#allocation2 + $0x7c] sm:$0xf] }
 0x14e   : > { %v2019_v37 = vrot.slane %v6428_v34, 5  ;;  %v2890_v8 = vrot.slane %v2888_v61, 4  ;;  %v2893_v9 = vrot.slane %v2891_v6, 5  ;;  %v7326_v31 = vrot.slane %v2897_v21, 5  ;;  %v6095_v61 = vld [vmem:[#allocation2 + $0x78] sm:$0xff] }
 0x14f   : > { %3227 = vmatmul.bf16.gmra.mxu0 %v3111_v27  ;;  %v2903_v14 = vrot.slane %v2901_v32, 4  ;;  %v6134_v21 = vld [vmem:[#allocation2 + $0x78] sm:$0xff]  ;;  %v2907_v32 = vshll.u32 %v2652_v60, 16 }
 0x150   : > { %2550 = vmatmul.bf16.gmra.mxu3 %v6133_v23  ;;  %v3088_v23 = vunpack.c.l.b16 %v2876_v0  ;;  %v2021_v46 = vrot.slane %v2019_v37, 4  ;;  %v2020_v7 = vsel %vm7099_vm14, %v5579_v55, %v2019_v37  ;;  %v6191_v37 = vld [vmem:[%s8050_s3 + $0x1d0] sm:$0xff] }
 0x151   : > { %v2904_v34 = vor.u32 %v2903_v14, %v7326_v31  ;;  %4612 = vmatpush.bf16.msra.mxu3 %v6191_v37 }
 0x152   : > { %v2199_v4 = vpop.f32.mrf.mxu2  ;;  %v1823_v15 = vpop.f32.mrf.mxu1  ;;  %v3112_v57 = vpack.c.b16 %v3089_v59, %v3088_v23  ;;  %v6183_v59 = vld [vmem:[%s8050_s3 + $0x190] sm:$0xff] }
 0x153   : > { %v2511_v44 = vpop.f32.mrf.mxu3  ;;  %v2278_v17 = vadd.f32 %v2199_v4, %v1819_v26  ;;  %v6429_v26 = vld [vmem:[#allocation2 + $0x80] sm:$0x1]  ;;  %3930 = vmatpush.bf16.msra.mxu2 %v6183_v59  ;;  %v2905_v55 = vrot.slane %v2904_v34, 4  ;;  %v6199_v34 = vld [vmem:[%s8050_s3 + $0x210] sm:$0xff] }
 0x154   : > { %v7324_v25 = vpop.f32.mrf.mxu0  ;;  %v2591_v27 = vadd.f32 %v2511_v44, %v2277_v33  ;;  %v2022_v56 = vrot.slane %v6429_v26, 5  ;;  %v2894_v44 = vor.u32 %v2893_v9, %v2890_v8  ;;  %v2654_v8 = vld [vmem:[#allocation2 + $0x88] sm:$0xf]  ;;  %v6159_v9 = vld [vmem:[%s8050_s3 + $0x150] sm:$0xff]  ;;  %5038 = vmatpush.bf16.msra.mxu0 %v6199_v34 }
 0x155   : > { %3615 = vmatpush.bf16.msra.mxu1 %v6159_v9 }
 0x156   : > { %v2023_v23 = vsel %vm7099_vm14, %v2021_v46, %v2022_v56  ;;  %v2895_v14 = vrot.slane %v2894_v44, 4  ;;  %v2909_v46 = vrot.slane %v2907_v32, 5 }
 0x157   : > { %2241 = vmatmul.bf16.gmra.mxu2 %v2117_v62 }
 0x158   : > { %v2900_v44 = vsel %vm6716_vm11, %v2895_v14, %v7326_v31  ;;  %v2655_v14 = vld [vmem:[#allocation2 + $0x8c] sm:$0x1] }
 0x159   : > { %v3090_v9 = vunpack.c.l.b16 %v2900_v44 }
 0x15a   : > { %v2202_v4 = vpop.f32.mrf.mxu2  ;;  %v1826_v3 = vpop.f32.mrf.mxu1 }
 0x15b   : > { %v2513_v33 = vpop.f32.mrf.mxu3  ;;  %v2279_v0 = vadd.f32 %v2202_v4, %v1822_v42  ;;  %v7330_v12 = vadd.f32 %v1826_v3, %v7277_v20  ;;  %v2653_v20 = vld [vmem:[#allocation2 + $0x84] sm:$0xf]  ;;  %v2096_v3 = vunpack.c.l.b16 %v2020_v7  ;;  %v2925_v4 = vshrl.u32 %v2654_v8, 16 }
 0x15c   : > { %v3193_v6 = vpop.f32.mrf.mxu0  ;;  %v2592_v62 = vadd.f32 %v2513_v33, %v2278_v17  ;;  %v2097_v17 = vunpack.c.l.b16 %v2023_v23  ;;  %v2912_v26 = vshrl.u32 %v2653_v20, 16  ;;  %v2915_v56 = vshll.u32 %v2653_v20, 16 }
 0x15d   : > { %1865 = vmatmul.bf16.gmra.mxu1 %v6095_v61  ;;  %v7339_v42 = vadd.f32 %v3193_v6, %v2591_v27  ;;  %v1824_v27 = vadd.f32 %v1823_v15, %v7265_v51  ;;  %v2910_v51 = vsel %vm6716_vm11, %v2905_v55, %v2909_v46  ;;  %v2927_v37 = vrot.slane %v2925_v4, 4  ;;  %v6431_v46 = vld [vmem:[#allocation2 + $0x8c] sm:$0x1]  ;;  %v6096_v4 = vld [vmem:[#allocation2 + $0x84] sm:$0xff] }
 0x15e   : > { %v2118_v7 = vpack.c.b16 %v2097_v17, %v2096_v3  ;;  %v2914_v20 = vrot.slane %v2912_v26, 4  ;;  %v1907_v3 = vld [vmem:[#allocation2 + $0x84] sm:$0xe]  ;;  %v3091_v31 = vunpack.c.l.b16 %v2910_v51 }
 0x15f   : > { %8066 = vst [vmem:[#allocation4_spill] sm:$0xff] %v7339_v42  ;;  %3232 = vmatmul.bf16.gmra.mxu0 %v3112_v57  ;;  %v2921_v57 = vshll.u32 %v2654_v8, 16  ;;  %v2917_v8 = vrot.slane %v2915_v56, 5  ;;  %v5580_v55 = vrot.slane %v1907_v3, 9 }
 0x160   : > { %2555 = vmatmul.bf16.gmra.mxu3 %v6134_v21  ;;  %v6430_v21 = vld [vmem:[#allocation2 + $0x88] sm:$0xf]  ;;  %v3113_v56 = vpack.c.b16 %v3091_v31, %v3090_v9  ;;  %v2657_v31 = vld [vmem:[#allocation2 + $0x94] sm:$0xf] }
 0x161   : > { %v2026_v32 = vrot.slane %v6430_v21, 5 }
 0x162   : > { %v2204_v60 = vpop.f32.mrf.mxu2  ;;  %v1828_v33 = vpop.f32.mrf.mxu1 }
 0x163   : > { %v2516_v61 = vpop.f32.mrf.mxu3  ;;  %v2280_v6 = vadd.f32 %v2204_v60, %v1824_v27  ;;  %v1829_v23 = vadd.f32 %v1828_v33, %v7297_v29  ;;  %v2923_v29 = vrot.slane %v2921_v57, 5  ;;  %v2029_v27 = vrot.slane %v6431_v46, 5 }
 0x164   : > { %v3195_v59 = vpop.f32.mrf.mxu0  ;;  %v2593_v15 = vadd.f32 %v2516_v61, %v2279_v0  ;;  %v2028_v0 = vrot.slane %v2026_v32, 4  ;;  %v2918_v60 = vor.u32 %v2917_v8, %v2914_v20  ;;  %v2931_v61 = vshll.u32 %v2655_v14, 16 }
 0x165   : > { %v7357_v17 = vadd.f32 %v3195_v59, %v2592_v62  ;;  %v2928_v33 = vor.u32 %v2927_v37, %v2923_v29  ;;  %v2027_v51 = vsel %vm7099_vm14, %v5580_v55, %v2026_v32 }
 0x166   : > { %v2030_v34 = vsel %vm7099_vm14, %v2028_v0, %v2029_v27  ;;  %v2919_v20 = vrot.slane %v2918_v60, 4  ;;  %v2933_v37 = vrot.slane %v2931_v61, 5  ;;  %v2945_v0 = vshll.u32 %v2657_v31, 16 }
 0x167   : > { %2246 = vmatmul.bf16.gmra.mxu2 %v2118_v7  ;;  %v6135_v7 = vld [vmem:[#allocation2 + $0x84] sm:$0xff]  ;;  %v2929_v3 = vrot.slane %v2928_v33, 4  ;;  %v2099_v9 = vunpack.c.l.b16 %v2030_v34  ;;  %v2949_v33 = vshrl.u32 %v2657_v31, 16  ;;  %v2658_v31 = vld [vmem:[#allocation2 + $0x98] sm:$0x1] }
 0x16a   : > { %v2207_v21 = vpop.f32.mrf.mxu2  ;;  %v1831_v26 = vpop.f32.mrf.mxu1 }
 0x16b   : > { %v2518_v42 = vpop.f32.mrf.mxu3  ;;  %v2281_v62 = vadd.f32 %v2207_v21, %v7330_v12  ;;  %v1832_v57 = vadd.f32 %v1831_v26, %v7313_v36  ;;  %v2098_v12 = vunpack.c.l.b16 %v2027_v51  ;;  %v2656_v36 = vld [vmem:[#allocation2 + $0x90] sm:$0xf] }
 0x16c   : > { %v3198_v59 = vpop.f32.mrf.mxu0  ;;  %v2594_v44 = vadd.f32 %v2518_v42, %v2280_v6  ;;  %v2924_v42 = vsel %vm6716_vm11, %v2919_v20, %v2923_v29  ;;  %v2934_v6 = vsel %vm6716_vm11, %v2929_v3, %v2933_v37  ;;  %v2936_v14 = vshrl.u32 %v2656_v36, 16 }
 0x16d   : > { %1870 = vmatmul.bf16.gmra.mxu1 %v6096_v4  ;;  %v7365_v8 = vadd.f32 %v3198_v59, %v2593_v15  ;;  %v2939_v55 = vshll.u32 %v2656_v36, 16  ;;  %v2119_v60 = vpack.c.b16 %v2099_v9, %v2098_v12  ;;  %v1908_v59 = vld [vmem:[#allocation2 + $0x90] sm:$0xe]  ;;  %v3093_v51 = vunpack.c.l.b16 %v2934_v6  ;;  %v6433_v12 = vld [vmem:[#allocation2 + $0x98] sm:$0x1] }
 0x16e   : > { %v2938_v34 = vrot.slane %v2936_v14, 4  ;;  %v2947_v3 = vrot.slane %v2945_v0, 5  ;;  %v2951_v37 = vrot.slane %v2949_v33, 4  ;;  %v5581_v36 = vrot.slane %v1908_v59, 9  ;;  %v6136_v14 = vld [vmem:[#allocation2 + $0x90] sm:$0xff] }
 0x16f   : > { %8067 = vst [vmem:[#allocation5_spill] sm:$0xff] %v7365_v8  ;;  %3237 = vmatmul.bf16.gmra.mxu0 %v3113_v56  ;;  %v6432_v56 = vld [vmem:[#allocation2 + $0x94] sm:$0xf]  ;;  %v2941_v20 = vrot.slane %v2939_v55, 5  ;;  %v2036_v9 = vrot.slane %v6433_v12, 5  ;;  %v2955_v55 = vshll.u32 %v2658_v31, 16 }
 0x170   : > { %2560 = vmatmul.bf16.gmra.mxu3 %v6135_v7  ;;  %v2033_v4 = vrot.slane %v6432_v56, 5  ;;  %v3092_v7 = vunpack.c.l.b16 %v2924_v42  ;;  %v6097_v42 = vld [vmem:[#allocation2 + $0x90] sm:$0xff]  ;;  %v6182_v56 = vld [vmem:[%s8050_s3 + $0x188] sm:$0xff]  ;;  %v2659_v59 = vld [vmem:[#allocation2 + $0x9c] sm:$0xf] }
 0x171   : > { %3931 = vmatpush.bf16.msra.mxu2 %v6182_v56 }
 0x172   : > { %v2209_v32 = vpop.f32.mrf.mxu2  ;;  %v1833_v15 = vpop.f32.mrf.mxu1  ;;  %v2034_v0 = vsel %vm7099_vm14, %v5581_v36, %v2033_v4 }
 0x173   : > { %v2521_v46 = vpop.f32.mrf.mxu3  ;;  %v2282_v27 = vadd.f32 %v2209_v32, %v1829_v23  ;;  %v1834_v61 = vadd.f32 %v1833_v15, %v7324_v25  ;;  %v2035_v23 = vrot.slane %v2033_v4, 4  ;;  %v6190_v4 = vld [vmem:[%s8050_s3 + $0x1c8] sm:$0xff] }
 0x174   : > { %v3200_v21 = vpop.f32.mrf.mxu0  ;;  %v2595_v26 = vadd.f32 %v2521_v46, %v2281_v62  ;;  %v3114_v62 = vpack.c.b16 %v3093_v51, %v3092_v7  ;;  %v2942_v46 = vor.u32 %v2941_v20, %v2938_v34  ;;  %v2960_v34 = vshrl.u32 %v2659_v59, 16  ;;  %4613 = vmatpush.bf16.msra.mxu3 %v6190_v4 }
 0x175   : > { %v7372_v29 = vadd.f32 %v3200_v21, %v2594_v44  ;;  %v2952_v44 = vor.u32 %v2951_v37, %v2947_v3  ;;  %v2037_v33 = vsel %vm7099_vm14, %v2035_v23, %v2036_v9  ;;  %v2963_v20 = vshll.u32 %v2659_v59, 16  ;;  %v6158_v37 = vld [vmem:[%s8050_s3 + $0x148] sm:$0xff] }
 0x176   : > { %v2101_v51 = vunpack.c.l.b16 %v2037_v33  ;;  %v2943_v36 = vrot.slane %v2942_v46, 4  ;;  %3616 = vmatpush.bf16.msra.mxu1 %v6158_v37 }
 0x177   : > { %8068 = vst [vmem:[#allocation6_spill] sm:$0xff] %v7372_v29  ;;  %2251 = vmatmul.bf16.gmra.mxu2 %v2119_v60  ;;  %v2953_v23 = vrot.slane %v2952_v44, 4  ;;  %v2666_v29 = vld [vmem:[#allocation2 + $0xb8] sm:$0xf] }
 0x178   : > { %v2948_v56 = vsel %vm6716_vm11, %v2943_v36, %v2947_v3  ;;  %v6435_v36 = vld [vmem:[#allocation2 + $0xa4] sm:$0x1] }
 0x179   : > { %v3094_v3 = vunpack.c.l.b16 %v2948_v56 }
 0x17a   : > { %v2212_v25 = vpop.f32.mrf.mxu2  ;;  %v7374_v32 = vpop.f32.mrf.mxu1 }
 0x17b   : > { %v2523_v15 = vpop.f32.mrf.mxu3  ;;  %v2283_v21 = vadd.f32 %v2212_v25, %v1832_v57  ;;  %v2660_v57 = vld [vmem:[#allocation2 + $0xa0] sm:$0xf] }
 0x17c   : > { %v3203_v6 = vpop.f32.mrf.mxu0  ;;  %v2596_v60 = vadd.f32 %v2523_v15, %v2282_v27  ;;  %v2100_v27 = vunpack.c.l.b16 %v2034_v0  ;;  %v2969_v12 = vshll.u32 %v2660_v57, 16  ;;  %v2973_v9 = vshrl.u32 %v2660_v57, 16 }
 0x17d   : > { %1875 = vmatmul.bf16.gmra.mxu1 %v6097_v42  ;;  %v7383_v7 = vadd.f32 %v3203_v6, %v2595_v26  ;;  %v2957_v26 = vrot.slane %v2955_v55, 5  ;;  %v2962_v6 = vrot.slane %v2960_v34, 4  ;;  %v2965_v0 = vrot.slane %v2963_v20, 5  ;;  %v6434_v55 = vld [vmem:[#allocation2 + $0xa0] sm:$0xf] }
 0x17e   : > { %v2120_v42 = vpack.c.b16 %v2101_v51, %v2100_v27  ;;  %v2040_v59 = vrot.slane %v6434_v55, 5  ;;  %v7400_v57 = vrot.slane %v2969_v12, 5  ;;  %v1909_v27 = vld [vmem:[#allocation2 + $0x9c] sm:$0xe]  ;;  %v2661_v34 = vld [vmem:[#allocation2 + $0xa4] sm:$0x1] }
 0x17f   : > { %8069 = vst [vmem:[#allocation7_spill] sm:$0xff] %v7383_v7  ;;  %3242 = vmatmul.bf16.gmra.mxu0 %v3114_v62  ;;  %v2958_v46 = vsel %vm6716_vm11, %v2953_v23, %v2957_v26  ;;  %v2966_v4 = vor.u32 %v2965_v0, %v2962_v6  ;;  %v2043_v23 = vrot.slane %v6435_v36, 5  ;;  %v6363_v26 = vld [vmem:[%s6547_s27 + $0x78] sm:$0xff]  }
 0x180   : > { %2565 = vmatmul.bf16.gmra.mxu3 %v6136_v14  ;;  %v6198_v14 = vld [vmem:[%s8050_s3 + $0x208] sm:$0xff]  ;;  %v3095_v20 = vunpack.c.l.b16 %v2958_v46  ;;  %v2042_v37 = vrot.slane %v2040_v59, 4  ;;  %v6098_v0 = vld [vmem:[#allocation2 + $0x9c] sm:$0xff] }
 0x181   : > { %5039 = vmatpush.bf16.msra.mxu0 %v6198_v14  ;;  %v6268_v14 = vunpack.c.h.bf16 %v6363_v26  ;;  %v6137_v36 = vld [vmem:[#allocation2 + $0x9c] sm:$0xff] }
 0x182   : > { %v2214_v31 = vpop.f32.mrf.mxu2  ;;  %v7391_v25 = vpop.f32.mrf.mxu1  ;;  %v3115_v56 = vpack.c.b16 %v3095_v20, %v3094_v3 }
 0x183   : > { %v2526_v62 = vpop.f32.mrf.mxu3  ;;  %v2284_v15 = vadd.f32 %v2214_v31, %v1834_v61  ;;  %v2975_v61 = vrot.slane %v2973_v9, 4  ;;  %v1837_v31 = vadd.f32 %v7374_v32, %v7176_v45  ;;  %v2979_v9 = vshll.u32 %v2661_v34, 16  ;;  %v6436_v32 = vld [vmem:[%s8048_s1] ss:$0 sm:$0xff] }
 0x184   : > { %v3205_v33 = vpop.f32.mrf.mxu0  ;;  %v2597_v44 = vadd.f32 %v2526_v62, %v2283_v21  ;;  %v5582_v21 = vrot.slane %v1909_v27, 9  ;;  %v2044_v45 = vsel %vm7099_vm14, %v2042_v37, %v2043_v23  ;;  %v457_v20 = vmul.f32 %v6436_v32, %v6268_v14  ;;  %v2662_v37 = vld [vmem:[#allocation2 + $0xa8] sm:$0xf]  ;;  %v2663_v23 = vld [vmem:[#allocation2 + $0xac] sm:$0xf] }
 0x185   : > { %v7402_v51 = vadd.f32 %v3205_v33, %v2596_v60  ;;  %v2976_v12 = vor.u32 %v2975_v61, %v7400_v57  ;;  %v6267_v33 = vunpack.c.l.bf16 %v6363_v26  ;;  %v2981_v3 = vrot.slane %v2979_v9, 5 }
 0x187   : > { %8070 = vst [vmem:[#allocation8_spill] sm:$0xff] %v7402_v51  ;;  %2256 = vmatmul.bf16.gmra.mxu2 %v2120_v42  ;;  %v2967_v42 = vrot.slane %v2966_v4, 4  ;;  %v2041_v51 = vsel %vm7099_vm14, %v5582_v21, %v2040_v59  ;;  %v456_v61 = vmul.f32 %v6436_v32, %v6267_v33  ;;  %v2977_v34 = vrot.slane %v2976_v12, 4 }
 0x188   : > { %v2102_v59 = vunpack.c.l.b16 %v2041_v51  ;;  %v2103_v21 = vunpack.c.l.b16 %v2044_v45  ;;  %v1839_v51 = vadd.f32 %v7391_v25, %v7193_v28 }
 0x189   : > { %v2982_v33 = vsel %vm6716_vm11, %v2977_v34, %v2981_v3  ;;  %v1910_v3 = vld [vmem:[#allocation2 + $0xa8] sm:$0xe] }
 0x18a   : > { %v2217_v62 = vpop.f32.mrf.mxu2  ;;  %v7408_v60 = vpop.f32.mrf.mxu1 }
 0x18b   : > { %v2528_v46 = vpop.f32.mrf.mxu3  ;;  %v2285_v6 = vadd.f32 %v2217_v62, %v1837_v31  ;;  %v297_v31 = vld [vmem:[#allocation2 + $0xc0] sm:$0x1] }
 0x18c   : > { %v3208_v55 = vpop.f32.mrf.mxu0  ;;  %v2598_v27 = vadd.f32 %v2528_v46, %v2284_v15  ;;  %v6437_v15 = vld [vmem:[%s8049_s2] ss:$0 sm:$0xff]  ;;  %v298_v12 = vsel %vm6530_vm2, 0, %v297_v31  ;;  %v2987_v46 = vshll.u32 %v2662_v37, 16 }
 0x18d   : > { %1880 = vmatmul.bf16.gmra.mxu1 %v6098_v0  ;;  %v7417_v4 = vadd.f32 %v3208_v55, %v2597_v44  ;;  %v491_v26 = vadd.f32 %v6437_v15, %v456_v61  ;;  %v492_v62 = vadd.f32 %v6437_v15, %v457_v20  ;;  %v2972_v44 = vsel %vm6716_vm11, %v2967_v42, %v7400_v57 }
 0x18e   : > { %299 = vst [vmem:[#allocation2 + $0xc0] sm:$0x1] %v298_v12  ;;  %v2993_v0 = vshll.u32 %v2663_v23, 16  ;;  %v2997_v55 = vshrl.u32 %v2663_v23, 16  ;;  %v2121_v61 = vpack.c.b16 %v2103_v21, %v2102_v59  ;;  %v3096_v25 = vunpack.c.l.b16 %v2972_v44  ;;  %v2664_v21 = vld [vmem:[#allocation2 + $0xb0] sm:$0x1] }
 0x18f   : > { %8071 = vst [vmem:[#allocation9_spill] sm:$0xff] %v7417_v4  ;;  %3247 = vmatmul.bf16.gmra.mxu0 %v3115_v56  ;;  %v523_v9 = vmax.f32 %v491_v26, 0.0  ;;  %v2984_v56 = vshrl.u32 %v2662_v37, 16  ;;  %v524_v20 = vmax.f32 %v492_v62, 0.0  ;;  %v6438_v26 = vld [vmem:[#allocation2 + $0xac] sm:$0xf]  ;;  %v3097_v12 = vunpack.c.l.b16 %v2982_v33 }
 0x190   : > { %2570 = vmatmul.bf16.gmra.mxu3 %v6137_v36  ;;  %v2047_v34 = vrot.slane %v6438_v26, 5  ;;  %v2989_v4 = vrot.slane %v2987_v46, 5  ;;  %v7435_v23 = vrot.slane %v2993_v0, 5  ;;  %v2999_v7 = vrot.slane %v2997_v55, 4 }
 0x191   : > { %v555_v15 = vpack.c.bf16 %v523_v9, %v523_v9  ;;  %v556_v31 = vpack.c.bf16 %v524_v20, %v524_v20  ;;  %v2986_v37 = vrot.slane %v2984_v56, 4  ;;  %v6439_v9 = vld [vmem:[#allocation2 + $0xb0] sm:$0x1]  ;;  %v2665_v20 = vld [vmem:[#allocation2 + $0xb4] sm:$0xf]  ;;  %v3116_v44 = vpack.c.b16 %v3097_v12, %v3096_v25  ;;  %v6138_v25 = vld [vmem:[#allocation2 + $0xa8] sm:$0xff] }
 0x192   : > { %v2219_v14 = vpop.f32.mrf.mxu2  ;;  %v7431_v36 = vpop.f32.mrf.mxu1  ;;  %v2049_v62 = vrot.slane %v2047_v34, 4 }
 0x193   : > { %v2531_v45 = vpop.f32.mrf.mxu3  ;;  %v2286_v32 = vadd.f32 %v2219_v14, %v1839_v51  ;;  %v5583_v51 = vrot.slane %v1910_v3, 9  ;;  %v815_v59 = vshrl.u32 %v555_v15, 16  ;;  %v818_v14 = vshll.u32 %v555_v15, 16 }
 0x194   : > { %v3210_v57 = vpop.f32.mrf.mxu0  ;;  %v2599_v42 = vadd.f32 %v2531_v45, %v2285_v6  ;;  %v2050_v6 = vrot.slane %v6439_v9, 5  ;;  %v823_v45 = vshrl.u32 %v556_v31, 16  ;;  %v826_v55 = vshll.u32 %v556_v31, 16 }
 0x195   : > { %v7433_v28 = vadd.f32 %v3210_v57, %v2598_v27  ;;  %v1842_v27 = vadd.f32 %v7408_v60, %v7203_v49  ;;  %v817_v46 = vrot.slane %v815_v59, 7  ;;  %v2990_v26 = vor.u32 %v2989_v4, %v2986_v37  ;;  %v987_v8 = vld [vmem:[#allocation2 + $0xc0] sm:$0xf] }
 0x196   : > { %v7441_v0 = vrot.slane %v823_v45, 7  ;;  %v3000_v3 = vor.u32 %v2999_v7, %v7435_v23  ;;  %v3003_v9 = vshll.u32 %v2664_v21, 16  ;;  %v2048_v12 = vsel %vm7099_vm14, %v5583_v51, %v2047_v34  ;;  %v6181_v4 = vld [vmem:[%s8050_s3 + $0x180] sm:$0xff] }
 0x197   : > { %8072 = vst [vmem:[#allocation10_spill] sm:$0xff] %v7433_v28  ;;  %2261 = vmatmul.bf16.gmra.mxu2 %v2121_v61  ;;  %v353_v61 = vld [vmem:[#allocation2 + $0xc8] sm:$0x1]  ;;  %v2051_v59 = vsel %vm7099_vm14, %v2049_v62, %v2050_v6  ;;  %v820_v31 = vor.u32 %v818_v14, %v817_v46  ;;  %v3008_v7 = vshrl.u32 %v2665_v20, 16  ;;  %v821_v37 = vrot.slane %v817_v46, 4  ;;  %v6189_v14 = vld [vmem:[%s8050_s3 + $0x1c0] sm:$0xff] }
 0x198   : > { %v6099_v28 = vld [vmem:[#allocation2 + $0xa8] sm:$0xff]  ;;  %v828_v21 = vor.u32 %v826_v55, %v7441_v0  ;;  %3932 = vmatpush.bf16.msra.mxu2 %v6181_v4  ;;  %v3011_v45 = vshll.u32 %v2665_v20, 16  ;;  %v2104_v62 = vunpack.c.l.b16 %v2048_v12  ;;  %v2105_v6 = vunpack.c.l.b16 %v2051_v59  ;;  %4614 = vmatpush.bf16.msra.mxu3 %v6189_v14 }
 0x199   : > { %v988_v34 = vsel %vm6612_vm7, %v820_v31, %v987_v8  ;;  %v2991_v11 = vrot.slane %v2990_v26, 4  ;;  %v3001_v8 = vrot.slane %v3000_v3, 4  ;;  %v3010_v46 = vrot.slane %v3008_v7, 4  ;;  %v2667_v31 = vld [vmem:[#allocation2 + $0xbc] sm:$0x1] }
 0x19a   : > { %v2222_v33 = vpop.f32.mrf.mxu2  ;;  %v7439_v56 = vpop.f32.mrf.mxu1  ;;  %v829_v20 = vsel %vm6622_vm8, %v821_v37, %v828_v21  ;;  %989 = vst [vmem:[#allocation2 + $0xc0] sm:$0xf] %v988_v34  ;;  %v3013_v55 = vrot.slane %v3011_v45, 5  ;;  %v2122_v12 = vpack.c.b16 %v2105_v6, %v2104_v62  ;;  %v1911_v7 = vld [vmem:[#allocation2 + $0xb4] sm:$0xe]  ;;  %v3027_v34 = vshll.u32 %v2667_v31, 16 }
 0x19b   : > { %v2533_v57 = vpop.f32.mrf.mxu3  ;;  %v2287_v15 = vadd.f32 %v2222_v33, %v1842_v27  ;;  %v3017_v27 = vshll.u32 %v2666_v29, 16  ;;  %v6157_v33 = vld [vmem:[%s8050_s3 + $0x140] sm:$0xff]  ;;  %990 = vst [vmem:[#allocation2 + $0xc4] sm:$0xf] %v829_v20  ;;  %v5584_v62 = vrot.slane %v1911_v7, 9 }
 0x19c   : > { %v3213_v49 = vpop.f32.mrf.mxu0  ;;  %v2600_v60 = vadd.f32 %v2533_v57, %v2286_v32  ;;  %v354_v32 = vsel %vm6538_vm4, 0, %v353_v61  ;;  %3617 = vmatpush.bf16.msra.mxu1 %v6157_v33  ;;  %v830_v57 = vrot.slane %v7441_v0, 4  ;;  %v6440_v0 = vld [vmem:[#allocation2 + $0xb8] sm:$0xf]  ;;  %v6442_v31 = vld [vmem:[#allocation2 + $0x10] sm:$0xf] }
 0x19d   : > { %1885 = vmatmul.bf16.gmra.mxu1 %v6099_v28  ;;  %355 = vst [vmem:[#allocation2 + $0xc8] sm:$0x1] %v354_v32  ;;  %v7456_v51 = vadd.f32 %v3213_v49, %v2599_v42  ;;  %v3021_v28 = vshrl.u32 %v2666_v29, 16  ;;  %v3005_v42 = vrot.slane %v3003_v9, 5  ;;  %v1844_v29 = vadd.f32 %v7431_v36, %v7211_v16 }
 0x19e   : > { %v7469_v59 = vrot.slane %v3017_v27, 5  ;;  %v2996_v9 = vsel %vm6716_vm11, %v2991_v11, %v7435_v23  ;;  %v2054_v4 = vrot.slane %v6440_v0, 5  ;;  %v3014_v27 = vor.u32 %v3013_v55, %v3010_v46  ;;  %v6100_v46 = vld [vmem:[#allocation2 + $0xb4] sm:$0xff] }
 0x19f   : > { %3252 = vmatmul.bf16.gmra.mxu0 %v3116_v44  ;;  %v3023_v26 = vrot.slane %v3021_v28, 4  ;;  %v3006_v16 = vsel %vm6716_vm11, %v3001_v8, %v3005_v42  ;;  %v3098_v23 = vunpack.c.l.b16 %v2996_v9  ;;  %v6441_v28 = vld [vmem:[#allocation2 + $0xbc] sm:$0x1]  ;;  %v4046_v0 = vld [vmem:[#allocation2 + $0x18] sm:$0xf]  ;;  %v3371_v7 = vrot.slane %v6442_v31, 5 }
 0x1a0   : > { %2575 = vmatmul.bf16.gmra.mxu3 %v6138_v25  ;;  %v6197_v25 = vld [vmem:[%s8050_s3 + $0x200] sm:$0xff]  ;;  %v3099_v45 = vunpack.c.l.b16 %v3006_v16  ;;  %v2056_v6 = vrot.slane %v2054_v4, 4  ;;  %v2057_v14 = vrot.slane %v6441_v28, 5  ;;  %v3015_v42 = vrot.slane %v3014_v27, 4  ;;  %v6443_v27 = vld [vmem:[#allocation2 + $0x14] sm:$0x1] }
 0x1a1   : > { %5040 = vmatpush.bf16.msra.mxu0 %v6197_v25  ;;  %v4095_v28 = vshrl.u32 %v4046_v0, 16 }
 0x1a2   : > { %v2224_v44 = vpop.f32.mrf.mxu2  ;;  %v1848_v61 = vpop.f32.mrf.mxu1  ;;  %v3117_v11 = vpack.c.b16 %v3099_v45, %v3098_v23  ;;  %v2669_v9 = vld [vmem:[#allocation2 + $0xc4] sm:$0xf] }
 0x1a3   : > { %v2536_v49 = vpop.f32.mrf.mxu3  ;;  %v2288_v18 = vadd.f32 %v2224_v44, %v1844_v29  ;;  %v3041_v45 = vshll.u32 %v2669_v9, 16 }
 0x1a4   : > { %v3215_v3 = vpop.f32.mrf.mxu0  ;;  %v2601_v36 = vadd.f32 %v2536_v49, %v2287_v15  ;;  %v991_v37 = vld [vmem:[#allocation2 + $0xc8] sm:$0x1]  ;;  %v3024_v15 = vor.u32 %v3023_v26, %v7469_v59  ;;  %v6139_v49 = vld [vmem:[#allocation2 + $0xb4] sm:$0xff]  ;;  %v2055_v26 = vsel %vm7099_vm14, %v5584_v62, %v2054_v4  ;;  %v3045_v62 = vshrl.u32 %v2669_v9, 16 }
 0x1a5   : > { %v7479_v21 = vadd.f32 %v3215_v3, %v2600_v60  ;;  %v992_v32 = vsel %vm6530_vm2, %v830_v57, %v991_v37  ;;  %v1847_v60 = vadd.f32 %v7439_v56, %v7224_v48  ;;  %v2058_v3 = vsel %vm7099_vm14, %v2056_v6, %v2057_v14  ;;  %v2668_v56 = vld [vmem:[#allocation2 + $0xc0] sm:$0xf]  ;;  %v7499_v37 = vld [vmem:[#allocation2 + $0x1c] sm:$0xf] }
 0x1a6   : > { %993 = vst [vmem:[#allocation2 + $0xc8] sm:$0x1] %v992_v32  ;;  %v3025_v29 = vrot.slane %v3024_v15, 4  ;;  %v2106_v16 = vunpack.c.l.b16 %v2055_v26  ;;  %v2107_v25 = vunpack.c.l.b16 %v2058_v3  ;;  %v3032_v32 = vshrl.u32 %v2668_v56, 16  ;;  %v3305_v26 = vld [vmem:[#allocation2 + $0xc] sm:$0xe] }
 0x1a7   : > { %2266 = vmatmul.bf16.gmra.mxu2 %v2122_v12  ;;  %v3029_v12 = vrot.slane %v3027_v34, 5  ;;  %v3035_v23 = vshll.u32 %v2668_v56, 16  ;;  %v3374_v15 = vrot.slane %v6443_v27, 5  ;;  %v4098_v14 = vshll.u32 %v4046_v0, 16 }
 0x1a8   : > { %v3047_v56 = vrot.slane %v3045_v62, 4  ;;  %v5793_v9 = vrot.slane %v3305_v26, 9  ;;  %v4097_v0 = vrot.slane %v4095_v28, 4 }
 0x1a9   : > { %v3030_v4 = vsel %vm6716_vm11, %v3025_v29, %v3029_v12  ;;  %v3043_v12 = vrot.slane %v3041_v45, 5  ;;  %v4100_v31 = vrot.slane %v4098_v14, 5 }
 0x1aa   : > { %v2227_v33 = vpop.f32.mrf.mxu2  ;;  %v7486_v20 = vpop.f32.mrf.mxu1 }
 0x1ab   : > { %v2538_v8 = vpop.f32.mrf.mxu3  ;;  %v2289_v44 = vadd.f32 %v2227_v33, %v1847_v60 }
 0x1ac   : > { %v3218_v55 = vpop.f32.mrf.mxu0  ;;  %v2602_v57 = vadd.f32 %v2538_v8, %v2288_v18  ;;  %v3020_v18 = vsel %vm6716_vm11, %v3015_v42, %v7469_v59  ;;  %v2123_v59 = vpack.c.b16 %v2107_v25, %v2106_v16  ;;  %v4108_v8 = vshrl.u32 %v7499_v37, 16 }
 0x1ad   : > { %1890 = vmatmul.bf16.gmra.mxu1 %v6100_v46  ;;  %v7492_v48 = vadd.f32 %v3218_v55, %v2601_v36  ;;  %v1849_v36 = vadd.f32 %v1848_v61, %v7245_v13  ;;  %v3373_v42 = vrot.slane %v3371_v7, 4  ;;  %v3100_v13 = vunpack.c.l.b16 %v3020_v18  ;;  %v2670_v16 = vld [vmem:[#allocation2 + $0xc8] sm:$0x1] }
 0x1ae   : > { %v3101_v61 = vunpack.c.l.b16 %v3030_v4  ;;  %v3034_v55 = vrot.slane %v3032_v32, 4  ;;  %v3372_v18 = vsel %vm7099_vm14, %v5793_v9, %v3371_v7  ;;  %v7512_v4 = vld [vmem:[#allocation2 + $0x20] sm:$0x1]  ;;  %v3051_v62 = vshll.u32 %v2670_v16, 16 }
 0x1af   : > { %3257 = vmatmul.bf16.gmra.mxu0 %v3117_v11  ;;  %v4104_v11 = vshll.u32 %v7499_v37, 16 }
 0x1b0   : > { %2580 = vmatmul.bf16.gmra.mxu3 %v6139_v49  ;;  %v3037_v49 = vrot.slane %v3035_v23, 5  ;;  %v3118_v32 = vpack.c.b16 %v3101_v61, %v3100_v13  ;;  %v3498_v23 = vunpack.c.l.b16 %v3372_v18  ;;  %v6140_v13 = vld [vmem:[#allocation2 + $0xc0] sm:$0xff] }
 0x1b1   : > { %v7506_v25 = vrot.slane %v4104_v11, 5 }
 0x1b2   : > { %v2229_v34 = vpop.f32.mrf.mxu2  ;;  %v1853_v6 = vpop.f32.mrf.mxu1  ;;  %v3038_v27 = vor.u32 %v3037_v49, %v3034_v55  ;;  %v3053_v55 = vrot.slane %v3051_v62, 5 }
 0x1b3   : > { %v2541_v60 = vpop.f32.mrf.mxu3  ;;  %v2290_v33 = vadd.f32 %v2229_v34, %v1849_v36  ;;  %v4110_v36 = vrot.slane %v4108_v8, 4  ;;  %v3048_v34 = vor.u32 %v3047_v56, %v3043_v12  ;;  %v1854_v9 = vadd.f32 %v1853_v6, %v7273_v24 }
 0x1b4   : > { %v3220_v29 = vpop.f32.mrf.mxu0  ;;  %v2603_v46 = vadd.f32 %v2541_v60, %v2289_v44  ;;  %v3375_v44 = vsel %vm7099_vm14, %v3373_v42, %v3374_v15  ;;  %v4101_v60 = vor.u32 %v4100_v31, %v4097_v0  ;;  %v4114_v15 = vshll.u32 %v7512_v4, 16  ;;  %v4049_v0 = vld [vmem:[#allocation2 + $0x24] sm:$0xf] }
 0x1b5   : > { %v7504_v3 = vadd.f32 %v3220_v29, %v2602_v57  ;;  %v1852_v57 = vadd.f32 %v7486_v20, %v7259_v38  ;;  %v3499_v45 = vunpack.c.l.b16 %v3375_v44  ;;  %v4111_v8 = vor.u32 %v4110_v36, %v7506_v25  ;;  %v7523_v36 = vld [vmem:[#allocation2 + $0x28] sm:$0xf] }
 0x1b6   : > { %v3039_v20 = vrot.slane %v3038_v27, 4  ;;  %v3049_v61 = vrot.slane %v3048_v34, 4  ;;  %v4102_v49 = vrot.slane %v4101_v60, 4  ;;  %v4116_v56 = vrot.slane %v4114_v15, 5 }
 0x1b7   : > { %2271 = vmatmul.bf16.gmra.mxu2 %v2123_v59  ;;  %v3530_v7 = vpack.c.b16 %v3499_v45, %v3498_v23  ;;  %v4112_v26 = vrot.slane %v4111_v8, 4  ;;  %v4119_v27 = vshrl.u32 %v4049_v0, 16  ;;  %v4122_v34 = vshll.u32 %v4049_v0, 16 }
 0x1b8   : > { %v3044_v31 = vsel %vm6716_vm11, %v3039_v20, %v3043_v12  ;;  %v6444_v12 = vld [vmem:[#allocation2 + $0x1c] sm:$0xf]  ;;  %v4128_v60 = vshll.u32 %v7523_v36, 16 }
 0x1b9   : > { %v4117_v24 = vsel %vm6716_vm11, %v4112_v26, %v4116_v56  ;;  %v3378_v45 = vrot.slane %v6444_v12, 5  ;;  %v3102_v62 = vunpack.c.l.b16 %v3044_v31  ;;  %v4121_v56 = vrot.slane %v4119_v27, 4 }
 0x1ba   : > { %v2232_v28 = vpop.f32.mrf.mxu2  ;;  %v1856_v14 = vpop.f32.mrf.mxu1  ;;  %v4797_v27 = vrot.slane %v7512_v4, 5 }
 0x1bb   : > { %v2543_v59 = vpop.f32.mrf.mxu3  ;;  %v2291_v11 = vadd.f32 %v2232_v28, %v1852_v57  ;;  %v4107_v57 = vsel %vm6716_vm11, %v4102_v49, %v7506_v25  ;;  %v3306_v28 = vld [vmem:[#allocation2 + $0x18] sm:$0xe]  ;;  %v3380_v25 = vrot.slane %v3378_v45, 4  ;;  %v1857_v20 = vadd.f32 %v1856_v14, %v7185_v22  ;;  %v7542_v14 = vld [vmem:[#allocation2 + $0x2c] sm:$0x1] }
 0x1bc   : > { %v3223_v42 = vpop.f32.mrf.mxu0  ;;  %v2604_v29 = vadd.f32 %v2543_v59, %v2290_v33  ;;  %v4132_v59 = vshrl.u32 %v7523_v36, 16  ;;  %v5794_v15 = vrot.slane %v3306_v28, 9  ;;  %v4728_v49 = vld [vmem:[#allocation2 + $0x18] sm:$0xe] }
 0x1bd   : > { %3618 = vmatmul.bf16.vlgmr.msra.gmra.mxu1 %v3530_v7  ;;  %v7518_v38 = vadd.f32 %v3223_v42, %v2603_v46  ;;  %v3054_v46 = vsel %vm6716_vm11, %v3049_v61, %v3053_v55  ;;  %v6445_v42 = vld [vmem:[#allocation2 + $0x20] sm:$0x1]  ;;  %v4496_v61 = vunpack.c.l.b16 %v4117_v24  ;;  %v4794_v55 = vrot.slane %v7499_v37, 5 }
 0x1be   : > { %v3103_v8 = vunpack.c.l.b16 %v3054_v46  ;;  %v3379_v26 = vsel %vm7099_vm14, %v5794_v15, %v3378_v45  ;;  %v4134_v46 = vrot.slane %v4132_v59, 4  ;;  %v6017_v37 = vrot.slane %v4728_v49, 9 }
 0x1bf   : > { %3262 = vmatmul.bf16.gmra.mxu0 %v3118_v32  ;;  %v6165_v32 = vld [vmem:[#allocation2 + $0x18] sm:$0xff]  ;;  %v3500_v0 = vunpack.c.l.b16 %v3379_v26  ;;  %v4796_v15 = vrot.slane %v4794_v55, 4 }
 0x1c0   : > { %2585 = vmatmul.bf16.gmra.mxu3 %v6140_v13  ;;  %v3381_v13 = vrot.slane %v6445_v42, 5  ;;  %v4052_v42 = vld [vmem:[#allocation2 + $0x30] sm:$0xf] }
 0x1c1   : > { %v4146_v26 = vshll.u32 %v4052_v42, 16 }
 0x1c2   : > { %v2234_v16 = vpop.f32.mrf.mxu2  ;;  %v1858_v33 = vpop.f32.mrf.mxu1 }
 0x1c3   : > { %v2546_v18 = vpop.f32.mrf.mxu3  ;;  %v2292_v44 = vadd.f32 %v2234_v16, %v1854_v9  ;;  %v4124_v9 = vrot.slane %v4122_v34, 5  ;;  %v4130_v16 = vrot.slane %v4128_v60, 5  ;;  %v4138_v60 = vshll.u32 %v7542_v14, 16 }
 0x1c4   : > { %v3225_v6 = vpop.f32.mrf.mxu0  ;;  %v2605_v23 = vadd.f32 %v2546_v18, %v2291_v11  ;;  %v4495_v11 = vunpack.c.l.b16 %v4107_v57 }
 0x1c5   : > { %v7534_v7 = vadd.f32 %v3225_v6, %v2604_v29  ;;  %v3382_v29 = vsel %vm7099_vm14, %v3380_v25, %v3381_v13  ;;  %v4125_v34 = vor.u32 %v4124_v9, %v4121_v56  ;;  %v4135_v25 = vor.u32 %v4134_v46, %v4130_v16  ;;  %v7553_v13 = vld [vmem:[#allocation2 + $0x34] sm:$0xf]  ;;  %v6166_v9 = vld [vmem:[#allocation2 + $0x24] sm:$0xff] }
 0x1c6   : > { %v3501_v31 = vunpack.c.l.b16 %v3382_v29  ;;  %v4527_v28 = vpack.c.b16 %v4496_v61, %v4495_v11  ;;  %v4140_v11 = vrot.slane %v4138_v60, 5  ;;  %v4143_v61 = vshrl.u32 %v4052_v42, 16 }
 0x1c7   : > { %3933 = vmatmul.bf16.vlgmr.msra.gmra.mxu2 %v6165_v32  ;;  %v3119_v32 = vpack.c.b16 %v3103_v8, %v3102_v62  ;;  %v4795_v62 = vsel %vm7099_vm14, %v6017_v37, %v4794_v55  ;;  %v1859_v8 = vadd.f32 %v1858_v33, %v7201_v39  ;;  %v4126_v4 = vrot.slane %v4125_v34, 4  ;;  %v6446_v33 = vld [vmem:[#allocation2 + $0x28] sm:$0xf]  ;;  %v6447_v34 = vld [vmem:[#allocation2 + $0x2c] sm:$0x1] }
 0x1c8   : > { %v3531_v6 = vpack.c.b16 %v3501_v31, %v3500_v0  ;;  %v4152_v0 = vshll.u32 %v7553_v13, 16  ;;  %v4156_v55 = vshrl.u32 %v7553_v13, 16  ;;  %v4921_v46 = vunpack.c.l.b16 %v4795_v62 }
 0x1c9   : > { %v4148_v60 = vrot.slane %v4146_v26, 5 }
 0x1ca   : > { %v2237_v18 = vpop.f32.mrf.mxu2  ;;  %v1861_v22 = vpop.f32.mrf.mxu1  ;;  %v7563_v42 = vrot.slane %v4152_v0, 5 }
 0x1cb   : > { %v2548_v57 = vpop.f32.mrf.mxu3  ;;  %v2293_v24 = vadd.f32 %v2237_v18, %v1857_v20  ;;  %v4136_v20 = vrot.slane %v4135_v25, 4  ;;  %v3388_v25 = vrot.slane %v6447_v34, 5 }
 0x1cc   : > { %v3228_v12 = vpop.f32.mrf.mxu0  ;;  %v2606_v45 = vadd.f32 %v2548_v57, %v2292_v44  ;;  %v4798_v44 = vsel %vm7099_vm14, %v4796_v15, %v4797_v27  ;;  %v4131_v57 = vsel %vm6716_vm11, %v4126_v4, %v4130_v16  ;;  %v7569_v4 = vld [vmem:[#allocation2 + $0x38] sm:$0x1] }
 0x1cd   : > { %3623 = vmatmul.bf16.gmra.mxu1 %v3531_v6  ;;  %v7546_v59 = vadd.f32 %v3228_v12, %v2605_v23  ;;  %v4922_v18 = vunpack.c.l.b16 %v4798_v44  ;;  %v4141_v37 = vsel %vm6716_vm11, %v4136_v20, %v4140_v11  ;;  %v3307_v6 = vld [vmem:[#allocation2 + $0x24] sm:$0xe]  ;;  %v4145_v12 = vrot.slane %v4143_v61, 4 }
 0x1ce   : > { %v5795_v15 = vrot.slane %v3307_v6, 9  ;;  %v4497_v62 = vunpack.c.l.b16 %v4131_v57  ;;  %v4498_v44 = vunpack.c.l.b16 %v4141_v37  ;;  %v4162_v57 = vshll.u32 %v7569_v4, 16 }
 0x1cf   : > { %3267 = vmatmul.bf16.gmra.mxu0 %v3119_v32  ;;  %v3385_v32 = vrot.slane %v6446_v33, 5  ;;  %v4953_v61 = vpack.c.b16 %v4922_v18, %v4921_v46 }
 0x1d0   : > { %4615 = vmatmul.bf16.vlgmr.msra.gmra.mxu3 %v4527_v28 }
 0x1d1   : > { %v3387_v27 = vrot.slane %v3385_v32, 4  ;;  %v3386_v16 = vsel %vm7099_vm14, %v5795_v15, %v3385_v32  ;;  %v4528_v15 = vpack.c.b16 %v4498_v44, %v4497_v62  ;;  %v7581_v62 = vld [vmem:[#allocation2 + $0x40] sm:$0xf] }
 0x1d2   : > { %v2239_v49 = vpop.f32.mrf.mxu2  ;;  %v1863_v23 = vpop.f32.mrf.mxu1  ;;  %v3502_v20 = vunpack.c.l.b16 %v3386_v16 }
 0x1d3   : > { %v2551_v29 = vpop.f32.mrf.mxu3  ;;  %v2294_v56 = vadd.f32 %v2239_v49, %v1859_v8  ;;  %v3389_v8 = vsel %vm7099_vm14, %v3387_v27, %v3388_v25  ;;  %v4801_v49 = vrot.slane %v7523_v36, 5  ;;  %v4804_v36 = vrot.slane %v7542_v14, 5  ;;  %v4055_v25 = vld [vmem:[#allocation2 + $0x3c] sm:$0xf]  ;;  %v6167_v14 = vld [vmem:[#allocation2 + $0x30] sm:$0xff] }
 0x1d4   : > { %v3230_v31 = vpop.f32.mrf.mxu0  ;;  %v2607_v39 = vadd.f32 %v2551_v29, %v2293_v24  ;;  %v4158_v24 = vrot.slane %v4156_v55, 4  ;;  %v3503_v11 = vunpack.c.l.b16 %v3389_v8  ;;  %v4729_v55 = vld [vmem:[#allocation2 + $0x24] sm:$0xe]  ;;  %v4164_v27 = vrot.slane %v4162_v57, 5 }
 0x1d5   : > { %v7561_v28 = vadd.f32 %v3230_v31, %v2606_v45  ;;  %v1862_v45 = vadd.f32 %v1861_v22, %v7220_v54  ;;  %v6018_v22 = vrot.slane %v4729_v55, 9  ;;  %v4803_v46 = vrot.slane %v4801_v49, 4 }
 0x1d6   : > { %v3532_v33 = vpack.c.b16 %v3503_v11, %v3502_v20  ;;  %v4159_v32 = vor.u32 %v4158_v24, %v7563_v42  ;;  %v1864_v34 = vadd.f32 %v1863_v23, %v7230_v43  ;;  %v6448_v20 = vld [vmem:[#allocation2 + $0x34] sm:$0xf]  ;;  %v4180_v55 = vshrl.u32 %v7581_v62, 16 }
 0x1d7   : > { %3938 = vmatmul.bf16.gmra.mxu2 %v6166_v9  ;;  %v4149_v9 = vor.u32 %v4148_v60, %v4145_v12  ;;  %v4802_v60 = vsel %vm7099_vm14, %v6018_v22, %v4801_v49  ;;  %v3392_v11 = vrot.slane %v6448_v20, 5  ;;  %v4170_v49 = vshll.u32 %v4055_v25, 16 }
 0x1d8   : > { %v4160_v12 = vrot.slane %v4159_v32, 4 }
 0x1d9   : > { %v4150_v18 = vrot.slane %v4149_v9, 4  ;;  %v3308_v9 = vld [vmem:[#allocation2 + $0x30] sm:$0xe] }
 0x1da   : > { %v2242_v26 = vpop.f32.mrf.mxu2  ;;  %v1866_v29 = vpop.f32.mrf.mxu1  ;;  %v4165_v43 = vsel %vm6716_vm11, %v4160_v12, %v4164_v27  ;;  %v5796_v57 = vrot.slane %v3308_v9, 9 }
 0x1db   : > { %v2553_v0 = vpop.f32.mrf.mxu3  ;;  %v2295_v31 = vadd.f32 %v2242_v26, %v1862_v45  ;;  %v4155_v8 = vsel %vm6716_vm11, %v4150_v18, %v7563_v42  ;;  %v4923_v26 = vunpack.c.l.b16 %v4802_v60  ;;  %v3394_v42 = vrot.slane %v3392_v11, 4  ;;  %v4730_v18 = vld [vmem:[#allocation2 + $0x30] sm:$0xe] }
 0x1dc   : > { %v3233_v37 = vpop.f32.mrf.mxu0  ;;  %v2608_v6 = vadd.f32 %v2553_v0, %v2294_v56  ;;  %v4176_v0 = vshll.u32 %v7581_v62, 16  ;;  %v1867_v22 = vadd.f32 %v1866_v29, %v7256_v35  ;;  %v3393_v12 = vsel %vm7099_vm14, %v5796_v57, %v3392_v11  ;;  %v7600_v29 = vld [vmem:[#allocation2 + $0x44] sm:$0x1] }
 0x1dd   : > { %3628 = vmatmul.bf16.gmra.mxu1 %v3532_v33  ;;  %v7575_v54 = vadd.f32 %v3233_v37, %v2607_v39  ;;  %v4805_v39 = vsel %vm7099_vm14, %v4803_v46, %v4804_v36  ;;  %v6449_v37 = vld [vmem:[#allocation2 + $0x38] sm:$0x1]  ;;  %v4500_v46 = vunpack.c.l.b16 %v4165_v43  ;;  %v4808_v36 = vrot.slane %v7553_v13, 5 }
 0x1de   : > { %v4924_v32 = vunpack.c.l.b16 %v4805_v39  ;;  %v4182_v39 = vrot.slane %v4180_v55, 4  ;;  %v6019_v13 = vrot.slane %v4730_v18, 9 }
 0x1df   : > { %5041 = vmatmul.bf16.vlgmr.msra.gmra.mxu0 %v4953_v61  ;;  %v4167_v61 = vshrl.u32 %v4055_v25, 16  ;;  %v3504_v25 = vunpack.c.l.b16 %v3393_v12  ;;  %v4810_v57 = vrot.slane %v4808_v36, 4 }
 0x1e0   : > { %4620 = vmatmul.bf16.gmra.mxu3 %v4528_v15  ;;  %v3395_v15 = vrot.slane %v6449_v37, 5  ;;  %v4058_v37 = vld [vmem:[#allocation2 + $0x48] sm:$0xf] }
 0x1e1   : > { %v4169_v27 = vrot.slane %v4167_v61, 4  ;;  %v4811_v61 = vrot.slane %v7569_v4, 5  ;;  %v4194_v12 = vshll.u32 %v4058_v37, 16 }
 0x1e2   : > { %v2244_v56 = vpop.f32.mrf.mxu2  ;;  %v1868_v24 = vpop.f32.mrf.mxu1 }
 0x1e3   : > { %v2556_v44 = vpop.f32.mrf.mxu3  ;;  %v2296_v16 = vadd.f32 %v2244_v56, %v1864_v34  ;;  %v4172_v34 = vrot.slane %v4170_v49, 5  ;;  %v4178_v56 = vrot.slane %v4176_v0, 5  ;;  %v4186_v0 = vshll.u32 %v7600_v29, 16 }
 0x1e4   : > { %v3235_v23 = vpop.f32.mrf.mxu0  ;;  %v2609_v45 = vadd.f32 %v2556_v44, %v2295_v31  ;;  %v4499_v31 = vunpack.c.l.b16 %v4155_v8 }
 0x1e5   : > { %v7592_v33 = vadd.f32 %v3235_v23, %v2608_v6  ;;  %v3396_v6 = vsel %vm7099_vm14, %v3394_v42, %v3395_v15  ;;  %v4173_v49 = vor.u32 %v4172_v34, %v4169_v27  ;;  %v4183_v42 = vor.u32 %v4182_v39, %v4178_v56  ;;  %v7611_v15 = vld [vmem:[#allocation2 + $0x4c] sm:$0xf]  ;;  %v6168_v34 = vld [vmem:[#allocation2 + $0x3c] sm:$0xff] }
 0x1e6   : > { %v3505_v60 = vunpack.c.l.b16 %v3396_v6  ;;  %v4529_v9 = vpack.c.b16 %v4500_v46, %v4499_v31  ;;  %v4188_v31 = vrot.slane %v4186_v0, 5  ;;  %v4191_v46 = vshrl.u32 %v4058_v37, 16 }
 0x1e7   : > { %3943 = vmatmul.bf16.gmra.mxu2 %v6167_v14  ;;  %v4954_v14 = vpack.c.b16 %v4924_v32, %v4923_v26  ;;  %v4809_v26 = vsel %vm7099_vm14, %v6019_v13, %v4808_v36  ;;  %v1869_v32 = vadd.f32 %v1868_v24, %v7269_v63  ;;  %v4174_v4 = vrot.slane %v4173_v49, 4  ;;  %v6450_v24 = vld [vmem:[#allocation2 + $0x40] sm:$0xf]  ;;  %v6451_v49 = vld [vmem:[#allocation2 + $0x44] sm:$0x1] }
 0x1e8   : > { %v3533_v23 = vpack.c.b16 %v3505_v60, %v3504_v25  ;;  %v4200_v25 = vshll.u32 %v7611_v15, 16  ;;  %v4204_v36 = vshrl.u32 %v7611_v15, 16  ;;  %v4925_v39 = vunpack.c.l.b16 %v4809_v26 }
 0x1e9   : > { %v4196_v0 = vrot.slane %v4194_v12, 5 }
 0x1ea   : > { %v2247_v44 = vpop.f32.mrf.mxu2  ;;  %v1871_v35 = vpop.f32.mrf.mxu1  ;;  %v7621_v37 = vrot.slane %v4200_v25, 5 }
 0x1eb   : > { %v2558_v8 = vpop.f32.mrf.mxu3  ;;  %v2297_v43 = vadd.f32 %v2247_v44, %v1867_v22  ;;  %v4184_v22 = vrot.slane %v4183_v42, 4  ;;  %v3402_v42 = vrot.slane %v6451_v49, 5 }
 0x1ec   : > { %v3238_v20 = vpop.f32.mrf.mxu0  ;;  %v2610_v11 = vadd.f32 %v2558_v8, %v2296_v16  ;;  %v4812_v16 = vsel %vm7099_vm14, %v4810_v57, %v4811_v61  ;;  %v4179_v8 = vsel %vm6716_vm11, %v4174_v4, %v4178_v56  ;;  %v7627_v4 = vld [vmem:[#allocation2 + $0x50] sm:$0x1] }
 0x1ed   : > { %3633 = vmatmul.bf16.gmra.mxu1 %v3533_v23  ;;  %v7604_v55 = vadd.f32 %v3238_v20, %v2609_v45  ;;  %v4926_v44 = vunpack.c.l.b16 %v4812_v16  ;;  %v4189_v13 = vsel %vm6716_vm11, %v4184_v22, %v4188_v31  ;;  %v3309_v23 = vld [vmem:[#allocation2 + $0x3c] sm:$0xe]  ;;  %v4193_v20 = vrot.slane %v4191_v46, 4 }
 0x1ee   : > { %v5797_v57 = vrot.slane %v3309_v23, 9  ;;  %v4501_v26 = vunpack.c.l.b16 %v4179_v8  ;;  %v4502_v16 = vunpack.c.l.b16 %v4189_v13  ;;  %v4210_v8 = vshll.u32 %v7627_v4, 16 }
 0x1ef   : > { %5046 = vmatmul.bf16.gmra.mxu0 %v4954_v14  ;;  %v3399_v14 = vrot.slane %v6450_v24, 5  ;;  %v4955_v46 = vpack.c.b16 %v4926_v44, %v4925_v39 }
 0x1f0   : > { %4625 = vmatmul.bf16.gmra.mxu3 %v4529_v9 }
 0x1f1   : > { %v3401_v61 = vrot.slane %v3399_v14, 4  ;;  %v3400_v56 = vsel %vm7099_vm14, %v5797_v57, %v3399_v14  ;;  %v4530_v57 = vpack.c.b16 %v4502_v16, %v4501_v26  ;;  %v7639_v26 = vld [vmem:[#allocation2 + $0x58] sm:$0xf] }
 0x1f2   : > { %v2249_v18 = vpop.f32.mrf.mxu2  ;;  %v1873_v45 = vpop.f32.mrf.mxu1  ;;  %v3506_v22 = vunpack.c.l.b16 %v3400_v56 }
 0x1f3   : > { %v2561_v6 = vpop.f32.mrf.mxu3  ;;  %v2298_v27 = vadd.f32 %v2249_v18, %v1869_v32  ;;  %v3403_v32 = vsel %vm7099_vm14, %v3401_v61, %v3402_v42  ;;  %v4815_v18 = vrot.slane %v7581_v62, 5  ;;  %v4818_v62 = vrot.slane %v7600_v29, 5  ;;  %v4061_v42 = vld [vmem:[#allocation2 + $0x54] sm:$0xf]  ;;  %v6169_v29 = vld [vmem:[#allocation2 + $0x48] sm:$0xff] }
 0x1f4   : > { %v3240_v60 = vpop.f32.mrf.mxu0  ;;  %v2611_v63 = vadd.f32 %v2561_v6, %v2297_v43  ;;  %v4206_v43 = vrot.slane %v4204_v36, 4  ;;  %v3507_v31 = vunpack.c.l.b16 %v3403_v32  ;;  %v4731_v36 = vld [vmem:[#allocation2 + $0x3c] sm:$0xe]  ;;  %v4212_v61 = vrot.slane %v4210_v8, 5 }
 0x1f5   : > { %v7619_v9 = vadd.f32 %v3240_v60, %v2610_v11  ;;  %v1872_v11 = vadd.f32 %v1871_v35, %v7281_v47  ;;  %v6020_v35 = vrot.slane %v4731_v36, 9  ;;  %v4817_v39 = vrot.slane %v4815_v18, 4 }
 0x1f6   : > { %v3534_v24 = vpack.c.b16 %v3507_v31, %v3506_v22  ;;  %v4207_v14 = vor.u32 %v4206_v43, %v7621_v37  ;;  %v1874_v49 = vadd.f32 %v1873_v45, %v7299_v30  ;;  %v6452_v22 = vld [vmem:[#allocation2 + $0x4c] sm:$0xf]  ;;  %v4228_v36 = vshrl.u32 %v7639_v26, 16 }
 0x1f7   : > { %3948 = vmatmul.bf16.gmra.mxu2 %v6168_v34  ;;  %v4197_v34 = vor.u32 %v4196_v0, %v4193_v20  ;;  %v4816_v0 = vsel %vm7099_vm14, %v6020_v35, %v4815_v18  ;;  %v3406_v31 = vrot.slane %v6452_v22, 5  ;;  %v4218_v18 = vshll.u32 %v4061_v42, 16 }
 0x1f8   : > { %v4208_v20 = vrot.slane %v4207_v14, 4 }
 0x1f9   : > { %v4198_v44 = vrot.slane %v4197_v34, 4  ;;  %v3310_v34 = vld [vmem:[#allocation2 + $0x48] sm:$0xe] }
 0x1fa   : > { %v2252_v12 = vpop.f32.mrf.mxu2  ;;  %v1876_v6 = vpop.f32.mrf.mxu1  ;;  %v4213_v30 = vsel %vm6716_vm11, %v4208_v20, %v4212_v61  ;;  %v5798_v8 = vrot.slane %v3310_v34, 9 }
 0x1fb   : > { %v2563_v25 = vpop.f32.mrf.mxu3  ;;  %v2299_v60 = vadd.f32 %v2252_v12, %v1872_v11  ;;  %v4203_v32 = vsel %vm6716_vm11, %v4198_v44, %v7621_v37  ;;  %v4927_v12 = vunpack.c.l.b16 %v4816_v0  ;;  %v3408_v37 = vrot.slane %v3406_v31, 4  ;;  %v4732_v44 = vld [vmem:[#allocation2 + $0x48] sm:$0xe] }
 0x1fc   : > { %v3243_v13 = vpop.f32.mrf.mxu0  ;;  %v2612_v23 = vadd.f32 %v2563_v25, %v2298_v27  ;;  %v4224_v25 = vshll.u32 %v7639_v26, 16  ;;  %v1877_v35 = vadd.f32 %v1876_v6, %v7199_v40  ;;  %v3407_v20 = vsel %vm7099_vm14, %v5798_v8, %v3406_v31  ;;  %v7658_v6 = vld [vmem:[#allocation2 + $0x5c] sm:$0x1] }
 0x1fd   : > { %3638 = vmatmul.bf16.gmra.mxu1 %v3534_v24  ;;  %v7633_v47 = vadd.f32 %v3243_v13, %v2611_v63  ;;  %v4819_v63 = vsel %vm7099_vm14, %v4817_v39, %v4818_v62  ;;  %v6453_v13 = vld [vmem:[#allocation2 + $0x50] sm:$0x1]  ;;  %v4504_v39 = vunpack.c.l.b16 %v4213_v30  ;;  %v4822_v62 = vrot.slane %v7611_v15, 5 }
 0x1fe   : > { %v4928_v14 = vunpack.c.l.b16 %v4819_v63  ;;  %v4230_v63 = vrot.slane %v4228_v36, 4  ;;  %v6021_v15 = vrot.slane %v4732_v44, 9 }
 0x1ff   : > { %5051 = vmatmul.bf16.gmra.mxu0 %v4955_v46  ;;  %v4215_v46 = vshrl.u32 %v4061_v42, 16  ;;  %v3508_v42 = vunpack.c.l.b16 %v3407_v20  ;;  %v4824_v8 = vrot.slane %v4822_v62, 4 }
 0x200   : > { %4630 = vmatmul.bf16.gmra.mxu3 %v4530_v57  ;;  %v3409_v57 = vrot.slane %v6453_v13, 5  ;;  %v4064_v13 = vld [vmem:[#allocation2 + $0x60] sm:$0xf] }
 0x201   : > { %v4217_v61 = vrot.slane %v4215_v46, 4  ;;  %v4825_v46 = vrot.slane %v7627_v4, 5  ;;  %v4242_v20 = vshll.u32 %v4064_v13, 16 }
 0x202   : > { %v2254_v27 = vpop.f32.mrf.mxu2  ;;  %v1878_v43 = vpop.f32.mrf.mxu1 }
 0x203   : > { %v2566_v16 = vpop.f32.mrf.mxu3  ;;  %v2300_v56 = vadd.f32 %v2254_v27, %v1874_v49  ;;  %v4220_v49 = vrot.slane %v4218_v18, 5  ;;  %v4226_v27 = vrot.slane %v4224_v25, 5  ;;  %v4234_v25 = vshll.u32 %v7658_v6, 16 }
 0x204   : > { %v3245_v45 = vpop.f32.mrf.mxu0  ;;  %v2613_v11 = vadd.f32 %v2566_v16, %v2299_v60  ;;  %v4503_v60 = vunpack.c.l.b16 %v4203_v32 }
 0x205   : > { %v7650_v24 = vadd.f32 %v3245_v45, %v2612_v23  ;;  %v3410_v23 = vsel %vm7099_vm14, %v3408_v37, %v3409_v57  ;;  %v4221_v18 = vor.u32 %v4220_v49, %v4217_v61  ;;  %v4231_v37 = vor.u32 %v4230_v63, %v4226_v27  ;;  %v7669_v57 = vld [vmem:[#allocation2 + $0x64] sm:$0xf]  ;;  %v6170_v49 = vld [vmem:[#allocation2 + $0x54] sm:$0xff] }
 0x206   : > { %v3509_v0 = vunpack.c.l.b16 %v3410_v23  ;;  %v4531_v34 = vpack.c.b16 %v4504_v39, %v4503_v60  ;;  %v4236_v60 = vrot.slane %v4234_v25, 5  ;;  %v4239_v39 = vshrl.u32 %v4064_v13, 16 }
 0x207   : > { %3953 = vmatmul.bf16.gmra.mxu2 %v6169_v29  ;;  %v4956_v29 = vpack.c.b16 %v4928_v14, %v4927_v12  ;;  %v4823_v12 = vsel %vm7099_vm14, %v6021_v15, %v4822_v62  ;;  %v1879_v14 = vadd.f32 %v1878_v43, %v7216_v19  ;;  %v4222_v4 = vrot.slane %v4221_v18, 4  ;;  %v6454_v43 = vld [vmem:[#allocation2 + $0x58] sm:$0xf]  ;;  %v6455_v18 = vld [vmem:[#allocation2 + $0x5c] sm:$0x1] }
 0x208   : > { %v3535_v45 = vpack.c.b16 %v3509_v0, %v3508_v42  ;;  %v4248_v42 = vshll.u32 %v7669_v57, 16  ;;  %v4252_v62 = vshrl.u32 %v7669_v57, 16  ;;  %v4929_v63 = vunpack.c.l.b16 %v4823_v12 }
 0x209   : > { %v4244_v25 = vrot.slane %v4242_v20, 5 }
 0x20a   : > { %v2257_v16 = vpop.f32.mrf.mxu2  ;;  %v1881_v40 = vpop.f32.mrf.mxu1  ;;  %v7679_v13 = vrot.slane %v4248_v42, 5 }
 0x20b   : > { %v2568_v32 = vpop.f32.mrf.mxu3  ;;  %v2301_v30 = vadd.f32 %v2257_v16, %v1877_v35  ;;  %v4232_v35 = vrot.slane %v4231_v37, 4  ;;  %v3416_v37 = vrot.slane %v6455_v18, 5 }
 0x20c   : > { %v3248_v22 = vpop.f32.mrf.mxu0  ;;  %v2614_v31 = vadd.f32 %v2568_v32, %v2300_v56  ;;  %v4826_v56 = vsel %vm7099_vm14, %v4824_v8, %v4825_v46  ;;  %v4227_v32 = vsel %vm6716_vm11, %v4222_v4, %v4226_v27  ;;  %v7685_v4 = vld [vmem:[#allocation2 + $0x68] sm:$0x1] }
 0x20d   : > { %3643 = vmatmul.bf16.gmra.mxu1 %v3535_v45  ;;  %v7662_v36 = vadd.f32 %v3248_v22, %v2613_v11  ;;  %v4930_v16 = vunpack.c.l.b16 %v4826_v56  ;;  %v4237_v15 = vsel %vm6716_vm11, %v4232_v35, %v4236_v60  ;;  %v3311_v45 = vld [vmem:[#allocation2 + $0x54] sm:$0xe]  ;;  %v4241_v22 = vrot.slane %v4239_v39, 4 }
 0x20e   : > { %v5799_v8 = vrot.slane %v3311_v45, 9  ;;  %v4505_v12 = vunpack.c.l.b16 %v4227_v32  ;;  %v4506_v56 = vunpack.c.l.b16 %v4237_v15  ;;  %v4258_v32 = vshll.u32 %v7685_v4, 16 }
 0x20f   : > { %5056 = vmatmul.bf16.gmra.mxu0 %v4956_v29  ;;  %v3413_v29 = vrot.slane %v6454_v43, 5  ;;  %v4957_v39 = vpack.c.b16 %v4930_v16, %v4929_v63 }
 0x210   : > { %4635 = vmatmul.bf16.gmra.mxu3 %v4531_v34 }
 0x211   : > { %v3415_v46 = vrot.slane %v3413_v29, 4  ;;  %v3414_v27 = vsel %vm7099_vm14, %v5799_v8, %v3413_v29  ;;  %v4532_v8 = vpack.c.b16 %v4506_v56, %v4505_v12  ;;  %v7697_v12 = vld [vmem:[#allocation2 + $0x70] sm:$0xf] }
 0x212   : > { %v2259_v44 = vpop.f32.mrf.mxu2  ;;  %v1883_v11 = vpop.f32.mrf.mxu1  ;;  %v3510_v35 = vunpack.c.l.b16 %v3414_v27 }
 0x213   : > { %v2571_v23 = vpop.f32.mrf.mxu3  ;;  %v2302_v61 = vadd.f32 %v2259_v44, %v1879_v14  ;;  %v3417_v14 = vsel %vm7099_vm14, %v3415_v46, %v3416_v37  ;;  %v4829_v44 = vrot.slane %v7639_v26, 5  ;;  %v4832_v26 = vrot.slane %v7658_v6, 5  ;;  %v4067_v37 = vld [vmem:[#allocation2 + $0x6c] sm:$0xf]  ;;  %v6171_v6 = vld [vmem:[#allocation2 + $0x60] sm:$0xff] }
 0x214   : > { %v3250_v0 = vpop.f32.mrf.mxu0  ;;  %v2615_v19 = vadd.f32 %v2571_v23, %v2301_v30  ;;  %v4254_v30 = vrot.slane %v4252_v62, 4  ;;  %v3511_v60 = vunpack.c.l.b16 %v3417_v14  ;;  %v4733_v62 = vld [vmem:[#allocation2 + $0x54] sm:$0xe]  ;;  %v4260_v46 = vrot.slane %v4258_v32, 5 }
 0x215   : > { %v7677_v34 = vadd.f32 %v3250_v0, %v2614_v31  ;;  %v1882_v31 = vadd.f32 %v1881_v40, %v7228_v58  ;;  %v6022_v40 = vrot.slane %v4733_v62, 9  ;;  %v4831_v63 = vrot.slane %v4829_v44, 4 }
 0x216   : > { %v3536_v43 = vpack.c.b16 %v3511_v60, %v3510_v35  ;;  %v4255_v29 = vor.u32 %v4254_v30, %v7679_v13  ;;  %v1884_v18 = vadd.f32 %v1883_v11, %v7254_v1  ;;  %v6456_v35 = vld [vmem:[#allocation2 + $0x64] sm:$0xf]  ;;  %v4276_v62 = vshrl.u32 %v7697_v12, 16 }
 0x217   : > { %3958 = vmatmul.bf16.gmra.mxu2 %v6170_v49  ;;  %v4245_v49 = vor.u32 %v4244_v25, %v4241_v22  ;;  %v4830_v25 = vsel %vm7099_vm14, %v6022_v40, %v4829_v44  ;;  %v3420_v60 = vrot.slane %v6456_v35, 5  ;;  %v4266_v44 = vshll.u32 %v4067_v37, 16 }
 0x218   : > { %v4256_v22 = vrot.slane %v4255_v29, 4 }
 0x219   : > { %v4246_v16 = vrot.slane %v4245_v49, 4  ;;  %v3312_v49 = vld [vmem:[#allocation2 + $0x60] sm:$0xe] }
 0x21a   : > { %v2262_v20 = vpop.f32.mrf.mxu2  ;;  %v1886_v23 = vpop.f32.mrf.mxu1  ;;  %v4261_v1 = vsel %vm6716_vm11, %v4256_v22, %v4260_v46  ;;  %v5800_v32 = vrot.slane %v3312_v49, 9 }
 0x21b   : > { %v2573_v42 = vpop.f32.mrf.mxu3  ;;  %v2303_v0 = vadd.f32 %v2262_v20, %v1882_v31  ;;  %v4251_v14 = vsel %vm6716_vm11, %v4246_v16, %v7679_v13  ;;  %v4931_v20 = vunpack.c.l.b16 %v4830_v25  ;;  %v3422_v13 = vrot.slane %v3420_v60, 4  ;;  %v4734_v16 = vld [vmem:[#allocation2 + $0x60] sm:$0xe] }
 0x21c   : > { %v3253_v15 = vpop.f32.mrf.mxu0  ;;  %v2616_v45 = vadd.f32 %v2573_v42, %v2302_v61  ;;  %v4272_v42 = vshll.u32 %v7697_v12, 16  ;;  %v1887_v40 = vadd.f32 %v1886_v23, %v7267_v53  ;;  %v3421_v22 = vsel %vm7099_vm14, %v5800_v32, %v3420_v60  ;;  %v7716_v23 = vld [vmem:[#allocation2 + $0x74] sm:$0x1] }
 0x21d   : > { %3648 = vmatmul.bf16.gmra.mxu1 %v3536_v43  ;;  %v7691_v58 = vadd.f32 %v3253_v15, %v2615_v19  ;;  %v4833_v19 = vsel %vm7099_vm14, %v4831_v63, %v4832_v26  ;;  %v6457_v15 = vld [vmem:[#allocation2 + $0x68] sm:$0x1]  ;;  %v4508_v63 = vunpack.c.l.b16 %v4261_v1  ;;  %v4836_v26 = vrot.slane %v7669_v57, 5 }
 0x21e   : > { %v4932_v29 = vunpack.c.l.b16 %v4833_v19  ;;  %v4278_v19 = vrot.slane %v4276_v62, 4  ;;  %v6023_v57 = vrot.slane %v4734_v16, 9 }
 0x21f   : > { %5061 = vmatmul.bf16.gmra.mxu0 %v4957_v39  ;;  %v4263_v39 = vshrl.u32 %v4067_v37, 16  ;;  %v3512_v37 = vunpack.c.l.b16 %v3421_v22  ;;  %v4838_v32 = vrot.slane %v4836_v26, 4 }
 0x220   : > { %4640 = vmatmul.bf16.gmra.mxu3 %v4532_v8  ;;  %v3423_v8 = vrot.slane %v6457_v15, 5  ;;  %v4070_v15 = vld [vmem:[#allocation2 + $0x78] sm:$0xf] }
 0x221   : > { %v4265_v46 = vrot.slane %v4263_v39, 4  ;;  %v4839_v39 = vrot.slane %v7685_v4, 5  ;;  %v4290_v22 = vshll.u32 %v4070_v15, 16 }
 0x222   : > { %v2264_v61 = vpop.f32.mrf.mxu2  ;;  %v1888_v30 = vpop.f32.mrf.mxu1 }
 0x223   : > { %v2576_v56 = vpop.f32.mrf.mxu3  ;;  %v2304_v27 = vadd.f32 %v2264_v61, %v1884_v18  ;;  %v4268_v18 = vrot.slane %v4266_v44, 5  ;;  %v4274_v61 = vrot.slane %v4272_v42, 5  ;;  %v4282_v42 = vshll.u32 %v7716_v23, 16 }
 0x224   : > { %v3255_v11 = vpop.f32.mrf.mxu0  ;;  %v2617_v31 = vadd.f32 %v2576_v56, %v2303_v0  ;;  %v4507_v0 = vunpack.c.l.b16 %v4251_v14 }
 0x225   : > { %v7708_v43 = vadd.f32 %v3255_v11, %v2616_v45  ;;  %v3424_v45 = vsel %vm7099_vm14, %v3422_v13, %v3423_v8  ;;  %v4269_v44 = vor.u32 %v4268_v18, %v4265_v46  ;;  %v4279_v13 = vor.u32 %v4278_v19, %v4274_v61  ;;  %v7727_v8 = vld [vmem:[#allocation2 + $0x7c] sm:$0xf]  ;;  %v6172_v18 = vld [vmem:[#allocation2 + $0x6c] sm:$0xff] }
 0x226   : > { %v3513_v25 = vunpack.c.l.b16 %v3424_v45  ;;  %v4533_v49 = vpack.c.b16 %v4508_v63, %v4507_v0  ;;  %v4284_v0 = vrot.slane %v4282_v42, 5  ;;  %v4287_v63 = vshrl.u32 %v4070_v15, 16 }
 0x227   : > { %3963 = vmatmul.bf16.gmra.mxu2 %v6171_v6  ;;  %v4958_v6 = vpack.c.b16 %v4932_v29, %v4931_v20  ;;  %v4837_v20 = vsel %vm7099_vm14, %v6023_v57, %v4836_v26  ;;  %v1889_v29 = vadd.f32 %v1888_v30, %v7279_v41  ;;  %v4270_v4 = vrot.slane %v4269_v44, 4  ;;  %v6458_v30 = vld [vmem:[#allocation2 + $0x70] sm:$0xf]  ;;  %v6459_v44 = vld [vmem:[#allocation2 + $0x74] sm:$0x1] }
 0x228   : > { %v3537_v11 = vpack.c.b16 %v3513_v25, %v3512_v37  ;;  %v4296_v37 = vshll.u32 %v7727_v8, 16  ;;  %v4300_v26 = vshrl.u32 %v7727_v8, 16  ;;  %v4933_v19 = vunpack.c.l.b16 %v4837_v20 }
 0x229   : > { %v4292_v42 = vrot.slane %v4290_v22, 5 }
 0x22a   : > { %v2267_v56 = vpop.f32.mrf.mxu2  ;;  %v1891_v53 = vpop.f32.mrf.mxu1  ;;  %v7737_v15 = vrot.slane %v4296_v37, 5 }
 0x22b   : > { %v2578_v14 = vpop.f32.mrf.mxu3  ;;  %v2305_v1 = vadd.f32 %v2267_v56, %v1887_v40  ;;  %v4280_v40 = vrot.slane %v4279_v13, 4  ;;  %v3430_v13 = vrot.slane %v6459_v44, 5  ;;  %v4073_v44 = vld [vmem:[#allocation2 + $0x84] sm:$0xf] }
 0x22c   : > { %v3258_v35 = vpop.f32.mrf.mxu0  ;;  %v2618_v60 = vadd.f32 %v2578_v14, %v2304_v27  ;;  %v4840_v27 = vsel %vm7099_vm14, %v4838_v32, %v4839_v39  ;;  %v4275_v14 = vsel %vm6716_vm11, %v4270_v4, %v4274_v61  ;;  %v7743_v4 = vld [vmem:[#allocation2 + $0x80] sm:$0x1] }
 0x22d   : > { %3653 = vmatmul.bf16.gmra.mxu1 %v3537_v11  ;;  %v7720_v62 = vadd.f32 %v3258_v35, %v2617_v31  ;;  %v4934_v56 = vunpack.c.l.b16 %v4840_v27  ;;  %v4285_v57 = vsel %vm6716_vm11, %v4280_v40, %v4284_v0  ;;  %v3313_v11 = vld [vmem:[#allocation2 + $0x6c] sm:$0xe]  ;;  %v4289_v35 = vrot.slane %v4287_v63, 4 }
 0x22e   : > { %v5801_v32 = vrot.slane %v3313_v11, 9  ;;  %v4509_v20 = vunpack.c.l.b16 %v4275_v14  ;;  %v4510_v27 = vunpack.c.l.b16 %v4285_v57  ;;  %v4306_v14 = vshll.u32 %v7743_v4, 16 }
 0x22f   : > { %8073 = vst [vmem:[#allocation11_spill] sm:$0xff] %v7720_v62  ;;  %5066 = vmatmul.bf16.gmra.mxu0 %v4958_v6  ;;  %v3427_v6 = vrot.slane %v6458_v30, 5  ;;  %v4959_v63 = vpack.c.b16 %v4934_v56, %v4933_v19  ;;  %v4846_v56 = vrot.slane %v7716_v23, 5 }
 0x230   : > { %4645 = vmatmul.bf16.gmra.mxu3 %v4533_v49 }
 0x231   : > { %v3429_v39 = vrot.slane %v3427_v6, 4  ;;  %v3428_v61 = vsel %vm7099_vm14, %v5801_v32, %v3427_v6 }
 0x232   : > { %v2269_v16 = vpop.f32.mrf.mxu2  ;;  %v1893_v31 = vpop.f32.mrf.mxu1  ;;  %v3514_v40 = vunpack.c.l.b16 %v3428_v61 }
 0x233   : > { %v2581_v45 = vpop.f32.mrf.mxu3  ;;  %v2306_v46 = vadd.f32 %v2269_v16, %v1889_v29  ;;  %v3431_v29 = vsel %vm7099_vm14, %v3429_v39, %v3430_v13  ;;  %v4843_v16 = vrot.slane %v7697_v12, 5  ;;  %v4308_v39 = vrot.slane %v4306_v14, 5  ;;  %v8076_v13 = vld [vmem:[#allocation3_spill] sm:$0xff] }
 0x234   : > { %v3260_v25 = vpop.f32.mrf.mxu0  ;;  %v2619_v41 = vadd.f32 %v2581_v45, %v2305_v1  ;;  %v4302_v1 = vrot.slane %v4300_v26, 4  ;;  %v3515_v0 = vunpack.c.l.b16 %v3431_v29  ;;  %v4735_v26 = vld [vmem:[#allocation2 + $0x6c] sm:$0xe] }
 0x235   : > { %v7735_v49 = vadd.f32 %v3260_v25, %v2618_v60  ;;  %v1892_v60 = vadd.f32 %v1891_v53, %v7301_v50  ;;  %v4534_v50 = vpack.c.b16 %v4510_v27, %v4509_v20  ;;  %v6024_v19 = vrot.slane %v4735_v26, 9 }
 0x236   : > { %v3538_v30 = vpack.c.b16 %v3515_v0, %v3514_v40  ;;  %v4303_v6 = vor.u32 %v4302_v1, %v7737_v15  ;;  %v4845_v12 = vrot.slane %v4843_v16, 4  ;;  %v7755_v1 = vld [vmem:[#allocation2 + $0x88] sm:$0xf]  ;;  %v4311_v40 = vshrl.u32 %v4073_v44, 16 }
 0x237   : > { %8074 = vst [vmem:[#allocation12_spill] sm:$0xff] %v7735_v49  ;;  %3968 = vmatmul.bf16.gmra.mxu2 %v6172_v18  ;;  %v4293_v18 = vor.u32 %v4292_v42, %v4289_v35  ;;  %v1894_v42 = vadd.f32 %v1893_v31, %v8076_v13  ;;  %v4314_v0 = vshll.u32 %v4073_v44, 16  ;;  %v4324_v26 = vshrl.u32 %v7755_v1, 16 }
 0x238   : > { %v4304_v35 = vrot.slane %v4303_v6, 4 }
 0x239   : > { %v4294_v32 = vrot.slane %v4293_v18, 4 }
 0x23a   : > { %v2272_v22 = vpop.f32.mrf.mxu2  ;;  %v7747_v45 = vpop.f32.mrf.mxu1  ;;  %v4309_v31 = vsel %vm6716_vm11, %v4304_v35, %v4308_v39  ;;  %v4313_v35 = vrot.slane %v4311_v40, 4  ;;  %v4850_v40 = vrot.slane %v7727_v8, 5  ;;  %v4853_v8 = vrot.slane %v7743_v4, 5 }
 0x23b   : > { %v2583_v37 = vpop.f32.mrf.mxu3  ;;  %v2307_v25 = vadd.f32 %v2272_v22, %v1892_v60  ;;  %v4299_v23 = vsel %vm6716_vm11, %v4294_v32, %v7737_v15  ;;  %v6173_v60 = vld [vmem:[#allocation2 + $0x78] sm:$0xff]  ;;  %v4512_v32 = vunpack.c.l.b16 %v4309_v31 }
 0x23c   : > { %v3263_v57 = vpop.f32.mrf.mxu0  ;;  %v2620_v11 = vadd.f32 %v2583_v37, %v2306_v46  ;;  %v4844_v46 = vsel %vm7099_vm14, %v6024_v19, %v4843_v16  ;;  %v6460_v22 = vld [vmem:[#allocation2 + $0x7c] sm:$0xf]  ;;  %v4320_v37 = vshll.u32 %v7755_v1, 16  ;;  %v3314_v15 = vld [vmem:[#allocation2 + $0x78] sm:$0xe] }
 0x23d   : > { %3658 = vmatmul.bf16.gmra.mxu1 %v3538_v30  ;;  %v7751_v53 = vadd.f32 %v3263_v57, %v2619_v41  ;;  %v4847_v41 = vsel %vm7099_vm14, %v4845_v12, %v4846_v56  ;;  %v3434_v18 = vrot.slane %v6460_v22, 5  ;;  %v4935_v30 = vunpack.c.l.b16 %v4844_v46  ;;  %v6461_v19 = vld [vmem:[#allocation2 + $0x80] sm:$0x1] }
 0x23e   : > { %v4936_v14 = vunpack.c.l.b16 %v4847_v41  ;;  %v5802_v57 = vrot.slane %v3314_v15, 9  ;;  %v3437_v12 = vrot.slane %v6461_v19, 5  ;;  %v4511_v56 = vunpack.c.l.b16 %v4299_v23  ;;  %v7776_v41 = vld [vmem:[#allocation2 + $0x8c] sm:$0x1] }
 0x23f   : > { %8075 = vst [vmem:[#allocation13_spill] sm:$0xff] %v7751_v53  ;;  %5071 = vmatmul.bf16.gmra.mxu0 %v4959_v63  ;;  %v4322_v13 = vrot.slane %v4320_v37, 5  ;;  %v4852_v19 = vrot.slane %v4850_v40, 4 }
 0x240   : > { %4650 = vmatmul.bf16.gmra.mxu3 %v4534_v50  ;;  %v3436_v50 = vrot.slane %v3434_v18, 4  ;;  %v3435_v39 = vsel %vm7099_vm14, %v5802_v57, %v3434_v18  ;;  %v4960_v23 = vpack.c.b16 %v4936_v14, %v4935_v30  ;;  %v4535_v31 = vpack.c.b16 %v4512_v32, %v4511_v56  ;;  %v4736_v18 = vld [vmem:[#allocation2 + $0x78] sm:$0xe]  ;;  %v7786_v30 = vld [vmem:[#allocation2 + $0x94] sm:$0xf] }
 0x241   : > { %v4854_v4 = vsel %vm7099_vm14, %v4852_v19, %v4853_v8  ;;  %v8080_v8 = vld [vmem:[#allocation4_spill] sm:$0xff] }
 0x242   : > { %v2274_v20 = vpop.f32.mrf.mxu2  ;;  %v7764_v27 = vpop.f32.mrf.mxu1  ;;  %v3438_v44 = vsel %vm7099_vm14, %v3436_v50, %v3437_v12  ;;  %v6025_v50 = vrot.slane %v4736_v18, 9  ;;  %v4076_v12 = vld [vmem:[#allocation2 + $0x90] sm:$0xf]  ;;  %v3315_v18 = vld [vmem:[#allocation2 + $0x84] sm:$0xe]  ;;  %v4938_v53 = vunpack.c.l.b16 %v4854_v4 }
 0x243   : > { %v2586_v61 = vpop.f32.mrf.mxu3  ;;  %v2308_v29 = vadd.f32 %v2274_v20, %v1894_v42  ;;  %v4326_v42 = vrot.slane %v4324_v26, 4  ;;  %v3517_v46 = vunpack.c.l.b16 %v3438_v44  ;;  %v4330_v26 = vshll.u32 %v7776_v41, 16 }
 0x244   : > { %v3265_v63 = vpop.f32.mrf.mxu0  ;;  %v2621_v16 = vadd.f32 %v2586_v61, %v2307_v25  ;;  %v4316_v25 = vrot.slane %v4314_v0, 5  ;;  %v4335_v32 = vshrl.u32 %v4076_v12, 16 }
 0x245   : > { %v7770_v6 = vadd.f32 %v3265_v63, %v2620_v11  ;;  %v3516_v11 = vunpack.c.l.b16 %v3435_v39  ;;  %v4327_v37 = vor.u32 %v4326_v42, %v4322_v13  ;;  %v4851_v42 = vsel %vm7099_vm14, %v6025_v50, %v4850_v40 }
 0x246   : > { %v4317_v15 = vor.u32 %v4316_v25, %v4313_v35  ;;  %v4338_v35 = vshll.u32 %v4076_v12, 16  ;;  %v4344_v25 = vshll.u32 %v7786_v30, 16  ;;  %v5803_v50 = vrot.slane %v3315_v18, 9 }
 0x247   : > { %8077 = vst [vmem:[#allocation3_spill] sm:$0xff] %v7770_v6  ;;  %3973 = vmatmul.bf16.gmra.mxu2 %v6173_v60  ;;  %v3539_v0 = vpack.c.b16 %v3517_v46, %v3516_v11  ;;  %v4328_v56 = vrot.slane %v4327_v37, 4  ;;  %v6174_v46 = vld [vmem:[#allocation2 + $0x84] sm:$0xff] }
 0x248   : > { %v4318_v14 = vrot.slane %v4317_v15, 4  ;;  %v4337_v15 = vrot.slane %v4335_v32, 4  ;;  %v4340_v37 = vrot.slane %v4338_v35, 5 }
 0x24a   : > { %v7778_v20 = vpop.f32.mrf.mxu2  ;;  %v7780_v61 = vpop.f32.mrf.mxu1 }
 0x24b   : > { %v2588_v60 = vpop.f32.mrf.mxu3 }
 0x24c   : > { %v3268_v63 = vpop.f32.mrf.mxu0  ;;  %v2622_v22 = vadd.f32 %v2588_v60, %v2308_v29  ;;  %v4332_v29 = vrot.slane %v4330_v26, 5  ;;  %v4323_v60 = vsel %vm6716_vm11, %v4318_v14, %v4322_v13  ;;  %v7801_v26 = vrot.slane %v4344_v25, 5 }
 0x24d   : > { %3663 = vmatmul.bf16.gmra.mxu1 %v3539_v0  ;;  %v7784_v57 = vadd.f32 %v3268_v63, %v2621_v16  ;;  %v4348_v16 = vshrl.u32 %v7786_v30, 16  ;;  %v6462_v0 = vld [vmem:[#allocation2 + $0x88] sm:$0xf]  ;;  %v3699_v13 = vadd.f32 %v7747_v45, %v8080_v8  ;;  %v4937_v14 = vunpack.c.l.b16 %v4851_v42 }
 0x24e   : > { %v3441_v63 = vrot.slane %v6462_v0, 5  ;;  %v4513_v32 = vunpack.c.l.b16 %v4323_v60  ;;  %v3700_v0 = vadd.f32 %v7764_v27, %v7357_v17  ;;  %v7826_v27 = vld [vmem:[#allocation2 + $0xa0] sm:$0xf] }
 0x24f   : > { %8078 = vst [vmem:[#allocation14_spill] sm:$0xff] %v7784_v57  ;;  %5076 = vmatmul.bf16.gmra.mxu0 %v4960_v23  ;;  %v6463_v57 = vld [vmem:[#allocation2 + $0x8c] sm:$0x1]  ;;  %v4350_v19 = vrot.slane %v4348_v16, 4  ;;  %v4014_v45 = vadd.f32 %v7778_v20, %v3699_v13  ;;  %v4860_v20 = vrot.slane %v7776_v41, 5 }
 0x250   : > { %4655 = vmatmul.bf16.gmra.mxu3 %v4535_v31  ;;  %v4333_v31 = vsel %vm6716_vm11, %v4328_v56, %v4332_v29  ;;  %v3443_v12 = vrot.slane %v3441_v63, 4  ;;  %v3444_v6 = vrot.slane %v6463_v57, 5  ;;  %v4857_v56 = vrot.slane %v7755_v1, 5  ;;  %v7808_v29 = vld [vmem:[#allocation2 + $0x98] sm:$0x1] }
 0x251   : > { %v4514_v35 = vunpack.c.l.b16 %v4333_v31  ;;  %v4737_v57 = vld [vmem:[#allocation2 + $0x84] sm:$0xe]  ;;  %v4351_v1 = vor.u32 %v4350_v19, %v7801_v26  ;;  %v4354_v60 = vshll.u32 %v7808_v29, 16  ;;  %v4961_v31 = vpack.c.b16 %v4938_v53, %v4937_v14 }
 0x252   : > { %v3936_v39 = vpop.f32.mrf.mxu2  ;;  %v7790_v44 = vpop.f32.mrf.mxu1  ;;  %v3445_v25 = vsel %vm7099_vm14, %v3443_v12, %v3444_v6  ;;  %v6026_v12 = vrot.slane %v4737_v57, 9  ;;  %v4859_v8 = vrot.slane %v4857_v56, 4 }
 0x253   : > { %v4616_v11 = vpop.f32.mrf.mxu3  ;;  %v4015_v13 = vadd.f32 %v3936_v39, %v3700_v0  ;;  %v4356_v19 = vrot.slane %v4354_v60, 5  ;;  %v6175_v60 = vld [vmem:[#allocation2 + $0x90] sm:$0xff]  ;;  %v4368_v0 = vshll.u32 %v7826_v27, 16 }
 0x254   : > { %v3270_v23 = vpop.f32.mrf.mxu0  ;;  %v4858_v17 = vsel %vm7099_vm14, %v6026_v12, %v4857_v56  ;;  %v4861_v53 = vsel %vm7099_vm14, %v4859_v8, %v4860_v20 }
 0x255   : > { %v7803_v40 = vadd.f32 %v3270_v23, %v2622_v22  ;;  %v3442_v22 = vsel %vm7099_vm14, %v5803_v50, %v3441_v63  ;;  %v3519_v23 = vunpack.c.l.b16 %v3445_v25  ;;  %v4536_v50 = vpack.c.b16 %v4514_v35, %v4513_v32  ;;  %v4079_v25 = vld [vmem:[#allocation2 + $0x9c] sm:$0xf]  ;;  %v8081_v35 = vld [vmem:[#allocation5_spill] sm:$0xff] }
 0x256   : > { %v3518_v16 = vunpack.c.l.b16 %v3442_v22  ;;  %v4696_v22 = vadd.f32 %v4616_v11, %v4014_v45  ;;  %v4359_v14 = vshrl.u32 %v4079_v25, 16  ;;  %v4362_v32 = vshll.u32 %v4079_v25, 16 }
 0x257   : > { %8079 = vst [vmem:[#allocation15_spill] sm:$0xff] %v7803_v40  ;;  %3978 = vmatmul.bf16.gmra.mxu2 %v6174_v46  ;;  %v4341_v46 = vor.u32 %v4340_v37, %v4337_v15  ;;  %v4352_v37 = vrot.slane %v4351_v1, 4  ;;  %v3701_v11 = vadd.f32 %v7780_v61, %v8081_v35  ;;  %v4939_v45 = vunpack.c.l.b16 %v4858_v17 }
 0x258   : > { %v3540_v18 = vpack.c.b16 %v3519_v23, %v3518_v16 }
 0x259   : > { %v4342_v15 = vrot.slane %v4341_v46, 4  ;;  %v4357_v56 = vsel %vm6716_vm11, %v4352_v37, %v4356_v19  ;;  %v4940_v46 = vunpack.c.l.b16 %v4861_v53  ;;  %v6465_v19 = vld [vmem:[#allocation2 + $0x98] sm:$0x1] }
 0x25a   : > { %v3939_v42 = vpop.f32.mrf.mxu2  ;;  %v7815_v4 = vpop.f32.mrf.mxu1  ;;  %v3451_v25 = vrot.slane %v6465_v19, 5  ;;  %v7852_v19 = vld [vmem:[#allocation2 + $0xa4] sm:$0x1] }
 0x25b   : > { %v4618_v63 = vpop.f32.mrf.mxu3  ;;  %v4347_v16 = vsel %vm6716_vm11, %v4342_v15, %v7801_v26  ;;  %v4372_v26 = vshrl.u32 %v7826_v27, 16  ;;  %v4016_v8 = vadd.f32 %v3939_v42, %v3701_v11  ;;  %v4370_v42 = vrot.slane %v4368_v0, 5 }
 0x25c   : > { %v5042_v6 = vpop.f32.mrf.mxu0  ;;  %v4697_v41 = vadd.f32 %v4618_v63, %v4015_v13  ;;  %v6464_v63 = vld [vmem:[#allocation2 + $0x94] sm:$0xf]  ;;  %v4515_v20 = vunpack.c.l.b16 %v4347_v16  ;;  %v4516_v13 = vunpack.c.l.b16 %v4357_v56 }
 0x25d   : > { %3668 = vmatmul.bf16.gmra.mxu1 %v3540_v18  ;;  %v5122_v39 = vadd.f32 %v5042_v6, %v4696_v22  ;;  %v3448_v18 = vrot.slane %v6464_v63, 5  ;;  %v4361_v6 = vrot.slane %v4359_v14, 4  ;;  %v3316_v22 = vld [vmem:[#allocation2 + $0x90] sm:$0xe]  ;;  %v4374_v16 = vrot.slane %v4372_v26, 4 }
 0x25f   : > { %5081 = vmatmul.bf16.gmra.mxu0 %v4961_v31  ;;  %v4864_v31 = vrot.slane %v7786_v30, 5  ;;  %v5255_v15 = vmul.f32 %v5122_v39, %v5122_v39  ;;  %v5804_v30 = vrot.slane %v3316_v22, 9  ;;  %v3450_v37 = vrot.slane %v3448_v18, 4 }
 0x260   : > { %4660 = vmatmul.bf16.gmra.mxu3 %v4536_v50  ;;  %v4364_v50 = vrot.slane %v4362_v32, 5  ;;  %v4738_v32 = vld [vmem:[#allocation2 + $0x90] sm:$0xe] }
 0x261   : > { %v3452_v35 = vsel %vm7099_vm14, %v3450_v37, %v3451_v25  ;;  %v4866_v49 = vrot.slane %v4864_v31, 4  ;;  %v4378_v37 = vshll.u32 %v7852_v19, 16 }
 0x262   : > { %v3941_v57 = vpop.f32.mrf.mxu2  ;;  %v7835_v23 = vpop.f32.mrf.mxu1  ;;  %v4365_v11 = vor.u32 %v4364_v50, %v4361_v6  ;;  %v3521_v22 = vunpack.c.l.b16 %v3452_v35  ;;  %v4867_v6 = vrot.slane %v7808_v29, 5 }
 0x263   : > { %v4621_v1 = vpop.f32.mrf.mxu3 }
 0x264   : > { %v5044_v61 = vpop.f32.mrf.mxu0  ;;  %v4868_v29 = vsel %vm7099_vm14, %v4866_v49, %v4867_v6  ;;  %v6176_v49 = vld [vmem:[#allocation2 + $0x9c] sm:$0xff] }
 0x265   : > { %v5123_v12 = vadd.f32 %v5044_v61, %v4697_v41  ;;  %v3449_v41 = vsel %vm7099_vm14, %v5804_v30, %v3448_v18  ;;  %v4698_v61 = vadd.f32 %v4621_v1, %v4016_v8  ;;  %v6027_v30 = vrot.slane %v4738_v32, 9  ;;  %v7862_v32 = vld [vmem:[#allocation2 + $0xac] sm:$0xf]  ;;  %v6466_v6 = vld [vmem:[#allocation2 + $0xa0] sm:$0xf] }
 0x266   : > { %v3520_v63 = vunpack.c.l.b16 %v3449_v41  ;;  %v4366_v1 = vrot.slane %v4365_v11, 4  ;;  %v4375_v8 = vor.u32 %v4374_v16, %v4370_v42  ;;  %v4380_v41 = vrot.slane %v4378_v37, 5 }
 0x267   : > { %v6272_v17 = vpack.c.bf16 %v5123_v12, %v5122_v39  ;;  %v5218_v53 = vadd.f32 %v5123_v12, %v5122_v39  ;;  %v5256_v14 = vmul.f32 %v5123_v12, %v5123_v12  ;;  %3983 = vmatmul.bf16.gmra.mxu2 %v6175_v60  ;;  %v4962_v39 = vpack.c.b16 %v4940_v46, %v4939_v45  ;;  %v8082_v12 = vld [vmem:[#allocation6_spill] sm:$0xff] }
 0x268   : > { %v3702_v60 = vadd.f32 %v7790_v44, %v8082_v12  ;;  %v3541_v50 = vpack.c.b16 %v3521_v22, %v3520_v63  ;;  %v8083_v63 = vld [vmem:[#allocation7_spill] sm:$0xff] }
 0x269   : > { %6273 = vst [vmem:[%s7845_s9] sm:$0xff] %v6272_v17   ;;  %v5287_v56 = vadd.f32 %v5256_v14, %v5255_v15  ;;  %v4537_v15 = vpack.c.b16 %v4516_v13, %v4515_v20  ;;  %v4865_v17 = vsel %vm7099_vm14, %v6027_v30, %v4864_v31  ;;  %v4082_v14 = vld [vmem:[#allocation2 + $0xa8] sm:$0xf]  ;;  %v4371_v20 = vsel %vm6716_vm11, %v4366_v1, %v4370_v42  ;;  %v3317_v1 = vld [vmem:[#allocation2 + $0x9c] sm:$0xe] }
 0x26a   : > { %v3944_v0 = vpop.f32.mrf.mxu2  ;;  %v7856_v40 = vpop.f32.mrf.mxu1  ;;  %v4017_v45 = vadd.f32 %v3941_v57, %v3702_v60  ;;  %v4376_v13 = vrot.slane %v4375_v8, 4  ;;  %v4383_v11 = vshrl.u32 %v4082_v14, 16  ;;  %v4392_v31 = vshll.u32 %v7862_v32, 16 }
 0x26b   : > { %v4623_v18 = vpop.f32.mrf.mxu3  ;;  %v3703_v22 = vadd.f32 %v7815_v4, %v8083_v63  ;;  %v4396_v60 = vshrl.u32 %v7862_v32, 16  ;;  %v4942_v30 = vunpack.c.l.b16 %v4868_v29  ;;  %v5805_v4 = vrot.slane %v3317_v1, 9 }
 0x26c   : > { %v5047_v26 = vpop.f32.mrf.mxu0  ;;  %v4699_v35 = vadd.f32 %v4623_v18, %v4017_v45  ;;  %v4517_v18 = vunpack.c.l.b16 %v4371_v20  ;;  %v4385_v8 = vrot.slane %v4383_v11, 4  ;;  %v7883_v11 = vld [vmem:[#allocation2 + $0xb0] sm:$0x1] }
 0x26d   : > { %v5124_v25 = vadd.f32 %v5047_v26, %v4698_v61  ;;  %3673 = vmatmul.bf16.gmra.mxu1 %v3541_v50  ;;  %v3455_v50 = vrot.slane %v6466_v6, 5 }
 0x26f   : > { %5086 = vmatmul.bf16.gmra.mxu0 %v4962_v39  ;;  %v5219_v44 = vadd.f32 %v5218_v53, %v5124_v25  ;;  %v5257_v46 = vmul.f32 %v5124_v25, %v5124_v25  ;;  %v4386_v53 = vshll.u32 %v4082_v14, 16  ;;  %v4941_v39 = vunpack.c.l.b16 %v4865_v17 }
 0x270   : > { %4665 = vmatmul.bf16.gmra.mxu3 %v4537_v15  ;;  %v4018_v15 = vadd.f32 %v3944_v0, %v3703_v22  ;;  %v3457_v45 = vrot.slane %v3455_v50, 4  ;;  %v7876_v14 = vrot.slane %v4392_v31, 5  ;;  %v3456_v0 = vsel %vm7099_vm14, %v5805_v4, %v3455_v50  ;;  %v4739_v22 = vld [vmem:[#allocation2 + $0x9c] sm:$0xe] }
 0x271   : > { %v5288_v57 = vadd.f32 %v5287_v56, %v5257_v46  ;;  %v4381_v56 = vsel %vm6716_vm11, %v4376_v13, %v4380_v41  ;;  %v4388_v37 = vrot.slane %v4386_v53, 5  ;;  %v6467_v46 = vld [vmem:[#allocation2 + $0xa4] sm:$0x1]  ;;  %v4398_v13 = vrot.slane %v4396_v60, 4 }
 0x272   : > { %v3946_v16 = vpop.f32.mrf.mxu2  ;;  %v7868_v61 = vpop.f32.mrf.mxu1  ;;  %v3458_v17 = vrot.slane %v6467_v46, 5  ;;  %v4518_v20 = vunpack.c.l.b16 %v4381_v56  ;;  %v4871_v41 = vrot.slane %v7826_v27, 5  ;;  %v8084_v27 = vld [vmem:[#allocation8_spill] sm:$0xff]  ;;  %v4402_v4 = vshll.u32 %v7883_v11, 16 }
 0x273   : > { %v4626_v12 = vpop.f32.mrf.mxu3  ;;  %v4389_v56 = vor.u32 %v4388_v37, %v4385_v8  ;;  %v3704_v6 = vadd.f32 %v7835_v23, %v8084_v27  ;;  %v4399_v1 = vor.u32 %v4398_v13, %v7876_v14  ;;  %v6177_v27 = vld [vmem:[#allocation2 + $0xa8] sm:$0xff] }
 0x274   : > { %v5049_v42 = vpop.f32.mrf.mxu0  ;;  %v4700_v31 = vadd.f32 %v4626_v12, %v4018_v15  ;;  %v4873_v12 = vrot.slane %v4871_v41, 4  ;;  %v4874_v15 = vrot.slane %v7852_v19, 5 }
 0x275   : > { %v5125_v26 = vadd.f32 %v5049_v42, %v4699_v35  ;;  %v3459_v35 = vsel %vm7099_vm14, %v3457_v45, %v3458_v17  ;;  %v4963_v42 = vpack.c.b16 %v4942_v30, %v4941_v39  ;;  %v4019_v30 = vadd.f32 %v3946_v16, %v3704_v6 }
 0x276   : > { %v4390_v46 = vrot.slane %v4389_v56, 4  ;;  %v4400_v23 = vrot.slane %v4399_v1, 4  ;;  %v4404_v17 = vrot.slane %v4402_v4, 5 }
 0x277   : > { %v6277_v63 = vpack.c.bf16 %v5125_v26, %v5124_v25  ;;  %v5220_v29 = vadd.f32 %v5219_v44, %v5125_v26  ;;  %v5258_v62 = vmul.f32 %v5125_v26, %v5125_v26  ;;  %3988 = vmatmul.bf16.gmra.mxu2 %v6176_v49  ;;  %v3522_v25 = vunpack.c.l.b16 %v3456_v0 }
 0x278   : > { %v3523_v44 = vunpack.c.l.b16 %v3459_v35  ;;  %v4405_v6 = vsel %vm6716_vm11, %v4400_v23, %v4404_v17  ;;  %v6469_v23 = vld [vmem:[#allocation2 + $0xb0] sm:$0x1] }
 0x279   : > { %6364 = vst [vmem:[%s7845_s9 + $0x8] sm:$0xff] %v6277_v63   ;;  %v5289_v53 = vadd.f32 %v5288_v57, %v5258_v62  ;;  %v4538_v62 = vpack.c.b16 %v4518_v20, %v4517_v18  ;;  %v6028_v57 = vrot.slane %v4739_v22, 9  ;;  %v4085_v63 = vld [vmem:[#allocation2 + $0xb4] sm:$0xf]  ;;  %v4875_v18 = vsel %vm7099_vm14, %v4873_v12, %v4874_v15  ;;  %v7897_v20 = vld [vmem:[#allocation2 + $0xb8] sm:$0xf] }
 0x27a   : > { %v3949_v49 = vpop.f32.mrf.mxu2  ;;  %v7886_v60 = vpop.f32.mrf.mxu1  ;;  %v3542_v26 = vpack.c.b16 %v3523_v44, %v3522_v25  ;;  %v4407_v19 = vshrl.u32 %v4085_v63, 16  ;;  %v4410_v0 = vshll.u32 %v4085_v63, 16  ;;  %v4395_v25 = vsel %vm6716_vm11, %v4390_v46, %v7876_v14  ;;  %v3318_v15 = vld [vmem:[#allocation2 + $0xa8] sm:$0xe] }
 0x27b   : > { %v4628_v50 = vpop.f32.mrf.mxu3  ;;  %v4872_v13 = vsel %vm7099_vm14, %v6028_v57, %v4871_v41  ;;  %v4519_v57 = vunpack.c.l.b16 %v4395_v25  ;;  %v4878_v12 = vrot.slane %v7862_v32, 5  ;;  %v5806_v46 = vrot.slane %v3318_v15, 9 }
 0x27c   : > { %v5052_v45 = vpop.f32.mrf.mxu0  ;;  %v4701_v35 = vadd.f32 %v4628_v50, %v4019_v30  ;;  %v4943_v41 = vunpack.c.l.b16 %v4872_v13  ;;  %v4412_v4 = vrot.slane %v4410_v0, 5  ;;  %v4520_v30 = vunpack.c.l.b16 %v4405_v6 }
 0x27d   : > { %v5126_v39 = vadd.f32 %v5052_v45, %v4700_v31  ;;  %3678 = vmatmul.bf16.gmra.mxu1 %v3542_v26  ;;  %v8085_v31 = vld [vmem:[#allocation9_spill] sm:$0xff]  ;;  %v4420_v45 = vshrl.u32 %v7897_v20, 16  ;;  %v3465_v17 = vrot.slane %v6469_v23, 5 }
 0x27e   : > { %v6468_v26 = vld [vmem:[#allocation2 + $0xac] sm:$0xf] }
 0x27f   : > { %5091 = vmatmul.bf16.gmra.mxu0 %v4963_v42  ;;  %v5221_v8 = vadd.f32 %v5220_v29, %v5126_v39  ;;  %v5259_v37 = vmul.f32 %v5126_v39, %v5126_v39  ;;  %v3705_v29 = vadd.f32 %v7856_v40, %v8085_v31  ;;  %v4944_v42 = vunpack.c.l.b16 %v4875_v18 }
 0x280   : > { %4670 = vmatmul.bf16.gmra.mxu3 %v4538_v62  ;;  %v3462_v1 = vrot.slane %v6468_v26, 5  ;;  %v4409_v40 = vrot.slane %v4407_v19, 4  ;;  %v4740_v19 = vld [vmem:[#allocation2 + $0xa8] sm:$0xe]  ;;  %v4422_v31 = vrot.slane %v4420_v45, 4 }
 0x281   : > { %v5290_v16 = vadd.f32 %v5289_v53, %v5259_v37  ;;  %v4416_v53 = vshll.u32 %v7897_v20, 16  ;;  %v4020_v14 = vadd.f32 %v3949_v49, %v3705_v29  ;;  %v7916_v26 = vld [vmem:[#allocation2 + $0xbc] sm:$0x1] }
 0x282   : > { %v3951_v22 = vpop.f32.mrf.mxu2  ;;  %v7904_v44 = vpop.f32.mrf.mxu1  ;;  %v3464_v37 = vrot.slane %v3462_v1, 4  ;;  %v4413_v32 = vor.u32 %v4412_v4, %v4409_v40  ;;  %v4881_v40 = vrot.slane %v7883_v11, 5  ;;  %v4426_v23 = vshll.u32 %v7916_v26, 16  ;;  %v7928_v11 = vld [vmem:[#allocation2 + $0xc4] sm:$0xf] }
 0x283   : > { %v4631_v56 = vpop.f32.mrf.mxu3  ;;  %v4418_v0 = vrot.slane %v4416_v53, 5  ;;  %v6029_v53 = vrot.slane %v4740_v19, 9 }
 0x284   : > { %v5054_v50 = vpop.f32.mrf.mxu0  ;;  %v3466_v49 = vsel %vm7099_vm14, %v3464_v37, %v3465_v17  ;;  %v4702_v25 = vadd.f32 %v4631_v56, %v4020_v14  ;;  %v4880_v37 = vrot.slane %v4878_v12, 4  ;;  %v4414_v45 = vrot.slane %v4413_v32, 4 }
 0x285   : > { %v5127_v62 = vadd.f32 %v5054_v50, %v4701_v35  ;;  %v3463_v35 = vsel %vm7099_vm14, %v5806_v46, %v3462_v1  ;;  %v3525_v50 = vunpack.c.l.b16 %v3466_v49  ;;  %v4539_v46 = vpack.c.b16 %v4520_v30, %v4519_v57  ;;  %v4088_v30 = vld [vmem:[#allocation2 + $0xc0] sm:$0xf] }
 0x286   : > { %v3524_v6 = vunpack.c.l.b16 %v3463_v35  ;;  %v4423_v14 = vor.u32 %v4422_v31, %v4418_v0  ;;  %v4879_v17 = vsel %vm7099_vm14, %v6029_v53, %v4878_v12  ;;  %v4882_v57 = vsel %vm7099_vm14, %v4880_v37, %v4881_v40 }
 0x287   : > { %v6282_v63 = vpack.c.bf16 %v5127_v62, %v5126_v39  ;;  %v5222_v13 = vadd.f32 %v5221_v8, %v5127_v62  ;;  %v5260_v18 = vmul.f32 %v5127_v62, %v5127_v62  ;;  %3993 = vmatmul.bf16.gmra.mxu2 %v6177_v27  ;;  %v4964_v39 = vpack.c.b16 %v4944_v42, %v4943_v41  ;;  %v8086_v8 = vld [vmem:[#allocation10_spill] sm:$0xff] }
 0x288   : > { %v3706_v27 = vadd.f32 %v7868_v61, %v8086_v8  ;;  %v3543_v4 = vpack.c.b16 %v3525_v50, %v3524_v6  ;;  %v4428_v19 = vrot.slane %v4426_v23, 5  ;;  %v4431_v49 = vshrl.u32 %v4088_v30, 16 }
 0x289   : > { %6365 = vst [vmem:[%s7845_s9 + $0x10] sm:$0xff] %v6282_v63   ;;  %v5291_v29 = vadd.f32 %v5290_v16, %v5260_v18  ;;  %v4424_v18 = vrot.slane %v4423_v14, 4  ;;  %v4440_v32 = vshll.u32 %v7928_v11, 16  ;;  %v3707_v12 = vadd.f32 %v7886_v60, %v7456_v51  ;;  %v6471_v14 = vld [vmem:[#allocation2 + $0xbc] sm:$0x1] }
 0x28a   : > { %v3954_v62 = vpop.f32.mrf.mxu2  ;;  %v7920_v15 = vpop.f32.mrf.mxu1  ;;  %v4021_v56 = vadd.f32 %v3951_v22, %v3706_v27  ;;  %v4419_v22 = vsel %vm6716_vm11, %v4414_v45, %v4418_v0  ;;  %v4444_v6 = vshrl.u32 %v7928_v11, 16  ;;  %v4945_v50 = vunpack.c.l.b16 %v4879_v17  ;;  %v6178_v27 = vld [vmem:[#allocation2 + $0xb4] sm:$0xff] }
 0x28b   : > { %v4633_v1 = vpop.f32.mrf.mxu3  ;;  %v4022_v53 = vadd.f32 %v3954_v62, %v3707_v12  ;;  %v4433_v51 = vrot.slane %v4431_v49, 4  ;;  %v3472_v23 = vrot.slane %v6471_v14, 5 }
 0x28c   : > { %v5057_v16 = vpop.f32.mrf.mxu0  ;;  %v4703_v63 = vadd.f32 %v4633_v1, %v4021_v56  ;;  %v4521_v1 = vunpack.c.l.b16 %v4419_v22  ;;  %v7943_v22 = vld [vmem:[#allocation2 + $0xc8] sm:$0x1] }
 0x28d   : > { %v5128_v41 = vadd.f32 %v5057_v16, %v4702_v25  ;;  %3683 = vmatmul.bf16.gmra.mxu1 %v3543_v4  ;;  %v3319_v4 = vld [vmem:[#allocation2 + $0xb4] sm:$0xe]  ;;  %v7940_v16 = vrot.slane %v4440_v32, 5 }
 0x28e   : > { %v5807_v56 = vrot.slane %v3319_v4, 9 }
 0x28f   : > { %5096 = vmatmul.bf16.gmra.mxu0 %v4964_v39  ;;  %v5223_v61 = vadd.f32 %v5222_v13, %v5128_v41  ;;  %v5261_v42 = vmul.f32 %v5128_v41, %v5128_v41  ;;  %v4434_v13 = vshll.u32 %v4088_v30, 16  ;;  %v4946_v39 = vunpack.c.l.b16 %v4882_v57 }
 0x290   : > { %4675 = vmatmul.bf16.gmra.mxu3 %v4539_v46  ;;  %v6470_v46 = vld [vmem:[#allocation2 + $0xb8] sm:$0xf]  ;;  %v4885_v30 = vrot.slane %v7897_v20, 5 }
 0x291   : > { %v5292_v35 = vadd.f32 %v5291_v29, %v5261_v42  ;;  %v4429_v29 = vsel %vm6716_vm11, %v4424_v18, %v4428_v19  ;;  %v3469_v37 = vrot.slane %v6470_v46, 5  ;;  %v4436_v60 = vrot.slane %v4434_v13, 5  ;;  %v4741_v19 = vld [vmem:[#allocation2 + $0xb4] sm:$0xe] }
 0x292   : > { %v3956_v31 = vpop.f32.mrf.mxu2  ;;  %v7935_v25 = vpop.f32.mrf.mxu1  ;;  %v4446_v42 = vrot.slane %v4444_v6, 4  ;;  %v4522_v18 = vunpack.c.l.b16 %v4429_v29  ;;  %v300_v6 = vld [vmem:[#allocation2 + $0xcc] sm:$0x1]  ;;  %v4965_v29 = vpack.c.b16 %v4946_v39, %v4945_v50  ;;  %v3708_v46 = vadd.f32 %v7904_v44, %v7479_v21 }
 0x293   : > { %v4636_v8 = vpop.f32.mrf.mxu3  ;;  %v3471_v45 = vrot.slane %v3469_v37, 4  ;;  %v3470_v49 = vsel %vm7099_vm14, %v5807_v56, %v3469_v37 }
 0x294   : > { %v5059_v0 = vpop.f32.mrf.mxu0  ;;  %v3526_v12 = vunpack.c.l.b16 %v3470_v49  ;;  %v4447_v20 = vor.u32 %v4446_v42, %v7940_v16  ;;  %v4540_v56 = vpack.c.b16 %v4522_v18, %v4521_v1 }
 0x295   : > { %v5129_v40 = vadd.f32 %v5059_v0, %v4703_v63  ;;  %v4704_v63 = vadd.f32 %v4636_v8, %v4022_v53  ;;  %v3473_v13 = vsel %vm7099_vm14, %v3471_v45, %v3472_v23  ;;  %v4450_v8 = vshll.u32 %v7943_v22, 16  ;;  %v356_v53 = vld [vmem:[#allocation2 + $0xd4] sm:$0x1] }
 0x296   : > { %v4887_v45 = vrot.slane %v4885_v30, 4  ;;  %v4023_v23 = vadd.f32 %v3956_v31, %v3708_v46  ;;  %v357_v50 = vsel %vm6538_vm4, 0, %v356_v53  ;;  %v4448_v21 = vrot.slane %v4447_v20, 4  ;;  %v6472_v20 = vld [vmem:[#allocation2 + $0xc4] sm:$0xf] }
 0x297   : > { %v6287_v17 = vpack.c.bf16 %v5129_v40, %v5128_v41  ;;  %v5224_v62 = vadd.f32 %v5223_v61, %v5129_v40  ;;  %v5262_v57 = vmul.f32 %v5129_v40, %v5129_v40  ;;  %3998 = vmatmul.bf16.gmra.mxu2 %v6178_v27  ;;  %v3527_v41 = vunpack.c.l.b16 %v3473_v13  ;;  %358 = vst [vmem:[#allocation2 + $0xd4] sm:$0x1] %v357_v50 }
 0x298   : > { %v4437_v61 = vor.u32 %v4436_v60, %v4433_v51  ;;  %v6030_v40 = vrot.slane %v4741_v19, 9  ;;  %v4888_v51 = vrot.slane %v7916_v26, 5  ;;  %v301_v60 = vsel %vm6530_vm2, 0, %v300_v6 }
 0x299   : > { %6366 = vst [vmem:[%s7845_s9 + $0x18] sm:$0xff] %v6287_v17   ;;  %v5293_v32 = vadd.f32 %v5292_v35, %v5262_v57  ;;  %v3544_v4 = vpack.c.b16 %v3527_v41, %v3526_v12  ;;  %v4452_v44 = vrot.slane %v4450_v8, 5  ;;  %v7961_v17 = vld [vmem:[#allocation2 + $0xd0] sm:$0xf]  ;;  %v3476_v8 = vrot.slane %v6472_v20, 5 }
 0x29a   : > { %v3959_v27 = vpop.f32.mrf.mxu2  ;;  %v7950_v0 = vpop.f32.mrf.mxu1  ;;  %v4438_v42 = vrot.slane %v4437_v61, 4  ;;  %302 = vst [vmem:[#allocation2 + $0xcc] sm:$0x1] %v301_v60  ;;  %v4886_v2 = vsel %vm7099_vm14, %v6030_v40, %v4885_v30  ;;  %v4889_v57 = vsel %vm7099_vm14, %v4887_v45, %v4888_v51  ;;  %v4464_v30 = vshll.u32 %v7961_v17, 16 }
 0x29b   : > { %v4638_v37 = vpop.f32.mrf.mxu3  ;;  %v4453_v18 = vsel %vm6716_vm11, %v4448_v21, %v4452_v44  ;;  %v4947_v49 = vunpack.c.l.b16 %v4886_v2  ;;  %v4468_v12 = vshrl.u32 %v7961_v17, 16  ;;  %v4948_v61 = vunpack.c.l.b16 %v4889_v57 }
 0x29c   : > { %v5062_v35 = vpop.f32.mrf.mxu0  ;;  %v4705_v31 = vadd.f32 %v4638_v37, %v4023_v23  ;;  %v4443_v5 = vsel %vm6716_vm11, %v4438_v42, %v7940_v16  ;;  %v4524_v53 = vunpack.c.l.b16 %v4453_v18  ;;  %v4466_v45 = vrot.slane %v4464_v30, 5 }
 0x29d   : > { %v5130_v14 = vadd.f32 %v5062_v35, %v4704_v63  ;;  %3688 = vmatmul.bf16.gmra.mxu1 %v3544_v4  ;;  %v3709_v63 = vadd.f32 %v7920_v15, %v7492_v48  ;;  %v4523_v16 = vunpack.c.l.b16 %v4443_v5  ;;  %v3478_v4 = vrot.slane %v3476_v8, 4  ;;  %v6473_v35 = vld [vmem:[#allocation2 + $0xc8] sm:$0x1] }
 0x29e   : > { %v3710_v18 = vadd.f32 %v7935_v25, %v7504_v3  ;;  %v4895_v25 = vrot.slane %v7943_v22, 5 }
 0x29f   : > { %5101 = vmatmul.bf16.gmra.mxu0 %v4965_v29  ;;  %v5225_v39 = vadd.f32 %v5224_v62, %v5130_v14  ;;  %v5263_v1 = vmul.f32 %v5130_v14, %v5130_v14  ;;  %v4024_v6 = vadd.f32 %v3959_v27, %v3709_v63  ;;  %v3320_v29 = vld [vmem:[#allocation2 + $0xc0] sm:$0xe]  ;;  %v4470_v27 = vrot.slane %v4468_v12, 4 }
 0x2a0   : > { %4680 = vmatmul.bf16.gmra.mxu3 %v4540_v56  ;;  %v5808_v40 = vrot.slane %v3320_v29, 9  ;;  %v3479_v56 = vrot.slane %v6473_v35, 5  ;;  %v4541_v12 = vpack.c.b16 %v4524_v53, %v4523_v16 }
 0x2a1   : > { %v5294_v26 = vadd.f32 %v5293_v32, %v5263_v1  ;;  %v6179_v32 = vld [vmem:[#allocation2 + $0xc0] sm:$0xff]  ;;  %v4091_v48 = vld [vmem:[#allocation2 + $0xcc] sm:$0xf] }
 0x2a2   : > { %v3961_v62 = vpop.f32.mrf.mxu2  ;;  %v7974_v19 = vpop.f32.mrf.mxu1  ;;  %v4455_v46 = vshrl.u32 %v4091_v48, 16  ;;  %v4458_v37 = vshll.u32 %v4091_v48, 16  ;;  %v3477_v50 = vsel %vm7099_vm14, %v5808_v40, %v3476_v8  ;;  %v3480_v21 = vsel %vm7099_vm14, %v3478_v4, %v3479_v56 }
 0x2a3   : > { %v4641_v13 = vpop.f32.mrf.mxu3  ;;  %v3528_v2 = vunpack.c.l.b16 %v3477_v50  ;;  %v4025_v8 = vadd.f32 %v3961_v62, %v3710_v18  ;;  %v3711_v62 = vadd.f32 %v7950_v0, %v7518_v38 }
 0x2a4   : > { %v5064_v41 = vpop.f32.mrf.mxu0  ;;  %v4706_v42 = vadd.f32 %v4641_v13, %v4024_v6  ;;  %v4457_v44 = vrot.slane %v4455_v46, 4  ;;  %v4460_v57 = vrot.slane %v4458_v37, 5  ;;  %v4892_v6 = vrot.slane %v7928_v11, 5 }
 0x2a5   : > { %v5131_v15 = vadd.f32 %v5064_v41, %v4705_v31  ;;  %v3529_v31 = vunpack.c.l.b16 %v3480_v21  ;;  %v4742_v41 = vld [vmem:[#allocation2 + $0xc0] sm:$0xe] }
 0x2a6   : > { %v4461_v48 = vor.u32 %v4460_v57, %v4457_v44  ;;  %v4894_v3 = vrot.slane %v4892_v6, 4 }
 0x2a7   : > { %v6292_v51 = vpack.c.bf16 %v5131_v15, %v5130_v14  ;;  %v5226_v60 = vadd.f32 %v5225_v39, %v5131_v15  ;;  %v5264_v23 = vmul.f32 %v5131_v15, %v5131_v15  ;;  %4003 = vmatmul.bf16.gmra.mxu2 %v6179_v32  ;;  %v7985_v14 = vld [vmem:[#allocation2 + $0xd4] sm:$0x1]  ;;  %v4966_v39 = vpack.c.b16 %v4948_v61, %v4947_v49 }
 0x2a8   : > { %v3545_v13 = vpack.c.b16 %v3529_v31, %v3528_v2  ;;  %v4474_v15 = vshll.u32 %v7985_v14, 16  ;;  %v6031_v61 = vrot.slane %v4742_v41, 9  ;;  %v4462_v37 = vrot.slane %v4461_v48, 4 }
 0x2a9   : > { %6367 = vst [vmem:[%s7845_s9 + $0x20] sm:$0xff] %v6292_v51   ;;  %v5295_v1 = vadd.f32 %v5294_v26, %v5264_v23  ;;  %v4471_v26 = vor.u32 %v4470_v27, %v4466_v45  ;;  %v6180_v51 = vld [vmem:[#allocation2 + $0xcc] sm:$0xff]  ;;  %v4896_v22 = vsel %vm7099_vm14, %v4894_v3, %v4895_v25  ;;  %v4899_v41 = vrot.slane %v7961_v17, 5 }
 0x2aa   : > { %v3964_v5 = vpop.f32.mrf.mxu2  ;;  %v7983_v63 = vpop.f32.mrf.mxu1  ;;  %v4476_v11 = vrot.slane %v4474_v15, 5  ;;  %v4893_v35 = vsel %vm7099_vm14, %v6031_v61, %v4892_v6 }
 0x2ab   : > { %v4643_v30 = vpop.f32.mrf.mxu3  ;;  %v4472_v46 = vrot.slane %v4471_v26, 4  ;;  %v4026_v27 = vadd.f32 %v3964_v5, %v3711_v62  ;;  %v4949_v21 = vunpack.c.l.b16 %v4893_v35  ;;  %v4901_v15 = vrot.slane %v4899_v41, 4 }
 0x2ac   : > { %v5067_v32 = vpop.f32.mrf.mxu0  ;;  %v4707_v53 = vadd.f32 %v4643_v30, %v4025_v8  ;;  %v3713_v3 = vadd.f32 %v7983_v63, %v7546_v59 }
 0x2ad   : > { %v5132_v20 = vadd.f32 %v5067_v32, %v4706_v42  ;;  %3693 = vmatmul.bf16.gmra.mxu1 %v3545_v13  ;;  %v4467_v42 = vsel %vm6716_vm11, %v4462_v37, %v4466_v45  ;;  %v4477_v50 = vsel %vm6716_vm11, %v4472_v46, %v4476_v11  ;;  %v3712_v45 = vadd.f32 %v7974_v19, %v7534_v7 }
 0x2ae   : > { %v4525_v2 = vunpack.c.l.b16 %v4467_v42  ;;  %v4526_v31 = vunpack.c.l.b16 %v4477_v50 }
 0x2af   : > { %5106 = vmatmul.bf16.gmra.mxu0 %v4966_v39  ;;  %v5227_v29 = vadd.f32 %v5226_v60, %v5132_v20  ;;  %v5265_v49 = vmul.f32 %v5132_v20, %v5132_v20 }
 0x2b0   : > { %4685 = vmatmul.bf16.gmra.mxu3 %v4541_v12  ;;  %v4542_v32 = vpack.c.b16 %v4526_v31, %v4525_v2  ;;  %v4743_v12 = vld [vmem:[#allocation2 + $0xcc] sm:$0xe] }
 0x2b1   : > { %v5296_v16 = vadd.f32 %v5295_v1, %v5265_v49  ;;  %v4950_v1 = vunpack.c.l.b16 %v4896_v22  ;;  %v6032_v48 = vrot.slane %v4743_v12, 9 }
 0x2b2   : > { %v3966_v40 = vpop.f32.mrf.mxu2  ;;  %v3656_v4 = vpop.f32.mrf.mxu1 }
 0x2b3   : > { %v4646_v56 = vpop.f32.mrf.mxu3  ;;  %v4967_v5 = vpack.c.b16 %v4950_v1, %v4949_v21  ;;  %v4027_v26 = vadd.f32 %v3966_v40, %v3712_v45  ;;  %v4900_v17 = vsel %vm7099_vm14, %v6032_v48, %v4899_v41  ;;  %v3714_v22 = vadd.f32 %v3656_v4, %v7561_v28 }
 0x2b4   : > { %v5069_v60 = vpop.f32.mrf.mxu0  ;;  %v4708_v39 = vadd.f32 %v4646_v56, %v4026_v27  ;;  %v4951_v11 = vunpack.c.l.b16 %v4900_v17 }
 0x2b5   : > { %v5133_v23 = vadd.f32 %v5069_v60, %v4707_v53 }
 0x2b7   : > { %v6297_v38 = vpack.c.bf16 %v5133_v23, %v5132_v20  ;;  %v5228_v0 = vadd.f32 %v5227_v29, %v5133_v23  ;;  %v5266_v44 = vmul.f32 %v5133_v23, %v5133_v23  ;;  %4008 = vmatmul.bf16.gmra.mxu2 %v6180_v51  ;;  %v4902_v29 = vrot.slane %v7985_v14, 5 }
 0x2b9   : > { %6368 = vst [vmem:[%s7845_s9 + $0x28] sm:$0xff] %v6297_v38   ;;  %v5297_v57 = vadd.f32 %v5296_v16, %v5266_v44  ;;  %v4903_v16 = vsel %vm7099_vm14, %v4901_v15, %v4902_v29 }
 0x2ba   : > { %v3969_v18 = vpop.f32.mrf.mxu2  ;;  %v3659_v30 = vpop.f32.mrf.mxu1  ;;  %v4952_v35 = vunpack.c.l.b16 %v4903_v16 }
 0x2bb   : > { %v4648_v13 = vpop.f32.mrf.mxu3  ;;  %v4028_v37 = vadd.f32 %v3969_v18, %v3713_v3  ;;  %v3715_v2 = vadd.f32 %v3659_v30, %v7575_v54 }
 0x2bc   : > { %v5072_v52 = vpop.f32.mrf.mxu0  ;;  %v4709_v61 = vadd.f32 %v4648_v13, %v4027_v26  ;;  %v4968_v63 = vpack.c.b16 %v4952_v35, %v4951_v11 }
 0x2bd   : > { %v5134_v6 = vadd.f32 %v5072_v52, %v4708_v39 }
 0x2bf   : > { %5111 = vmatmul.bf16.gmra.mxu0 %v4967_v5  ;;  %v5229_v20 = vadd.f32 %v5228_v0, %v5134_v6  ;;  %v5267_v8 = vmul.f32 %v5134_v6, %v5134_v6 }
 0x2c0   : > { %4690 = vmatmul.bf16.gmra.mxu3 %v4542_v32 }
 0x2c1   : > { %v5298_v49 = vadd.f32 %v5297_v57, %v5267_v8 }
 0x2c2   : > { %v3971_v7 = vpop.f32.mrf.mxu2  ;;  %v3661_v19 = vpop.f32.mrf.mxu1 }
 0x2c3   : > { %v4651_v25 = vpop.f32.mrf.mxu3  ;;  %v4029_v10 = vadd.f32 %v3971_v7, %v3714_v22  ;;  %v3716_v12 = vadd.f32 %v3661_v19, %v7592_v33 }
 0x2c4   : > { %v5074_v46 = vpop.f32.mrf.mxu0  ;;  %v4710_v51 = vadd.f32 %v4651_v25, %v4028_v37 }
 0x2c5   : > { %v5135_v53 = vadd.f32 %v5074_v46, %v4709_v61 }
 0x2c7   : > { %v6302_v14 = vpack.c.bf16 %v5135_v53, %v5134_v6  ;;  %v5230_v40 = vadd.f32 %v5229_v20, %v5135_v53  ;;  %v5268_v62 = vmul.f32 %v5135_v53, %v5135_v53 }
 0x2c9   : > { %6369 = vst [vmem:[%s7845_s9 + $0x30] sm:$0xff] %v6302_v14   ;;  %v5299_v56 = vadd.f32 %v5298_v49, %v5268_v62 }
 0x2ca   : > { %v3974_v60 = vpop.f32.mrf.mxu2  ;;  %v3664_v59 = vpop.f32.mrf.mxu1 }
 0x2cb   : > { %v4653_v23 = vpop.f32.mrf.mxu3  ;;  %v4030_v18 = vadd.f32 %v3974_v60, %v3715_v2  ;;  %v3717_v29 = vadd.f32 %v3664_v59, %v7604_v55 }
 0x2cc   : > { %v5077_v27 = vpop.f32.mrf.mxu0  ;;  %v4711_v0 = vadd.f32 %v4653_v23, %v4029_v10 }
 0x2cd   : > { %v5136_v42 = vadd.f32 %v5077_v27, %v4710_v51 }
 0x2cf   : > { %5116 = vmatmul.bf16.gmra.mxu0 %v4968_v63  ;;  %v5231_v50 = vadd.f32 %v5230_v40, %v5136_v42  ;;  %v5269_v21 = vmul.f32 %v5136_v42, %v5136_v42 }
 0x2d1   : > { %v5300_v38 = vadd.f32 %v5299_v56, %v5269_v21 }
 0x2d2   : > { %v3976_v44 = vpop.f32.mrf.mxu2  ;;  %v3666_v1 = vpop.f32.mrf.mxu1 }
 0x2d3   : > { %v4656_v31 = vpop.f32.mrf.mxu3  ;;  %v4031_v20 = vadd.f32 %v3976_v44, %v3716_v12  ;;  %v3718_v37 = vadd.f32 %v3666_v1, %v7619_v9 }
 0x2d4   : > { %v5079_v57 = vpop.f32.mrf.mxu0  ;;  %v4712_v13 = vadd.f32 %v4656_v31, %v4030_v18 }
 0x2d5   : > { %v5137_v39 = vadd.f32 %v5079_v57, %v4711_v0 }
 0x2d7   : > { %v6307_v5 = vpack.c.bf16 %v5137_v39, %v5136_v42  ;;  %v5232_v28 = vadd.f32 %v5231_v50, %v5137_v39  ;;  %v5270_v4 = vmul.f32 %v5137_v39, %v5137_v39 }
 0x2d9   : > { %6370 = vst [vmem:[%s7845_s9 + $0x38] sm:$0xff] %v6307_v5   ;;  %v5301_v45 = vadd.f32 %v5300_v38, %v5270_v4 }
 0x2da   : > { %v3979_v52 = vpop.f32.mrf.mxu2  ;;  %v3669_v32 = vpop.f32.mrf.mxu1 }
 0x2db   : > { %v4658_v41 = vpop.f32.mrf.mxu3  ;;  %v4032_v17 = vadd.f32 %v3979_v52, %v3717_v29  ;;  %v3719_v63 = vadd.f32 %v3669_v32, %v7633_v47 }
 0x2dc   : > { %v5082_v6 = vpop.f32.mrf.mxu0  ;;  %v4713_v48 = vadd.f32 %v4658_v41, %v4031_v20 }
 0x2dd   : > { %v5138_v26 = vadd.f32 %v5082_v6, %v4712_v13 }
 0x2df   : > { %v5233_v54 = vadd.f32 %v5232_v28, %v5138_v26  ;;  %v5271_v30 = vmul.f32 %v5138_v26, %v5138_v26 }
 0x2e1   : > { %v5302_v8 = vadd.f32 %v5301_v45, %v5271_v30 }
 0x2e2   : > { %v3981_v15 = vpop.f32.mrf.mxu2  ;;  %v3671_v7 = vpop.f32.mrf.mxu1 }
 0x2e3   : > { %v4661_v49 = vpop.f32.mrf.mxu3  ;;  %v4033_v62 = vadd.f32 %v3981_v15, %v3718_v37  ;;  %v3720_v1 = vadd.f32 %v3671_v7, %v7650_v24 }
 0x2e4   : > { %v5084_v61 = vpop.f32.mrf.mxu0  ;;  %v4714_v16 = vadd.f32 %v4661_v49, %v4032_v17 }
 0x2e5   : > { %v5139_v3 = vadd.f32 %v5084_v61, %v4713_v48 }
 0x2e7   : > { %v6312_v25 = vpack.c.bf16 %v5139_v3, %v5138_v26  ;;  %v5234_v46 = vadd.f32 %v5233_v54, %v5139_v3  ;;  %v5272_v33 = vmul.f32 %v5139_v3, %v5139_v3 }
 0x2e9   : > { %6371 = vst [vmem:[%s7845_s9 + $0x40] sm:$0xff] %v6312_v25   ;;  %v5303_v19 = vadd.f32 %v5302_v8, %v5272_v33 }
 0x2ea   : > { %v3984_v53 = vpop.f32.mrf.mxu2  ;;  %v3674_v55 = vpop.f32.mrf.mxu1 }
 0x2eb   : > { %v4663_v11 = vpop.f32.mrf.mxu3  ;;  %v4034_v42 = vadd.f32 %v3984_v53, %v3719_v63  ;;  %v3721_v13 = vadd.f32 %v3674_v55, %v7662_v36 }
 0x2ec   : > { %v5087_v14 = vpop.f32.mrf.mxu0  ;;  %v4715_v60 = vadd.f32 %v4663_v11, %v4033_v62 }
 0x2ed   : > { %v5140_v40 = vadd.f32 %v5087_v14, %v4714_v16 }
 0x2ef   : > { %v5235_v35 = vadd.f32 %v5234_v46, %v5140_v40  ;;  %v5273_v56 = vmul.f32 %v5140_v40, %v5140_v40 }
 0x2f1   : > { %v5304_v51 = vadd.f32 %v5303_v19, %v5273_v56 }
 0x2f2   : > { %v3986_v59 = vpop.f32.mrf.mxu2  ;;  %v3676_v21 = vpop.f32.mrf.mxu1 }
 0x2f3   : > { %v4666_v22 = vpop.f32.mrf.mxu3  ;;  %v4035_v39 = vadd.f32 %v3986_v59, %v3720_v1  ;;  %v3722_v8 = vadd.f32 %v3676_v21, %v7677_v34 }
 0x2f4   : > { %v5089_v23 = vpop.f32.mrf.mxu0  ;;  %v4716_v0 = vadd.f32 %v4666_v22, %v4034_v42 }
 0x2f5   : > { %v5141_v27 = vadd.f32 %v5089_v23, %v4715_v60 }
 0x2f7   : > { %v6317_v10 = vpack.c.bf16 %v5141_v27, %v5140_v40  ;;  %v5236_v50 = vadd.f32 %v5235_v35, %v5141_v27  ;;  %v5274_v9 = vmul.f32 %v5141_v27, %v5141_v27 }
 0x2f9   : > { %6372 = vst [vmem:[%s7845_s9 + $0x48] sm:$0xff] %v6317_v10   ;;  %v5305_v38 = vadd.f32 %v5304_v51, %v5274_v9  ;;  %v8087_v10 = vld [vmem:[#allocation11_spill] sm:$0xff] }
 0x2fa   : > { %v3989_v44 = vpop.f32.mrf.mxu2  ;;  %v3679_v45 = vpop.f32.mrf.mxu1 }
 0x2fb   : > { %v4668_v2 = vpop.f32.mrf.mxu3  ;;  %v4036_v41 = vadd.f32 %v3989_v44, %v3721_v13  ;;  %v3723_v46 = vadd.f32 %v3679_v45, %v7691_v58 }
 0x2fc   : > { %v5092_v31 = vpop.f32.mrf.mxu0  ;;  %v4717_v28 = vadd.f32 %v4668_v2, %v4035_v39  ;;  %v8088_v39 = vld [vmem:[#allocation12_spill] sm:$0xff] }
 0x2fd   : > { %v5142_v57 = vadd.f32 %v5092_v31, %v4716_v0 }
 0x2ff   : > { %v5237_v47 = vadd.f32 %v5236_v50, %v5142_v57  ;;  %v5275_v18 = vmul.f32 %v5142_v57, %v5142_v57 }
 0x301   : > { %v5306_v5 = vadd.f32 %v5305_v38, %v5275_v18 }
 0x302   : > { %v3991_v4 = vpop.f32.mrf.mxu2  ;;  %v3681_v29 = vpop.f32.mrf.mxu1 }
 0x303   : > { %v4671_v52 = vpop.f32.mrf.mxu3  ;;  %v4037_v61 = vadd.f32 %v3991_v4, %v3722_v8  ;;  %v3724_v35 = vadd.f32 %v3681_v29, %v7708_v43 }
 0x304   : > { %v5094_v32 = vpop.f32.mrf.mxu0  ;;  %v4718_v54 = vadd.f32 %v4671_v52, %v4036_v41  ;;  %v8089_v41 = vld [vmem:[#allocation13_spill] sm:$0xff] }
 0x305   : > { %v5143_v12 = vadd.f32 %v5094_v32, %v4717_v28 }
 0x307   : > { %v6322_v6 = vpack.c.bf16 %v5143_v12, %v5142_v57  ;;  %v5238_v26 = vadd.f32 %v5237_v47, %v5143_v12  ;;  %v5276_v24 = vmul.f32 %v5143_v12, %v5143_v12 }
 0x309   : > { %6373 = vst [vmem:[%s7845_s9 + $0x50] sm:$0xff] %v6322_v6   ;;  %v5307_v20 = vadd.f32 %v5306_v5, %v5276_v24 }
 0x30a   : > { %v3994_v30 = vpop.f32.mrf.mxu2  ;;  %v3684_v37 = vpop.f32.mrf.mxu1 }
 0x30b   : > { %v4673_v48 = vpop.f32.mrf.mxu3  ;;  %v4038_v53 = vadd.f32 %v3994_v30, %v3723_v46  ;;  %v3725_v50 = vadd.f32 %v3684_v37, %v8087_v10 }
 0x30c   : > { %v5097_v15 = vpop.f32.mrf.mxu0  ;;  %v4719_v17 = vadd.f32 %v4673_v48, %v4037_v61 }
 0x30d   : > { %v5144_v49 = vadd.f32 %v5097_v15, %v4718_v54 }
 0x30f   : > { %v5239_v36 = vadd.f32 %v5238_v26, %v5144_v49  ;;  %v5277_v7 = vmul.f32 %v5144_v49, %v5144_v49 }
 0x311   : > { %v5308_v3 = vadd.f32 %v5307_v20, %v5277_v7 }
 0x312   : > { %v3996_v25 = vpop.f32.mrf.mxu2  ;;  %v3686_v22 = vpop.f32.mrf.mxu1 }
 0x313   : > { %v4676_v33 = vpop.f32.mrf.mxu3  ;;  %v4039_v59 = vadd.f32 %v3996_v25, %v3724_v35  ;;  %v3726_v47 = vadd.f32 %v3686_v22, %v8088_v39 }
 0x314   : > { %v5099_v19 = vpop.f32.mrf.mxu0  ;;  %v4720_v62 = vadd.f32 %v4676_v33, %v4038_v53 }
 0x315   : > { %v5145_v16 = vadd.f32 %v5099_v19, %v4719_v17 }
 0x317   : > { %v6327_v11 = vpack.c.bf16 %v5145_v16, %v5144_v49  ;;  %v5240_v34 = vadd.f32 %v5239_v36, %v5145_v16  ;;  %v5278_v14 = vmul.f32 %v5145_v16, %v5145_v16  ;;  %v8090_v36 = vld [vmem:[#allocation3_spill] sm:$0xff] }
 0x319   : > { %6374 = vst [vmem:[%s7845_s9 + $0x58] sm:$0xff] %v6327_v11   ;;  %v5309_v40 = vadd.f32 %v5308_v3, %v5278_v14 }
 0x31a   : > { %v3999_v55 = vpop.f32.mrf.mxu2  ;;  %v3689_v57 = vpop.f32.mrf.mxu1 }
 0x31b   : > { %v4678_v56 = vpop.f32.mrf.mxu3  ;;  %v4040_v0 = vadd.f32 %v3999_v55, %v3725_v50  ;;  %v3727_v6 = vadd.f32 %v3689_v57, %v8089_v41 }
 0x31c   : > { %v5102_v51 = vpop.f32.mrf.mxu0  ;;  %v4721_v27 = vadd.f32 %v4678_v56, %v4039_v59 }
 0x31d   : > { %v5146_v60 = vadd.f32 %v5102_v51, %v4720_v62 }
 0x31f   : > { %v5241_v58 = vadd.f32 %v5240_v34, %v5146_v60  ;;  %v5279_v63 = vmul.f32 %v5146_v60, %v5146_v60  ;;  %v8091_v34 = vld [vmem:[#allocation14_spill] sm:$0xff] }
 0x321   : > { %v5310_v23 = vadd.f32 %v5309_v40, %v5279_v63 }
 0x322   : > { %v4001_v42 = vpop.f32.mrf.mxu2  ;;  %v3691_v20 = vpop.f32.mrf.mxu1 }
 0x323   : > { %v4681_v9 = vpop.f32.mrf.mxu3  ;;  %v4041_v45 = vadd.f32 %v4001_v42, %v3726_v47  ;;  %v3728_v7 = vadd.f32 %v3691_v20, %v8090_v36 }
 0x324   : > { %v5104_v21 = vpop.f32.mrf.mxu0  ;;  %v4722_v31 = vadd.f32 %v4681_v9, %v4040_v0 }
 0x325   : > { %v5147_v38 = vadd.f32 %v5104_v21, %v4721_v27 }
 0x327   : > { %v6332_v44 = vpack.c.bf16 %v5147_v38, %v5146_v60  ;;  %v5242_v1 = vadd.f32 %v5241_v58, %v5147_v38  ;;  %v5280_v43 = vmul.f32 %v5147_v38, %v5147_v38 }
 0x329   : > { %6375 = vst [vmem:[%s7845_s9 + $0x60] sm:$0xff] %v6332_v44   ;;  %v5311_v2 = vadd.f32 %v5310_v23, %v5280_v43  ;;  %v8092_v23 = vld [vmem:[#allocation15_spill] sm:$0xff] }
 0x32a   : > { %v4004_v28 = vpop.f32.mrf.mxu2  ;;  %v3694_v33 = vpop.f32.mrf.mxu1 }
 0x32b   : > { %v4683_v18 = vpop.f32.mrf.mxu3  ;;  %v4042_v30 = vadd.f32 %v4004_v28, %v3727_v6  ;;  %v3729_v14 = vadd.f32 %v3694_v33, %v8091_v34  ;;  %v5324_v28 = vlaneseq }
 0x32c   : > { %v5107_v5 = vpop.f32.mrf.mxu0  ;;  %v4723_v12 = vadd.f32 %v4683_v18, %v4041_v45 }
 0x32d   : > { %v5148_v4 = vadd.f32 %v5107_v5, %v4722_v31 }
 0x32f   : > { %v5243_v13 = vadd.f32 %v5242_v1, %v5148_v4  ;;  %v5281_v52 = vmul.f32 %v5148_v4, %v5148_v4 }
 0x331   : > { %v5312_v32 = vadd.f32 %v5311_v2, %v5281_v52 }
 0x332   : > { %v4006_v8 = vpop.f32.mrf.mxu2  ;;  %v3696_v59 = vpop.f32.mrf.mxu1 }
 0x333   : > { %v4686_v26 = vpop.f32.mrf.mxu3  ;;  %v4043_v46 = vadd.f32 %v4006_v8, %v3728_v7  ;;  %v3730_v27 = vadd.f32 %v3696_v59, %v8092_v23 }
 0x334   : > { %v5109_v24 = vpop.f32.mrf.mxu0  ;;  %v4724_v61 = vadd.f32 %v4686_v26, %v4042_v30 }
 0x335   : > { %v5149_v54 = vadd.f32 %v5109_v24, %v4723_v12 }
 0x337   : > { %v6337_v48 = vpack.c.bf16 %v5149_v54, %v5148_v4  ;;  %v5244_v15 = vadd.f32 %v5243_v13, %v5149_v54  ;;  %v5282_v29 = vmul.f32 %v5149_v54, %v5149_v54 }
 0x339   : > { %6376 = vst [vmem:[%s7845_s9 + $0x68] sm:$0xff] %v6337_v48   ;;  %v5313_v49 = vadd.f32 %v5312_v32, %v5282_v29  ;;  %v5325_v32 = vshrl.u32 %v5324_v28, 7 }
 0x33a   : > { %v4009_v53 = vpop.f32.mrf.mxu2 }
 0x33b   : > { %v4688_v17 = vpop.f32.mrf.mxu3  ;;  %v4044_v55 = vadd.f32 %v4009_v53, %v3729_v14  ;;  %vm5326_vm15 = vcmp.lt.s32.totalorder %v5325_v32, 4 }
 0x33c   : > { %v5112_v3 = vpop.f32.mrf.mxu0  ;;  %v4725_v11 = vadd.f32 %v4688_v17, %v4043_v46 }
 0x33d   : > { %v5150_v25 = vadd.f32 %v5112_v3, %v4724_v61 }
 0x33f   : > { %v5245_v19 = vadd.f32 %v5244_v15, %v5150_v25  ;;  %v5283_v16 = vmul.f32 %v5150_v25, %v5150_v25 }
 0x341   : > { %v5314_v37 = vadd.f32 %v5313_v49, %v5283_v16 }
 0x342   : > { %v4011_v22 = vpop.f32.mrf.mxu2 }
 0x343   : > { %v4691_v35 = vpop.f32.mrf.mxu3  ;;  %v4045_v50 = vadd.f32 %v4011_v22, %v3730_v27 }
 0x344   : > { %v5114_v40 = vpop.f32.mrf.mxu0  ;;  %v4726_v63 = vadd.f32 %v4691_v35, %v4044_v55 }
 0x345   : > { %v5151_v62 = vadd.f32 %v5114_v40, %v4725_v11 }
 0x347   : > { %v6342_v56 = vpack.c.bf16 %v5151_v62, %v5150_v25  ;;  %v5246_v51 = vadd.f32 %v5245_v19, %v5151_v62  ;;  %v5284_v60 = vmul.f32 %v5151_v62, %v5151_v62 }
 0x349   : > { %6377 = vst [vmem:[%s7845_s9 + $0x70] sm:$0xff] %v6342_v56   ;;  %v5315_v58 = vadd.f32 %v5314_v37, %v5284_v60 }
 0x34b   : > { %v4693_v38 = vpop.f32.mrf.mxu3 }
 0x34c   : > { %v5117_v42 = vpop.f32.mrf.mxu0  ;;  %v4727_v44 = vadd.f32 %v4693_v38, %v4045_v50 }
 0x34d   : > { %v5152_v10 = vadd.f32 %v5117_v42, %v4726_v63 }
 0x34f   : > { %v5247_v9 = vadd.f32 %v5246_v51, %v5152_v10  ;;  %v5285_v21 = vmul.f32 %v5152_v10, %v5152_v10 }
 0x351   : > { %v5316_v0 = vadd.f32 %v5315_v58, %v5285_v21 }
 0x354   : > { %v5119_v1 = vpop.f32.mrf.mxu0 }
 0x355   : > { %v5153_v43 = vadd.f32 %v5119_v1, %v4727_v44 }
 0x357   : > { %v6347_v2 = vpack.c.bf16 %v5153_v43, %v5152_v10  ;;  %v5248_v31 = vadd.f32 %v5247_v9, %v5153_v43  ;;  %v5286_v57 = vmul.f32 %v5153_v43, %v5153_v43 }
 0x359   : > { %6378 = vst [vmem:[%s7845_s9 + $0x78] sm:$0xff] %v6347_v2   ;;  %v5249_v39 = vrot.slane %v5248_v31, 4  ;;  %v5317_v47 = vadd.f32 %v5316_v0, %v5286_v57 }
 0x35b   : > { %v5250_v18 = vadd.f32 %v5249_v39, %v5248_v31  ;;  %v5318_v5 = vrot.slane %v5317_v47, 4 }
 0x35d   : > { %v5251_v4 = vrot.slane %v5250_v18, 2  ;;  %v5319_v45 = vadd.f32 %v5318_v5, %v5317_v47 }
 0x35f   : > { %v5252_v13 = vadd.f32 %v5251_v4, %v5250_v18  ;;  %v5320_v52 = vrot.slane %v5319_v45, 2 }
 0x361   : > { %v5253_v12 = vrot.slane %v5252_v13, 1  ;;  %v5321_v41 = vadd.f32 %v5320_v52, %v5319_v45 }
 0x363   : > { %v5322_v6 = vrot.slane %v5321_v41, 1  ;;  %v5254_v26 = vadd.f32 %v5253_v12, %v5252_v13 }
 0x365   : > { %v5323_v24 = vadd.f32 %v5322_v6, %v5321_v41 }
 0x367   : > { %v5327_v20 = vsel %vm5326_vm15, %v5254_v26, %v5323_v24 }
 0x368   : > { %5328 = vst [vmem:[%s235_s12] sm:$0xff] %v5327_v20 }
 0x369 PF: > { %s16_s18 = sadd.s32 1, %s6480_s18  }
 0x36a   : > { %p13_p4 = scmp.ge.s32.totalorder %s16_s18, 4  }
 0x36c   :  { %15 = sbr.rel (!%p13_p4) target bundleno = 1 (0x1), region = 89 }

</bundles_post_ra>
